<compile_context>
chip_gen: v7x
topology: tpu7x:2x2x1
jax: 0.10.0
libtpu: 0.0.40
codegen_flags: <defaults>
</compile_context>

<pallas_src>
import jax
import jax.numpy as jnp
import numpy as np
from jax import lax
from jax.experimental import pallas as pl
from jax.experimental.pallas import tpu as pltpu


# ----------------------------------------------------------------------------
# Pallas kernels
# ----------------------------------------------------------------------------
def fused_ghost2_kernel(x_ref, wp1_ref, sb1p_ref, wd1_ref, sb1c_ref,
                        wp2_ref, sb2p_ref, wd2_ref, sb2c_ref,
                        c2_ref, xp1_s, pp1_s, xp2_s, pp2_s):
    """Both GhostConvBlocks fused, one batch element per grid step.

    x_ref  : (1, H, W, Cin)          unpadded input tile (NHWC)
    wp*_ref: (3, 3, Cb, Cmid)        primary conv weights (HWIO)
    sb*p/c : (2, Cmid)               folded BN: row0 = scale, row1 = bias
    wd*_ref: (3, 3, Cmid)            depthwise ("cheap") conv weights
    c2_ref : (1, H, W, 2*Cmid2)      output of the second ghost block
    xp*_s  : (H+2, W+2, Cb)          VMEM halo scratch for block inputs
    pp*_s  : (H+2, W+2, Cmid)        VMEM halo scratch for depthwise inputs
    """
    H = c2_ref.shape[1]
    W = c2_ref.shape[2]

    def ghost_block(xp_s, pp_s, wp_ref, sbp_ref, wd_ref, sbc_ref):
        # xp_s already holds the zero-padded (H+2, W+2, Cb) block input.
        Cb = xp_s.shape[-1]
        Cmid = wp_ref.shape[-1]

        # -- primary 3x3 dense conv: 9 shifted (H*W, Cb) x (Cb, Cmid) matmuls
        #    with f32 MXU accumulation.
        # TODO(synk): collapse the 9 taps into one K=9*Cb im2col matmul once
        #             an in-register lane-concat path is validated for these
        #             tiny channel counts.
        acc = jnp.zeros((H * W, Cmid), jnp.float32)
        for kh in range(3):
            for kw in range(3):
                xs = xp_s[kh:kh + H, kw:kw + W, :].reshape(H * W, Cb)
                acc = acc + jnp.dot(xs, wp_ref[kh, kw],
                                    preferred_element_type=jnp.float32)
        prim = jnp.maximum(acc * sbp_ref[0, :] + sbp_ref[1, :], 0.0)  # BN+ReLU
        prim = prim.reshape(H, W, Cmid)

        # -- cheap 3x3 depthwise conv (halo built in VMEM scratch, never HBM)
        pp_s[...] = jnp.zeros_like(pp_s)
        pp_s[1:H + 1, 1:W + 1, :] = prim
        acc2 = jnp.zeros((H, W, Cmid), jnp.float32)
        for kh in range(3):
            for kw in range(3):
                acc2 = acc2 + pp_s[kh:kh + H, kw:kw + W, :] * wd_ref[kh, kw, :]
        cheap = jnp.maximum(acc2 * sbc_ref[0, :] + sbc_ref[1, :], 0.0)
        return prim, cheap

    # ---- block 1: build the 1-pixel halo of the raw input in VMEM
    xp1_s[...] = jnp.zeros_like(xp1_s)
    xp1_s[1:H + 1, 1:W + 1, :] = x_ref[0]
    p1, q1 = ghost_block(xp1_s, pp1_s, wp1_ref, sb1p_ref, wd1_ref, sb1c_ref)

    # ---- block 2: c1 = concat([p1, q1], channel) assembled directly into the
    #      padded scratch for block 2 (c1 never touches HBM)
    cm1 = p1.shape[-1]
    xp2_s[...] = jnp.zeros_like(xp2_s)
    xp2_s[1:H + 1, 1:W + 1, :cm1] = p1
    xp2_s[1:H + 1, 1:W + 1, cm1:] = q1
    p2, q2 = ghost_block(xp2_s, pp2_s, wp2_ref, sb2p_ref, wd2_ref, sb2c_ref)

    # ---- c2 output (channel concat)
    cm2 = p2.shape[-1]
    c2_ref[0, :, :, :cm2] = p2.astype(c2_ref.dtype)
    c2_ref[0, :, :, cm2:] = q2.astype(c2_ref.dtype)


def maxpool_kernel(x_ref, o_ref):
    """2x2/stride-2 max pool on a paired-column view.

    x_ref: (1, H, W//2, 2*C)  -- lanes hold [c2[.., 2w, :], c2[.., 2w+1, :]]
    o_ref: (1, H//2, W//2, C)
    """
    C = o_ref.shape[-1]
    h2 = o_ref.shape[1]
    x = x_ref[0]                                        # (H, W//2, 2C)
    mw = jnp.maximum(x[:, :, :C], x[:, :, C:])          # max over the W pair
    mwr = mw.reshape(h2, 2, mw.shape[1], C)             # split leading (H) dim
    o_ref[0] = jnp.maximum(mwr[:, 0], mwr[:, 1]).astype(o_ref.dtype)


# ----------------------------------------------------------------------------
# Wrappers (glue: transposes, free reshapes, BlockSpecs)
# ----------------------------------------------------------------------------
def fused_ghost_blocks(x_nhwc, p1, p2):
    N, H, W, Cin = x_nhwc.shape
    wp1, wd1 = p1["w_primary"], p1["w_cheap"]
    wp2, wd2 = p2["w_primary"], p2["w_cheap"]
    Cmid1 = wp1.shape[-1]
    Cout1 = 2 * Cmid1
    Cmid2 = wp2.shape[-1]
    Cout2 = 2 * Cmid2
    assert wp2.shape[2] == Cout1

    sb1p = jnp.stack([p1["scale_p"], p1["bias_p"]])      # (2, Cmid1)
    sb1c = jnp.stack([p1["scale_c"], p1["bias_c"]])
    sb2p = jnp.stack([p2["scale_p"], p2["bias_p"]])      # (2, Cmid2)
    sb2c = jnp.stack([p2["scale_c"], p2["bias_c"]])

    # TODO(synk): for large images add an H-tile "parallel" grid axis with a
    #             1-row halo and set vmem_limit_bytes per generation
    #             (v7x 64 MiB physical vs v5e/v6e 128 MiB).
    return pl.pallas_call(
        fused_ghost2_kernel,
        out_shape=jax.ShapeDtypeStruct((N, H, W, Cout2), x_nhwc.dtype),
        grid_spec=pltpu.PrefetchScalarGridSpec(
            num_scalar_prefetch=0,
            grid=(N,),
            in_specs=[
                pl.BlockSpec((1, H, W, Cin), lambda b: (b, 0, 0, 0)),
                pl.BlockSpec((3, 3, Cin, Cmid1), lambda b: (0, 0, 0, 0)),
                pl.BlockSpec((2, Cmid1), lambda b: (0, 0)),
                pl.BlockSpec((3, 3, Cmid1), lambda b: (0, 0, 0)),
                pl.BlockSpec((2, Cmid1), lambda b: (0, 0)),
                pl.BlockSpec((3, 3, Cout1, Cmid2), lambda b: (0, 0, 0, 0)),
                pl.BlockSpec((2, Cmid2), lambda b: (0, 0)),
                pl.BlockSpec((3, 3, Cmid2), lambda b: (0, 0, 0)),
                pl.BlockSpec((2, Cmid2), lambda b: (0, 0)),
            ],
            out_specs=pl.BlockSpec((1, H, W, Cout2), lambda b: (b, 0, 0, 0)),
            scratch_shapes=[
                pltpu.VMEM((H + 2, W + 2, Cin), jnp.float32),
                pltpu.VMEM((H + 2, W + 2, Cmid1), jnp.float32),
                pltpu.VMEM((H + 2, W + 2, Cout1), jnp.float32),
                pltpu.VMEM((H + 2, W + 2, Cmid2), jnp.float32),
            ],
        ),
        compiler_params=pltpu.CompilerParams(
            dimension_semantics=("parallel",)),
    )(x_nhwc, wp1, sb1p, wd1, sb1c, wp2, sb2p, wd2, sb2c)


def maxpool2x2(x_nhwc):
    # TODO(synk): fuse the pool into the ghost kernel once a safe in-register
    #             W-pair reduction (strided ref read) is validated; this still
    #             re-reads c2 once from HBM.
    N, H, W, C = x_nhwc.shape
    h2, w2 = H // 2, W // 2
    xr = x_nhwc.reshape(N, H, w2, 2 * C)   # free row-major view: W pair -> lanes
    return pl.pallas_call(
        maxpool_kernel,
        out_shape=jax.ShapeDtypeStruct((N, h2, w2, C), x_nhwc.dtype),
        grid=(N,),
        in_specs=[pl.BlockSpec((1, H, w2, 2 * C), lambda b: (b, 0, 0, 0))],
        out_specs=pl.BlockSpec((1, h2, w2, C), lambda b: (b, 0, 0, 0)),
        compiler_params=pltpu.CompilerParams(
            dimension_semantics=("parallel",)),
    )(xr)


def ghost_down_conv(x_nchw, params1, params2):
    """Forward pass of GhostDownConv. Accepts/returns NCHW like the torch module."""
    x = jnp.transpose(x_nchw, (0, 2, 3, 1))        # NCHW -> NHWC
    c2 = fused_ghost_blocks(x, params1, params2)   # conv1 -> conv2, fused
    p = maxpool2x2(c2)
    conv2 = jnp.transpose(c2, (0, 3, 1, 2))        # NHWC -> NCHW
    pool = jnp.transpose(p, (0, 3, 1, 2))
    return conv2, pool


# ----------------------------------------------------------------------------
# Pure-JAX reference (for correctness check)
# ----------------------------------------------------------------------------
def _ghost_block_ref(x_nhwc, p):
    y = lax.conv_general_dilated(x_nhwc, p["w_primary"], (1, 1), "SAME",
                                 dimension_numbers=("NHWC", "HWIO", "NHWC"))
    y = jnp.maximum(y * p["scale_p"] + p["bias_p"], 0.0)
    Cmid = y.shape[-1]
    wd = p["w_cheap"].reshape(3, 3, 1, Cmid)
    z = lax.conv_general_dilated(y, wd, (1, 1), "SAME",
                                 dimension_numbers=("NHWC", "HWIO", "NHWC"),
                                 feature_group_count=Cmid)
    z = jnp.maximum(z * p["scale_c"] + p["bias_c"], 0.0)
    return jnp.concatenate([y, z], axis=-1)


def _ghost_down_conv_ref(x_nchw, p1, p2):
    x = jnp.transpose(x_nchw, (0, 2, 3, 1))
    c1 = _ghost_block_ref(x, p1)
    c2 = _ghost_block_ref(c1, p2)
    N, H, W, C = c2.shape
    pool = c2.reshape(N, H // 2, 2, W // 2, 2, C).max(axis=(2, 4))
    return jnp.transpose(c2, (0, 3, 1, 2)), jnp.transpose(pool, (0, 3, 1, 2))


# ----------------------------------------------------------------------------
# Deterministic parameter init (folded BN = scale/bias) and test driver
# ----------------------------------------------------------------------------
def make_ghost_params(key, in_c, out_c):
    cmid = out_c // 2
    k = jax.random.split(key, 6)
    return {
        "w_primary": 0.2 * jax.random.normal(k[0], (3, 3, in_c, cmid), jnp.float32),
        "scale_p": 0.5 + jax.random.uniform(k[1], (cmid,), jnp.float32),
        "bias_p": 0.1 * jax.random.normal(k[2], (cmid,), jnp.float32),
        "w_cheap": 0.2 * jax.random.normal(k[3], (3, 3, cmid), jnp.float32),
        "scale_c": 0.5 + jax.random.uniform(k[4], (cmid,), jnp.float32),
        "bias_c": 0.1 * jax.random.normal(k[5], (cmid,), jnp.float32),
    }


if __name__ == "__main__":
    key = jax.random.PRNGKey(0)
    k_x, k_p1, k_p2 = jax.random.split(key, 3)

    batch, in_channel, out_channel, H, W = 2, 4, 8, 16, 16
    x = jax.random.normal(k_x, (batch, in_channel, H, W), jnp.float32)  # NCHW
    params1 = make_ghost_params(k_p1, in_channel, out_channel)
    params2 = make_ghost_params(k_p2, out_channel, out_channel)

    conv2, pool = jax.jit(ghost_down_conv)(x, params1, params2)
    conv2 = jax.block_until_ready(conv2)
    pool = jax.block_until_ready(pool)

    ref_conv2, ref_pool = _ghost_down_conv_ref(x, params1, params2)

    assert conv2.shape == (batch, out_channel, H, W)
    assert pool.shape == (batch, out_channel, H // 2, W // 2)
    np.testing.assert_allclose(np.asarray(conv2), np.asarray(ref_conv2),
                               rtol=1e-5, atol=1e-5)
    np.testing.assert_allclose(np.asarray(pool), np.asarray(ref_pool),
                               rtol=1e-5, atol=1e-5)
    print("KERNEL_OK")
</pallas_src>

<mosaic_0001>
module attributes {stable_mosaic.version = 11 : i64} {
  func.func @fused_ghost2_kernel(%arg0: i32, %arg1: memref<1x16x16x4xf32, #tpu.memory_space<vmem>>, %arg2: memref<3x3x4x4xf32, #tpu.memory_space<vmem>>, %arg3: memref<2x4xf32, #tpu.memory_space<vmem>>, %arg4: memref<3x3x4xf32, #tpu.memory_space<vmem>>, %arg5: memref<2x4xf32, #tpu.memory_space<vmem>>, %arg6: memref<3x3x8x4xf32, #tpu.memory_space<vmem>>, %arg7: memref<2x4xf32, #tpu.memory_space<vmem>>, %arg8: memref<3x3x4xf32, #tpu.memory_space<vmem>>, %arg9: memref<2x4xf32, #tpu.memory_space<vmem>>, %arg10: memref<1x16x16x8xf32, #tpu.memory_space<vmem>>, %arg11: memref<18x18x4xf32, #tpu.memory_space<vmem>>, %arg12: memref<18x18x4xf32, #tpu.memory_space<vmem>>, %arg13: memref<18x18x8xf32, #tpu.memory_space<vmem>>, %arg14: memref<18x18x4xf32, #tpu.memory_space<vmem>>) attributes {dimension_semantics = [#tpu.dimension_semantics<parallel>], iteration_bounds = array<i64: 2>, scalar_prefetch = 0 : i64, scratch_operands = 4 : i64, tpu.core_type = #tpu.core_type<tc>, window_params = [{transform_indices = @transform_0, window_bounds = array<i64: 1, 16, 16, 4>}, {pipeline_mode = #tpu.pipeline_mode<synchronous>, transform_indices = @transform_1, window_bounds = array<i64: 3, 3, 4, 4>}, {pipeline_mode = #tpu.pipeline_mode<synchronous>, transform_indices = @transform_2, window_bounds = array<i64: 2, 4>}, {pipeline_mode = #tpu.pipeline_mode<synchronous>, transform_indices = @transform_3, window_bounds = array<i64: 3, 3, 4>}, {pipeline_mode = #tpu.pipeline_mode<synchronous>, transform_indices = @transform_4, window_bounds = array<i64: 2, 4>}, {pipeline_mode = #tpu.pipeline_mode<synchronous>, transform_indices = @transform_5, window_bounds = array<i64: 3, 3, 8, 4>}, {pipeline_mode = #tpu.pipeline_mode<synchronous>, transform_indices = @transform_6, window_bounds = array<i64: 2, 4>}, {pipeline_mode = #tpu.pipeline_mode<synchronous>, transform_indices = @transform_7, window_bounds = array<i64: 3, 3, 4>}, {pipeline_mode = #tpu.pipeline_mode<synchronous>, transform_indices = @transform_8, window_bounds = array<i64: 2, 4>}, {transform_indices = @transform_9, window_bounds = array<i64: 1, 16, 16, 8>}]} {
    %cst = arith.constant 0.000000e+00 : f32
    %0 = vector.broadcast %cst : f32 to vector<18x18x4xf32>
    %c0 = arith.constant 0 : index
    %c0_0 = arith.constant 0 : index
    %c0_1 = arith.constant 0 : index
    %1 = vector.load %arg11[%c0, %c0_0, %c0_1] : memref<18x18x4xf32, #tpu.memory_space<vmem>>, vector<18x18x4xf32>
    tpu.vector_store %arg11[%c0, %c0_0, %c0_1], %0 {strides = array<i32>} : memref<18x18x4xf32, #tpu.memory_space<vmem>>, vector<18x18x4xf32>,
    %c0_2 = arith.constant 0 : index
    %c0_3 = arith.constant 0 : index
    %c0_4 = arith.constant 0 : index
    %c0_5 = arith.constant 0 : index
    %2 = vector.load %arg1[%c0_2, %c0_3, %c0_4, %c0_5] : memref<1x16x16x4xf32, #tpu.memory_space<vmem>>, vector<1x16x16x4xf32>
    %3 = vector.shape_cast %2 : vector<1x16x16x4xf32> to vector<16x16x4xf32>
    %c1 = arith.constant 1 : index
    %c1_6 = arith.constant 1 : index
    %c0_7 = arith.constant 0 : index
    %4 = vector.load %arg11[%c1, %c1_6, %c0_7] : memref<18x18x4xf32, #tpu.memory_space<vmem>>, vector<16x16x4xf32>
    tpu.vector_store %arg11[%c1, %c1_6, %c0_7], %3 {strides = array<i32>} : memref<18x18x4xf32, #tpu.memory_space<vmem>>, vector<16x16x4xf32>,
    %cst_8 = arith.constant 0.000000e+00 : f32
    %5 = vector.broadcast %cst_8 : f32 to vector<256x4xf32>
    %c0_9 = arith.constant 0 : index
    %c0_10 = arith.constant 0 : index
    %c0_11 = arith.constant 0 : index
    %6 = vector.load %arg11[%c0_9, %c0_10, %c0_11] : memref<18x18x4xf32, #tpu.memory_space<vmem>>, vector<16x16x4xf32>
    %7 = vector.shape_cast %6 : vector<16x16x4xf32> to vector<256x4xf32>
    %c0_12 = arith.constant 0 : index
    %c0_13 = arith.constant 0 : index
    %c0_14 = arith.constant 0 : index
    %c0_15 = arith.constant 0 : index
    %8 = vector.load %arg2[%c0_12, %c0_13, %c0_14, %c0_15] : memref<3x3x4x4xf32, #tpu.memory_space<vmem>>, vector<1x1x4x4xf32>
    %9 = vector.shape_cast %8 : vector<1x1x4x4xf32> to vector<4x4xf32>
    %cst_16 = arith.constant dense<0.000000e+00> : vector<256x4xf32>
    %10 = tpu.matmul %7, %9, %cst_16 {dimension_numbers = #tpu.dot_dimension_numbers<[1], [0], [0], [1], [0, 0, 1, 1], [], []>} : vector<256x4xf32>, vector<4x4xf32>, vector<256x4xf32> -> vector<256x4xf32>
    %11 = arith.addf %5, %10 : vector<256x4xf32>
    %c0_17 = arith.constant 0 : index
    %c1_18 = arith.constant 1 : index
    %c0_19 = arith.constant 0 : index
    %12 = vector.load %arg11[%c0_17, %c1_18, %c0_19] : memref<18x18x4xf32, #tpu.memory_space<vmem>>, vector<16x16x4xf32>
    %13 = vector.shape_cast %12 : vector<16x16x4xf32> to vector<256x4xf32>
    %c0_20 = arith.constant 0 : index
    %c1_21 = arith.constant 1 : index
    %c0_22 = arith.constant 0 : index
    %c0_23 = arith.constant 0 : index
    %14 = vector.load %arg2[%c0_20, %c1_21, %c0_22, %c0_23] : memref<3x3x4x4xf32, #tpu.memory_space<vmem>>, vector<1x1x4x4xf32>
    %15 = vector.shape_cast %14 : vector<1x1x4x4xf32> to vector<4x4xf32>
    %cst_24 = arith.constant dense<0.000000e+00> : vector<256x4xf32>
    %16 = tpu.matmul %13, %15, %cst_24 {dimension_numbers = #tpu.dot_dimension_numbers<[1], [0], [0], [1], [0, 0, 1, 1], [], []>} : vector<256x4xf32>, vector<4x4xf32>, vector<256x4xf32> -> vector<256x4xf32>
    %17 = arith.addf %11, %16 : vector<256x4xf32>
    %c0_25 = arith.constant 0 : index
    %c2 = arith.constant 2 : index
    %c0_26 = arith.constant 0 : index
    %18 = vector.load %arg11[%c0_25, %c2, %c0_26] : memref<18x18x4xf32, #tpu.memory_space<vmem>>, vector<16x16x4xf32>
    %19 = vector.shape_cast %18 : vector<16x16x4xf32> to vector<256x4xf32>
    %c0_27 = arith.constant 0 : index
    %c2_28 = arith.constant 2 : index
    %c0_29 = arith.constant 0 : index
    %c0_30 = arith.constant 0 : index
    %20 = vector.load %arg2[%c0_27, %c2_28, %c0_29, %c0_30] : memref<3x3x4x4xf32, #tpu.memory_space<vmem>>, vector<1x1x4x4xf32>
    %21 = vector.shape_cast %20 : vector<1x1x4x4xf32> to vector<4x4xf32>
    %cst_31 = arith.constant dense<0.000000e+00> : vector<256x4xf32>
    %22 = tpu.matmul %19, %21, %cst_31 {dimension_numbers = #tpu.dot_dimension_numbers<[1], [0], [0], [1], [0, 0, 1, 1], [], []>} : vector<256x4xf32>, vector<4x4xf32>, vector<256x4xf32> -> vector<256x4xf32>
    %23 = arith.addf %17, %22 : vector<256x4xf32>
    %c1_32 = arith.constant 1 : index
    %c0_33 = arith.constant 0 : index
    %c0_34 = arith.constant 0 : index
    %24 = vector.load %arg11[%c1_32, %c0_33, %c0_34] : memref<18x18x4xf32, #tpu.memory_space<vmem>>, vector<16x16x4xf32>
    %25 = vector.shape_cast %24 : vector<16x16x4xf32> to vector<256x4xf32>
    %c1_35 = arith.constant 1 : index
    %c0_36 = arith.constant 0 : index
    %c0_37 = arith.constant 0 : index
    %c0_38 = arith.constant 0 : index
    %26 = vector.load %arg2[%c1_35, %c0_36, %c0_37, %c0_38] : memref<3x3x4x4xf32, #tpu.memory_space<vmem>>, vector<1x1x4x4xf32>
    %27 = vector.shape_cast %26 : vector<1x1x4x4xf32> to vector<4x4xf32>
    %cst_39 = arith.constant dense<0.000000e+00> : vector<256x4xf32>
    %28 = tpu.matmul %25, %27, %cst_39 {dimension_numbers = #tpu.dot_dimension_numbers<[1], [0], [0], [1], [0, 0, 1, 1], [], []>} : vector<256x4xf32>, vector<4x4xf32>, vector<256x4xf32> -> vector<256x4xf32>
    %29 = arith.addf %23, %28 : vector<256x4xf32>
    %c1_40 = arith.constant 1 : index
    %c1_41 = arith.constant 1 : index
    %c0_42 = arith.constant 0 : index
    %30 = vector.load %arg11[%c1_40, %c1_41, %c0_42] : memref<18x18x4xf32, #tpu.memory_space<vmem>>, vector<16x16x4xf32>
    %31 = vector.shape_cast %30 : vector<16x16x4xf32> to vector<256x4xf32>
    %c1_43 = arith.constant 1 : index
    %c1_44 = arith.constant 1 : index
    %c0_45 = arith.constant 0 : index
    %c0_46 = arith.constant 0 : index
    %32 = vector.load %arg2[%c1_43, %c1_44, %c0_45, %c0_46] : memref<3x3x4x4xf32, #tpu.memory_space<vmem>>, vector<1x1x4x4xf32>
    %33 = vector.shape_cast %32 : vector<1x1x4x4xf32> to vector<4x4xf32>
    %cst_47 = arith.constant dense<0.000000e+00> : vector<256x4xf32>
    %34 = tpu.matmul %31, %33, %cst_47 {dimension_numbers = #tpu.dot_dimension_numbers<[1], [0], [0], [1], [0, 0, 1, 1], [], []>} : vector<256x4xf32>, vector<4x4xf32>, vector<256x4xf32> -> vector<256x4xf32>
    %35 = arith.addf %29, %34 : vector<256x4xf32>
    %c1_48 = arith.constant 1 : index
    %c2_49 = arith.constant 2 : index
    %c0_50 = arith.constant 0 : index
    %36 = vector.load %arg11[%c1_48, %c2_49, %c0_50] : memref<18x18x4xf32, #tpu.memory_space<vmem>>, vector<16x16x4xf32>
    %37 = vector.shape_cast %36 : vector<16x16x4xf32> to vector<256x4xf32>
    %c1_51 = arith.constant 1 : index
    %c2_52 = arith.constant 2 : index
    %c0_53 = arith.constant 0 : index
    %c0_54 = arith.constant 0 : index
    %38 = vector.load %arg2[%c1_51, %c2_52, %c0_53, %c0_54] : memref<3x3x4x4xf32, #tpu.memory_space<vmem>>, vector<1x1x4x4xf32>
    %39 = vector.shape_cast %38 : vector<1x1x4x4xf32> to vector<4x4xf32>
    %cst_55 = arith.constant dense<0.000000e+00> : vector<256x4xf32>
    %40 = tpu.matmul %37, %39, %cst_55 {dimension_numbers = #tpu.dot_dimension_numbers<[1], [0], [0], [1], [0, 0, 1, 1], [], []>} : vector<256x4xf32>, vector<4x4xf32>, vector<256x4xf32> -> vector<256x4xf32>
    %41 = arith.addf %35, %40 : vector<256x4xf32>
    %c2_56 = arith.constant 2 : index
    %c0_57 = arith.constant 0 : index
    %c0_58 = arith.constant 0 : index
    %42 = vector.load %arg11[%c2_56, %c0_57, %c0_58] : memref<18x18x4xf32, #tpu.memory_space<vmem>>, vector<16x16x4xf32>
    %43 = vector.shape_cast %42 : vector<16x16x4xf32> to vector<256x4xf32>
    %c2_59 = arith.constant 2 : index
    %c0_60 = arith.constant 0 : index
    %c0_61 = arith.constant 0 : index
    %c0_62 = arith.constant 0 : index
    %44 = vector.load %arg2[%c2_59, %c0_60, %c0_61, %c0_62] : memref<3x3x4x4xf32, #tpu.memory_space<vmem>>, vector<1x1x4x4xf32>
    %45 = vector.shape_cast %44 : vector<1x1x4x4xf32> to vector<4x4xf32>
    %cst_63 = arith.constant dense<0.000000e+00> : vector<256x4xf32>
    %46 = tpu.matmul %43, %45, %cst_63 {dimension_numbers = #tpu.dot_dimension_numbers<[1], [0], [0], [1], [0, 0, 1, 1], [], []>} : vector<256x4xf32>, vector<4x4xf32>, vector<256x4xf32> -> vector<256x4xf32>
    %47 = arith.addf %41, %46 : vector<256x4xf32>
    %c2_64 = arith.constant 2 : index
    %c1_65 = arith.constant 1 : index
    %c0_66 = arith.constant 0 : index
    %48 = vector.load %arg11[%c2_64, %c1_65, %c0_66] : memref<18x18x4xf32, #tpu.memory_space<vmem>>, vector<16x16x4xf32>
    %49 = vector.shape_cast %48 : vector<16x16x4xf32> to vector<256x4xf32>
    %c2_67 = arith.constant 2 : index
    %c1_68 = arith.constant 1 : index
    %c0_69 = arith.constant 0 : index
    %c0_70 = arith.constant 0 : index
    %50 = vector.load %arg2[%c2_67, %c1_68, %c0_69, %c0_70] : memref<3x3x4x4xf32, #tpu.memory_space<vmem>>, vector<1x1x4x4xf32>
    %51 = vector.shape_cast %50 : vector<1x1x4x4xf32> to vector<4x4xf32>
    %cst_71 = arith.constant dense<0.000000e+00> : vector<256x4xf32>
    %52 = tpu.matmul %49, %51, %cst_71 {dimension_numbers = #tpu.dot_dimension_numbers<[1], [0], [0], [1], [0, 0, 1, 1], [], []>} : vector<256x4xf32>, vector<4x4xf32>, vector<256x4xf32> -> vector<256x4xf32>
    %53 = arith.addf %47, %52 : vector<256x4xf32>
    %c2_72 = arith.constant 2 : index
    %c2_73 = arith.constant 2 : index
    %c0_74 = arith.constant 0 : index
    %54 = vector.load %arg11[%c2_72, %c2_73, %c0_74] : memref<18x18x4xf32, #tpu.memory_space<vmem>>, vector<16x16x4xf32>
    %55 = vector.shape_cast %54 : vector<16x16x4xf32> to vector<256x4xf32>
    %c2_75 = arith.constant 2 : index
    %c2_76 = arith.constant 2 : index
    %c0_77 = arith.constant 0 : index
    %c0_78 = arith.constant 0 : index
    %56 = vector.load %arg2[%c2_75, %c2_76, %c0_77, %c0_78] : memref<3x3x4x4xf32, #tpu.memory_space<vmem>>, vector<1x1x4x4xf32>
    %57 = vector.shape_cast %56 : vector<1x1x4x4xf32> to vector<4x4xf32>
    %cst_79 = arith.constant dense<0.000000e+00> : vector<256x4xf32>
    %58 = tpu.matmul %55, %57, %cst_79 {dimension_numbers = #tpu.dot_dimension_numbers<[1], [0], [0], [1], [0, 0, 1, 1], [], []>} : vector<256x4xf32>, vector<4x4xf32>, vector<256x4xf32> -> vector<256x4xf32>
    %59 = arith.addf %53, %58 : vector<256x4xf32>
    %c0_80 = arith.constant 0 : index
    %c0_81 = arith.constant 0 : index
    %60 = vector.load %arg3[%c0_80, %c0_81] : memref<2x4xf32, #tpu.memory_space<vmem>>, vector<1x4xf32>
    %61 = vector.shape_cast %60 : vector<1x4xf32> to vector<4xf32>
    %62 = vector.shape_cast %61 : vector<4xf32> to vector<1x4xf32>
    %63 = vector.broadcast %62 : vector<1x4xf32> to vector<256x4xf32>
    %64 = arith.mulf %59, %63 : vector<256x4xf32>
    %c1_82 = arith.constant 1 : index
    %c0_83 = arith.constant 0 : index
    %65 = vector.load %arg3[%c1_82, %c0_83] : memref<2x4xf32, #tpu.memory_space<vmem>>, vector<1x4xf32>
    %66 = vector.shape_cast %65 : vector<1x4xf32> to vector<4xf32>
    %67 = vector.shape_cast %66 : vector<4xf32> to vector<1x4xf32>
    %68 = vector.broadcast %67 : vector<1x4xf32> to vector<256x4xf32>
    %69 = arith.addf %64, %68 : vector<256x4xf32>
    %cst_84 = arith.constant 0.000000e+00 : f32
    %70 = vector.broadcast %cst_84 : f32 to vector<256x4xf32>
    %71 = arith.maximumf %69, %70 : vector<256x4xf32>
    %72 = vector.shape_cast %71 : vector<256x4xf32> to vector<16x16x4xf32>
    %cst_85 = arith.constant 0.000000e+00 : f32
    %73 = vector.broadcast %cst_85 : f32 to vector<18x18x4xf32>
    %c0_86 = arith.constant 0 : index
    %c0_87 = arith.constant 0 : index
    %c0_88 = arith.constant 0 : index
    %74 = vector.load %arg12[%c0_86, %c0_87, %c0_88] : memref<18x18x4xf32, #tpu.memory_space<vmem>>, vector<18x18x4xf32>
    tpu.vector_store %arg12[%c0_86, %c0_87, %c0_88], %73 {strides = array<i32>} : memref<18x18x4xf32, #tpu.memory_space<vmem>>, vector<18x18x4xf32>,
    %c1_89 = arith.constant 1 : index
    %c1_90 = arith.constant 1 : index
    %c0_91 = arith.constant 0 : index
    %75 = vector.load %arg12[%c1_89, %c1_90, %c0_91] : memref<18x18x4xf32, #tpu.memory_space<vmem>>, vector<16x16x4xf32>
    tpu.vector_store %arg12[%c1_89, %c1_90, %c0_91], %72 {strides = array<i32>} : memref<18x18x4xf32, #tpu.memory_space<vmem>>, vector<16x16x4xf32>,
    %cst_92 = arith.constant 0.000000e+00 : f32
    %76 = vector.broadcast %cst_92 : f32 to vector<16x16x4xf32>
    %c0_93 = arith.constant 0 : index
    %c0_94 = arith.constant 0 : index
    %c0_95 = arith.constant 0 : index
    %77 = vector.load %arg12[%c0_93, %c0_94, %c0_95] : memref<18x18x4xf32, #tpu.memory_space<vmem>>, vector<16x16x4xf32>
    %c0_96 = arith.constant 0 : index
    %c0_97 = arith.constant 0 : index
    %c0_98 = arith.constant 0 : index
    %78 = vector.load %arg4[%c0_96, %c0_97, %c0_98] : memref<3x3x4xf32, #tpu.memory_space<vmem>>, vector<1x1x4xf32>
    %79 = vector.shape_cast %78 : vector<1x1x4xf32> to vector<4xf32>
    %80 = vector.shape_cast %79 : vector<4xf32> to vector<1x1x4xf32>
    %81 = vector.broadcast %80 : vector<1x1x4xf32> to vector<16x16x4xf32>
    %82 = arith.mulf %77, %81 : vector<16x16x4xf32>
    %83 = arith.addf %76, %82 : vector<16x16x4xf32>
    %c0_99 = arith.constant 0 : index
    %c1_100 = arith.constant 1 : index
    %c0_101 = arith.constant 0 : index
    %84 = vector.load %arg12[%c0_99, %c1_100, %c0_101] : memref<18x18x4xf32, #tpu.memory_space<vmem>>, vector<16x16x4xf32>
    %c0_102 = arith.constant 0 : index
    %c1_103 = arith.constant 1 : index
    %c0_104 = arith.constant 0 : index
    %85 = vector.load %arg4[%c0_102, %c1_103, %c0_104] : memref<3x3x4xf32, #tpu.memory_space<vmem>>, vector<1x1x4xf32>
    %86 = vector.shape_cast %85 : vector<1x1x4xf32> to vector<4xf32>
    %87 = vector.shape_cast %86 : vector<4xf32> to vector<1x1x4xf32>
    %88 = vector.broadcast %87 : vector<1x1x4xf32> to vector<16x16x4xf32>
    %89 = arith.mulf %84, %88 : vector<16x16x4xf32>
    %90 = arith.addf %83, %89 : vector<16x16x4xf32>
    %c0_105 = arith.constant 0 : index
    %c2_106 = arith.constant 2 : index
    %c0_107 = arith.constant 0 : index
    %91 = vector.load %arg12[%c0_105, %c2_106, %c0_107] : memref<18x18x4xf32, #tpu.memory_space<vmem>>, vector<16x16x4xf32>
    %c0_108 = arith.constant 0 : index
    %c2_109 = arith.constant 2 : index
    %c0_110 = arith.constant 0 : index
    %92 = vector.load %arg4[%c0_108, %c2_109, %c0_110] : memref<3x3x4xf32, #tpu.memory_space<vmem>>, vector<1x1x4xf32>
    %93 = vector.shape_cast %92 : vector<1x1x4xf32> to vector<4xf32>
    %94 = vector.shape_cast %93 : vector<4xf32> to vector<1x1x4xf32>
    %95 = vector.broadcast %94 : vector<1x1x4xf32> to vector<16x16x4xf32>
    %96 = arith.mulf %91, %95 : vector<16x16x4xf32>
    %97 = arith.addf %90, %96 : vector<16x16x4xf32>
    %c1_111 = arith.constant 1 : index
    %c0_112 = arith.constant 0 : index
    %c0_113 = arith.constant 0 : index
    %98 = vector.load %arg12[%c1_111, %c0_112, %c0_113] : memref<18x18x4xf32, #tpu.memory_space<vmem>>, vector<16x16x4xf32>
    %c1_114 = arith.constant 1 : index
    %c0_115 = arith.constant 0 : index
    %c0_116 = arith.constant 0 : index
    %99 = vector.load %arg4[%c1_114, %c0_115, %c0_116] : memref<3x3x4xf32, #tpu.memory_space<vmem>>, vector<1x1x4xf32>
    %100 = vector.shape_cast %99 : vector<1x1x4xf32> to vector<4xf32>
    %101 = vector.shape_cast %100 : vector<4xf32> to vector<1x1x4xf32>
    %102 = vector.broadcast %101 : vector<1x1x4xf32> to vector<16x16x4xf32>
    %103 = arith.mulf %98, %102 : vector<16x16x4xf32>
    %104 = arith.addf %97, %103 : vector<16x16x4xf32>
    %c1_117 = arith.constant 1 : index
    %c1_118 = arith.constant 1 : index
    %c0_119 = arith.constant 0 : index
    %105 = vector.load %arg12[%c1_117, %c1_118, %c0_119] : memref<18x18x4xf32, #tpu.memory_space<vmem>>, vector<16x16x4xf32>
    %c1_120 = arith.constant 1 : index
    %c1_121 = arith.constant 1 : index
    %c0_122 = arith.constant 0 : index
    %106 = vector.load %arg4[%c1_120, %c1_121, %c0_122] : memref<3x3x4xf32, #tpu.memory_space<vmem>>, vector<1x1x4xf32>
    %107 = vector.shape_cast %106 : vector<1x1x4xf32> to vector<4xf32>
    %108 = vector.shape_cast %107 : vector<4xf32> to vector<1x1x4xf32>
    %109 = vector.broadcast %108 : vector<1x1x4xf32> to vector<16x16x4xf32>
    %110 = arith.mulf %105, %109 : vector<16x16x4xf32>
    %111 = arith.addf %104, %110 : vector<16x16x4xf32>
    %c1_123 = arith.constant 1 : index
    %c2_124 = arith.constant 2 : index
    %c0_125 = arith.constant 0 : index
    %112 = vector.load %arg12[%c1_123, %c2_124, %c0_125] : memref<18x18x4xf32, #tpu.memory_space<vmem>>, vector<16x16x4xf32>
    %c1_126 = arith.constant 1 : index
    %c2_127 = arith.constant 2 : index
    %c0_128 = arith.constant 0 : index
    %113 = vector.load %arg4[%c1_126, %c2_127, %c0_128] : memref<3x3x4xf32, #tpu.memory_space<vmem>>, vector<1x1x4xf32>
    %114 = vector.shape_cast %113 : vector<1x1x4xf32> to vector<4xf32>
    %115 = vector.shape_cast %114 : vector<4xf32> to vector<1x1x4xf32>
    %116 = vector.broadcast %115 : vector<1x1x4xf32> to vector<16x16x4xf32>
    %117 = arith.mulf %112, %116 : vector<16x16x4xf32>
    %118 = arith.addf %111, %117 : vector<16x16x4xf32>
    %c2_129 = arith.constant 2 : index
    %c0_130 = arith.constant 0 : index
    %c0_131 = arith.constant 0 : index
    %119 = vector.load %arg12[%c2_129, %c0_130, %c0_131] : memref<18x18x4xf32, #tpu.memory_space<vmem>>, vector<16x16x4xf32>
    %c2_132 = arith.constant 2 : index
    %c0_133 = arith.constant 0 : index
    %c0_134 = arith.constant 0 : index
    %120 = vector.load %arg4[%c2_132, %c0_133, %c0_134] : memref<3x3x4xf32, #tpu.memory_space<vmem>>, vector<1x1x4xf32>
    %121 = vector.shape_cast %120 : vector<1x1x4xf32> to vector<4xf32>
    %122 = vector.shape_cast %121 : vector<4xf32> to vector<1x1x4xf32>
    %123 = vector.broadcast %122 : vector<1x1x4xf32> to vector<16x16x4xf32>
    %124 = arith.mulf %119, %123 : vector<16x16x4xf32>
    %125 = arith.addf %118, %124 : vector<16x16x4xf32>
    %c2_135 = arith.constant 2 : index
    %c1_136 = arith.constant 1 : index
    %c0_137 = arith.constant 0 : index
    %126 = vector.load %arg12[%c2_135, %c1_136, %c0_137] : memref<18x18x4xf32, #tpu.memory_space<vmem>>, vector<16x16x4xf32>
    %c2_138 = arith.constant 2 : index
    %c1_139 = arith.constant 1 : index
    %c0_140 = arith.constant 0 : index
    %127 = vector.load %arg4[%c2_138, %c1_139, %c0_140] : memref<3x3x4xf32, #tpu.memory_space<vmem>>, vector<1x1x4xf32>
    %128 = vector.shape_cast %127 : vector<1x1x4xf32> to vector<4xf32>
    %129 = vector.shape_cast %128 : vector<4xf32> to vector<1x1x4xf32>
    %130 = vector.broadcast %129 : vector<1x1x4xf32> to vector<16x16x4xf32>
    %131 = arith.mulf %126, %130 : vector<16x16x4xf32>
    %132 = arith.addf %125, %131 : vector<16x16x4xf32>
    %c2_141 = arith.constant 2 : index
    %c2_142 = arith.constant 2 : index
    %c0_143 = arith.constant 0 : index
    %133 = vector.load %arg12[%c2_141, %c2_142, %c0_143] : memref<18x18x4xf32, #tpu.memory_space<vmem>>, vector<16x16x4xf32>
    %c2_144 = arith.constant 2 : index
    %c2_145 = arith.constant 2 : index
    %c0_146 = arith.constant 0 : index
    %134 = vector.load %arg4[%c2_144, %c2_145, %c0_146] : memref<3x3x4xf32, #tpu.memory_space<vmem>>, vector<1x1x4xf32>
    %135 = vector.shape_cast %134 : vector<1x1x4xf32> to vector<4xf32>
    %136 = vector.shape_cast %135 : vector<4xf32> to vector<1x1x4xf32>
    %137 = vector.broadcast %136 : vector<1x1x4xf32> to vector<16x16x4xf32>
    %138 = arith.mulf %133, %137 : vector<16x16x4xf32>
    %139 = arith.addf %132, %138 : vector<16x16x4xf32>
    %c0_147 = arith.constant 0 : index
    %c0_148 = arith.constant 0 : index
    %140 = vector.load %arg5[%c0_147, %c0_148] : memref<2x4xf32, #tpu.memory_space<vmem>>, vector<1x4xf32>
    %141 = vector.shape_cast %140 : vector<1x4xf32> to vector<4xf32>
    %142 = vector.shape_cast %141 : vector<4xf32> to vector<1x1x4xf32>
    %143 = vector.broadcast %142 : vector<1x1x4xf32> to vector<16x16x4xf32>
    %144 = arith.mulf %139, %143 : vector<16x16x4xf32>
    %c1_149 = arith.constant 1 : index
    %c0_150 = arith.constant 0 : index
    %145 = vector.load %arg5[%c1_149, %c0_150] : memref<2x4xf32, #tpu.memory_space<vmem>>, vector<1x4xf32>
    %146 = vector.shape_cast %145 : vector<1x4xf32> to vector<4xf32>
    %147 = vector.shape_cast %146 : vector<4xf32> to vector<1x1x4xf32>
    %148 = vector.broadcast %147 : vector<1x1x4xf32> to vector<16x16x4xf32>
    %149 = arith.addf %144, %148 : vector<16x16x4xf32>
    %cst_151 = arith.constant 0.000000e+00 : f32
    %150 = vector.broadcast %cst_151 : f32 to vector<16x16x4xf32>
    %151 = arith.maximumf %149, %150 : vector<16x16x4xf32>
    %cst_152 = arith.constant 0.000000e+00 : f32
    %152 = vector.broadcast %cst_152 : f32 to vector<18x18x8xf32>
    %c0_153 = arith.constant 0 : index
    %c0_154 = arith.constant 0 : index
    %c0_155 = arith.constant 0 : index
    %153 = vector.load %arg13[%c0_153, %c0_154, %c0_155] : memref<18x18x8xf32, #tpu.memory_space<vmem>>, vector<18x18x8xf32>
    tpu.vector_store %arg13[%c0_153, %c0_154, %c0_155], %152 {strides = array<i32>} : memref<18x18x8xf32, #tpu.memory_space<vmem>>, vector<18x18x8xf32>,
    %c1_156 = arith.constant 1 : index
    %c1_157 = arith.constant 1 : index
    %c0_158 = arith.constant 0 : index
    %154 = vector.load %arg13[%c1_156, %c1_157, %c0_158] : memref<18x18x8xf32, #tpu.memory_space<vmem>>, vector<16x16x4xf32>
    tpu.vector_store %arg13[%c1_156, %c1_157, %c0_158], %72 {strides = array<i32>} : memref<18x18x8xf32, #tpu.memory_space<vmem>>, vector<16x16x4xf32>,
    %c1_159 = arith.constant 1 : index
    %c1_160 = arith.constant 1 : index
    %c4 = arith.constant 4 : index
    %155 = vector.load %arg13[%c1_159, %c1_160, %c4] : memref<18x18x8xf32, #tpu.memory_space<vmem>>, vector<16x16x4xf32>
    tpu.vector_store %arg13[%c1_159, %c1_160, %c4], %151 {strides = array<i32>} : memref<18x18x8xf32, #tpu.memory_space<vmem>>, vector<16x16x4xf32>,
    %cst_161 = arith.constant 0.000000e+00 : f32
    %156 = vector.broadcast %cst_161 : f32 to vector<256x4xf32>
    %c0_162 = arith.constant 0 : index
    %c0_163 = arith.constant 0 : index
    %c0_164 = arith.constant 0 : index
    %157 = vector.load %arg13[%c0_162, %c0_163, %c0_164] : memref<18x18x8xf32, #tpu.memory_space<vmem>>, vector<16x16x8xf32>
    %158 = vector.shape_cast %157 : vector<16x16x8xf32> to vector<256x8xf32>
    %c0_165 = arith.constant 0 : index
    %c0_166 = arith.constant 0 : index
    %c0_167 = arith.constant 0 : index
    %c0_168 = arith.constant 0 : index
    %159 = vector.load %arg6[%c0_165, %c0_166, %c0_167, %c0_168] : memref<3x3x8x4xf32, #tpu.memory_space<vmem>>, vector<1x1x8x4xf32>
    %160 = vector.shape_cast %159 : vector<1x1x8x4xf32> to vector<8x4xf32>
    %cst_169 = arith.constant dense<0.000000e+00> : vector<256x4xf32>
    %161 = tpu.matmul %158, %160, %cst_169 {dimension_numbers = #tpu.dot_dimension_numbers<[1], [0], [0], [1], [0, 0, 1, 1], [], []>} : vector<256x8xf32>, vector<8x4xf32>, vector<256x4xf32> -> vector<256x4xf32>
    %162 = arith.addf %156, %161 : vector<256x4xf32>
    %c0_170 = arith.constant 0 : index
    %c1_171 = arith.constant 1 : index
    %c0_172 = arith.constant 0 : index
    %163 = vector.load %arg13[%c0_170, %c1_171, %c0_172] : memref<18x18x8xf32, #tpu.memory_space<vmem>>, vector<16x16x8xf32>
    %164 = vector.shape_cast %163 : vector<16x16x8xf32> to vector<256x8xf32>
    %c0_173 = arith.constant 0 : index
    %c1_174 = arith.constant 1 : index
    %c0_175 = arith.constant 0 : index
    %c0_176 = arith.constant 0 : index
    %165 = vector.load %arg6[%c0_173, %c1_174, %c0_175, %c0_176] : memref<3x3x8x4xf32, #tpu.memory_space<vmem>>, vector<1x1x8x4xf32>
    %166 = vector.shape_cast %165 : vector<1x1x8x4xf32> to vector<8x4xf32>
    %cst_177 = arith.constant dense<0.000000e+00> : vector<256x4xf32>
    %167 = tpu.matmul %164, %166, %cst_177 {dimension_numbers = #tpu.dot_dimension_numbers<[1], [0], [0], [1], [0, 0, 1, 1], [], []>} : vector<256x8xf32>, vector<8x4xf32>, vector<256x4xf32> -> vector<256x4xf32>
    %168 = arith.addf %162, %167 : vector<256x4xf32>
    %c0_178 = arith.constant 0 : index
    %c2_179 = arith.constant 2 : index
    %c0_180 = arith.constant 0 : index
    %169 = vector.load %arg13[%c0_178, %c2_179, %c0_180] : memref<18x18x8xf32, #tpu.memory_space<vmem>>, vector<16x16x8xf32>
    %170 = vector.shape_cast %169 : vector<16x16x8xf32> to vector<256x8xf32>
    %c0_181 = arith.constant 0 : index
    %c2_182 = arith.constant 2 : index
    %c0_183 = arith.constant 0 : index
    %c0_184 = arith.constant 0 : index
    %171 = vector.load %arg6[%c0_181, %c2_182, %c0_183, %c0_184] : memref<3x3x8x4xf32, #tpu.memory_space<vmem>>, vector<1x1x8x4xf32>
    %172 = vector.shape_cast %171 : vector<1x1x8x4xf32> to vector<8x4xf32>
    %cst_185 = arith.constant dense<0.000000e+00> : vector<256x4xf32>
    %173 = tpu.matmul %170, %172, %cst_185 {dimension_numbers = #tpu.dot_dimension_numbers<[1], [0], [0], [1], [0, 0, 1, 1], [], []>} : vector<256x8xf32>, vector<8x4xf32>, vector<256x4xf32> -> vector<256x4xf32>
    %174 = arith.addf %168, %173 : vector<256x4xf32>
    %c1_186 = arith.constant 1 : index
    %c0_187 = arith.constant 0 : index
    %c0_188 = arith.constant 0 : index
    %175 = vector.load %arg13[%c1_186, %c0_187, %c0_188] : memref<18x18x8xf32, #tpu.memory_space<vmem>>, vector<16x16x8xf32>
    %176 = vector.shape_cast %175 : vector<16x16x8xf32> to vector<256x8xf32>
    %c1_189 = arith.constant 1 : index
    %c0_190 = arith.constant 0 : index
    %c0_191 = arith.constant 0 : index
    %c0_192 = arith.constant 0 : index
    %177 = vector.load %arg6[%c1_189, %c0_190, %c0_191, %c0_192] : memref<3x3x8x4xf32, #tpu.memory_space<vmem>>, vector<1x1x8x4xf32>
    %178 = vector.shape_cast %177 : vector<1x1x8x4xf32> to vector<8x4xf32>
    %cst_193 = arith.constant dense<0.000000e+00> : vector<256x4xf32>
    %179 = tpu.matmul %176, %178, %cst_193 {dimension_numbers = #tpu.dot_dimension_numbers<[1], [0], [0], [1], [0, 0, 1, 1], [], []>} : vector<256x8xf32>, vector<8x4xf32>, vector<256x4xf32> -> vector<256x4xf32>
    %180 = arith.addf %174, %179 : vector<256x4xf32>
    %c1_194 = arith.constant 1 : index
    %c1_195 = arith.constant 1 : index
    %c0_196 = arith.constant 0 : index
    %181 = vector.load %arg13[%c1_194, %c1_195, %c0_196] : memref<18x18x8xf32, #tpu.memory_space<vmem>>, vector<16x16x8xf32>
    %182 = vector.shape_cast %181 : vector<16x16x8xf32> to vector<256x8xf32>
    %c1_197 = arith.constant 1 : index
    %c1_198 = arith.constant 1 : index
    %c0_199 = arith.constant 0 : index
    %c0_200 = arith.constant 0 : index
    %183 = vector.load %arg6[%c1_197, %c1_198, %c0_199, %c0_200] : memref<3x3x8x4xf32, #tpu.memory_space<vmem>>, vector<1x1x8x4xf32>
    %184 = vector.shape_cast %183 : vector<1x1x8x4xf32> to vector<8x4xf32>
    %cst_201 = arith.constant dense<0.000000e+00> : vector<256x4xf32>
    %185 = tpu.matmul %182, %184, %cst_201 {dimension_numbers = #tpu.dot_dimension_numbers<[1], [0], [0], [1], [0, 0, 1, 1], [], []>} : vector<256x8xf32>, vector<8x4xf32>, vector<256x4xf32> -> vector<256x4xf32>
    %186 = arith.addf %180, %185 : vector<256x4xf32>
    %c1_202 = arith.constant 1 : index
    %c2_203 = arith.constant 2 : index
    %c0_204 = arith.constant 0 : index
    %187 = vector.load %arg13[%c1_202, %c2_203, %c0_204] : memref<18x18x8xf32, #tpu.memory_space<vmem>>, vector<16x16x8xf32>
    %188 = vector.shape_cast %187 : vector<16x16x8xf32> to vector<256x8xf32>
    %c1_205 = arith.constant 1 : index
    %c2_206 = arith.constant 2 : index
    %c0_207 = arith.constant 0 : index
    %c0_208 = arith.constant 0 : index
    %189 = vector.load %arg6[%c1_205, %c2_206, %c0_207, %c0_208] : memref<3x3x8x4xf32, #tpu.memory_space<vmem>>, vector<1x1x8x4xf32>
    %190 = vector.shape_cast %189 : vector<1x1x8x4xf32> to vector<8x4xf32>
    %cst_209 = arith.constant dense<0.000000e+00> : vector<256x4xf32>
    %191 = tpu.matmul %188, %190, %cst_209 {dimension_numbers = #tpu.dot_dimension_numbers<[1], [0], [0], [1], [0, 0, 1, 1], [], []>} : vector<256x8xf32>, vector<8x4xf32>, vector<256x4xf32> -> vector<256x4xf32>
    %192 = arith.addf %186, %191 : vector<256x4xf32>
    %c2_210 = arith.constant 2 : index
    %c0_211 = arith.constant 0 : index
    %c0_212 = arith.constant 0 : index
    %193 = vector.load %arg13[%c2_210, %c0_211, %c0_212] : memref<18x18x8xf32, #tpu.memory_space<vmem>>, vector<16x16x8xf32>
    %194 = vector.shape_cast %193 : vector<16x16x8xf32> to vector<256x8xf32>
    %c2_213 = arith.constant 2 : index
    %c0_214 = arith.constant 0 : index
    %c0_215 = arith.constant 0 : index
    %c0_216 = arith.constant 0 : index
    %195 = vector.load %arg6[%c2_213, %c0_214, %c0_215, %c0_216] : memref<3x3x8x4xf32, #tpu.memory_space<vmem>>, vector<1x1x8x4xf32>
    %196 = vector.shape_cast %195 : vector<1x1x8x4xf32> to vector<8x4xf32>
    %cst_217 = arith.constant dense<0.000000e+00> : vector<256x4xf32>
    %197 = tpu.matmul %194, %196, %cst_217 {dimension_numbers = #tpu.dot_dimension_numbers<[1], [0], [0], [1], [0, 0, 1, 1], [], []>} : vector<256x8xf32>, vector<8x4xf32>, vector<256x4xf32> -> vector<256x4xf32>
    %198 = arith.addf %192, %197 : vector<256x4xf32>
    %c2_218 = arith.constant 2 : index
    %c1_219 = arith.constant 1 : index
    %c0_220 = arith.constant 0 : index
    %199 = vector.load %arg13[%c2_218, %c1_219, %c0_220] : memref<18x18x8xf32, #tpu.memory_space<vmem>>, vector<16x16x8xf32>
    %200 = vector.shape_cast %199 : vector<16x16x8xf32> to vector<256x8xf32>
    %c2_221 = arith.constant 2 : index
    %c1_222 = arith.constant 1 : index
    %c0_223 = arith.constant 0 : index
    %c0_224 = arith.constant 0 : index
    %201 = vector.load %arg6[%c2_221, %c1_222, %c0_223, %c0_224] : memref<3x3x8x4xf32, #tpu.memory_space<vmem>>, vector<1x1x8x4xf32>
    %202 = vector.shape_cast %201 : vector<1x1x8x4xf32> to vector<8x4xf32>
    %cst_225 = arith.constant dense<0.000000e+00> : vector<256x4xf32>
    %203 = tpu.matmul %200, %202, %cst_225 {dimension_numbers = #tpu.dot_dimension_numbers<[1], [0], [0], [1], [0, 0, 1, 1], [], []>} : vector<256x8xf32>, vector<8x4xf32>, vector<256x4xf32> -> vector<256x4xf32>
    %204 = arith.addf %198, %203 : vector<256x4xf32>
    %c2_226 = arith.constant 2 : index
    %c2_227 = arith.constant 2 : index
    %c0_228 = arith.constant 0 : index
    %205 = vector.load %arg13[%c2_226, %c2_227, %c0_228] : memref<18x18x8xf32, #tpu.memory_space<vmem>>, vector<16x16x8xf32>
    %206 = vector.shape_cast %205 : vector<16x16x8xf32> to vector<256x8xf32>
    %c2_229 = arith.constant 2 : index
    %c2_230 = arith.constant 2 : index
    %c0_231 = arith.constant 0 : index
    %c0_232 = arith.constant 0 : index
    %207 = vector.load %arg6[%c2_229, %c2_230, %c0_231, %c0_232] : memref<3x3x8x4xf32, #tpu.memory_space<vmem>>, vector<1x1x8x4xf32>
    %208 = vector.shape_cast %207 : vector<1x1x8x4xf32> to vector<8x4xf32>
    %cst_233 = arith.constant dense<0.000000e+00> : vector<256x4xf32>
    %209 = tpu.matmul %206, %208, %cst_233 {dimension_numbers = #tpu.dot_dimension_numbers<[1], [0], [0], [1], [0, 0, 1, 1], [], []>} : vector<256x8xf32>, vector<8x4xf32>, vector<256x4xf32> -> vector<256x4xf32>
    %210 = arith.addf %204, %209 : vector<256x4xf32>
    %c0_234 = arith.constant 0 : index
    %c0_235 = arith.constant 0 : index
    %211 = vector.load %arg7[%c0_234, %c0_235] : memref<2x4xf32, #tpu.memory_space<vmem>>, vector<1x4xf32>
    %212 = vector.shape_cast %211 : vector<1x4xf32> to vector<4xf32>
    %213 = vector.shape_cast %212 : vector<4xf32> to vector<1x4xf32>
    %214 = vector.broadcast %213 : vector<1x4xf32> to vector<256x4xf32>
    %215 = arith.mulf %210, %214 : vector<256x4xf32>
    %c1_236 = arith.constant 1 : index
    %c0_237 = arith.constant 0 : index
    %216 = vector.load %arg7[%c1_236, %c0_237] : memref<2x4xf32, #tpu.memory_space<vmem>>, vector<1x4xf32>
    %217 = vector.shape_cast %216 : vector<1x4xf32> to vector<4xf32>
    %218 = vector.shape_cast %217 : vector<4xf32> to vector<1x4xf32>
    %219 = vector.broadcast %218 : vector<1x4xf32> to vector<256x4xf32>
    %220 = arith.addf %215, %219 : vector<256x4xf32>
    %cst_238 = arith.constant 0.000000e+00 : f32
    %221 = vector.broadcast %cst_238 : f32 to vector<256x4xf32>
    %222 = arith.maximumf %220, %221 : vector<256x4xf32>
    %223 = vector.shape_cast %222 : vector<256x4xf32> to vector<16x16x4xf32>
    %cst_239 = arith.constant 0.000000e+00 : f32
    %224 = vector.broadcast %cst_239 : f32 to vector<18x18x4xf32>
    %c0_240 = arith.constant 0 : index
    %c0_241 = arith.constant 0 : index
    %c0_242 = arith.constant 0 : index
    %225 = vector.load %arg14[%c0_240, %c0_241, %c0_242] : memref<18x18x4xf32, #tpu.memory_space<vmem>>, vector<18x18x4xf32>
    tpu.vector_store %arg14[%c0_240, %c0_241, %c0_242], %224 {strides = array<i32>} : memref<18x18x4xf32, #tpu.memory_space<vmem>>, vector<18x18x4xf32>,
    %c1_243 = arith.constant 1 : index
    %c1_244 = arith.constant 1 : index
    %c0_245 = arith.constant 0 : index
    %226 = vector.load %arg14[%c1_243, %c1_244, %c0_245] : memref<18x18x4xf32, #tpu.memory_space<vmem>>, vector<16x16x4xf32>
    tpu.vector_store %arg14[%c1_243, %c1_244, %c0_245], %223 {strides = array<i32>} : memref<18x18x4xf32, #tpu.memory_space<vmem>>, vector<16x16x4xf32>,
    %cst_246 = arith.constant 0.000000e+00 : f32
    %227 = vector.broadcast %cst_246 : f32 to vector<16x16x4xf32>
    %c0_247 = arith.constant 0 : index
    %c0_248 = arith.constant 0 : index
    %c0_249 = arith.constant 0 : index
    %228 = vector.load %arg14[%c0_247, %c0_248, %c0_249] : memref<18x18x4xf32, #tpu.memory_space<vmem>>, vector<16x16x4xf32>
    %c0_250 = arith.constant 0 : index
    %c0_251 = arith.constant 0 : index
    %c0_252 = arith.constant 0 : index
    %229 = vector.load %arg8[%c0_250, %c0_251, %c0_252] : memref<3x3x4xf32, #tpu.memory_space<vmem>>, vector<1x1x4xf32>
    %230 = vector.shape_cast %229 : vector<1x1x4xf32> to vector<4xf32>
    %231 = vector.shape_cast %230 : vector<4xf32> to vector<1x1x4xf32>
    %232 = vector.broadcast %231 : vector<1x1x4xf32> to vector<16x16x4xf32>
    %233 = arith.mulf %228, %232 : vector<16x16x4xf32>
    %234 = arith.addf %227, %233 : vector<16x16x4xf32>
    %c0_253 = arith.constant 0 : index
    %c1_254 = arith.constant 1 : index
    %c0_255 = arith.constant 0 : index
    %235 = vector.load %arg14[%c0_253, %c1_254, %c0_255] : memref<18x18x4xf32, #tpu.memory_space<vmem>>, vector<16x16x4xf32>
    %c0_256 = arith.constant 0 : index
    %c1_257 = arith.constant 1 : index
    %c0_258 = arith.constant 0 : index
    %236 = vector.load %arg8[%c0_256, %c1_257, %c0_258] : memref<3x3x4xf32, #tpu.memory_space<vmem>>, vector<1x1x4xf32>
    %237 = vector.shape_cast %236 : vector<1x1x4xf32> to vector<4xf32>
    %238 = vector.shape_cast %237 : vector<4xf32> to vector<1x1x4xf32>
    %239 = vector.broadcast %238 : vector<1x1x4xf32> to vector<16x16x4xf32>
    %240 = arith.mulf %235, %239 : vector<16x16x4xf32>
    %241 = arith.addf %234, %240 : vector<16x16x4xf32>
    %c0_259 = arith.constant 0 : index
    %c2_260 = arith.constant 2 : index
    %c0_261 = arith.constant 0 : index
    %242 = vector.load %arg14[%c0_259, %c2_260, %c0_261] : memref<18x18x4xf32, #tpu.memory_space<vmem>>, vector<16x16x4xf32>
    %c0_262 = arith.constant 0 : index
    %c2_263 = arith.constant 2 : index
    %c0_264 = arith.constant 0 : index
    %243 = vector.load %arg8[%c0_262, %c2_263, %c0_264] : memref<3x3x4xf32, #tpu.memory_space<vmem>>, vector<1x1x4xf32>
    %244 = vector.shape_cast %243 : vector<1x1x4xf32> to vector<4xf32>
    %245 = vector.shape_cast %244 : vector<4xf32> to vector<1x1x4xf32>
    %246 = vector.broadcast %245 : vector<1x1x4xf32> to vector<16x16x4xf32>
    %247 = arith.mulf %242, %246 : vector<16x16x4xf32>
    %248 = arith.addf %241, %247 : vector<16x16x4xf32>
    %c1_265 = arith.constant 1 : index
    %c0_266 = arith.constant 0 : index
    %c0_267 = arith.constant 0 : index
    %249 = vector.load %arg14[%c1_265, %c0_266, %c0_267] : memref<18x18x4xf32, #tpu.memory_space<vmem>>, vector<16x16x4xf32>
    %c1_268 = arith.constant 1 : index
    %c0_269 = arith.constant 0 : index
    %c0_270 = arith.constant 0 : index
    %250 = vector.load %arg8[%c1_268, %c0_269, %c0_270] : memref<3x3x4xf32, #tpu.memory_space<vmem>>, vector<1x1x4xf32>
    %251 = vector.shape_cast %250 : vector<1x1x4xf32> to vector<4xf32>
    %252 = vector.shape_cast %251 : vector<4xf32> to vector<1x1x4xf32>
    %253 = vector.broadcast %252 : vector<1x1x4xf32> to vector<16x16x4xf32>
    %254 = arith.mulf %249, %253 : vector<16x16x4xf32>
    %255 = arith.addf %248, %254 : vector<16x16x4xf32>
    %c1_271 = arith.constant 1 : index
    %c1_272 = arith.constant 1 : index
    %c0_273 = arith.constant 0 : index
    %256 = vector.load %arg14[%c1_271, %c1_272, %c0_273] : memref<18x18x4xf32, #tpu.memory_space<vmem>>, vector<16x16x4xf32>
    %c1_274 = arith.constant 1 : index
    %c1_275 = arith.constant 1 : index
    %c0_276 = arith.constant 0 : index
    %257 = vector.load %arg8[%c1_274, %c1_275, %c0_276] : memref<3x3x4xf32, #tpu.memory_space<vmem>>, vector<1x1x4xf32>
    %258 = vector.shape_cast %257 : vector<1x1x4xf32> to vector<4xf32>
    %259 = vector.shape_cast %258 : vector<4xf32> to vector<1x1x4xf32>
    %260 = vector.broadcast %259 : vector<1x1x4xf32> to vector<16x16x4xf32>
    %261 = arith.mulf %256, %260 : vector<16x16x4xf32>
    %262 = arith.addf %255, %261 : vector<16x16x4xf32>
    %c1_277 = arith.constant 1 : index
    %c2_278 = arith.constant 2 : index
    %c0_279 = arith.constant 0 : index
    %263 = vector.load %arg14[%c1_277, %c2_278, %c0_279] : memref<18x18x4xf32, #tpu.memory_space<vmem>>, vector<16x16x4xf32>
    %c1_280 = arith.constant 1 : index
    %c2_281 = arith.constant 2 : index
    %c0_282 = arith.constant 0 : index
    %264 = vector.load %arg8[%c1_280, %c2_281, %c0_282] : memref<3x3x4xf32, #tpu.memory_space<vmem>>, vector<1x1x4xf32>
    %265 = vector.shape_cast %264 : vector<1x1x4xf32> to vector<4xf32>
    %266 = vector.shape_cast %265 : vector<4xf32> to vector<1x1x4xf32>
    %267 = vector.broadcast %266 : vector<1x1x4xf32> to vector<16x16x4xf32>
    %268 = arith.mulf %263, %267 : vector<16x16x4xf32>
    %269 = arith.addf %262, %268 : vector<16x16x4xf32>
    %c2_283 = arith.constant 2 : index
    %c0_284 = arith.constant 0 : index
    %c0_285 = arith.constant 0 : index
    %270 = vector.load %arg14[%c2_283, %c0_284, %c0_285] : memref<18x18x4xf32, #tpu.memory_space<vmem>>, vector<16x16x4xf32>
    %c2_286 = arith.constant 2 : index
    %c0_287 = arith.constant 0 : index
    %c0_288 = arith.constant 0 : index
    %271 = vector.load %arg8[%c2_286, %c0_287, %c0_288] : memref<3x3x4xf32, #tpu.memory_space<vmem>>, vector<1x1x4xf32>
    %272 = vector.shape_cast %271 : vector<1x1x4xf32> to vector<4xf32>
    %273 = vector.shape_cast %272 : vector<4xf32> to vector<1x1x4xf32>
    %274 = vector.broadcast %273 : vector<1x1x4xf32> to vector<16x16x4xf32>
    %275 = arith.mulf %270, %274 : vector<16x16x4xf32>
    %276 = arith.addf %269, %275 : vector<16x16x4xf32>
    %c2_289 = arith.constant 2 : index
    %c1_290 = arith.constant 1 : index
    %c0_291 = arith.constant 0 : index
    %277 = vector.load %arg14[%c2_289, %c1_290, %c0_291] : memref<18x18x4xf32, #tpu.memory_space<vmem>>, vector<16x16x4xf32>
    %c2_292 = arith.constant 2 : index
    %c1_293 = arith.constant 1 : index
    %c0_294 = arith.constant 0 : index
    %278 = vector.load %arg8[%c2_292, %c1_293, %c0_294] : memref<3x3x4xf32, #tpu.memory_space<vmem>>, vector<1x1x4xf32>
    %279 = vector.shape_cast %278 : vector<1x1x4xf32> to vector<4xf32>
    %280 = vector.shape_cast %279 : vector<4xf32> to vector<1x1x4xf32>
    %281 = vector.broadcast %280 : vector<1x1x4xf32> to vector<16x16x4xf32>
    %282 = arith.mulf %277, %281 : vector<16x16x4xf32>
    %283 = arith.addf %276, %282 : vector<16x16x4xf32>
    %c2_295 = arith.constant 2 : index
    %c2_296 = arith.constant 2 : index
    %c0_297 = arith.constant 0 : index
    %284 = vector.load %arg14[%c2_295, %c2_296, %c0_297] : memref<18x18x4xf32, #tpu.memory_space<vmem>>, vector<16x16x4xf32>
    %c2_298 = arith.constant 2 : index
    %c2_299 = arith.constant 2 : index
    %c0_300 = arith.constant 0 : index
    %285 = vector.load %arg8[%c2_298, %c2_299, %c0_300] : memref<3x3x4xf32, #tpu.memory_space<vmem>>, vector<1x1x4xf32>
    %286 = vector.shape_cast %285 : vector<1x1x4xf32> to vector<4xf32>
    %287 = vector.shape_cast %286 : vector<4xf32> to vector<1x1x4xf32>
    %288 = vector.broadcast %287 : vector<1x1x4xf32> to vector<16x16x4xf32>
    %289 = arith.mulf %284, %288 : vector<16x16x4xf32>
    %290 = arith.addf %283, %289 : vector<16x16x4xf32>
    %c0_301 = arith.constant 0 : index
    %c0_302 = arith.constant 0 : index
    %291 = vector.load %arg9[%c0_301, %c0_302] : memref<2x4xf32, #tpu.memory_space<vmem>>, vector<1x4xf32>
    %292 = vector.shape_cast %291 : vector<1x4xf32> to vector<4xf32>
    %293 = vector.shape_cast %292 : vector<4xf32> to vector<1x1x4xf32>
    %294 = vector.broadcast %293 : vector<1x1x4xf32> to vector<16x16x4xf32>
    %295 = arith.mulf %290, %294 : vector<16x16x4xf32>
    %c1_303 = arith.constant 1 : index
    %c0_304 = arith.constant 0 : index
    %296 = vector.load %arg9[%c1_303, %c0_304] : memref<2x4xf32, #tpu.memory_space<vmem>>, vector<1x4xf32>
    %297 = vector.shape_cast %296 : vector<1x4xf32> to vector<4xf32>
    %298 = vector.shape_cast %297 : vector<4xf32> to vector<1x1x4xf32>
    %299 = vector.broadcast %298 : vector<1x1x4xf32> to vector<16x16x4xf32>
    %300 = arith.addf %295, %299 : vector<16x16x4xf32>
    %cst_305 = arith.constant 0.000000e+00 : f32
    %301 = vector.broadcast %cst_305 : f32 to vector<16x16x4xf32>
    %302 = arith.maximumf %300, %301 : vector<16x16x4xf32>
    %c0_306 = arith.constant 0 : index
    %c0_307 = arith.constant 0 : index
    %c0_308 = arith.constant 0 : index
    %c0_309 = arith.constant 0 : index
    %303 = vector.load %arg10[%c0_306, %c0_307, %c0_308, %c0_309] : memref<1x16x16x8xf32, #tpu.memory_space<vmem>>, vector<1x16x16x4xf32>
    %304 = vector.shape_cast %303 : vector<1x16x16x4xf32> to vector<16x16x4xf32>
    %305 = vector.shape_cast %223 : vector<16x16x4xf32> to vector<1x16x16x4xf32>
    tpu.vector_store %arg10[%c0_306, %c0_307, %c0_308, %c0_309], %305 {strides = array<i32>} : memref<1x16x16x8xf32, #tpu.memory_space<vmem>>, vector<1x16x16x4xf32>,
    %c0_310 = arith.constant 0 : index
    %c0_311 = arith.constant 0 : index
    %c0_312 = arith.constant 0 : index
    %c4_313 = arith.constant 4 : index
    %306 = vector.load %arg10[%c0_310, %c0_311, %c0_312, %c4_313] : memref<1x16x16x8xf32, #tpu.memory_space<vmem>>, vector<1x16x16x4xf32>
    %307 = vector.shape_cast %306 : vector<1x16x16x4xf32> to vector<16x16x4xf32>
    %308 = vector.shape_cast %302 : vector<16x16x4xf32> to vector<1x16x16x4xf32>
    tpu.vector_store %arg10[%c0_310, %c0_311, %c0_312, %c4_313], %308 {strides = array<i32>} : memref<1x16x16x8xf32, #tpu.memory_space<vmem>>, vector<1x16x16x4xf32>,
    return
  }
  func.func @transform_0(%arg0: i32) -> (i32, i32, i32, i32) {
    %c0_i32 = arith.constant 0 : i32
    %c0_i32_0 = arith.constant 0 : i32
    %c0_i32_1 = arith.constant 0 : i32
    %c0_i32_2 = arith.constant 0 : i32
    return %arg0, %c0_i32, %c0_i32_0, %c0_i32_1 : i32, i32, i32, i32
  }
  func.func @transform_1(%arg0: i32) -> (i32, i32, i32, i32) {
    %c0_i32 = arith.constant 0 : i32
    %c0_i32_0 = arith.constant 0 : i32
    %c0_i32_1 = arith.constant 0 : i32
    %c0_i32_2 = arith.constant 0 : i32
    %c0_i32_3 = arith.constant 0 : i32
    return %c0_i32, %c0_i32_0, %c0_i32_1, %c0_i32_2 : i32, i32, i32, i32
  }
  func.func @transform_2(%arg0: i32) -> (i32, i32) {
    %c0_i32 = arith.constant 0 : i32
    %c0_i32_0 = arith.constant 0 : i32
    %c0_i32_1 = arith.constant 0 : i32
    return %c0_i32, %c0_i32_0 : i32, i32
  }
  func.func @transform_3(%arg0: i32) -> (i32, i32, i32) {
    %c0_i32 = arith.constant 0 : i32
    %c0_i32_0 = arith.constant 0 : i32
    %c0_i32_1 = arith.constant 0 : i32
    %c0_i32_2 = arith.constant 0 : i32
    return %c0_i32, %c0_i32_0, %c0_i32_1 : i32, i32, i32
  }
  func.func @transform_4(%arg0: i32) -> (i32, i32) {
    %c0_i32 = arith.constant 0 : i32
    %c0_i32_0 = arith.constant 0 : i32
    %c0_i32_1 = arith.constant 0 : i32
    return %c0_i32, %c0_i32_0 : i32, i32
  }
  func.func @transform_5(%arg0: i32) -> (i32, i32, i32, i32) {
    %c0_i32 = arith.constant 0 : i32
    %c0_i32_0 = arith.constant 0 : i32
    %c0_i32_1 = arith.constant 0 : i32
    %c0_i32_2 = arith.constant 0 : i32
    %c0_i32_3 = arith.constant 0 : i32
    return %c0_i32, %c0_i32_0, %c0_i32_1, %c0_i32_2 : i32, i32, i32, i32
  }
  func.func @transform_6(%arg0: i32) -> (i32, i32) {
    %c0_i32 = arith.constant 0 : i32
    %c0_i32_0 = arith.constant 0 : i32
    %c0_i32_1 = arith.constant 0 : i32
    return %c0_i32, %c0_i32_0 : i32, i32
  }
  func.func @transform_7(%arg0: i32) -> (i32, i32, i32) {
    %c0_i32 = arith.constant 0 : i32
    %c0_i32_0 = arith.constant 0 : i32
    %c0_i32_1 = arith.constant 0 : i32
    %c0_i32_2 = arith.constant 0 : i32
    return %c0_i32, %c0_i32_0, %c0_i32_1 : i32, i32, i32
  }
  func.func @transform_8(%arg0: i32) -> (i32, i32) {
    %c0_i32 = arith.constant 0 : i32
    %c0_i32_0 = arith.constant 0 : i32
    %c0_i32_1 = arith.constant 0 : i32
    return %c0_i32, %c0_i32_0 : i32, i32
  }
  func.func @transform_9(%arg0: i32) -> (i32, i32, i32, i32) {
    %c0_i32 = arith.constant 0 : i32
    %c0_i32_0 = arith.constant 0 : i32
    %c0_i32_1 = arith.constant 0 : i32
    %c0_i32_2 = arith.constant 0 : i32
    return %arg0, %c0_i32, %c0_i32_0, %c0_i32_1 : i32, i32, i32, i32
  }
}

module attributes {stable_mosaic.version = 11 : i64} {
  func.func @maxpool_kernel(%arg0: i32, %arg1: memref<1x16x8x16xf32, #tpu.memory_space<vmem>>, %arg2: memref<1x8x8x8xf32, #tpu.memory_space<vmem>>) attributes {dimension_semantics = [#tpu.dimension_semantics<parallel>], iteration_bounds = array<i64: 2>, scalar_prefetch = 0 : i64, scratch_operands = 0 : i64, tpu.core_type = #tpu.core_type<tc>, window_params = [{transform_indices = @transform_0, window_bounds = array<i64: 1, 16, 8, 16>}, {transform_indices = @transform_1, window_bounds = array<i64: 1, 8, 8, 8>}]} {
    %c0 = arith.constant 0 : index
    %c0_0 = arith.constant 0 : index
    %c0_1 = arith.constant 0 : index
    %c0_2 = arith.constant 0 : index
    %0 = vector.load %arg1[%c0, %c0_0, %c0_1, %c0_2] : memref<1x16x8x16xf32, #tpu.memory_space<vmem>>, vector<1x16x8x16xf32>
    %1 = vector.shape_cast %0 : vector<1x16x8x16xf32> to vector<16x8x16xf32>
    %2 = vector.extract_strided_slice %1 {offsets = [0, 0, 0], sizes = [16, 8, 8], strides = [1, 1, 1]} : vector<16x8x16xf32> to vector<16x8x8xf32>
    %3 = vector.extract_strided_slice %1 {offsets = [0, 0, 8], sizes = [16, 8, 8], strides = [1, 1, 1]} : vector<16x8x16xf32> to vector<16x8x8xf32>
    %4 = arith.maximumf %2, %3 : vector<16x8x8xf32>
    %5 = vector.shape_cast %4 : vector<16x8x8xf32> to vector<8x2x8x8xf32>
    %6 = vector.extract_strided_slice %5 {offsets = [0, 0, 0, 0], sizes = [8, 1, 8, 8], strides = [1, 1, 1, 1]} : vector<8x2x8x8xf32> to vector<8x1x8x8xf32>
    %7 = vector.shape_cast %6 : vector<8x1x8x8xf32> to vector<8x8x8xf32>
    %8 = vector.extract_strided_slice %5 {offsets = [0, 1, 0, 0], sizes = [8, 1, 8, 8], strides = [1, 1, 1, 1]} : vector<8x2x8x8xf32> to vector<8x1x8x8xf32>
    %9 = vector.shape_cast %8 : vector<8x1x8x8xf32> to vector<8x8x8xf32>
    %10 = arith.maximumf %7, %9 : vector<8x8x8xf32>
    %c0_3 = arith.constant 0 : index
    %c0_4 = arith.constant 0 : index
    %c0_5 = arith.constant 0 : index
    %c0_6 = arith.constant 0 : index
    %11 = vector.load %arg2[%c0_3, %c0_4, %c0_5, %c0_6] : memref<1x8x8x8xf32, #tpu.memory_space<vmem>>, vector<1x8x8x8xf32>
    %12 = vector.shape_cast %11 : vector<1x8x8x8xf32> to vector<8x8x8xf32>
    %13 = vector.shape_cast %10 : vector<8x8x8xf32> to vector<1x8x8x8xf32>
    tpu.vector_store %arg2[%c0_3, %c0_4, %c0_5, %c0_6], %13 {strides = array<i32>} : memref<1x8x8x8xf32, #tpu.memory_space<vmem>>, vector<1x8x8x8xf32>,
    return
  }
  func.func @transform_0(%arg0: i32) -> (i32, i32, i32, i32) {
    %c0_i32 = arith.constant 0 : i32
    %c0_i32_0 = arith.constant 0 : i32
    %c0_i32_1 = arith.constant 0 : i32
    %c0_i32_2 = arith.constant 0 : i32
    return %arg0, %c0_i32, %c0_i32_0, %c0_i32_1 : i32, i32, i32, i32
  }
  func.func @transform_1(%arg0: i32) -> (i32, i32, i32, i32) {
    %c0_i32 = arith.constant 0 : i32
    %c0_i32_0 = arith.constant 0 : i32
    %c0_i32_1 = arith.constant 0 : i32
    %c0_i32_2 = arith.constant 0 : i32
    return %arg0, %c0_i32, %c0_i32_0, %c0_i32_1 : i32, i32, i32, i32
  }
}

</mosaic_0001>

<bundles_post_ra>
// kernel: ghost_down_conv.3
= control target key start
LH: loop header
LB: loop body
LE: loop exit
PB: predicated region body
PF: predicated region fallthrough
CT: control target
= control target key end

     0   :  { %s326_s6 = smov 0   ;;  %s383_s0 = inlined_call_operand.vmem [shape: f32[2,16,8,16], index: 0, kind: input, shape index: {}]   ;;  %s384_s1 = inlined_call_operand.vmem [shape: f32[2,8,8,8], index: 1, kind: output, shape index: {}]  }
   0x1 LB: > { %s285_s7 = sadd.s32 4294967295, %s313_s6   ;;  %p289_p0 = scmp.ge.s32.totalorder %s313_s6, 1  ;;  %s313_s6 = sphi %s326_s6, %s11_s6  }
   0x2   : > { %p87_p1 = scmp.lt.s32.totalorder %s313_s6, 3 }
   0x4   : > { %p88_p2 = pnand %p289_p0, %p87_p1 }
   0x5   : > { %p107_p3 = scmp.lt.s32.totalorder (!%p88_p2), %s285_s7, 1  ;;  %s315_s12 = smov (!%p88_p2), 120   ;;  %vm221_vm0 = vcmask (!%p88_p2), 64512  }
   0x6   : > { %91 = sbr.rel (%p88_p2) target bundleno = 165 (0xa5), region = 24 }
   0xd   : > { %s386_s7 = smov (!%p107_p3, %s285_s7), 1 }
   0xe   : > { %s296_s8 = sshll.u32 %s386_s7, 7  ;;  %s297_s13 = sshll.u32 %s386_s7, 6 }
   0xf   : > { %s340_s11 = scalar_lea.vmem %s383_s0, %s296_s8  ;;  %s362_s16 = scalar_lea.vmem %s384_s1, %s297_s13 }
  0x10   : > { %v119_v0 = vld [vmem:[%s340_s11 + $0x10] sm:$0xff]  ;;  %v117_v1 = vld [vmem:[%s340_s11] sm:$0xff]  ;;  %v120_v2 = vld [vmem:[%s340_s11 + $0x18] sm:$0xff] }
  0x11   : > { %153 = vrot.lane.b32.xlu1 %v119_v0, %s315_s12  ;;  %149 = vrot.lane.b32.xlu0 %v117_v1, %s315_s12  ;;  %v118_v3 = vld [vmem:[%s340_s11 + $0x8] sm:$0xff]  ;;  %v121_v5 = vld [vmem:[%s340_s11 + $0x20] sm:$0xff] }
  0x12   : > { %v122_v4 = vld [vmem:[%s340_s11 + $0x28] sm:$0xff]  ;;  %v124_v6 = vld [vmem:[%s340_s11 + $0x38] sm:$0xff]  ;;  %v123_v7 = vld [vmem:[%s340_s11 + $0x30] sm:$0xff] }
  0x13   : > { %v126_v8 = vld [vmem:[%s340_s11 + $0x48] sm:$0xff]  ;;  %v125_v9 = vld [vmem:[%s340_s11 + $0x40] sm:$0xff]  ;;  %v128_v10 = vld [vmem:[%s340_s11 + $0x58] sm:$0xff] }
  0x14   : > { %v127_v11 = vld [vmem:[%s340_s11 + $0x50] sm:$0xff]  ;;  %v130_v12 = vld [vmem:[%s340_s11 + $0x68] sm:$0xff]  ;;  %v129_v13 = vld [vmem:[%s340_s11 + $0x60] sm:$0xff] }
  0x15   : > { %155 = vrot.lane.b32.xlu1 %v120_v2, %s315_s12  ;;  %151 = vrot.lane.b32.xlu0 %v118_v3, %s315_s12  ;;  %v132_v14 = vld [vmem:[%s340_s11 + $0x78] sm:$0xff]  ;;  %v131_v15 = vld [vmem:[%s340_s11 + $0x70] sm:$0xff] }
  0x19   : > { %159 = vrot.lane.b32.xlu1 %v122_v4, %s315_s12  ;;  %157 = vrot.lane.b32.xlu0 %v121_v5, %s315_s12 }
  0x1d   : > { %163 = vrot.lane.b32.xlu1 %v124_v6, %s315_s12  ;;  %161 = vrot.lane.b32.xlu0 %v123_v7, %s315_s12 }
  0x21   : > { %167 = vrot.lane.b32.xlu1 %v126_v8, %s315_s12  ;;  %165 = vrot.lane.b32.xlu0 %v125_v9, %s315_s12 }
  0x25   : > { %171 = vrot.lane.b32.xlu1 %v128_v10, %s315_s12  ;;  %169 = vrot.lane.b32.xlu0 %v127_v11, %s315_s12 }
  0x29   : > { %175 = vrot.lane.b32.xlu1 %v130_v12, %s315_s12  ;;  %173 = vrot.lane.b32.xlu0 %v129_v13, %s315_s12 }
  0x2d   : > { %179 = vrot.lane.b32.xlu1 %v132_v14, %s315_s12  ;;  %177 = vrot.lane.b32.xlu0 %v131_v15, %s315_s12 }
  0x83   : > { %v154_v16 = vpop.permute.xlu1 %153  ;;  %v150_v17 = vpop.permute.xlu0 %149 }
  0x84   : > { %v199_v20 = vmax.f32 %v119_v0, %v154_v16  ;;  %v197_v21 = vmax.f32 %v117_v1, %v150_v17 }
  0x87   : > { %v156_v18 = vpop.permute.xlu1 %155  ;;  %v152_v19 = vpop.permute.xlu0 %151 }
  0x88   : > { %v200_v22 = vmax.f32 %v120_v2, %v156_v18  ;;  %v198_v23 = vmax.f32 %v118_v3, %v152_v19 }
  0x8a   : > { %v214_v24 = vmax.f32 %v199_v20, %v200_v22  ;;  %v213_v25 = vmax.f32 %v197_v21, %v198_v23 }
  0x8b   : > { %v160_v26 = vpop.permute.xlu1 %159  ;;  %v158_v27 = vpop.permute.xlu0 %157 }
  0x8c   : > { %223 = vst.msk [vmem:[%s362_s16 + $0x8] sm:$0xff] %vm221_vm0, %v214_v24  ;;  %222 = vst.msk [vmem:[%s362_s16] sm:$0xff] %vm221_vm0, %v213_v25  ;;  %v202_v28 = vmax.f32 %v122_v4, %v160_v26  ;;  %v201_v29 = vmax.f32 %v121_v5, %v158_v27 }
  0x8e   : > { %v215_v30 = vmax.f32 %v201_v29, %v202_v28 }
  0x8f   : > { %v164_v31 = vpop.permute.xlu1 %163  ;;  %v162_v32 = vpop.permute.xlu0 %161 }
  0x90   : > { %224 = vst.msk [vmem:[%s362_s16 + $0x10] sm:$0xff] %vm221_vm0, %v215_v30  ;;  %v204_v33 = vmax.f32 %v124_v6, %v164_v31  ;;  %v203_v34 = vmax.f32 %v123_v7, %v162_v32 }
  0x92   : > { %v216_v35 = vmax.f32 %v203_v34, %v204_v33 }
  0x93   : > { %v168_v36 = vpop.permute.xlu1 %167  ;;  %v166_v37 = vpop.permute.xlu0 %165 }
  0x94   : > { %225 = vst.msk [vmem:[%s362_s16 + $0x18] sm:$0xff] %vm221_vm0, %v216_v35  ;;  %v206_v38 = vmax.f32 %v126_v8, %v168_v36  ;;  %v205_v39 = vmax.f32 %v125_v9, %v166_v37 }
  0x96   : > { %v217_v40 = vmax.f32 %v205_v39, %v206_v38 }
  0x97   : > { %v172_v41 = vpop.permute.xlu1 %171  ;;  %v170_v42 = vpop.permute.xlu0 %169 }
  0x98   : > { %226 = vst.msk [vmem:[%s362_s16 + $0x20] sm:$0xff] %vm221_vm0, %v217_v40  ;;  %v208_v43 = vmax.f32 %v128_v10, %v172_v41  ;;  %v207_v44 = vmax.f32 %v127_v11, %v170_v42 }
  0x9a   : > { %v218_v45 = vmax.f32 %v207_v44, %v208_v43 }
  0x9b   : > { %v176_v46 = vpop.permute.xlu1 %175  ;;  %v174_v47 = vpop.permute.xlu0 %173 }
  0x9c   : > { %227 = vst.msk [vmem:[%s362_s16 + $0x28] sm:$0xff] %vm221_vm0, %v218_v45  ;;  %v210_v48 = vmax.f32 %v130_v12, %v176_v46  ;;  %v209_v49 = vmax.f32 %v129_v13, %v174_v47 }
  0x9e   : > { %v219_v50 = vmax.f32 %v209_v49, %v210_v48 }
  0x9f   : > { %v180_v51 = vpop.permute.xlu1 %179  ;;  %v178_v52 = vpop.permute.xlu0 %177 }
  0xa0   : > { %228 = vst.msk [vmem:[%s362_s16 + $0x30] sm:$0xff] %vm221_vm0, %v219_v50  ;;  %v212_v53 = vmax.f32 %v132_v14, %v180_v51  ;;  %v211_v54 = vmax.f32 %v131_v15, %v178_v52 }
  0xa2   : > { %v220_v55 = vmax.f32 %v211_v54, %v212_v53 }
  0xa4   : > { %229 = vst.msk [vmem:[%s362_s16 + $0x38] sm:$0xff] %vm221_vm0, %v220_v55 }
  0xa5 PF: > { %s11_s6 = sadd.s32 1, %s313_s6  }
  0xa6   : > { %p8_p4 = scmp.ge.s32.totalorder %s11_s6, 4  }
  0xa8   :  { %10 = sbr.rel (!%p8_p4) target bundleno = 1 (0x1), region = 54 }

// kernel: ghost_down_conv.2
= control target key start
LH: loop header
LB: loop body
LE: loop exit
PB: predicated region body
PF: predicated region fallthrough
CT: control target
= control target key end

     0   :  { %s12991_s30 = smov 0   ;;  %s17316_s0 = inlined_call_operand.vmem [shape: f32[2,16,16,4], index: 0, kind: input, shape index: {}]   ;;  %s17317_s1 = inlined_call_operand.vmem [shape: f32[3,3,4,4], index: 1, kind: input, shape index: {}]   ;;  %s17318_s2 = inlined_call_operand.vmem [shape: f32[2,4], index: 2, kind: input, shape index: {}]   ;;  %s17319_s3 = inlined_call_operand.vmem [shape: f32[3,3,4], index: 3, kind: input, shape index: {}]   ;;  %s17320_s4 = inlined_call_operand.vmem [shape: f32[2,4], index: 4, kind: input, shape index: {}]   ;;  %s17321_s5 = inlined_call_operand.vmem [shape: f32[3,3,8,4], index: 5, kind: input, shape index: {}]   ;;  %s17322_s6 = inlined_call_operand.vmem [shape: f32[2,4], index: 6, kind: input, shape index: {}]   ;;  %s17323_s7 = inlined_call_operand.vmem [shape: f32[3,3,4], index: 7, kind: input, shape index: {}]   ;;  %s17324_s8 = inlined_call_operand.vmem [shape: f32[2,4], index: 8, kind: input, shape index: {}]   ;;  %s17325_s9 = inlined_call_operand.vmem [shape: f32[2,16,16,8], index: 9, kind: output, shape index: {}]  }
   0x1 LB: > { %s10239_s10 = sadd.s32 4294967295, %s12937_s30   ;;  %p10243_p0 = scmp.ge.s32.totalorder %s12937_s30, 1  ;;  %s12937_s30 = sphi %s12991_s30, %s19_s30  }
   0x2   : > { %p287_p1 = scmp.lt.s32.totalorder %s12937_s30, 3 }
   0x4   : > { %p288_p2 = pnand %p10243_p0, %p287_p1 }
   0x6   : > { %291 = sbr.rel (%p288_p2) target bundleno = 2131 (0x853), region = 56 }
   0xd   : > { %v13002_v0 = vld [vmem:[%s17317_s1 + $0x4] sm:$0xf]  ;;  %vm617_vm0 = vcmask 1043456   ;;  %vm333_vm1 = vcmask 31744   ;;  %vm336_vm2 = vcmask 25600   ;;  %v17326_v1 = vmov 0.0  }
   0xe   : > { %11485 = vmatprep.subr.msk.mxu0 %vm617_vm0, %v13002_v0  ;;  %334 = vst.msk [vmem:[#allocation2] sm:$0xff] %vm333_vm1, %v17326_v1  ;;  %335 = vst.msk [vmem:[#allocation2 + $0x8] sm:$0xff] %vm333_vm1, %v17326_v1  ;;  %v13225_v2 = vld [vmem:[%s17317_s1] sm:$0xf]  ;;  %p323_p3 = scmp.lt.s32.totalorder %s10239_s10, 1  ;;  %vm5112_vm3 = vcmask 64512  }
   0xf   : > { %338 = vst.msk [vmem:[#allocation2 + $0x18] sm:$0xff] %vm333_vm1, %v17326_v1  ;;  %339 = vst.msk [vmem:[#allocation2 + $0x20] sm:$0xff] %vm333_vm1, %v17326_v1  ;;  %11486 = vmatpush3.msk.msra.mxu0 %vm617_vm0, %v13002_v0  ;;  %v13359_v6 = vld [vmem:[%s17317_s1 + $0x8] sm:$0xf]  ;;  %vm5115_vm4 = vcmask 58368   ;;  %s12940_s23 = smov 4  }
  0x10   : > { %341 = vst.msk [vmem:[#allocation2 + $0x30] sm:$0xff] %vm333_vm1, %v17326_v1  ;;  %342 = vst.msk [vmem:[#allocation2 + $0x38] sm:$0xff] %vm333_vm1, %v17326_v1  ;;  %11535 = vmatprep.subr.msk.mxu0 %vm617_vm0, %v13225_v2  ;;  %s17626_s10 = smov (!%p323_p3, %s10239_s10), 1  ;;  %vm5329_vm5 = vcmask 64544  }
  0x11   : > { %344 = vst.msk [vmem:[#allocation2 + $0x48] sm:$0xff] %vm333_vm1, %v17326_v1  ;;  %345 = vst.msk [vmem:[#allocation2 + $0x50] sm:$0xff] %vm333_vm1, %v17326_v1  ;;  %s10889_s15 = sshll.u32 %s17626_s10, 8 }
  0x12   : > { %347 = vst.msk [vmem:[#allocation2 + $0x60] sm:$0xff] %vm333_vm1, %v17326_v1  ;;  %348 = vst.msk [vmem:[#allocation2 + $0x68] sm:$0xff] %vm333_vm1, %v17326_v1  ;;  %s13351_s18 = scalar_lea.vmem %s17316_s0, %s10889_s15  ;;  %s16203_s22 = scalar_lea.vmem %s17325_s9, %s10889_s15 }
  0x13   : > { %350 = vst.msk [vmem:[#allocation2 + $0x78] sm:$0xff] %vm333_vm1, %v17326_v1  ;;  %351 = vst.msk [vmem:[#allocation2 + $0x80] sm:$0xff] %vm333_vm1, %v17326_v1  ;;  %v389_v3 = vld [vmem:[%s13351_s18] sm:$0xff]  ;;  %v390_v4 = vld [vmem:[%s13351_s18 + $0x8] sm:$0xff] }
  0x14   : > { %353 = vst.msk [vmem:[#allocation2 + $0x90] sm:$0xff] %vm333_vm1, %v17326_v1  ;;  %354 = vst.msk [vmem:[#allocation2 + $0x98] sm:$0xff] %vm333_vm1, %v17326_v1  ;;  %v391_v5 = vld [vmem:[%s13351_s18 + $0x10] sm:$0xff]  ;;  %v392_v9 = vld [vmem:[%s13351_s18 + $0x18] sm:$0xff] }
  0x15   : > { %356 = vst.msk [vmem:[#allocation2 + $0xa8] sm:$0xff] %vm333_vm1, %v17326_v1  ;;  %357 = vst.msk [vmem:[#allocation2 + $0xb0] sm:$0xff] %vm333_vm1, %v17326_v1  ;;  %v487_v7 = vld [vmem:[#allocation2 + $0x1] sm:$0xff]  ;;  %v395_v12 = vld [vmem:[%s13351_s18 + $0x30] sm:$0xff] }
  0x16   : > { %359 = vst.msk [vmem:[#allocation2 + $0xc0] sm:$0xff] %vm333_vm1, %v17326_v1  ;;  %360 = vst.msk [vmem:[#allocation2 + $0xc8] sm:$0xff] %vm333_vm1, %v17326_v1  ;;  %11487 = vmatprep.mubr.msk.f32.mxu0 %vm333_vm1, %v487_v7  ;;  %v393_v10 = vld [vmem:[%s13351_s18 + $0x20] sm:$0xff]  ;;  %v394_v11 = vld [vmem:[%s13351_s18 + $0x28] sm:$0xff] }
  0x17   : > { %362 = vst.msk [vmem:[#allocation2 + $0xd8] sm:$0xff] %vm333_vm1, %v17326_v1  ;;  %363 = vst.msk [vmem:[#allocation2 + $0xe0] sm:$0xff] %vm333_vm1, %v17326_v1  ;;  %v396_v13 = vld [vmem:[%s13351_s18 + $0x38] sm:$0xff]  ;;  %v397_v14 = vld [vmem:[%s13351_s18 + $0x40] sm:$0xff] }
  0x18   : > { %365 = vst.msk [vmem:[#allocation2 + $0xf0] sm:$0xff] %vm333_vm1, %v17326_v1  ;;  %366 = vst.msk [vmem:[#allocation2 + $0xf8] sm:$0xff] %vm333_vm1, %v17326_v1  ;;  %v398_v15 = vld [vmem:[%s13351_s18 + $0x48] sm:$0xff]  ;;  %v399_v16 = vld [vmem:[%s13351_s18 + $0x50] sm:$0xff] }
  0x19   : > { %368 = vst.msk [vmem:[#allocation2 + $0x108] sm:$0xff] %vm333_vm1, %v17326_v1  ;;  %369 = vst.msk [vmem:[#allocation2 + $0x110] sm:$0xff] %vm333_vm1, %v17326_v1  ;;  %v400_v17 = vld [vmem:[%s13351_s18 + $0x58] sm:$0xff]  ;;  %v401_v18 = vld [vmem:[%s13351_s18 + $0x60] sm:$0xff] }
  0x1a   : > { %371 = vst.msk [vmem:[#allocation2 + $0x120] sm:$0xff] %vm333_vm1, %v17326_v1  ;;  %372 = vst.msk [vmem:[#allocation2 + $0x128] sm:$0xff] %vm333_vm1, %v17326_v1  ;;  %v402_v19 = vld [vmem:[%s13351_s18 + $0x68] sm:$0xff]  ;;  %v403_v20 = vld [vmem:[%s13351_s18 + $0x70] sm:$0xff] }
  0x1b   : > { %374 = vst.msk [vmem:[#allocation2 + $0x138] sm:$0xff] %vm333_vm1, %v17326_v1  ;;  %375 = vst.msk [vmem:[#allocation2 + $0x140] sm:$0xff] %vm333_vm1, %v17326_v1  ;;  %v404_v21 = vld [vmem:[%s13351_s18 + $0x78] sm:$0xff]  ;;  %v405_v22 = vld [vmem:[%s13351_s18 + $0x80] sm:$0xff] }
  0x1c   : > { %377 = vst.msk [vmem:[#allocation2 + $0x150] sm:$0xff] %vm333_vm1, %v17326_v1  ;;  %378 = vst.msk [vmem:[#allocation2 + $0x158] sm:$0xff] %vm333_vm1, %v17326_v1  ;;  %v406_v23 = vld [vmem:[%s13351_s18 + $0x88] sm:$0xff]  ;;  %v407_v24 = vld [vmem:[%s13351_s18 + $0x90] sm:$0xff] }
  0x1d   : > { %380 = vst.msk [vmem:[#allocation2 + $0x168] sm:$0xff] %vm333_vm1, %v17326_v1  ;;  %381 = vst.msk [vmem:[#allocation2 + $0x170] sm:$0xff] %vm333_vm1, %v17326_v1  ;;  %v408_v25 = vld [vmem:[%s13351_s18 + $0x98] sm:$0xff]  ;;  %v409_v26 = vld [vmem:[%s13351_s18 + $0xa0] sm:$0xff] }
  0x1e   : > { %383 = vst.msk [vmem:[#allocation2 + $0x180] sm:$0xff] %vm333_vm1, %v17326_v1  ;;  %384 = vst.msk [vmem:[#allocation2 + $0x188] sm:$0xff] %vm333_vm1, %v17326_v1  ;;  %v410_v27 = vld [vmem:[%s13351_s18 + $0xa8] sm:$0xff]  ;;  %v411_v31 = vld [vmem:[%s13351_s18 + $0xb0] sm:$0xff] }
  0x1f   : > { %386 = vst.msk [vmem:[#allocation2 + $0x198] sm:$0xff] %vm333_vm1, %v17326_v1  ;;  %387 = vst.msk [vmem:[#allocation2 + $0x1a0] sm:$0xff] %vm333_vm1, %v17326_v1  ;;  %v412_v32 = vld [vmem:[%s13351_s18 + $0xb8] sm:$0xff]  ;;  %v413_v37 = vld [vmem:[%s13351_s18 + $0xc0] sm:$0xff] }
  0x20   : > { %4007 = vst.msk [vmem:[#allocation3] sm:$0xff] %vm333_vm1, %v17326_v1  ;;  %4008 = vst.msk [vmem:[#allocation3 + $0x8] sm:$0xff] %vm333_vm1, %v17326_v1  ;;  %v414_v38 = vld [vmem:[%s13351_s18 + $0xc8] sm:$0xff]  ;;  %v415_v39 = vld [vmem:[%s13351_s18 + $0xd0] sm:$0xff] }
  0x21   : > { %4010 = vst.msk [vmem:[#allocation3 + $0x18] sm:$0xff] %vm333_vm1, %v17326_v1  ;;  %4011 = vst.msk [vmem:[#allocation3 + $0x20] sm:$0xff] %vm333_vm1, %v17326_v1  ;;  %v416_v40 = vld [vmem:[%s13351_s18 + $0xd8] sm:$0xff]  ;;  %v417_v41 = vld [vmem:[%s13351_s18 + $0xe0] sm:$0xff] }
  0x22   : > { %4013 = vst.msk [vmem:[#allocation3 + $0x30] sm:$0xff] %vm333_vm1, %v17326_v1  ;;  %4014 = vst.msk [vmem:[#allocation3 + $0x38] sm:$0xff] %vm333_vm1, %v17326_v1  ;;  %v418_v42 = vld [vmem:[%s13351_s18 + $0xe8] sm:$0xff] }
  0x23   : > { %4016 = vst.msk [vmem:[#allocation3 + $0x48] sm:$0xff] %vm333_vm1, %v17326_v1  ;;  %4017 = vst.msk [vmem:[#allocation3 + $0x50] sm:$0xff] %vm333_vm1, %v17326_v1  ;;  %v13550_v7 = vld [vmem:[%s17317_s1 + $0xc] sm:$0xf] }
  0x24   : > { %4019 = vst.msk [vmem:[#allocation3 + $0x60] sm:$0xff] %vm333_vm1, %v17326_v1  ;;  %4020 = vst.msk [vmem:[#allocation3 + $0x68] sm:$0xff] %vm333_vm1, %v17326_v1 }
  0x25   : > { %4022 = vst.msk [vmem:[#allocation3 + $0x78] sm:$0xff] %vm333_vm1, %v17326_v1  ;;  %4023 = vst.msk [vmem:[#allocation3 + $0x80] sm:$0xff] %vm333_vm1, %v17326_v1 }
  0x26   : > { %4025 = vst.msk [vmem:[#allocation3 + $0x90] sm:$0xff] %vm333_vm1, %v17326_v1  ;;  %4026 = vst.msk [vmem:[#allocation3 + $0x98] sm:$0xff] %vm333_vm1, %v17326_v1 }
  0x27   : > { %4028 = vst.msk [vmem:[#allocation3 + $0xa8] sm:$0xff] %vm333_vm1, %v17326_v1  ;;  %4029 = vst.msk [vmem:[#allocation3 + $0xb0] sm:$0xff] %vm333_vm1, %v17326_v1 }
  0x28   : > { %4031 = vst.msk [vmem:[#allocation3 + $0xc0] sm:$0xff] %vm333_vm1, %v17326_v1  ;;  %4032 = vst.msk [vmem:[#allocation3 + $0xc8] sm:$0xff] %vm333_vm1, %v17326_v1 }
  0x29   : > { %4034 = vst.msk [vmem:[#allocation3 + $0xd8] sm:$0xff] %vm333_vm1, %v17326_v1  ;;  %4035 = vst.msk [vmem:[#allocation3 + $0xe0] sm:$0xff] %vm333_vm1, %v17326_v1 }
  0x2a   : > { %4037 = vst.msk [vmem:[#allocation3 + $0xf0] sm:$0xff] %vm333_vm1, %v17326_v1  ;;  %4038 = vst.msk [vmem:[#allocation3 + $0xf8] sm:$0xff] %vm333_vm1, %v17326_v1 }
  0x2b   : > { %4040 = vst.msk [vmem:[#allocation3 + $0x108] sm:$0xff] %vm333_vm1, %v17326_v1  ;;  %4041 = vst.msk [vmem:[#allocation3 + $0x110] sm:$0xff] %vm333_vm1, %v17326_v1 }
  0x2c   : > { %4043 = vst.msk [vmem:[#allocation3 + $0x120] sm:$0xff] %vm333_vm1, %v17326_v1  ;;  %4044 = vst.msk [vmem:[#allocation3 + $0x128] sm:$0xff] %vm333_vm1, %v17326_v1 }
  0x2d   : > { %4046 = vst.msk [vmem:[#allocation3 + $0x138] sm:$0xff] %vm333_vm1, %v17326_v1  ;;  %4047 = vst.msk [vmem:[#allocation3 + $0x140] sm:$0xff] %vm333_vm1, %v17326_v1 }
  0x2e   : > { %4049 = vst.msk [vmem:[#allocation3 + $0x150] sm:$0xff] %vm333_vm1, %v17326_v1  ;;  %4050 = vst.msk [vmem:[#allocation3 + $0x158] sm:$0xff] %vm333_vm1, %v17326_v1 }
  0x2f   : > { %4052 = vst.msk [vmem:[#allocation3 + $0x168] sm:$0xff] %vm333_vm1, %v17326_v1  ;;  %4053 = vst.msk [vmem:[#allocation3 + $0x170] sm:$0xff] %vm333_vm1, %v17326_v1 }
  0x30   : > { %4055 = vst.msk [vmem:[#allocation3 + $0x180] sm:$0xff] %vm333_vm1, %v17326_v1  ;;  %4056 = vst.msk [vmem:[#allocation3 + $0x188] sm:$0xff] %vm333_vm1, %v17326_v1 }
  0x31   : > { %4058 = vst.msk [vmem:[#allocation3 + $0x198] sm:$0xff] %vm333_vm1, %v17326_v1  ;;  %4059 = vst.msk [vmem:[#allocation3 + $0x1a0] sm:$0xff] %vm333_vm1, %v17326_v1 }
  0x32   : > { %8887 = vst.msk [vmem:[#allocation5] sm:$0xff] %vm333_vm1, %v17326_v1  ;;  %8888 = vst.msk [vmem:[#allocation5 + $0x8] sm:$0xff] %vm333_vm1, %v17326_v1 }
  0x33   : > { %8890 = vst.msk [vmem:[#allocation5 + $0x18] sm:$0xff] %vm333_vm1, %v17326_v1  ;;  %8891 = vst.msk [vmem:[#allocation5 + $0x20] sm:$0xff] %vm333_vm1, %v17326_v1 }
  0x34   : > { %8893 = vst.msk [vmem:[#allocation5 + $0x30] sm:$0xff] %vm333_vm1, %v17326_v1  ;;  %8894 = vst.msk [vmem:[#allocation5 + $0x38] sm:$0xff] %vm333_vm1, %v17326_v1 }
  0x35   : > { %8896 = vst.msk [vmem:[#allocation5 + $0x48] sm:$0xff] %vm333_vm1, %v17326_v1  ;;  %8897 = vst.msk [vmem:[#allocation5 + $0x50] sm:$0xff] %vm333_vm1, %v17326_v1 }
  0x36   : > { %8899 = vst.msk [vmem:[#allocation5 + $0x60] sm:$0xff] %vm333_vm1, %v17326_v1  ;;  %8900 = vst.msk [vmem:[#allocation5 + $0x68] sm:$0xff] %vm333_vm1, %v17326_v1 }
  0x37   : > { %8902 = vst.msk [vmem:[#allocation5 + $0x78] sm:$0xff] %vm333_vm1, %v17326_v1  ;;  %8903 = vst.msk [vmem:[#allocation5 + $0x80] sm:$0xff] %vm333_vm1, %v17326_v1 }
  0x38   : > { %8905 = vst.msk [vmem:[#allocation5 + $0x90] sm:$0xff] %vm333_vm1, %v17326_v1  ;;  %8906 = vst.msk [vmem:[#allocation5 + $0x98] sm:$0xff] %vm333_vm1, %v17326_v1 }
  0x39   : > { %8908 = vst.msk [vmem:[#allocation5 + $0xa8] sm:$0xff] %vm333_vm1, %v17326_v1  ;;  %8909 = vst.msk [vmem:[#allocation5 + $0xb0] sm:$0xff] %vm333_vm1, %v17326_v1 }
  0x3a   : > { %8911 = vst.msk [vmem:[#allocation5 + $0xc0] sm:$0xff] %vm333_vm1, %v17326_v1  ;;  %8912 = vst.msk [vmem:[#allocation5 + $0xc8] sm:$0xff] %vm333_vm1, %v17326_v1 }
  0x3b   : > { %8914 = vst.msk [vmem:[#allocation5 + $0xd8] sm:$0xff] %vm333_vm1, %v17326_v1  ;;  %8915 = vst.msk [vmem:[#allocation5 + $0xe0] sm:$0xff] %vm333_vm1, %v17326_v1 }
  0x3c   : > { %8917 = vst.msk [vmem:[#allocation5 + $0xf0] sm:$0xff] %vm333_vm1, %v17326_v1  ;;  %8918 = vst.msk [vmem:[#allocation5 + $0xf8] sm:$0xff] %vm333_vm1, %v17326_v1 }
  0x3d   : > { %8920 = vst.msk [vmem:[#allocation5 + $0x108] sm:$0xff] %vm333_vm1, %v17326_v1  ;;  %8921 = vst.msk [vmem:[#allocation5 + $0x110] sm:$0xff] %vm333_vm1, %v17326_v1 }
  0x3e   : > { %8923 = vst.msk [vmem:[#allocation5 + $0x120] sm:$0xff] %vm333_vm1, %v17326_v1  ;;  %8924 = vst.msk [vmem:[#allocation5 + $0x128] sm:$0xff] %vm333_vm1, %v17326_v1 }
  0x3f   : > { %8926 = vst.msk [vmem:[#allocation5 + $0x138] sm:$0xff] %vm333_vm1, %v17326_v1  ;;  %8927 = vst.msk [vmem:[#allocation5 + $0x140] sm:$0xff] %vm333_vm1, %v17326_v1 }
  0x40   : > { %8929 = vst.msk [vmem:[#allocation5 + $0x150] sm:$0xff] %vm333_vm1, %v17326_v1  ;;  %8930 = vst.msk [vmem:[#allocation5 + $0x158] sm:$0xff] %vm333_vm1, %v17326_v1 }
  0x41   : > { %8932 = vst.msk [vmem:[#allocation5 + $0x168] sm:$0xff] %vm333_vm1, %v17326_v1  ;;  %8933 = vst.msk [vmem:[#allocation5 + $0x170] sm:$0xff] %vm333_vm1, %v17326_v1 }
  0x42   : > { %8935 = vst.msk [vmem:[#allocation5 + $0x180] sm:$0xff] %vm333_vm1, %v17326_v1  ;;  %8936 = vst.msk [vmem:[#allocation5 + $0x188] sm:$0xff] %vm333_vm1, %v17326_v1 }
  0x43   : > { %8938 = vst.msk [vmem:[#allocation5 + $0x198] sm:$0xff] %vm333_vm1, %v17326_v1  ;;  %8939 = vst.msk [vmem:[#allocation5 + $0x1a0] sm:$0xff] %vm333_vm1, %v17326_v1 }
  0x44   : > { %337 = vst.msk [vmem:[#allocation2 + $0x10] sm:$0x3] %vm336_vm2, %v17326_v1  ;;  %340 = vst.msk [vmem:[#allocation2 + $0x28] sm:$0x3] %vm336_vm2, %v17326_v1 }
  0x45   : > { %343 = vst.msk [vmem:[#allocation2 + $0x40] sm:$0x3] %vm336_vm2, %v17326_v1  ;;  %346 = vst.msk [vmem:[#allocation2 + $0x58] sm:$0x3] %vm336_vm2, %v17326_v1 }
  0x46   : > { %349 = vst.msk [vmem:[#allocation2 + $0x70] sm:$0x3] %vm336_vm2, %v17326_v1  ;;  %352 = vst.msk [vmem:[#allocation2 + $0x88] sm:$0x3] %vm336_vm2, %v17326_v1 }
  0x47   : > { %355 = vst.msk [vmem:[#allocation2 + $0xa0] sm:$0x3] %vm336_vm2, %v17326_v1  ;;  %358 = vst.msk [vmem:[#allocation2 + $0xb8] sm:$0x3] %vm336_vm2, %v17326_v1 }
  0x48   : > { %361 = vst.msk [vmem:[#allocation2 + $0xd0] sm:$0x3] %vm336_vm2, %v17326_v1  ;;  %364 = vst.msk [vmem:[#allocation2 + $0xe8] sm:$0x3] %vm336_vm2, %v17326_v1 }
  0x49   : > { %367 = vst.msk [vmem:[#allocation2 + $0x100] sm:$0x3] %vm336_vm2, %v17326_v1  ;;  %370 = vst.msk [vmem:[#allocation2 + $0x118] sm:$0x3] %vm336_vm2, %v17326_v1 }
  0x4a   : > { %373 = vst.msk [vmem:[#allocation2 + $0x130] sm:$0x3] %vm336_vm2, %v17326_v1  ;;  %376 = vst.msk [vmem:[#allocation2 + $0x148] sm:$0x3] %vm336_vm2, %v17326_v1 }
  0x4b   : > { %379 = vst.msk [vmem:[#allocation2 + $0x160] sm:$0x3] %vm336_vm2, %v17326_v1  ;;  %382 = vst.msk [vmem:[#allocation2 + $0x178] sm:$0x3] %vm336_vm2, %v17326_v1  ;;  %v488_v8 = vld [vmem:[#allocation2 + $0x9] sm:$0xff] }
  0x4c   : > { %385 = vst.msk [vmem:[#allocation2 + $0x190] sm:$0x3] %vm336_vm2, %v17326_v1  ;;  %388 = vst.msk [vmem:[#allocation2 + $0x1a8] sm:$0x3] %vm336_vm2, %v17326_v1  ;;  %11488 = vmatmul.mubr.msk.f32.vlgmr.msra.gmra.mrb[0].mxu0 %vm333_vm1, %v488_v8 }
  0x4d   : > { %4009 = vst.msk [vmem:[#allocation3 + $0x10] sm:$0x3] %vm336_vm2, %v17326_v1  ;;  %4012 = vst.msk [vmem:[#allocation3 + $0x28] sm:$0x3] %vm336_vm2, %v17326_v1  ;;  %11536 = vmatpush3.msk.msra.mxu0 %vm617_vm0, %v13225_v2 }
  0x4e   : > { %4015 = vst.msk [vmem:[#allocation3 + $0x40] sm:$0x3] %vm336_vm2, %v17326_v1  ;;  %4018 = vst.msk [vmem:[#allocation3 + $0x58] sm:$0x3] %vm336_vm2, %v17326_v1  ;;  %11585 = vmatprep.subr.msk.mxu0 %vm617_vm0, %v13359_v6 }
  0x4f   : > { %4021 = vst.msk [vmem:[#allocation3 + $0x70] sm:$0x3] %vm336_vm2, %v17326_v1  ;;  %4024 = vst.msk [vmem:[#allocation3 + $0x88] sm:$0x3] %vm336_vm2, %v17326_v1 }
  0x50   : > { %4027 = vst.msk [vmem:[#allocation3 + $0xa0] sm:$0x3] %vm336_vm2, %v17326_v1  ;;  %4030 = vst.msk [vmem:[#allocation3 + $0xb8] sm:$0x3] %vm336_vm2, %v17326_v1 }
  0x51   : > { %4033 = vst.msk [vmem:[#allocation3 + $0xd0] sm:$0x3] %vm336_vm2, %v17326_v1  ;;  %4036 = vst.msk [vmem:[#allocation3 + $0xe8] sm:$0x3] %vm336_vm2, %v17326_v1 }
  0x52   : > { %4039 = vst.msk [vmem:[#allocation3 + $0x100] sm:$0x3] %vm336_vm2, %v17326_v1  ;;  %4042 = vst.msk [vmem:[#allocation3 + $0x118] sm:$0x3] %vm336_vm2, %v17326_v1 }
  0x53   : > { %4045 = vst.msk [vmem:[#allocation3 + $0x130] sm:$0x3] %vm336_vm2, %v17326_v1  ;;  %4048 = vst.msk [vmem:[#allocation3 + $0x148] sm:$0x3] %vm336_vm2, %v17326_v1 }
  0x54   : > { %4051 = vst.msk [vmem:[#allocation3 + $0x160] sm:$0x3] %vm336_vm2, %v17326_v1  ;;  %4054 = vst.msk [vmem:[#allocation3 + $0x178] sm:$0x3] %vm336_vm2, %v17326_v1 }
  0x55   : > { %4057 = vst.msk [vmem:[#allocation3 + $0x190] sm:$0x3] %vm336_vm2, %v17326_v1  ;;  %4060 = vst.msk [vmem:[#allocation3 + $0x1a8] sm:$0x3] %vm336_vm2, %v17326_v1 }
  0x56   : > { %8889 = vst.msk [vmem:[#allocation5 + $0x10] sm:$0x3] %vm336_vm2, %v17326_v1  ;;  %8892 = vst.msk [vmem:[#allocation5 + $0x28] sm:$0x3] %vm336_vm2, %v17326_v1 }
  0x57   : > { %8895 = vst.msk [vmem:[#allocation5 + $0x40] sm:$0x3] %vm336_vm2, %v17326_v1  ;;  %8898 = vst.msk [vmem:[#allocation5 + $0x58] sm:$0x3] %vm336_vm2, %v17326_v1 }
  0x58   : > { %8901 = vst.msk [vmem:[#allocation5 + $0x70] sm:$0x3] %vm336_vm2, %v17326_v1  ;;  %8904 = vst.msk [vmem:[#allocation5 + $0x88] sm:$0x3] %vm336_vm2, %v17326_v1 }
  0x59   : > { %8907 = vst.msk [vmem:[#allocation5 + $0xa0] sm:$0x3] %vm336_vm2, %v17326_v1  ;;  %8910 = vst.msk [vmem:[#allocation5 + $0xb8] sm:$0x3] %vm336_vm2, %v17326_v1 }
  0x5a   : > { %8913 = vst.msk [vmem:[#allocation5 + $0xd0] sm:$0x3] %vm336_vm2, %v17326_v1  ;;  %8916 = vst.msk [vmem:[#allocation5 + $0xe8] sm:$0x3] %vm336_vm2, %v17326_v1 }
  0x5b   : > { %8919 = vst.msk [vmem:[#allocation5 + $0x100] sm:$0x3] %vm336_vm2, %v17326_v1  ;;  %8922 = vst.msk [vmem:[#allocation5 + $0x118] sm:$0x3] %vm336_vm2, %v17326_v1 }
  0x5c   : > { %8925 = vst.msk [vmem:[#allocation5 + $0x130] sm:$0x3] %vm336_vm2, %v17326_v1  ;;  %8928 = vst.msk [vmem:[#allocation5 + $0x148] sm:$0x3] %vm336_vm2, %v17326_v1 }
  0x5d   : > { %8931 = vst.msk [vmem:[#allocation5 + $0x160] sm:$0x3] %vm336_vm2, %v17326_v1  ;;  %8934 = vst.msk [vmem:[#allocation5 + $0x178] sm:$0x3] %vm336_vm2, %v17326_v1 }
  0x5e   : > { %8937 = vst.msk [vmem:[#allocation5 + $0x190] sm:$0x3] %vm336_vm2, %v17326_v1  ;;  %8940 = vst.msk [vmem:[#allocation5 + $0x1a8] sm:$0x3] %vm336_vm2, %v17326_v1 }
  0x5f   : > { %422 = vst.msk [vmem:[#allocation2 + $0x19] sm:$0xff] %vm333_vm1, %v389_v3  ;;  %423 = vst.msk [vmem:[#allocation2 + $0x21] sm:$0xff] %vm333_vm1, %v390_v4  ;;  %v454_v3 = vld [vmem:[#allocation2] sm:$0xff]  ;;  %v455_v4 = vld [vmem:[#allocation2 + $0x8] sm:$0xff] }
  0x60   : > { %424 = vst.msk [vmem:[#allocation2 + $0x31] sm:$0xff] %vm333_vm1, %v391_v5  ;;  %425 = vst.msk [vmem:[#allocation2 + $0x39] sm:$0xff] %vm333_vm1, %v392_v9 }
  0x61   : > { %426 = vst.msk [vmem:[#allocation2 + $0x49] sm:$0xff] %vm333_vm1, %v393_v10  ;;  %427 = vst.msk [vmem:[#allocation2 + $0x51] sm:$0xff] %vm333_vm1, %v394_v11 }
  0x62   : > { %428 = vst.msk [vmem:[#allocation2 + $0x61] sm:$0xff] %vm333_vm1, %v395_v12  ;;  %429 = vst.msk [vmem:[#allocation2 + $0x69] sm:$0xff] %vm333_vm1, %v396_v13 }
  0x63   : > { %430 = vst.msk [vmem:[#allocation2 + $0x79] sm:$0xff] %vm333_vm1, %v397_v14  ;;  %431 = vst.msk [vmem:[#allocation2 + $0x81] sm:$0xff] %vm333_vm1, %v398_v15 }
  0x64   : > { %432 = vst.msk [vmem:[#allocation2 + $0x91] sm:$0xff] %vm333_vm1, %v399_v16  ;;  %433 = vst.msk [vmem:[#allocation2 + $0x99] sm:$0xff] %vm333_vm1, %v400_v17 }
  0x65   : > { %434 = vst.msk [vmem:[#allocation2 + $0xa9] sm:$0xff] %vm333_vm1, %v401_v18  ;;  %435 = vst.msk [vmem:[#allocation2 + $0xb1] sm:$0xff] %vm333_vm1, %v402_v19 }
  0x66   : > { %436 = vst.msk [vmem:[#allocation2 + $0xc1] sm:$0xff] %vm333_vm1, %v403_v20  ;;  %437 = vst.msk [vmem:[#allocation2 + $0xc9] sm:$0xff] %vm333_vm1, %v404_v21  ;;  %v13405_v28 = vld [vmem:[#allocation2 + $0x19] sm:$0xff]  ;;  %v13407_v29 = vld [vmem:[#allocation2 + $0x21] sm:$0xff] }
  0x67   : > { %438 = vst.msk [vmem:[#allocation2 + $0xd9] sm:$0xff] %vm333_vm1, %v405_v22  ;;  %439 = vst.msk [vmem:[#allocation2 + $0xe1] sm:$0xff] %vm333_vm1, %v406_v23  ;;  %v13409_v30 = vld [vmem:[#allocation2 + $0x31] sm:$0xff]  ;;  %11490 = vmatprep.mubr.msk.f32.mxu0 %vm333_vm1, %v13405_v28  ;;  %v13424_v33 = vld [vmem:[#allocation2 + $0x39] sm:$0xff] }
  0x68   : > { %440 = vst.msk [vmem:[#allocation2 + $0xf1] sm:$0xff] %vm333_vm1, %v407_v24  ;;  %441 = vst.msk [vmem:[#allocation2 + $0xf9] sm:$0xff] %vm333_vm1, %v408_v25  ;;  %11491 = vmatmul.mubr.msk.f32.gmra.mrb[2].mxu0 %vm333_vm1, %v13407_v29  ;;  %v13426_v34 = vld [vmem:[#allocation2 + $0x49] sm:$0xff]  ;;  %v13432_v35 = vld [vmem:[#allocation2 + $0x51] sm:$0xff] }
  0x69   : > { %442 = vst.msk [vmem:[#allocation2 + $0x109] sm:$0xff] %vm333_vm1, %v409_v26  ;;  %443 = vst.msk [vmem:[#allocation2 + $0x111] sm:$0xff] %vm333_vm1, %v410_v27  ;;  %11493 = vmatprep.mubr.msk.f32.mxu0 %vm333_vm1, %v13409_v30  ;;  %v13434_v36 = vld [vmem:[#allocation2 + $0x61] sm:$0xff]  ;;  %v13450_v43 = vld [vmem:[#allocation2 + $0x69] sm:$0xff] }
  0x6a   : > { %444 = vst.msk [vmem:[#allocation2 + $0x121] sm:$0xff] %vm333_vm1, %v411_v31  ;;  %445 = vst.msk [vmem:[#allocation2 + $0x129] sm:$0xff] %vm333_vm1, %v412_v32  ;;  %v13454_v44 = vld [vmem:[#allocation2 + $0x79] sm:$0xff]  ;;  %v13460_v45 = vld [vmem:[#allocation2 + $0x81] sm:$0xff] }
  0x6b   : > { %446 = vst.msk [vmem:[#allocation2 + $0x139] sm:$0xff] %vm333_vm1, %v413_v37  ;;  %447 = vst.msk [vmem:[#allocation2 + $0x141] sm:$0xff] %vm333_vm1, %v414_v38  ;;  %v13462_v46 = vld [vmem:[#allocation2 + $0x91] sm:$0xff]  ;;  %v13468_v47 = vld [vmem:[#allocation2 + $0x99] sm:$0xff] }
  0x6c   : > { %11494 = vmatmul.mubr.msk.f32.gmra.mrb[4].mxu0 %vm333_vm1, %v13424_v33  ;;  %448 = vst.msk [vmem:[#allocation2 + $0x151] sm:$0xff] %vm333_vm1, %v415_v39  ;;  %449 = vst.msk [vmem:[#allocation2 + $0x159] sm:$0xff] %vm333_vm1, %v416_v40  ;;  %v13470_v48 = vld [vmem:[#allocation2 + $0xa9] sm:$0xff]  ;;  %v13476_v49 = vld [vmem:[#allocation2 + $0xb1] sm:$0xff] }
  0x6d   : > { %11496 = vmatprep.mubr.msk.f32.mxu0 %vm333_vm1, %v13426_v34  ;;  %450 = vst.msk [vmem:[#allocation2 + $0x169] sm:$0xff] %vm333_vm1, %v417_v41  ;;  %451 = vst.msk [vmem:[#allocation2 + $0x171] sm:$0xff] %vm333_vm1, %v418_v42  ;;  %v13478_v50 = vld [vmem:[#allocation2 + $0xc1] sm:$0xff]  ;;  %v13484_v51 = vld [vmem:[#allocation2 + $0xc9] sm:$0xff] }
  0x6e   : > { %v13486_v52 = vld [vmem:[#allocation2 + $0xd9] sm:$0xff]  ;;  %v13492_v53 = vld [vmem:[#allocation2 + $0xe1] sm:$0xff]  ;;  %v13559_v9 = vld [vmem:[#allocation2 + $0x30] sm:$0xff] }
  0x6f   : > { %v13494_v54 = vld [vmem:[#allocation2 + $0xf1] sm:$0xff]  ;;  %v13500_v55 = vld [vmem:[#allocation2 + $0xf9] sm:$0xff]  ;;  %v13569_v11 = vld [vmem:[#allocation2 + $0x48] sm:$0xff] }
  0x70   : > { %11497 = vmatmul.mubr.msk.f32.gmra.mrb[6].mxu0 %vm333_vm1, %v13432_v35  ;;  %v13502_v56 = vld [vmem:[#allocation2 + $0x109] sm:$0xff]  ;;  %v13508_v57 = vld [vmem:[#allocation2 + $0x111] sm:$0xff]  ;;  %v13557_v8 = vld [vmem:[#allocation2 + $0x20] sm:$0xff] }
  0x71   : > { %11499 = vmatprep.mubr.msk.f32.mxu0 %vm333_vm1, %v13434_v36  ;;  %v13510_v58 = vld [vmem:[#allocation2 + $0x121] sm:$0xff]  ;;  %v13516_v59 = vld [vmem:[#allocation2 + $0x129] sm:$0xff]  ;;  %v13545_v5 = vld [vmem:[#allocation2 + $0x18] sm:$0xff] }
  0x72   : > { %v13518_v60 = vld [vmem:[#allocation2 + $0x139] sm:$0xff]  ;;  %v13524_v61 = vld [vmem:[#allocation2 + $0x141] sm:$0xff]  ;;  %v13593_v16 = vld [vmem:[#allocation2 + $0x90] sm:$0xff] }
  0x73   : > { %v13526_v62 = vld [vmem:[#allocation2 + $0x151] sm:$0xff]  ;;  %v13532_v63 = vld [vmem:[#allocation2 + $0x159] sm:$0xff]  ;;  %v13583_v13 = vld [vmem:[#allocation2 + $0x68] sm:$0xff] }
  0x74   : > { %11500 = vmatmul.mubr.msk.f32.gmra.mrb[8].mxu0 %vm333_vm1, %v13450_v43  ;;  %17448 = vst [vmem:[#allocation6_spill] sm:$0xff] %v13526_v62  ;;  %17449 = vst [vmem:[#allocation7_spill] sm:$0xff] %v13532_v63  ;;  %v13534_v0 = vld [vmem:[#allocation2 + $0x169] sm:$0xff]  ;;  %v13540_v2 = vld [vmem:[#allocation2 + $0x171] sm:$0xff] }
  0x75   : > { %11502 = vmatprep.mubr.msk.f32.mxu0 %vm333_vm1, %v13454_v44  ;;  %17450 = vst [vmem:[#allocation8_spill] sm:$0xff] %v13534_v0  ;;  %17451 = vst [vmem:[#allocation9_spill] sm:$0xff] %v13540_v2  ;;  %v13567_v10 = vld [vmem:[#allocation2 + $0x38] sm:$0xff]  ;;  %v13577_v12 = vld [vmem:[#allocation2 + $0x60] sm:$0xff] }
  0x76   : > { %v13585_v14 = vld [vmem:[#allocation2 + $0x78] sm:$0xff]  ;;  %v13591_v15 = vld [vmem:[#allocation2 + $0x80] sm:$0xff]  ;;  %v13601_v18 = vld [vmem:[#allocation2 + $0xa8] sm:$0xff] }
  0x77   : > { %v13599_v17 = vld [vmem:[#allocation2 + $0x98] sm:$0xff]  ;;  %v13607_v19 = vld [vmem:[#allocation2 + $0xb0] sm:$0xff]  ;;  %v13609_v20 = vld [vmem:[#allocation2 + $0xc0] sm:$0xff] }
  0x78   : > { %11503 = vmatmul.mubr.msk.f32.gmra.mrb[10].mxu0 %vm333_vm1, %v13460_v45  ;;  %v13615_v21 = vld [vmem:[#allocation2 + $0xc8] sm:$0xff]  ;;  %v13617_v22 = vld [vmem:[#allocation2 + $0xd8] sm:$0xff]  ;;  %v13623_v23 = vld [vmem:[#allocation2 + $0xe0] sm:$0xff] }
  0x79   : > { %11505 = vmatprep.mubr.msk.f32.mxu0 %vm333_vm1, %v13462_v46  ;;  %v13625_v24 = vld [vmem:[#allocation2 + $0xf0] sm:$0xff]  ;;  %v13631_v25 = vld [vmem:[#allocation2 + $0xf8] sm:$0xff]  ;;  %v13633_v26 = vld [vmem:[#allocation2 + $0x108] sm:$0xff] }
  0x7a   : > { %v13639_v27 = vld [vmem:[#allocation2 + $0x110] sm:$0xff]  ;;  %v13641_v31 = vld [vmem:[#allocation2 + $0x120] sm:$0xff]  ;;  %v13647_v32 = vld [vmem:[#allocation2 + $0x128] sm:$0xff] }
  0x7b   : > { %v13649_v37 = vld [vmem:[#allocation2 + $0x138] sm:$0xff]  ;;  %v13655_v38 = vld [vmem:[#allocation2 + $0x140] sm:$0xff]  ;;  %v13657_v39 = vld [vmem:[#allocation2 + $0x150] sm:$0xff] }
  0x7c   : > { %11506 = vmatmul.mubr.msk.f32.gmra.mrb[12].mxu0 %vm333_vm1, %v13468_v47  ;;  %v419_v40 = vld [vmem:[%s13351_s18 + $0xf0] sm:$0xff]  ;;  %v420_v41 = vld [vmem:[%s13351_s18 + $0xf8] sm:$0xff] }
  0x7d   : > { %11508 = vmatprep.mubr.msk.f32.mxu0 %vm333_vm1, %v13470_v48  ;;  %452 = vst.msk [vmem:[#allocation2 + $0x181] sm:$0xff] %vm333_vm1, %v419_v40  ;;  %453 = vst.msk [vmem:[#allocation2 + $0x189] sm:$0xff] %vm333_vm1, %v420_v41  ;;  %v13667_v42 = vld [vmem:[#allocation2 + $0x158] sm:$0xff]  ;;  %v1170_v40 = vld [vmem:[#allocation2 + $0x2] sm:$0xff] }
  0x7e   : > { %v1171_v41 = vld [vmem:[#allocation2 + $0xa] sm:$0xff]  ;;  %v13680_v1 = vld [vmem:[#allocation2 + $0x1a] sm:$0xff] }
  0x7f   : > { %17452 = vst [vmem:[#allocation10_spill] sm:$0xff] %v13680_v1 }
  0x80   : > { %11509 = vmatmul.mubr.msk.f32.gmra.mrb[14].mxu0 %vm333_vm1, %v13476_v49 }
  0x81   : > { %11511 = vmatprep.mubr.msk.f32.mxu0 %vm333_vm1, %v13478_v50 }
  0x84   : > { %11512 = vmatmul.mubr.msk.f32.gmra.mrb[16].mxu0 %vm333_vm1, %v13484_v51 }
  0x85   : > { %11514 = vmatprep.mubr.msk.f32.mxu0 %vm333_vm1, %v13486_v52 }
  0x88   : > { %11515 = vmatmul.mubr.msk.f32.gmra.mrb[18].mxu0 %vm333_vm1, %v13492_v53 }
  0x89   : > { %11517 = vmatprep.mubr.msk.f32.mxu0 %vm333_vm1, %v13494_v54 }
  0x8c   : > { %11518 = vmatmul.mubr.msk.f32.gmra.mrb[20].mxu0 %vm333_vm1, %v13500_v55 }
  0x8d   : > { %11520 = vmatprep.mubr.msk.f32.mxu0 %vm333_vm1, %v13502_v56 }
  0x90   : > { %11521 = vmatmul.mubr.msk.f32.gmra.mrb[22].mxu0 %vm333_vm1, %v13508_v57 }
  0x91   : > { %11523 = vmatprep.mubr.msk.f32.mxu0 %vm333_vm1, %v13510_v58 }
  0x94   : > { %11524 = vmatmul.mubr.msk.f32.gmra.mrb[24].mxu0 %vm333_vm1, %v13516_v59 }
  0x95   : > { %11526 = vmatprep.mubr.msk.f32.mxu0 %vm333_vm1, %v13518_v60 }
  0x98   : > { %11527 = vmatmul.mubr.msk.f32.gmra.mrb[26].mxu0 %vm333_vm1, %v13524_v61 }
  0x99   : > { %11529 = vmatprep.mubr.msk.f32.mxu0 %vm333_vm1, %v13526_v62 }
  0x9c   : > { %11530 = vmatmul.mubr.msk.f32.gmra.mrb[28].mxu0 %vm333_vm1, %v13532_v63  ;;  %v13694_v63 = vld [vmem:[#allocation2 + $0x32] sm:$0xff] }
  0x9d   : > { %11532 = vmatprep.mubr.msk.f32.mxu0 %vm333_vm1, %v13534_v0  ;;  %v13692_v0 = vld [vmem:[#allocation2 + $0x22] sm:$0xff]  ;;  %17454 = vst [vmem:[#allocation12_spill] sm:$0xff] %v13694_v63 }
  0x9e   : > { %17453 = vst [vmem:[#allocation11_spill] sm:$0xff] %v13692_v0 }
  0xa0   : > { %11533 = vmatmul.mubr.msk.f32.gmra.mrb[30].mxu0 %vm333_vm1, %v13540_v2  ;;  %v13685_v2 = vld [vmem:[%s17317_s1 + $0x10] sm:$0xf] }
  0xa1   : > { %11537 = vmatprep.mubr.msk.f32.mxu0 %vm333_vm1, %v454_v3  ;;  %v13669_v3 = vld [vmem:[#allocation2 + $0x168] sm:$0xff] }
  0xa4   : > { %11538 = vmatmul.mubr.msk.f32.vlgmr.msra.gmra.mrb[0].mxu0 %vm333_vm1, %v455_v4  ;;  %v13675_v4 = vld [vmem:[#allocation2 + $0x170] sm:$0xff] }
  0xa5   : > { %11586 = vmatpush3.msk.msra.mxu0 %vm617_vm0, %v13359_v6  ;;  %11540 = vmatprep.mubr.msk.f32.mxu0 %vm333_vm1, %v13545_v5  ;;  %v13575_v6 = vld [vmem:[#allocation2 + $0x50] sm:$0xff] }
  0xa6   : > { %11635 = vmatprep.subr.msk.mxu0 %vm617_vm0, %v13550_v7 }
  0xa8   : > { %11541 = vmatmul.mubr.msk.f32.gmra.mrb[2].mxu0 %vm333_vm1, %v13557_v8 }
  0xa9   : > { %11543 = vmatprep.mubr.msk.f32.mxu0 %vm333_vm1, %v13559_v9 }
  0xac   : > { %11544 = vmatmul.mubr.msk.f32.gmra.mrb[4].mxu0 %vm333_vm1, %v13567_v10 }
  0xad   : > { %11546 = vmatprep.mubr.msk.f32.mxu0 %vm333_vm1, %v13569_v11 }
  0xb0   : > { %11547 = vmatmul.mubr.msk.f32.gmra.mrb[6].mxu0 %vm333_vm1, %v13575_v6 }
  0xb1   : > { %11549 = vmatprep.mubr.msk.f32.mxu0 %vm333_vm1, %v13577_v12 }
  0xb4   : > { %11550 = vmatmul.mubr.msk.f32.gmra.mrb[8].mxu0 %vm333_vm1, %v13583_v13 }
  0xb5   : > { %11552 = vmatprep.mubr.msk.f32.mxu0 %vm333_vm1, %v13585_v14 }
  0xb8   : > { %11553 = vmatmul.mubr.msk.f32.gmra.mrb[10].mxu0 %vm333_vm1, %v13591_v15 }
  0xb9   : > { %11555 = vmatprep.mubr.msk.f32.mxu0 %vm333_vm1, %v13593_v16 }
  0xbc   : > { %11556 = vmatmul.mubr.msk.f32.gmra.mrb[12].mxu0 %vm333_vm1, %v13599_v17 }
  0xbd   : > { %11558 = vmatprep.mubr.msk.f32.mxu0 %vm333_vm1, %v13601_v18 }
  0xc0   : > { %11559 = vmatmul.mubr.msk.f32.gmra.mrb[14].mxu0 %vm333_vm1, %v13607_v19 }
  0xc1   : > { %11561 = vmatprep.mubr.msk.f32.mxu0 %vm333_vm1, %v13609_v20 }
  0xc4   : > { %11562 = vmatmul.mubr.msk.f32.gmra.mrb[16].mxu0 %vm333_vm1, %v13615_v21 }
  0xc5   : > { %11564 = vmatprep.mubr.msk.f32.mxu0 %vm333_vm1, %v13617_v22 }
  0xc8   : > { %11565 = vmatmul.mubr.msk.f32.gmra.mrb[18].mxu0 %vm333_vm1, %v13623_v23 }
  0xc9   : > { %11567 = vmatprep.mubr.msk.f32.mxu0 %vm333_vm1, %v13625_v24 }
  0xcc   : > { %11568 = vmatmul.mubr.msk.f32.gmra.mrb[20].mxu0 %vm333_vm1, %v13631_v25 }
  0xcd   : > { %11570 = vmatprep.mubr.msk.f32.mxu0 %vm333_vm1, %v13633_v26 }
  0xd0   : > { %11571 = vmatmul.mubr.msk.f32.gmra.mrb[22].mxu0 %vm333_vm1, %v13639_v27 }
  0xd1   : > { %11573 = vmatprep.mubr.msk.f32.mxu0 %vm333_vm1, %v13641_v31 }
  0xd4   : > { %11574 = vmatmul.mubr.msk.f32.gmra.mrb[24].mxu0 %vm333_vm1, %v13647_v32 }
  0xd5   : > { %11576 = vmatprep.mubr.msk.f32.mxu0 %vm333_vm1, %v13649_v37 }
  0xd8   : > { %11577 = vmatmul.mubr.msk.f32.gmra.mrb[26].mxu0 %vm333_vm1, %v13655_v38 }
  0xd9   : > { %11579 = vmatprep.mubr.msk.f32.mxu0 %vm333_vm1, %v13657_v39 }
  0xdc   : > { %11580 = vmatmul.mubr.msk.f32.gmra.mrb[28].mxu0 %vm333_vm1, %v13667_v42 }
  0xdd   : > { %11582 = vmatprep.mubr.msk.f32.mxu0 %vm333_vm1, %v13669_v3 }
  0xe0   : > { %11583 = vmatmul.mubr.msk.f32.gmra.mrb[30].mxu0 %vm333_vm1, %v13675_v4 }
  0xe1   : > { %11587 = vmatprep.mubr.msk.f32.mxu0 %vm333_vm1, %v1170_v40  ;;  %v13702_v40 = vld [vmem:[#allocation2 + $0x3a] sm:$0xff] }
  0xe2   : > { %17455 = vst [vmem:[#allocation13_spill] sm:$0xff] %v13702_v40 }
  0xe4   : > { %11588 = vmatmul.mubr.msk.f32.vlgmr.msra.gmra.mrb[0].mxu0 %vm333_vm1, %v1171_v41  ;;  %v13704_v41 = vld [vmem:[#allocation2 + $0x4a] sm:$0xff] }
  0xe5   : > { %11636 = vmatpush3.msk.msra.mxu0 %vm617_vm0, %v13550_v7  ;;  %11590 = vmatprep.mubr.msk.f32.mxu0 %vm333_vm1, %v13680_v1  ;;  %17456 = vst [vmem:[#allocation14_spill] sm:$0xff] %v13704_v41  ;;  %v13710_v7 = vld [vmem:[#allocation2 + $0x52] sm:$0xff]  ;;  %v13712_v1 = vld [vmem:[#allocation2 + $0x62] sm:$0xff] }
  0xe6   : > { %11685 = vmatprep.subr.msk.mxu0 %vm617_vm0, %v13685_v2  ;;  %17457 = vst [vmem:[#allocation15_spill] sm:$0xff] %v13710_v7  ;;  %17458 = vst [vmem:[#allocation16_spill] sm:$0xff] %v13712_v1 }
  0xe8   : > { %11591 = vmatmul.mubr.msk.f32.gmra.mrb[2].mxu0 %vm333_vm1, %v13692_v0  ;;  %v13720_v0 = vld [vmem:[#allocation2 + $0x7a] sm:$0xff] }
  0xe9   : > { %11593 = vmatprep.mubr.msk.f32.mxu0 %vm333_vm1, %v13694_v63  ;;  %v13718_v63 = vld [vmem:[#allocation2 + $0x6a] sm:$0xff]  ;;  %17460 = vst [vmem:[#allocation18_spill] sm:$0xff] %v13720_v0 }
  0xea   : > { %17459 = vst [vmem:[#allocation17_spill] sm:$0xff] %v13718_v63 }
  0xec   : > { %11594 = vmatmul.mubr.msk.f32.gmra.mrb[4].mxu0 %vm333_vm1, %v13702_v40  ;;  %v13728_v40 = vld [vmem:[#allocation2 + $0x92] sm:$0xff] }
  0xed   : > { %11596 = vmatprep.mubr.msk.f32.mxu0 %vm333_vm1, %v13704_v41  ;;  %v13726_v41 = vld [vmem:[#allocation2 + $0x82] sm:$0xff]  ;;  %17462 = vst [vmem:[#allocation20_spill] sm:$0xff] %v13728_v40 }
  0xee   : > { %17461 = vst [vmem:[#allocation19_spill] sm:$0xff] %v13726_v41 }
  0xf0   : > { %11597 = vmatmul.mubr.msk.f32.gmra.mrb[6].mxu0 %vm333_vm1, %v13710_v7  ;;  %v13736_v7 = vld [vmem:[#allocation2 + $0xaa] sm:$0xff] }
  0xf1   : > { %11599 = vmatprep.mubr.msk.f32.mxu0 %vm333_vm1, %v13712_v1  ;;  %v13734_v1 = vld [vmem:[#allocation2 + $0x9a] sm:$0xff]  ;;  %17464 = vst [vmem:[#allocation22_spill] sm:$0xff] %v13736_v7 }
  0xf2   : > { %17463 = vst [vmem:[#allocation21_spill] sm:$0xff] %v13734_v1 }
  0xf4   : > { %11600 = vmatmul.mubr.msk.f32.gmra.mrb[8].mxu0 %vm333_vm1, %v13718_v63  ;;  %v13744_v63 = vld [vmem:[#allocation2 + $0xc2] sm:$0xff] }
  0xf5   : > { %11602 = vmatprep.mubr.msk.f32.mxu0 %vm333_vm1, %v13720_v0  ;;  %v13742_v0 = vld [vmem:[#allocation2 + $0xb2] sm:$0xff]  ;;  %17466 = vst [vmem:[#allocation24_spill] sm:$0xff] %v13744_v63 }
  0xf6   : > { %17465 = vst [vmem:[#allocation23_spill] sm:$0xff] %v13742_v0 }
  0xf8   : > { %11603 = vmatmul.mubr.msk.f32.gmra.mrb[10].mxu0 %vm333_vm1, %v13726_v41  ;;  %v13752_v41 = vld [vmem:[#allocation2 + $0xda] sm:$0xff] }
  0xf9   : > { %11605 = vmatprep.mubr.msk.f32.mxu0 %vm333_vm1, %v13728_v40  ;;  %v13750_v40 = vld [vmem:[#allocation2 + $0xca] sm:$0xff]  ;;  %17468 = vst [vmem:[#allocation26_spill] sm:$0xff] %v13752_v41 }
  0xfa   : > { %17467 = vst [vmem:[#allocation25_spill] sm:$0xff] %v13750_v40 }
  0xfc   : > { %11606 = vmatmul.mubr.msk.f32.gmra.mrb[12].mxu0 %vm333_vm1, %v13734_v1  ;;  %v13760_v1 = vld [vmem:[#allocation2 + $0xf2] sm:$0xff] }
  0xfd   : > { %11608 = vmatprep.mubr.msk.f32.mxu0 %vm333_vm1, %v13736_v7  ;;  %v13758_v7 = vld [vmem:[#allocation2 + $0xe2] sm:$0xff]  ;;  %17470 = vst [vmem:[#allocation28_spill] sm:$0xff] %v13760_v1 }
  0xfe   : > { %17469 = vst [vmem:[#allocation27_spill] sm:$0xff] %v13758_v7 }
 0x100   : > { %11609 = vmatmul.mubr.msk.f32.gmra.mrb[14].mxu0 %vm333_vm1, %v13742_v0  ;;  %v13768_v0 = vld [vmem:[#allocation2 + $0x10a] sm:$0xff] }
 0x101   : > { %11611 = vmatprep.mubr.msk.f32.mxu0 %vm333_vm1, %v13744_v63  ;;  %v13766_v63 = vld [vmem:[#allocation2 + $0xfa] sm:$0xff]  ;;  %17472 = vst [vmem:[#allocation30_spill] sm:$0xff] %v13768_v0 }
 0x102   : > { %17471 = vst [vmem:[#allocation29_spill] sm:$0xff] %v13766_v63 }
 0x104   : > { %11612 = vmatmul.mubr.msk.f32.gmra.mrb[16].mxu0 %vm333_vm1, %v13750_v40  ;;  %v13776_v40 = vld [vmem:[#allocation2 + $0x122] sm:$0xff] }
 0x105   : > { %11614 = vmatprep.mubr.msk.f32.mxu0 %vm333_vm1, %v13752_v41  ;;  %v13774_v41 = vld [vmem:[#allocation2 + $0x112] sm:$0xff]  ;;  %17474 = vst [vmem:[#allocation32_spill] sm:$0xff] %v13776_v40 }
 0x106   : > { %17473 = vst [vmem:[#allocation31_spill] sm:$0xff] %v13774_v41 }
 0x108   : > { %11615 = vmatmul.mubr.msk.f32.gmra.mrb[18].mxu0 %vm333_vm1, %v13758_v7  ;;  %v13784_v7 = vld [vmem:[#allocation2 + $0x13a] sm:$0xff] }
 0x109   : > { %11617 = vmatprep.mubr.msk.f32.mxu0 %vm333_vm1, %v13760_v1  ;;  %v13782_v1 = vld [vmem:[#allocation2 + $0x12a] sm:$0xff]  ;;  %17475 = vst [vmem:[#allocation33_spill] sm:$0xff] %v13784_v7 }
 0x10c   : > { %11618 = vmatmul.mubr.msk.f32.gmra.mrb[20].mxu0 %vm333_vm1, %v13766_v63  ;;  %v13792_v63 = vld [vmem:[#allocation2 + $0x152] sm:$0xff] }
 0x10d   : > { %11620 = vmatprep.mubr.msk.f32.mxu0 %vm333_vm1, %v13768_v0  ;;  %v13790_v0 = vld [vmem:[#allocation2 + $0x142] sm:$0xff]  ;;  %17476 = vst [vmem:[#allocation34_spill] sm:$0xff] %v13792_v63 }
 0x110   : > { %11621 = vmatmul.mubr.msk.f32.gmra.mrb[22].mxu0 %vm333_vm1, %v13774_v41  ;;  %v13800_v41 = vld [vmem:[#allocation2 + $0x16a] sm:$0xff] }
 0x111   : > { %11623 = vmatprep.mubr.msk.f32.mxu0 %vm333_vm1, %v13776_v40  ;;  %v13798_v40 = vld [vmem:[#allocation2 + $0x15a] sm:$0xff]  ;;  %17477 = vst [vmem:[#allocation35_spill] sm:$0xff] %v13800_v41 }
 0x114   : > { %11624 = vmatmul.mubr.msk.f32.gmra.mrb[24].mxu0 %vm333_vm1, %v13782_v1 }
 0x115   : > { %11626 = vmatprep.mubr.msk.f32.mxu0 %vm333_vm1, %v13784_v7  ;;  %v13806_v7 = vld [vmem:[#allocation2 + $0x172] sm:$0xff] }
 0x118   : > { %11627 = vmatmul.mubr.msk.f32.gmra.mrb[26].mxu0 %vm333_vm1, %v13790_v0 }
 0x119   : > { %11629 = vmatprep.mubr.msk.f32.mxu0 %vm333_vm1, %v13792_v63  ;;  %v10417_v63 = vld [vmem:[%s17317_s1 + $0x14] sm:$0xf] }
 0x11c   : > { %11630 = vmatmul.mubr.msk.f32.gmra.mrb[28].mxu0 %vm333_vm1, %v13798_v40 }
 0x11d   : > { %11632 = vmatprep.mubr.msk.f32.mxu0 %vm333_vm1, %v13800_v41 }
 0x120   : > { %11633 = vmatmul.mubr.msk.f32.gmra.mrb[30].mxu0 %vm333_vm1, %v13806_v7 }
 0x121   : > { %11637 = vmatprep.mubr.msk.f32.mxu0 %vm333_vm1, %v13545_v5  ;;  %v13880_v5 = vld [vmem:[#allocation2 + $0x188] sm:$0xff] }
 0x124   : > { %11638 = vmatmul.mubr.msk.f32.vlgmr.msra.gmra.mrb[0].mxu0 %vm333_vm1, %v13557_v8  ;;  %v10451_v8 = vld [vmem:[%s17317_s1 + $0x18] sm:$0xf] }
 0x125   : > { %11686 = vmatpush3.msk.msra.mxu0 %vm617_vm0, %v13685_v2  ;;  %11640 = vmatprep.mubr.msk.f32.mxu0 %vm333_vm1, %v13559_v9  ;;  %v13874_v2 = vld [vmem:[#allocation2 + $0x180] sm:$0xff] }
 0x126   : > { %11735 = vmatprep.subr.msk.mxu0 %vm617_vm0, %v10417_v63 }
 0x128   : > { %11641 = vmatmul.mubr.msk.f32.gmra.mrb[2].mxu0 %vm333_vm1, %v13567_v10 }
 0x129   : > { %11643 = vmatprep.mubr.msk.f32.mxu0 %vm333_vm1, %v13569_v11 }
 0x12c   : > { %11644 = vmatmul.mubr.msk.f32.gmra.mrb[4].mxu0 %vm333_vm1, %v13575_v6 }
 0x12d   : > { %11646 = vmatprep.mubr.msk.f32.mxu0 %vm333_vm1, %v13577_v12 }
 0x130   : > { %11647 = vmatmul.mubr.msk.f32.gmra.mrb[6].mxu0 %vm333_vm1, %v13583_v13 }
 0x131   : > { %11649 = vmatprep.mubr.msk.f32.mxu0 %vm333_vm1, %v13585_v14 }
 0x134   : > { %11650 = vmatmul.mubr.msk.f32.gmra.mrb[8].mxu0 %vm333_vm1, %v13591_v15 }
 0x135   : > { %11652 = vmatprep.mubr.msk.f32.mxu0 %vm333_vm1, %v13593_v16 }
 0x138   : > { %11653 = vmatmul.mubr.msk.f32.gmra.mrb[10].mxu0 %vm333_vm1, %v13599_v17 }
 0x139   : > { %11655 = vmatprep.mubr.msk.f32.mxu0 %vm333_vm1, %v13601_v18 }
 0x13c   : > { %11656 = vmatmul.mubr.msk.f32.gmra.mrb[12].mxu0 %vm333_vm1, %v13607_v19 }
 0x13d   : > { %11658 = vmatprep.mubr.msk.f32.mxu0 %vm333_vm1, %v13609_v20 }
 0x140   : > { %11659 = vmatmul.mubr.msk.f32.gmra.mrb[14].mxu0 %vm333_vm1, %v13615_v21 }
 0x141   : > { %11661 = vmatprep.mubr.msk.f32.mxu0 %vm333_vm1, %v13617_v22 }
 0x144   : > { %11662 = vmatmul.mubr.msk.f32.gmra.mrb[16].mxu0 %vm333_vm1, %v13623_v23 }
 0x145   : > { %11664 = vmatprep.mubr.msk.f32.mxu0 %vm333_vm1, %v13625_v24 }
 0x148   : > { %11665 = vmatmul.mubr.msk.f32.gmra.mrb[18].mxu0 %vm333_vm1, %v13631_v25 }
 0x149   : > { %11667 = vmatprep.mubr.msk.f32.mxu0 %vm333_vm1, %v13633_v26 }
 0x14c   : > { %11668 = vmatmul.mubr.msk.f32.gmra.mrb[20].mxu0 %vm333_vm1, %v13639_v27 }
 0x14d   : > { %11670 = vmatprep.mubr.msk.f32.mxu0 %vm333_vm1, %v13641_v31 }
 0x150   : > { %11671 = vmatmul.mubr.msk.f32.gmra.mrb[22].mxu0 %vm333_vm1, %v13647_v32 }
 0x151   : > { %11673 = vmatprep.mubr.msk.f32.mxu0 %vm333_vm1, %v13649_v37 }
 0x154   : > { %11674 = vmatmul.mubr.msk.f32.gmra.mrb[24].mxu0 %vm333_vm1, %v13655_v38 }
 0x155   : > { %11676 = vmatprep.mubr.msk.f32.mxu0 %vm333_vm1, %v13657_v39 }
 0x158   : > { %11677 = vmatmul.mubr.msk.f32.gmra.mrb[26].mxu0 %vm333_vm1, %v13667_v42 }
 0x159   : > { %11679 = vmatprep.mubr.msk.f32.mxu0 %vm333_vm1, %v13669_v3 }
 0x15c   : > { %11680 = vmatmul.mubr.msk.f32.gmra.mrb[28].mxu0 %vm333_vm1, %v13675_v4 }
 0x15d   : > { %11682 = vmatprep.mubr.msk.f32.mxu0 %vm333_vm1, %v13874_v2 }
 0x160   : > { %11683 = vmatmul.mubr.msk.f32.gmra.mrb[30].mxu0 %vm333_vm1, %v13880_v5 }
 0x161   : > { %11687 = vmatprep.mubr.msk.f32.mxu0 %vm333_vm1, %v13405_v28  ;;  %v17478_v28 = vld [vmem:[#allocation7_spill] sm:$0xff] }
 0x164   : > { %11688 = vmatmul.mubr.msk.f32.vlgmr.msra.gmra.mrb[0].mxu0 %vm333_vm1, %v13407_v29  ;;  %v17479_v29 = vld [vmem:[#allocation8_spill] sm:$0xff] }
 0x165   : > { %11736 = vmatpush3.msk.msra.mxu0 %vm617_vm0, %v10417_v63  ;;  %11690 = vmatprep.mubr.msk.f32.mxu0 %vm333_vm1, %v13409_v30  ;;  %v13947_v30 = vld [vmem:[#allocation2 + $0x181] sm:$0xff]  ;;  %v10485_v63 = vld [vmem:[%s17317_s1 + $0x1c] sm:$0xf] }
 0x166   : > { %11785 = vmatprep.subr.msk.mxu0 %vm617_vm0, %v10451_v8  ;;  %17480 = vst [vmem:[#allocation36_spill] sm:$0xff] %v13947_v30 }
 0x168   : > { %11691 = vmatmul.mubr.msk.f32.gmra.mrb[2].mxu0 %vm333_vm1, %v13424_v33  ;;  %v17481_v33 = vld [vmem:[#allocation9_spill] sm:$0xff] }
 0x169   : > { %11693 = vmatprep.mubr.msk.f32.mxu0 %vm333_vm1, %v13426_v34  ;;  %v13953_v34 = vld [vmem:[#allocation2 + $0x189] sm:$0xff] }
 0x16a   : > { %17482 = vst [vmem:[#allocation37_spill] sm:$0xff] %v13953_v34 }
 0x16c   : > { %11694 = vmatmul.mubr.msk.f32.gmra.mrb[4].mxu0 %vm333_vm1, %v13432_v35  ;;  %v17483_v35 = vld [vmem:[#allocation10_spill] sm:$0xff] }
 0x16d   : > { %11696 = vmatprep.mubr.msk.f32.mxu0 %vm333_vm1, %v13434_v36 }
 0x170   : > { %11697 = vmatmul.mubr.msk.f32.gmra.mrb[6].mxu0 %vm333_vm1, %v13450_v43 }
 0x171   : > { %11699 = vmatprep.mubr.msk.f32.mxu0 %vm333_vm1, %v13454_v44 }
 0x174   : > { %11700 = vmatmul.mubr.msk.f32.gmra.mrb[8].mxu0 %vm333_vm1, %v13460_v45 }
 0x175   : > { %11702 = vmatprep.mubr.msk.f32.mxu0 %vm333_vm1, %v13462_v46 }
 0x178   : > { %11703 = vmatmul.mubr.msk.f32.gmra.mrb[10].mxu0 %vm333_vm1, %v13468_v47 }
 0x179   : > { %11705 = vmatprep.mubr.msk.f32.mxu0 %vm333_vm1, %v13470_v48 }
 0x17c   : > { %11706 = vmatmul.mubr.msk.f32.gmra.mrb[12].mxu0 %vm333_vm1, %v13476_v49 }
 0x17d   : > { %11708 = vmatprep.mubr.msk.f32.mxu0 %vm333_vm1, %v13478_v50 }
 0x180   : > { %11709 = vmatmul.mubr.msk.f32.gmra.mrb[14].mxu0 %vm333_vm1, %v13484_v51 }
 0x181   : > { %11711 = vmatprep.mubr.msk.f32.mxu0 %vm333_vm1, %v13486_v52 }
 0x184   : > { %11712 = vmatmul.mubr.msk.f32.gmra.mrb[16].mxu0 %vm333_vm1, %v13492_v53 }
 0x185   : > { %11714 = vmatprep.mubr.msk.f32.mxu0 %vm333_vm1, %v13494_v54 }
 0x188   : > { %11715 = vmatmul.mubr.msk.f32.gmra.mrb[18].mxu0 %vm333_vm1, %v13500_v55 }
 0x189   : > { %11717 = vmatprep.mubr.msk.f32.mxu0 %vm333_vm1, %v13502_v56 }
 0x18c   : > { %11718 = vmatmul.mubr.msk.f32.gmra.mrb[20].mxu0 %vm333_vm1, %v13508_v57 }
 0x18d   : > { %11720 = vmatprep.mubr.msk.f32.mxu0 %vm333_vm1, %v13510_v58 }
 0x190   : > { %11721 = vmatmul.mubr.msk.f32.gmra.mrb[22].mxu0 %vm333_vm1, %v13516_v59 }
 0x191   : > { %11723 = vmatprep.mubr.msk.f32.mxu0 %vm333_vm1, %v13518_v60 }
 0x194   : > { %11724 = vmatmul.mubr.msk.f32.gmra.mrb[24].mxu0 %vm333_vm1, %v13524_v61 }
 0x195   : > { %11726 = vmatprep.mubr.msk.f32.mxu0 %vm333_vm1, %v13526_v62  ;;  %v17493_v62 = vld [vmem:[#allocation20_spill] sm:$0xff] }
 0x198   : > { %11727 = vmatmul.mubr.msk.f32.gmra.mrb[26].mxu0 %vm333_vm1, %v17478_v28  ;;  %v17489_v28 = vld [vmem:[#allocation16_spill] sm:$0xff] }
 0x199   : > { %11729 = vmatprep.mubr.msk.f32.mxu0 %vm333_vm1, %v17479_v29  ;;  %v17484_v29 = vld [vmem:[#allocation11_spill] sm:$0xff] }
 0x19c   : > { %11730 = vmatmul.mubr.msk.f32.gmra.mrb[28].mxu0 %vm333_vm1, %v17481_v33  ;;  %v17485_v33 = vld [vmem:[#allocation12_spill] sm:$0xff] }
 0x19d   : > { %11732 = vmatprep.mubr.msk.f32.mxu0 %vm333_vm1, %v13947_v30  ;;  %v17486_v30 = vld [vmem:[#allocation13_spill] sm:$0xff] }
 0x1a0   : > { %11733 = vmatmul.mubr.msk.f32.gmra.mrb[30].mxu0 %vm333_vm1, %v13953_v34  ;;  %v17487_v34 = vld [vmem:[#allocation14_spill] sm:$0xff] }
 0x1a1   : > { %11737 = vmatprep.mubr.msk.f32.mxu0 %vm333_vm1, %v17483_v35  ;;  %v17488_v35 = vld [vmem:[#allocation15_spill] sm:$0xff] }
 0x1a4   : > { %11738 = vmatmul.mubr.msk.f32.vlgmr.msra.gmra.mrb[0].mxu0 %vm333_vm1, %v17484_v29  ;;  %v17490_v29 = vld [vmem:[#allocation17_spill] sm:$0xff] }
 0x1a5   : > { %11786 = vmatpush3.msk.msra.mxu0 %vm617_vm0, %v10451_v8  ;;  %11740 = vmatprep.mubr.msk.f32.mxu0 %vm333_vm1, %v17485_v33  ;;  %v17491_v8 = vld [vmem:[#allocation18_spill] sm:$0xff]  ;;  %v17492_v33 = vld [vmem:[#allocation19_spill] sm:$0xff] }
 0x1a6   : > { %11835 = vmatprep.subr.msk.mxu0 %vm617_vm0, %v10485_v63 }
 0x1a8   : > { %11741 = vmatmul.mubr.msk.f32.gmra.mrb[2].mxu0 %vm333_vm1, %v17486_v30  ;;  %v17494_v30 = vld [vmem:[#allocation21_spill] sm:$0xff] }
 0x1a9   : > { %11743 = vmatprep.mubr.msk.f32.mxu0 %vm333_vm1, %v17487_v34  ;;  %v17495_v34 = vld [vmem:[#allocation22_spill] sm:$0xff] }
 0x1ac   : > { %11744 = vmatmul.mubr.msk.f32.gmra.mrb[4].mxu0 %vm333_vm1, %v17488_v35  ;;  %v17496_v35 = vld [vmem:[#allocation23_spill] sm:$0xff] }
 0x1ad   : > { %11746 = vmatprep.mubr.msk.f32.mxu0 %vm333_vm1, %v17489_v28  ;;  %v17497_v28 = vld [vmem:[#allocation24_spill] sm:$0xff] }
 0x1b0   : > { %11747 = vmatmul.mubr.msk.f32.gmra.mrb[6].mxu0 %vm333_vm1, %v17490_v29  ;;  %v17498_v29 = vld [vmem:[#allocation25_spill] sm:$0xff] }
 0x1b1   : > { %11749 = vmatprep.mubr.msk.f32.mxu0 %vm333_vm1, %v17491_v8  ;;  %v17499_v8 = vld [vmem:[#allocation26_spill] sm:$0xff] }
 0x1b4   : > { %11750 = vmatmul.mubr.msk.f32.gmra.mrb[8].mxu0 %vm333_vm1, %v17492_v33  ;;  %v17500_v33 = vld [vmem:[#allocation27_spill] sm:$0xff] }
 0x1b5   : > { %11752 = vmatprep.mubr.msk.f32.mxu0 %vm333_vm1, %v17493_v62  ;;  %v17501_v62 = vld [vmem:[#allocation28_spill] sm:$0xff] }
 0x1b8   : > { %11753 = vmatmul.mubr.msk.f32.gmra.mrb[10].mxu0 %vm333_vm1, %v17494_v30  ;;  %v17502_v30 = vld [vmem:[#allocation29_spill] sm:$0xff] }
 0x1b9   : > { %11755 = vmatprep.mubr.msk.f32.mxu0 %vm333_vm1, %v17495_v34  ;;  %v17503_v34 = vld [vmem:[#allocation30_spill] sm:$0xff] }
 0x1bc   : > { %11756 = vmatmul.mubr.msk.f32.gmra.mrb[12].mxu0 %vm333_vm1, %v17496_v35  ;;  %v17504_v35 = vld [vmem:[#allocation31_spill] sm:$0xff] }
 0x1bd   : > { %11758 = vmatprep.mubr.msk.f32.mxu0 %vm333_vm1, %v17497_v28  ;;  %v17505_v28 = vld [vmem:[#allocation32_spill] sm:$0xff] }
 0x1c0   : > { %11759 = vmatmul.mubr.msk.f32.gmra.mrb[14].mxu0 %vm333_vm1, %v17498_v29 }
 0x1c1   : > { %11761 = vmatprep.mubr.msk.f32.mxu0 %vm333_vm1, %v17499_v8  ;;  %v17506_v8 = vld [vmem:[#allocation33_spill] sm:$0xff] }
 0x1c4   : > { %11762 = vmatmul.mubr.msk.f32.gmra.mrb[16].mxu0 %vm333_vm1, %v17500_v33 }
 0x1c5   : > { %11764 = vmatprep.mubr.msk.f32.mxu0 %vm333_vm1, %v17501_v62  ;;  %v17507_v62 = vld [vmem:[#allocation34_spill] sm:$0xff] }
 0x1c8   : > { %11765 = vmatmul.mubr.msk.f32.gmra.mrb[18].mxu0 %vm333_vm1, %v17502_v30 }
 0x1c9   : > { %11767 = vmatprep.mubr.msk.f32.mxu0 %vm333_vm1, %v17503_v34 }
 0x1cc   : > { %11768 = vmatmul.mubr.msk.f32.gmra.mrb[20].mxu0 %vm333_vm1, %v17504_v35  ;;  %v14020_v35 = vld [vmem:[#allocation2 + $0x182] sm:$0xff] }
 0x1cd   : > { %11770 = vmatprep.mubr.msk.f32.mxu0 %vm333_vm1, %v17505_v28 }
 0x1d0   : > { %11771 = vmatmul.mubr.msk.f32.gmra.mrb[22].mxu0 %vm333_vm1, %v13782_v1 }
 0x1d1   : > { %11773 = vmatprep.mubr.msk.f32.mxu0 %vm333_vm1, %v17506_v8  ;;  %v14026_v8 = vld [vmem:[#allocation2 + $0x18a] sm:$0xff] }
 0x1d4   : > { %11774 = vmatmul.mubr.msk.f32.gmra.mrb[24].mxu0 %vm333_vm1, %v13790_v0 }
 0x1d5   : > { %11776 = vmatprep.mubr.msk.f32.mxu0 %vm333_vm1, %v17507_v62 }
 0x1d8   : > { %11777 = vmatmul.mubr.msk.f32.gmra.mrb[26].mxu0 %vm333_vm1, %v13798_v40 }
 0x1d9   : > { %11779 = vmatprep.mubr.msk.f32.mxu0 %vm333_vm1, %v13800_v41  ;;  %v10519_v41 = vld [vmem:[%s17317_s1 + $0x20] sm:$0xf] }
 0x1dc   : > { %11780 = vmatmul.mubr.msk.f32.gmra.mrb[28].mxu0 %vm333_vm1, %v13806_v7 }
 0x1dd   : > { %11782 = vmatprep.mubr.msk.f32.mxu0 %vm333_vm1, %v14020_v35 }
 0x1e0   : > { %11783 = vmatmul.mubr.msk.f32.gmra.mrb[30].mxu0 %vm333_vm1, %v14026_v8 }
 0x1e1   : > { %11787 = vmatprep.mubr.msk.f32.mxu0 %vm333_vm1, %v13559_v9  ;;  %v2761_v9 = vld [vmem:[#allocation2 + $0x198] sm:$0xff] }
 0x1e4   : > { %11788 = vmatmul.mubr.msk.f32.vlgmr.msra.gmra.mrb[0].mxu0 %vm333_vm1, %v13567_v10  ;;  %v2762_v10 = vld [vmem:[#allocation2 + $0x1a0] sm:$0xff] }
 0x1e5   : > { %11836 = vmatpush3.msk.msra.mxu0 %vm617_vm0, %v10485_v63  ;;  %11790 = vmatprep.mubr.msk.f32.mxu0 %vm333_vm1, %v13569_v11  ;;  %v3121_v11 = vld [vmem:[#allocation2 + $0x31] sm:$0xff] }
 0x1e6   : > { %11885 = vmatprep.subr.msk.mxu0 %vm617_vm0, %v10519_v41 }
 0x1e8   : > { %11791 = vmatmul.mubr.msk.f32.gmra.mrb[2].mxu0 %vm333_vm1, %v13575_v6  ;;  %v3122_v6 = vld [vmem:[#allocation2 + $0x39] sm:$0xff] }
 0x1e9   : > { %11793 = vmatprep.mubr.msk.f32.mxu0 %vm333_vm1, %v13577_v12  ;;  %v3123_v12 = vld [vmem:[#allocation2 + $0x49] sm:$0xff] }
 0x1ec   : > { %11794 = vmatmul.mubr.msk.f32.gmra.mrb[4].mxu0 %vm333_vm1, %v13583_v13  ;;  %v3124_v13 = vld [vmem:[#allocation2 + $0x51] sm:$0xff] }
 0x1ed   : > { %11796 = vmatprep.mubr.msk.f32.mxu0 %vm333_vm1, %v13585_v14  ;;  %v17526_v14 = vld [vmem:[#allocation24_spill] sm:$0xff] }
 0x1f0   : > { %11797 = vmatmul.mubr.msk.f32.gmra.mrb[6].mxu0 %vm333_vm1, %v13591_v15  ;;  %v17527_v15 = vld [vmem:[#allocation26_spill] sm:$0xff] }
 0x1f1   : > { %11799 = vmatprep.mubr.msk.f32.mxu0 %vm333_vm1, %v13593_v16  ;;  %v17528_v16 = vld [vmem:[#allocation28_spill] sm:$0xff] }
 0x1f4   : > { %11800 = vmatmul.mubr.msk.f32.gmra.mrb[8].mxu0 %vm333_vm1, %v13599_v17  ;;  %v17529_v17 = vld [vmem:[#allocation31_spill] sm:$0xff] }
 0x1f5   : > { %11802 = vmatprep.mubr.msk.f32.mxu0 %vm333_vm1, %v13601_v18  ;;  %v17530_v18 = vld [vmem:[#allocation33_spill] sm:$0xff] }
 0x1f8   : > { %11803 = vmatmul.mubr.msk.f32.gmra.mrb[10].mxu0 %vm333_vm1, %v13607_v19  ;;  %v17531_v19 = vld [vmem:[#allocation35_spill] sm:$0xff] }
 0x1f9   : > { %11805 = vmatprep.mubr.msk.f32.mxu0 %vm333_vm1, %v13609_v20  ;;  %v14329_v20 = vld [vmem:[%s17318_s2] ss:$0 sm:$0xff] }
 0x1fc   : > { %11806 = vmatmul.mubr.msk.f32.gmra.mrb[12].mxu0 %vm333_vm1, %v13615_v21 }
 0x1fd   : > { %11808 = vmatprep.mubr.msk.f32.mxu0 %vm333_vm1, %v13617_v22  ;;  %v14334_v22 = vld [vmem:[%s17318_s2 + $0x1] ss:$0 sm:$0xff] }
 0x200   : > { %11809 = vmatmul.mubr.msk.f32.gmra.mrb[14].mxu0 %vm333_vm1, %v13623_v23 }
 0x201   : > { %11811 = vmatprep.mubr.msk.f32.mxu0 %vm333_vm1, %v13625_v24 }
 0x204   : > { %11812 = vmatmul.mubr.msk.f32.gmra.mrb[16].mxu0 %vm333_vm1, %v13631_v25 }
 0x205   : > { %11814 = vmatprep.mubr.msk.f32.mxu0 %vm333_vm1, %v13633_v26  ;;  %v4094_v26 = vld [vmem:[#allocation3] sm:$0xff] }
 0x208   : > { %11815 = vmatmul.mubr.msk.f32.gmra.mrb[18].mxu0 %vm333_vm1, %v13639_v27 }
 0x209   : > { %11817 = vmatprep.mubr.msk.f32.mxu0 %vm333_vm1, %v13641_v31  ;;  %v14342_v31 = vld [vmem:[%s17319_s3] ss:$0 sm:$0xff] }
 0x20c   : > { %11818 = vmatmul.mubr.msk.f32.gmra.mrb[20].mxu0 %vm333_vm1, %v13647_v32  ;;  %v4195_v32 = vld [vmem:[#allocation3 + $0x1] sm:$0xff] }
 0x20d   : > { %11820 = vmatprep.mubr.msk.f32.mxu0 %vm333_vm1, %v13649_v37  ;;  %v14347_v37 = vld [vmem:[%s17319_s3 + $0x1] ss:$0 sm:$0xff] }
 0x210   : > { %11821 = vmatmul.mubr.msk.f32.gmra.mrb[22].mxu0 %vm333_vm1, %v13655_v38 }
 0x211   : > { %11823 = vmatprep.mubr.msk.f32.mxu0 %vm333_vm1, %v13657_v39 }
 0x214   : > { %11824 = vmatmul.mubr.msk.f32.gmra.mrb[24].mxu0 %vm333_vm1, %v13667_v42  ;;  %v4095_v42 = vld [vmem:[#allocation3 + $0x8] sm:$0xff] }
 0x215   : > { %11826 = vmatprep.mubr.msk.f32.mxu0 %vm333_vm1, %v13669_v3  ;;  %v4196_v3 = vld [vmem:[#allocation3 + $0x9] sm:$0xff]  ;;  %v4132_v63 = vmul.f32 %v14342_v31, %v4095_v42 }
 0x218   : > { %11827 = vmatmul.mubr.msk.f32.gmra.mrb[26].mxu0 %vm333_vm1, %v13675_v4 }
 0x219   : > { %11829 = vmatprep.mubr.msk.f32.mxu0 %vm333_vm1, %v13874_v2 }
 0x21c   : > { %11830 = vmatmul.mubr.msk.f32.gmra.mrb[28].mxu0 %vm333_vm1, %v13880_v5  ;;  %v4131_v5 = vmul.f32 %v14342_v31, %v4094_v26 }
 0x21d   : > { %11832 = vmatprep.mubr.msk.f32.mxu0 %vm333_vm1, %v2761_v9  ;;  %v4297_v9 = vld [vmem:[#allocation3 + $0xa] sm:$0xff] }
 0x220   : > { %11833 = vmatmul.mubr.msk.f32.gmra.mrb[30].mxu0 %vm333_vm1, %v2762_v10 }
 0x221   : > { %11837 = vmatprep.mubr.msk.f32.mxu0 %vm333_vm1, %v3121_v11 }
 0x224   : > { %11838 = vmatmul.mubr.msk.f32.vlgmr.msra.gmra.mrb[0].mxu0 %vm333_vm1, %v3122_v6 }
 0x225   : > { %11886 = vmatpush3.msk.msra.mxu0 %vm617_vm0, %v10519_v41  ;;  %11840 = vmatprep.mubr.msk.f32.mxu0 %vm333_vm1, %v3123_v12 }
 0x228   : > { %11841 = vmatmul.mubr.msk.f32.gmra.mrb[2].mxu0 %vm333_vm1, %v3124_v13 }
 0x229   : > { %11843 = vmatprep.mubr.msk.f32.mxu0 %vm333_vm1, %v13434_v36  ;;  %v17508_v36 = vld [vmem:[#allocation6_spill] sm:$0xff] }
 0x22c   : > { %11844 = vmatmul.mubr.msk.f32.gmra.mrb[4].mxu0 %vm333_vm1, %v13450_v43  ;;  %v17509_v43 = vld [vmem:[#allocation7_spill] sm:$0xff] }
 0x22d   : > { %11846 = vmatprep.mubr.msk.f32.mxu0 %vm333_vm1, %v13454_v44  ;;  %v17510_v44 = vld [vmem:[#allocation8_spill] sm:$0xff] }
 0x230   : > { %11847 = vmatmul.mubr.msk.f32.gmra.mrb[6].mxu0 %vm333_vm1, %v13460_v45  ;;  %v17511_v45 = vld [vmem:[#allocation9_spill] sm:$0xff] }
 0x231   : > { %11849 = vmatprep.mubr.msk.f32.mxu0 %vm333_vm1, %v13462_v46  ;;  %v17512_v46 = vld [vmem:[#allocation36_spill] sm:$0xff] }
 0x234   : > { %11850 = vmatmul.mubr.msk.f32.gmra.mrb[8].mxu0 %vm333_vm1, %v13468_v47  ;;  %v3151_v47 = vld [vmem:[#allocation2 + $0x199] sm:$0xff] }
 0x235   : > { %11852 = vmatprep.mubr.msk.f32.mxu0 %vm333_vm1, %v13470_v48  ;;  %v17513_v48 = vld [vmem:[#allocation37_spill] sm:$0xff] }
 0x238   : > { %11853 = vmatmul.mubr.msk.f32.gmra.mrb[10].mxu0 %vm333_vm1, %v13476_v49  ;;  %v3152_v49 = vld [vmem:[#allocation2 + $0x1a1] sm:$0xff] }
 0x239   : > { %11855 = vmatprep.mubr.msk.f32.mxu0 %vm333_vm1, %v13478_v50  ;;  %v17514_v50 = vld [vmem:[#allocation12_spill] sm:$0xff] }
 0x23c   : > { %11856 = vmatmul.mubr.msk.f32.gmra.mrb[12].mxu0 %vm333_vm1, %v13484_v51  ;;  %v17515_v51 = vld [vmem:[#allocation13_spill] sm:$0xff] }
 0x23d   : > { %11858 = vmatprep.mubr.msk.f32.mxu0 %vm333_vm1, %v13486_v52  ;;  %v17516_v52 = vld [vmem:[#allocation14_spill] sm:$0xff] }
 0x240   : > { %11859 = vmatmul.mubr.msk.f32.gmra.mrb[14].mxu0 %vm333_vm1, %v13492_v53  ;;  %v17517_v53 = vld [vmem:[#allocation15_spill] sm:$0xff] }
 0x241   : > { %11861 = vmatprep.mubr.msk.f32.mxu0 %vm333_vm1, %v13494_v54  ;;  %v17518_v54 = vld [vmem:[#allocation16_spill] sm:$0xff] }
 0x244   : > { %11862 = vmatmul.mubr.msk.f32.gmra.mrb[16].mxu0 %vm333_vm1, %v13500_v55  ;;  %v17519_v55 = vld [vmem:[#allocation17_spill] sm:$0xff] }
 0x245   : > { %11864 = vmatprep.mubr.msk.f32.mxu0 %vm333_vm1, %v13502_v56  ;;  %v17520_v56 = vld [vmem:[#allocation18_spill] sm:$0xff] }
 0x248   : > { %11865 = vmatmul.mubr.msk.f32.gmra.mrb[18].mxu0 %vm333_vm1, %v13508_v57  ;;  %v17521_v57 = vld [vmem:[#allocation19_spill] sm:$0xff] }
 0x249   : > { %11867 = vmatprep.mubr.msk.f32.mxu0 %vm333_vm1, %v13510_v58  ;;  %v17522_v58 = vld [vmem:[#allocation20_spill] sm:$0xff] }
 0x24c   : > { %11868 = vmatmul.mubr.msk.f32.gmra.mrb[20].mxu0 %vm333_vm1, %v13516_v59  ;;  %v17523_v59 = vld [vmem:[#allocation21_spill] sm:$0xff] }
 0x24d   : > { %11870 = vmatprep.mubr.msk.f32.mxu0 %vm333_vm1, %v13518_v60  ;;  %v17524_v60 = vld [vmem:[#allocation22_spill] sm:$0xff] }
 0x250   : > { %11871 = vmatmul.mubr.msk.f32.gmra.mrb[22].mxu0 %vm333_vm1, %v13524_v61  ;;  %v17525_v61 = vld [vmem:[#allocation23_spill] sm:$0xff] }
 0x251   : > { %11873 = vmatprep.mubr.msk.f32.mxu0 %vm333_vm1, %v17508_v36 }
 0x254   : > { %11874 = vmatmul.mubr.msk.f32.gmra.mrb[24].mxu0 %vm333_vm1, %v17509_v43 }
 0x255   : > { %11876 = vmatprep.mubr.msk.f32.mxu0 %vm333_vm1, %v17510_v44 }
 0x258   : > { %11877 = vmatmul.mubr.msk.f32.gmra.mrb[26].mxu0 %vm333_vm1, %v17511_v45 }
 0x259   : > { %11879 = vmatprep.mubr.msk.f32.mxu0 %vm333_vm1, %v17512_v46 }
 0x25c   : > { %11880 = vmatmul.mubr.msk.f32.gmra.mrb[28].mxu0 %vm333_vm1, %v17513_v48 }
 0x25d   : > { %11882 = vmatprep.mubr.msk.f32.mxu0 %vm333_vm1, %v3151_v47 }
 0x260   : > { %11883 = vmatmul.mubr.msk.f32.gmra.mrb[30].mxu0 %vm333_vm1, %v3152_v49  ;;  %v14379_v49 = vld [vmem:[%s17319_s3 + $0x5] ss:$0 sm:$0xff] }
 0x261   : > { %11887 = vmatprep.mubr.msk.f32.mxu0 %vm333_vm1, %v17514_v50  ;;  %v14384_v50 = vld [vmem:[%s17319_s3 + $0x6] ss:$0 sm:$0xff] }
 0x264   : > { %11888 = vmatmul.mubr.msk.f32.vlgmr.msra.gmra.mrb[0].mxu0 %vm333_vm1, %v17515_v51 }
 0x265   : > { %11890 = vmatprep.mubr.msk.f32.mxu0 %vm333_vm1, %v17516_v52 }
 0x268   : > { %11891 = vmatmul.mubr.msk.f32.gmra.mrb[2].mxu0 %vm333_vm1, %v17517_v53 }
 0x269   : > { %11893 = vmatprep.mubr.msk.f32.mxu0 %vm333_vm1, %v17518_v54  ;;  %v14391_v54 = vld [vmem:[%s17319_s3 + $0x4] ss:$0 sm:$0xff] }
 0x26c   : > { %11894 = vmatmul.mubr.msk.f32.gmra.mrb[4].mxu0 %vm333_vm1, %v17519_v55 }
 0x26d   : > { %11896 = vmatprep.mubr.msk.f32.mxu0 %vm333_vm1, %v17520_v56 }
 0x270   : > { %11897 = vmatmul.mubr.msk.f32.gmra.mrb[6].mxu0 %vm333_vm1, %v17521_v57 }
 0x271   : > { %11899 = vmatprep.mubr.msk.f32.mxu0 %vm333_vm1, %v17522_v58 }
 0x274   : > { %11900 = vmatmul.mubr.msk.f32.gmra.mrb[8].mxu0 %vm333_vm1, %v17523_v59 }
 0x275   : > { %11902 = vmatprep.mubr.msk.f32.mxu0 %vm333_vm1, %v17524_v60 }
 0x278   : > { %11903 = vmatmul.mubr.msk.f32.gmra.mrb[10].mxu0 %vm333_vm1, %v17525_v61 }
 0x279   : > { %11905 = vmatprep.mubr.msk.f32.mxu0 %vm333_vm1, %v17526_v14 }
 0x27c   : > { %11906 = vmatmul.mubr.msk.f32.gmra.mrb[12].mxu0 %vm333_vm1, %v17498_v29 }
 0x27d   : > { %11908 = vmatprep.mubr.msk.f32.mxu0 %vm333_vm1, %v17527_v15 }
 0x280   : > { %11909 = vmatmul.mubr.msk.f32.gmra.mrb[14].mxu0 %vm333_vm1, %v17500_v33  ;;  %v4296_v33 = vld [vmem:[#allocation3 + $0x2] sm:$0xff] }
 0x281   : > { %11911 = vmatprep.mubr.msk.f32.mxu0 %vm333_vm1, %v17528_v16 }
 0x284   : > { %11912 = vmatmul.mubr.msk.f32.gmra.mrb[16].mxu0 %vm333_vm1, %v17502_v30 }
 0x285   : > { %11914 = vmatprep.mubr.msk.f32.mxu0 %vm333_vm1, %v17503_v34  ;;  %v14359_v34 = vld [vmem:[%s17319_s3 + $0x2] ss:$0 sm:$0xff] }
 0x286   : > { %v4333_v43 = vmul.f32 %v14359_v34, %v4296_v33  ;;  %v4334_v46 = vmul.f32 %v14359_v34, %v4297_v9 }
 0x288   : > { %11915 = vmatmul.mubr.msk.f32.gmra.mrb[18].mxu0 %vm333_vm1, %v17529_v17 }
 0x289   : > { %11917 = vmatprep.mubr.msk.f32.mxu0 %vm333_vm1, %v17505_v28  ;;  %v4232_v28 = vmul.f32 %v14347_v37, %v4195_v32 }
 0x28b   : > { %v4264_v36 = vadd.f32 %v4232_v28, %v4131_v5 }
 0x28c   : > { %11918 = vmatmul.mubr.msk.f32.gmra.mrb[20].mxu0 %vm333_vm1, %v13782_v1  ;;  %v3541_v1 = vld [vmem:[#allocation2 + $0x19a] sm:$0xff] }
 0x28d   : > { %11920 = vmatprep.mubr.msk.f32.mxu0 %vm333_vm1, %v17530_v18  ;;  %v4365_v57 = vadd.f32 %v4333_v43, %v4264_v36 }
 0x290   : > { %11921 = vmatmul.mubr.msk.f32.gmra.mrb[22].mxu0 %vm333_vm1, %v13790_v0  ;;  %v3542_v0 = vld [vmem:[#allocation2 + $0x1a2] sm:$0xff] }
 0x291   : > { %11923 = vmatprep.mubr.msk.f32.mxu0 %vm333_vm1, %v17507_v62  ;;  %v17532_v62 = vmov 0.0  }
 0x292   : > { %5117 = vst.msk [vmem:[#allocation4 + $0x18] sm:$0xff] %vm5112_vm3, %v17532_v62  ;;  %5118 = vst.msk [vmem:[#allocation4 + $0x20] sm:$0xff] %vm5112_vm3, %v17532_v62 }
 0x293   : > { %5113 = vst.msk [vmem:[#allocation4] sm:$0xff] %vm5112_vm3, %v17532_v62  ;;  %5114 = vst.msk [vmem:[#allocation4 + $0x8] sm:$0xff] %vm5112_vm3, %v17532_v62 }
 0x294   : > { %11924 = vmatmul.mubr.msk.f32.gmra.mrb[24].mxu0 %vm333_vm1, %v13798_v40  ;;  %5120 = vst.msk [vmem:[#allocation4 + $0x30] sm:$0xff] %vm5112_vm3, %v17532_v62  ;;  %5121 = vst.msk [vmem:[#allocation4 + $0x38] sm:$0xff] %vm5112_vm3, %v17532_v62 }
 0x295   : > { %11926 = vmatprep.mubr.msk.f32.mxu0 %vm333_vm1, %v17531_v19  ;;  %5123 = vst.msk [vmem:[#allocation4 + $0x48] sm:$0xff] %vm5112_vm3, %v17532_v62  ;;  %5124 = vst.msk [vmem:[#allocation4 + $0x50] sm:$0xff] %vm5112_vm3, %v17532_v62 }
 0x296   : > { %5126 = vst.msk [vmem:[#allocation4 + $0x60] sm:$0xff] %vm5112_vm3, %v17532_v62  ;;  %5127 = vst.msk [vmem:[#allocation4 + $0x68] sm:$0xff] %vm5112_vm3, %v17532_v62 }
 0x297   : > { %5129 = vst.msk [vmem:[#allocation4 + $0x78] sm:$0xff] %vm5112_vm3, %v17532_v62  ;;  %5130 = vst.msk [vmem:[#allocation4 + $0x80] sm:$0xff] %vm5112_vm3, %v17532_v62 }
 0x298   : > { %11927 = vmatmul.mubr.msk.f32.gmra.mrb[26].mxu0 %vm333_vm1, %v13806_v7  ;;  %5132 = vst.msk [vmem:[#allocation4 + $0x90] sm:$0xff] %vm5112_vm3, %v17532_v62  ;;  %5133 = vst.msk [vmem:[#allocation4 + $0x98] sm:$0xff] %vm5112_vm3, %v17532_v62 }
 0x299   : > { %11929 = vmatprep.mubr.msk.f32.mxu0 %vm333_vm1, %v14020_v35  ;;  %5135 = vst.msk [vmem:[#allocation4 + $0xa8] sm:$0xff] %vm5112_vm3, %v17532_v62  ;;  %5136 = vst.msk [vmem:[#allocation4 + $0xb0] sm:$0xff] %vm5112_vm3, %v17532_v62  ;;  %v4233_v35 = vmul.f32 %v14347_v37, %v4196_v3 }
 0x29a   : > { %5138 = vst.msk [vmem:[#allocation4 + $0xc0] sm:$0xff] %vm5112_vm3, %v17532_v62  ;;  %5139 = vst.msk [vmem:[#allocation4 + $0xc8] sm:$0xff] %vm5112_vm3, %v17532_v62 }
 0x29b   : > { %5141 = vst.msk [vmem:[#allocation4 + $0xd8] sm:$0xff] %vm5112_vm3, %v17532_v62  ;;  %5142 = vst.msk [vmem:[#allocation4 + $0xe0] sm:$0xff] %vm5112_vm3, %v17532_v62  ;;  %v4265_v45 = vadd.f32 %v4233_v35, %v4132_v63 }
 0x29c   : > { %11930 = vmatmul.mubr.msk.f32.gmra.mrb[28].mxu0 %vm333_vm1, %v14026_v8  ;;  %5144 = vst.msk [vmem:[#allocation4 + $0xf0] sm:$0xff] %vm5112_vm3, %v17532_v62  ;;  %5145 = vst.msk [vmem:[#allocation4 + $0xf8] sm:$0xff] %vm5112_vm3, %v17532_v62 }
 0x29d   : > { %11932 = vmatprep.mubr.msk.f32.mxu0 %vm333_vm1, %v3541_v1  ;;  %5147 = vst.msk [vmem:[#allocation4 + $0x108] sm:$0xff] %vm5112_vm3, %v17532_v62  ;;  %5148 = vst.msk [vmem:[#allocation4 + $0x110] sm:$0xff] %vm5112_vm3, %v17532_v62  ;;  %v4366_v16 = vadd.f32 %v4334_v46, %v4265_v45 }
 0x29e   : > { %5150 = vst.msk [vmem:[#allocation4 + $0x120] sm:$0xff] %vm5112_vm3, %v17532_v62  ;;  %5151 = vst.msk [vmem:[#allocation4 + $0x128] sm:$0xff] %vm5112_vm3, %v17532_v62 }
 0x29f   : > { %5153 = vst.msk [vmem:[#allocation4 + $0x138] sm:$0xff] %vm5112_vm3, %v17532_v62  ;;  %5154 = vst.msk [vmem:[#allocation4 + $0x140] sm:$0xff] %vm5112_vm3, %v17532_v62 }
 0x2a0   : > { %11933 = vmatmul.mubr.msk.f32.gmra.mrb[30].mxu0 %vm333_vm1, %v3542_v0  ;;  %5156 = vst.msk [vmem:[#allocation4 + $0x150] sm:$0xff] %vm5112_vm3, %v17532_v62  ;;  %5157 = vst.msk [vmem:[#allocation4 + $0x158] sm:$0xff] %vm5112_vm3, %v17532_v62 }
 0x2a1   : > { %5159 = vst.msk [vmem:[#allocation4 + $0x168] sm:$0xff] %vm5112_vm3, %v17532_v62  ;;  %5160 = vst.msk [vmem:[#allocation4 + $0x170] sm:$0xff] %vm5112_vm3, %v17532_v62 }
 0x2a2   : > { %5162 = vst.msk [vmem:[#allocation4 + $0x180] sm:$0xff] %vm5112_vm3, %v17532_v62  ;;  %5163 = vst.msk [vmem:[#allocation4 + $0x188] sm:$0xff] %vm5112_vm3, %v17532_v62 }
 0x2a3   : > { %5165 = vst.msk [vmem:[#allocation4 + $0x198] sm:$0xff] %vm5112_vm3, %v17532_v62  ;;  %5166 = vst.msk [vmem:[#allocation4 + $0x1a0] sm:$0xff] %vm5112_vm3, %v17532_v62 }
 0x2a4   : > { %5119 = vst.msk [vmem:[#allocation4 + $0x28] sm:$0x3] %vm5115_vm4, %v17532_v62  ;;  %5116 = vst.msk [vmem:[#allocation4 + $0x10] sm:$0x3] %vm5115_vm4, %v17532_v62 }
 0x2a5   : > { %5122 = vst.msk [vmem:[#allocation4 + $0x40] sm:$0x3] %vm5115_vm4, %v17532_v62  ;;  %5125 = vst.msk [vmem:[#allocation4 + $0x58] sm:$0x3] %vm5115_vm4, %v17532_v62 }
 0x2a6   : > { %5128 = vst.msk [vmem:[#allocation4 + $0x70] sm:$0x3] %vm5115_vm4, %v17532_v62  ;;  %5131 = vst.msk [vmem:[#allocation4 + $0x88] sm:$0x3] %vm5115_vm4, %v17532_v62 }
 0x2a7   : > { %5134 = vst.msk [vmem:[#allocation4 + $0xa0] sm:$0x3] %vm5115_vm4, %v17532_v62  ;;  %5137 = vst.msk [vmem:[#allocation4 + $0xb8] sm:$0x3] %vm5115_vm4, %v17532_v62 }
 0x2a8   : > { %5140 = vst.msk [vmem:[#allocation4 + $0xd0] sm:$0x3] %vm5115_vm4, %v17532_v62  ;;  %5143 = vst.msk [vmem:[#allocation4 + $0xe8] sm:$0x3] %vm5115_vm4, %v17532_v62 }
 0x2a9   : > { %5146 = vst.msk [vmem:[#allocation4 + $0x100] sm:$0x3] %vm5115_vm4, %v17532_v62  ;;  %5149 = vst.msk [vmem:[#allocation4 + $0x118] sm:$0x3] %vm5115_vm4, %v17532_v62 }
 0x2aa   : > { %5152 = vst.msk [vmem:[#allocation4 + $0x130] sm:$0x3] %vm5115_vm4, %v17532_v62  ;;  %5155 = vst.msk [vmem:[#allocation4 + $0x148] sm:$0x3] %vm5115_vm4, %v17532_v62 }
 0x2ab   : > { %5158 = vst.msk [vmem:[#allocation4 + $0x160] sm:$0x3] %vm5115_vm4, %v17532_v62  ;;  %5161 = vst.msk [vmem:[#allocation4 + $0x178] sm:$0x3] %vm5115_vm4, %v17532_v62 }
 0x2ac   : > { %5164 = vst.msk [vmem:[#allocation4 + $0x190] sm:$0x3] %vm5115_vm4, %v17532_v62  ;;  %5167 = vst.msk [vmem:[#allocation4 + $0x1a8] sm:$0x3] %vm5115_vm4, %v17532_v62 }
 0x337   : > { %v11889_v21 = vpop.f32.mrb[0].mxu0 }
 0x338   : > { %v3907_v23 = vmul.f32 %v11889_v21, %v14329_v20  ;;  %v3710_v24 = vpop.f32.mrb[1].mxu0  ;;  %v14409_v21 = vld [vmem:[%s17319_s3 + $0x9] ss:$0 sm:$0xff] }
 0x339   : > { %v3906_v25 = vmul.f32 %v14329_v20, %v3710_v24 }
 0x33a   : > { %v3944_v27 = vadd.f32 %v14334_v22, %v3907_v23 }
 0x33b   : > { %v3943_v38 = vadd.f32 %v14334_v22, %v3906_v25  ;;  %v11892_v39 = vpop.f32.mrb[2].mxu0 }
 0x33c   : > { %v3976_v4 = vmax.f32 %v3944_v27, 0.0  ;;  %v3909_v40 = vmul.f32 %v11892_v39, %v14329_v20  ;;  %v3720_v41 = vpop.f32.mrb[3].mxu0  ;;  %v14427_v39 = vld [vmem:[%s17319_s3 + $0xa] ss:$0 sm:$0xff] }
 0x33d   : > { %v3975_v7 = vmax.f32 %v3943_v38, 0.0  ;;  %v3908_v2 = vmul.f32 %v14329_v20, %v3720_v41  ;;  %v14422_v38 = vld [vmem:[%s17319_s3 + $0x8] ss:$0 sm:$0xff] }
 0x33e   : > { %4063 = vst.msk [vmem:[#allocation3 + $0x21] sm:$0xff] %vm333_vm1, %v3976_v4  ;;  %v3946_v30 = vadd.f32 %v14334_v22, %v3909_v40  ;;  %5170 = vst.msk [vmem:[#allocation4 + $0x21] sm:$0xff] %vm333_vm1, %v3976_v4 }
 0x33f   : > { %4062 = vst.msk [vmem:[#allocation3 + $0x19] sm:$0xff] %vm333_vm1, %v3975_v7  ;;  %v3945_v29 = vadd.f32 %v14334_v22, %v3908_v2  ;;  %v11895_v8 = vpop.f32.mrb[4].mxu0  ;;  %5169 = vst.msk [vmem:[#allocation4 + $0x19] sm:$0xff] %vm333_vm1, %v3975_v7 }
 0x340   : > { %v3978_v10 = vmax.f32 %v3946_v30, 0.0  ;;  %v3911_v11 = vmul.f32 %v11895_v8, %v14329_v20  ;;  %v3730_v6 = vpop.f32.mrb[5].mxu0 }
 0x341   : > { %v3977_v12 = vmax.f32 %v3945_v29, 0.0  ;;  %v3910_v13 = vmul.f32 %v14329_v20, %v3730_v6 }
 0x342   : > { %4065 = vst.msk [vmem:[#allocation3 + $0x39] sm:$0xff] %vm333_vm1, %v3978_v10  ;;  %v3948_v44 = vadd.f32 %v14334_v22, %v3911_v11  ;;  %5172 = vst.msk [vmem:[#allocation4 + $0x39] sm:$0xff] %vm333_vm1, %v3978_v10 }
 0x343   : > { %4064 = vst.msk [vmem:[#allocation3 + $0x31] sm:$0xff] %vm333_vm1, %v3977_v12  ;;  %v3947_v47 = vadd.f32 %v14334_v22, %v3910_v13  ;;  %v11898_v48 = vpop.f32.mrb[6].mxu0  ;;  %5171 = vst.msk [vmem:[#allocation4 + $0x31] sm:$0xff] %vm333_vm1, %v3977_v12 }
 0x344   : > { %v3980_v51 = vmax.f32 %v3948_v44, 0.0  ;;  %v3913_v52 = vmul.f32 %v11898_v48, %v14329_v20  ;;  %v3740_v53 = vpop.f32.mrb[7].mxu0 }
 0x345   : > { %v3979_v55 = vmax.f32 %v3947_v47, 0.0  ;;  %v3912_v56 = vmul.f32 %v14329_v20, %v3740_v53  ;;  %v4500_v58 = vld [vmem:[#allocation3 + $0x21] sm:$0xff] }
 0x346   : > { %v14394_v59 = vld [vmem:[#allocation3 + $0x22] sm:$0xff]  ;;  %4067 = vst.msk [vmem:[#allocation3 + $0x51] sm:$0xff] %vm333_vm1, %v3980_v51  ;;  %v3950_v60 = vadd.f32 %v14334_v22, %v3913_v52  ;;  %v4397_v61 = vld [vmem:[#allocation3 + $0x18] sm:$0xff]  ;;  %v4537_v17 = vmul.f32 %v14379_v49, %v4500_v58  ;;  %5174 = vst.msk [vmem:[#allocation4 + $0x51] sm:$0xff] %vm333_vm1, %v3980_v51  ;;  %v14414_v24 = vmul.f32 %v14347_v37, %v4500_v58 }
 0x347   : > { %v4499_v14 = vld [vmem:[#allocation3 + $0x19] sm:$0xff]  ;;  %v4638_v18 = vmul.f32 %v14384_v50, %v14394_v59  ;;  %4066 = vst.msk [vmem:[#allocation3 + $0x49] sm:$0xff] %vm333_vm1, %v3979_v55  ;;  %v3949_v19 = vadd.f32 %v14334_v22, %v3912_v56  ;;  %v11901_v1 = vpop.f32.mrb[8].mxu0  ;;  %v4435_v0 = vmul.f32 %v14391_v54, %v4397_v61  ;;  %5173 = vst.msk [vmem:[#allocation4 + $0x49] sm:$0xff] %vm333_vm1, %v3979_v55 }
 0x348   : > { %v4600_v15 = vld [vmem:[#allocation3 + $0x1a] sm:$0xff]  ;;  %v4536_v62 = vmul.f32 %v14379_v49, %v4499_v14  ;;  %v3982_v25 = vmax.f32 %v3950_v60, 0.0  ;;  %v3915_v26 = vmul.f32 %v11901_v1, %v14329_v20  ;;  %v3750_v27 = vpop.f32.mrb[9].mxu0  ;;  %v4133_v2 = vmul.f32 %v14342_v31, %v4397_v61 }
 0x349   : > { %v14411_v23 = vld [vmem:[#allocation3 + $0x20] sm:$0xff]  ;;  %v4637_v32 = vmul.f32 %v14384_v50, %v4600_v15  ;;  %v3981_v3 = vmax.f32 %v3949_v19, 0.0  ;;  %v3914_v4 = vmul.f32 %v14329_v20, %v3750_v27  ;;  %v4467_v40 = vadd.f32 %v4435_v0, %v4365_v57 }
 0x34a   : > { %v4436_v42 = vmul.f32 %v14391_v54, %v14411_v23  ;;  %v14432_v41 = vld [vmem:[#allocation3 + $0x39] sm:$0xff]  ;;  %4069 = vst.msk [vmem:[#allocation3 + $0x69] sm:$0xff] %vm333_vm1, %v3982_v25  ;;  %v3952_v5 = vadd.f32 %v14334_v22, %v3915_v26  ;;  %v14439_v28 = vld [vmem:[#allocation3 + $0x30] sm:$0xff]  ;;  %v4234_v35 = vmul.f32 %v14347_v37, %v4499_v14  ;;  %5176 = vst.msk [vmem:[#allocation4 + $0x69] sm:$0xff] %vm333_vm1, %v3982_v25 }
 0x34b   : > { %v14434_v7 = vld [vmem:[#allocation3 + $0x3a] sm:$0xff]  ;;  %v14441_v30 = vld [vmem:[#allocation3 + $0x31] sm:$0xff]  ;;  %v4842_v63 = vmul.f32 %v14409_v21, %v14432_v41  ;;  %4068 = vst.msk [vmem:[#allocation3 + $0x61] sm:$0xff] %vm333_vm1, %v3981_v3  ;;  %v3951_v29 = vadd.f32 %v14334_v22, %v3914_v4  ;;  %v11904_v8 = vpop.f32.mrb[10].mxu0  ;;  %v4568_v9 = vadd.f32 %v4536_v62, %v4467_v40  ;;  %v4740_v10 = vmul.f32 %v14422_v38, %v14439_v28 }
 0x34c   : > { %v4468_v33 = vadd.f32 %v4436_v42, %v4366_v16  ;;  %v14451_v11 = vld [vmem:[#allocation3 + $0x38] sm:$0xff]  ;;  %v4943_v6 = vmul.f32 %v14427_v39, %v14434_v7  ;;  %5175 = vst.msk [vmem:[#allocation4 + $0x61] sm:$0xff] %vm333_vm1, %v3981_v3  ;;  %v3984_v12 = vmax.f32 %v3952_v5, 0.0  ;;  %v3917_v13 = vmul.f32 %v11904_v8, %v14329_v20  ;;  %v3760_v36 = vpop.f32.mrb[11].mxu0  ;;  %v14488_v42 = vld [vmem:[%s17320_s4] ss:$0 sm:$0xff] }
 0x34d   : > { %v4841_v43 = vmul.f32 %v14409_v21, %v14441_v30  ;;  %v14459_v44 = vld [vmem:[#allocation3 + $0x32] sm:$0xff]  ;;  %v3983_v46 = vmax.f32 %v3951_v29, 0.0  ;;  %v3916_v47 = vmul.f32 %v14329_v20, %v3760_v36  ;;  %v4669_v48 = vadd.f32 %v4637_v32, %v4568_v9 }
 0x34e   : > { %v4569_v45 = vadd.f32 %v4537_v17, %v4468_v33  ;;  %v4741_v51 = vmul.f32 %v14422_v38, %v14451_v11  ;;  %4071 = vst.msk [vmem:[#allocation3 + $0x81] sm:$0xff] %vm333_vm1, %v3984_v12  ;;  %v3954_v52 = vadd.f32 %v14334_v22, %v3917_v13  ;;  %v4266_v55 = vadd.f32 %v4234_v35, %v4133_v2  ;;  %v14476_v1 = vld [vmem:[#allocation3 + $0x48] sm:$0xff] }
 0x34f   : > { %v4335_v56 = vmul.f32 %v14359_v34, %v4600_v15  ;;  %5178 = vst.msk [vmem:[#allocation4 + $0x81] sm:$0xff] %vm333_vm1, %v3984_v12  ;;  %4070 = vst.msk [vmem:[#allocation3 + $0x79] sm:$0xff] %vm333_vm1, %v3983_v46  ;;  %v3953_v57 = vadd.f32 %v14334_v22, %v3916_v47  ;;  %v11907_v58 = vpop.f32.mrb[12].mxu0  ;;  %v4772_v60 = vadd.f32 %v4740_v10, %v4669_v48  ;;  %v14478_v0 = vld [vmem:[#allocation3 + $0x49] sm:$0xff]  ;;  %v14504_v10 = vld [vmem:[%s17320_s4 + $0x1] ss:$0 sm:$0xff] }
 0x350   : > { %v4670_v53 = vadd.f32 %v4638_v18, %v4569_v45  ;;  %v4942_v61 = vmul.f32 %v14427_v39, %v14459_v44  ;;  %v4437_v14 = vmul.f32 %v14391_v54, %v14439_v28  ;;  %5177 = vst.msk [vmem:[#allocation4 + $0x79] sm:$0xff] %vm333_vm1, %v3983_v46  ;;  %v3986_v16 = vmax.f32 %v3954_v52, 0.0  ;;  %v3770_v15 = vpop.f32.mrb[13].mxu0 }
 0x351   : > { %v3919_v17 = vmul.f32 %v11907_v58, %v14329_v20  ;;  %v4367_v19 = vadd.f32 %v4335_v56, %v4266_v55  ;;  %v3985_v62 = vmax.f32 %v3953_v57, 0.0  ;;  %v3918_v25 = vmul.f32 %v14329_v20, %v3770_v15 }
 0x352   : > { %v4773_v18 = vadd.f32 %v4741_v51, %v4670_v53  ;;  %v4873_v26 = vadd.f32 %v4841_v43, %v4772_v60  ;;  %v4538_v27 = vmul.f32 %v14379_v49, %v14441_v30  ;;  %4073 = vst.msk [vmem:[#allocation3 + $0x99] sm:$0xff] %vm333_vm1, %v3986_v16  ;;  %v4639_v40 = vmul.f32 %v14384_v50, %v14459_v44 }
 0x353   : > { %v3956_v32 = vadd.f32 %v14334_v22, %v3919_v17  ;;  %v4469_v4 = vadd.f32 %v4437_v14, %v4367_v19  ;;  %5180 = vst.msk [vmem:[#allocation4 + $0x99] sm:$0xff] %vm333_vm1, %v3986_v16  ;;  %4072 = vst.msk [vmem:[#allocation3 + $0x91] sm:$0xff] %vm333_vm1, %v3985_v62  ;;  %v3955_v2 = vadd.f32 %v14334_v22, %v3918_v25  ;;  %v11910_v5 = vpop.f32.mrb[14].mxu0  ;;  %v14532_v25 = vld [vmem:[#allocation3 + $0x50] sm:$0xff] }
 0x354   : > { %v4874_v3 = vadd.f32 %v4842_v63, %v4773_v18  ;;  %v4974_v33 = vadd.f32 %v4942_v61, %v4873_v26  ;;  %v4742_v35 = vmul.f32 %v14422_v38, %v14476_v1  ;;  %v4843_v29 = vmul.f32 %v14409_v21, %v14478_v0  ;;  %5179 = vst.msk [vmem:[#allocation4 + $0x91] sm:$0xff] %vm333_vm1, %v3985_v62  ;;  %v3780_v9 = vpop.f32.mrb[15].mxu0 }
 0x355   : > { %v3988_v63 = vmax.f32 %v3956_v32, 0.0  ;;  %v3921_v8 = vmul.f32 %v11910_v5, %v14329_v20  ;;  %v4570_v13 = vadd.f32 %v4538_v27, %v4469_v4  ;;  %v3987_v36 = vmax.f32 %v3955_v2, 0.0 }
 0x356   : > { %v4975_v12 = vadd.f32 %v4943_v6, %v4874_v3  ;;  %v3920_v43 = vmul.f32 %v14329_v20, %v3780_v9  ;;  %v5011_v45 = vmul.f32 %v14488_v42, %v4974_v33  ;;  %v4134_v46 = vmul.f32 %v14342_v31, %v14411_v23  ;;  %v14519_v23 = vld [vmem:[#allocation3 + $0x4a] sm:$0xff] }
 0x357   : > { %4075 = vst.msk [vmem:[#allocation3 + $0xb1] sm:$0xff] %vm333_vm1, %v3988_v63  ;;  %v3958_v47 = vadd.f32 %v14334_v22, %v3921_v8  ;;  %v4671_v51 = vadd.f32 %v4639_v40, %v4570_v13  ;;  %v4336_v52 = vmul.f32 %v14359_v34, %v14394_v59  ;;  %5182 = vst.msk [vmem:[#allocation4 + $0xb1] sm:$0xff] %vm333_vm1, %v3988_v63  ;;  %v11913_v53 = vpop.f32.mrb[16].mxu0 }
 0x358   : > { %v5012_v48 = vmul.f32 %v14488_v42, %v4975_v12  ;;  %4074 = vst.msk [vmem:[#allocation3 + $0xa9] sm:$0xff] %vm333_vm1, %v3987_v36  ;;  %v3957_v6 = vadd.f32 %v14334_v22, %v3920_v43  ;;  %v5048_v55 = vadd.f32 %v14504_v10, %v5011_v45  ;;  %v4267_v56 = vadd.f32 %v14414_v24, %v4134_v46  ;;  %v3790_v60 = vpop.f32.mrb[17].mxu0 }
 0x359   : > { %v4438_v57 = vmul.f32 %v14391_v54, %v14451_v11  ;;  %5181 = vst.msk [vmem:[#allocation4 + $0xa9] sm:$0xff] %vm333_vm1, %v3987_v36  ;;  %v3990_v58 = vmax.f32 %v3958_v47, 0.0  ;;  %v3923_v59 = vmul.f32 %v11913_v53, %v14329_v20  ;;  %v4774_v14 = vadd.f32 %v4742_v35, %v4671_v51  ;;  %v14550_v36 = vld [vmem:[#allocation3 + $0x51] sm:$0xff] }
 0x35a   : > { %v5049_v61 = vadd.f32 %v14504_v10, %v5012_v48  ;;  %v3989_v16 = vmax.f32 %v3957_v6, 0.0  ;;  %v3922_v17 = vmul.f32 %v14329_v20, %v3790_v60  ;;  %v5080_v15 = vmax.f32 %v5048_v55, 0.0  ;;  %v14567_v55 = vld [vmem:[#allocation3 + $0x52] sm:$0xff] }
 0x35b   : > { %v4368_v18 = vadd.f32 %v4336_v52, %v4267_v56  ;;  %4077 = vst.msk [vmem:[#allocation3 + $0xc9] sm:$0xff] %vm333_vm1, %v3990_v58  ;;  %v3960_v24 = vadd.f32 %v14334_v22, %v3923_v59  ;;  %v4875_v19 = vadd.f32 %v4843_v29, %v4774_v14  ;;  %v4944_v62 = vmul.f32 %v14427_v39, %v14519_v23  ;;  %v11916_v27 = vpop.f32.mrb[18].mxu0 }
 0x35c   : > { %5184 = vst.msk [vmem:[#allocation4 + $0xc9] sm:$0xff] %vm333_vm1, %v3990_v58  ;;  %4076 = vst.msk [vmem:[#allocation3 + $0xc1] sm:$0xff] %vm333_vm1, %v3989_v16  ;;  %v3959_v26 = vadd.f32 %v14334_v22, %v3922_v17  ;;  %5233 = vrot.lane.b32.xlu0 %v5080_v15, %s12940_s23  ;;  %v5081_v32 = vmax.f32 %v5049_v61, 0.0  ;;  %v4539_v4 = vmul.f32 %v14379_v49, %v14432_v41  ;;  %v3800_v5 = vpop.f32.mrb[19].mxu0 }
 0x35d   : > { %v4470_v3 = vadd.f32 %v4438_v57, %v4368_v18  ;;  %5183 = vst.msk [vmem:[#allocation4 + $0xc1] sm:$0xff] %vm333_vm1, %v3989_v16  ;;  %v3992_v40 = vmax.f32 %v3960_v24, 0.0  ;;  %v3925_v2 = vmul.f32 %v11916_v27, %v14329_v20  ;;  %v4976_v33 = vadd.f32 %v4944_v62, %v4875_v19  ;;  %v14581_v24 = vld [vmem:[#allocation3 + $0x60] sm:$0xff] }
 0x35e   : > { %v4640_v35 = vmul.f32 %v14384_v50, %v14434_v7  ;;  %v3991_v29 = vmax.f32 %v3959_v26, 0.0  ;;  %v3924_v63 = vmul.f32 %v14329_v20, %v3800_v5  ;;  %v4743_v9 = vmul.f32 %v14422_v38, %v14532_v25 }
 0x35f   : > { %v4571_v8 = vadd.f32 %v4539_v4, %v4470_v3  ;;  %4079 = vst.msk [vmem:[#allocation3 + $0xe1] sm:$0xff] %vm333_vm1, %v3992_v40  ;;  %v3962_v12 = vadd.f32 %v14334_v22, %v3925_v2  ;;  %v5013_v13 = vmul.f32 %v14488_v42, %v4976_v33  ;;  %v4135_v43 = vmul.f32 %v14342_v31, %v14439_v28  ;;  %v11919_v47 = vpop.f32.mrb[20].mxu0 }
 0x360   : > { %v4236_v45 = vmul.f32 %v14347_v37, %v14441_v30  ;;  %5186 = vst.msk [vmem:[#allocation4 + $0xe1] sm:$0xff] %vm333_vm1, %v3992_v40  ;;  %4078 = vst.msk [vmem:[#allocation3 + $0xd9] sm:$0xff] %vm333_vm1, %v3991_v29  ;;  %v3961_v46 = vadd.f32 %v14334_v22, %v3924_v63  ;;  %5235 = vrot.lane.b32.xlu0 %v5081_v32, %s12940_s23  ;;  %v4337_v51 = vmul.f32 %v14359_v34, %v14459_v44  ;;  %v3810_v53 = vpop.f32.mrb[21].mxu0  ;;  %v14587_v32 = vld [vmem:[#allocation3 + $0x61] sm:$0xff] }
 0x361   : > { %v4672_v48 = vadd.f32 %v4640_v35, %v4571_v8  ;;  %v4439_v52 = vmul.f32 %v14391_v54, %v14476_v1  ;;  %5185 = vst.msk [vmem:[#allocation4 + $0xd9] sm:$0xff] %vm333_vm1, %v3991_v29  ;;  %v3994_v28 = vmax.f32 %v3962_v12, 0.0  ;;  %v5050_v30 = vadd.f32 %v14504_v10, %v5013_v13  ;;  %v14596_v63 = vld [vmem:[#allocation3 + $0x62] sm:$0xff] }
 0x362   : > { %v3927_v6 = vmul.f32 %v11919_v47, %v14329_v20  ;;  %v4268_v56 = vadd.f32 %v4236_v45, %v4135_v43  ;;  %v3993_v57 = vmax.f32 %v3961_v46, 0.0  ;;  %v3926_v58 = vmul.f32 %v14329_v20, %v3810_v53 }
 0x363   : > { %v4775_v59 = vadd.f32 %v4743_v9, %v4672_v48  ;;  %v4844_v44 = vmul.f32 %v14409_v21, %v14550_v36  ;;  %4081 = vst.msk [vmem:[#allocation3 + $0xf9] sm:$0xff] %vm333_vm1, %v3994_v28  ;;  %v5082_v60 = vmax.f32 %v5050_v30, 0.0  ;;  %5188 = vst.msk [vmem:[#allocation4 + $0xf9] sm:$0xff] %vm333_vm1, %v3994_v28  ;;  %v4945_v15 = vmul.f32 %v14427_v39, %v14567_v55  ;;  %v11922_v19 = vpop.f32.mrb[22].mxu0 }
 0x364   : > { %v3964_v61 = vadd.f32 %v14334_v22, %v3927_v6  ;;  %v4369_v14 = vadd.f32 %v4337_v51, %v4268_v56  ;;  %4080 = vst.msk [vmem:[#allocation3 + $0xf1] sm:$0xff] %vm333_vm1, %v3993_v57  ;;  %v3963_v16 = vadd.f32 %v14334_v22, %v3926_v58  ;;  %v4540_v18 = vmul.f32 %v14379_v49, %v14478_v0  ;;  %v3820_v4 = vpop.f32.mrb[23].mxu0  ;;  %v14612_v51 = vld [vmem:[#allocation3 + $0x68] sm:$0xff] }
 0x365   : > { %v4876_v17 = vadd.f32 %v4844_v44, %v4775_v59  ;;  %5187 = vst.msk [vmem:[#allocation4 + $0xf1] sm:$0xff] %vm333_vm1, %v3993_v57  ;;  %5237 = vrot.lane.b32.xlu1 %v5082_v60, %s12940_s23  ;;  %v4641_v27 = vmul.f32 %v14384_v50, %v14519_v23  ;;  %v3929_v3 = vmul.f32 %v11922_v19, %v14329_v20  ;;  %v14621_v56 = vld [vmem:[#allocation3 + $0x6a] sm:$0xff] }
 0x366   : > { %v3996_v62 = vmax.f32 %v3964_v61, 0.0  ;;  %v4471_v26 = vadd.f32 %v4439_v52, %v4369_v14  ;;  %v3995_v40 = vmax.f32 %v3963_v16, 0.0  ;;  %v3928_v5 = vmul.f32 %v14329_v20, %v3820_v4  ;;  %v14614_v52 = vld [vmem:[#allocation3 + $0x69] sm:$0xff] }
 0x367   : > { %v4977_v2 = vadd.f32 %v4945_v15, %v4876_v17  ;;  %v4136_v33 = vmul.f32 %v14342_v31, %v14451_v11  ;;  %v4744_v29 = vmul.f32 %v14422_v38, %v14581_v24  ;;  %v3966_v8 = vadd.f32 %v14334_v22, %v3929_v3  ;;  %v11925_v45 = vpop.f32.mrb[24].mxu0 }
 0x368   : > { %4083 = vst.msk [vmem:[#allocation3 + $0x111] sm:$0xff] %vm333_vm1, %v3996_v62  ;;  %v4572_v35 = vadd.f32 %v4540_v18, %v4471_v26  ;;  %v4237_v9 = vmul.f32 %v14347_v37, %v14432_v41  ;;  %5190 = vst.msk [vmem:[#allocation4 + $0x111] sm:$0xff] %vm333_vm1, %v3996_v62  ;;  %v4845_v11 = vmul.f32 %v14409_v21, %v14587_v32  ;;  %v3830_v28 = vpop.f32.mrb[25].mxu0  ;;  %v14643_v62 = vld [vmem:[#allocation3 + $0x78] sm:$0xff] }
 0x369   : > { %4082 = vst.msk [vmem:[#allocation3 + $0x109] sm:$0xff] %vm333_vm1, %v3995_v40  ;;  %v5014_v12 = vmul.f32 %v14488_v42, %v4977_v2  ;;  %v3965_v13 = vadd.f32 %v14334_v22, %v3928_v5  ;;  %v4338_v43 = vmul.f32 %v14359_v34, %v14434_v7  ;;  %5189 = vst.msk [vmem:[#allocation4 + $0x109] sm:$0xff] %vm333_vm1, %v3995_v40  ;;  %v3998_v47 = vmax.f32 %v3966_v8, 0.0 }
 0x36a   : > { %v4673_v46 = vadd.f32 %v4641_v27, %v4572_v35  ;;  %v4269_v41 = vadd.f32 %v4237_v9, %v4136_v33  ;;  %v4440_v48 = vmul.f32 %v14391_v54, %v14532_v25  ;;  %v4946_v6 = vmul.f32 %v14427_v39, %v14596_v63 }
 0x36b   : > { %v5051_v30 = vadd.f32 %v14504_v10, %v5014_v12  ;;  %v3997_v7 = vmax.f32 %v3965_v13, 0.0  ;;  %v4541_v53 = vmul.f32 %v14379_v49, %v14550_v36  ;;  %4085 = vst.msk [vmem:[#allocation3 + $0x129] sm:$0xff] %vm333_vm1, %v3998_v47  ;;  %v4642_v59 = vmul.f32 %v14384_v50, %v14567_v55  ;;  %5192 = vst.msk [vmem:[#allocation4 + $0x129] sm:$0xff] %vm333_vm1, %v3998_v47  ;;  %v14636_v17 = vpop.f32.mrb[26].mxu0  ;;  %v14665_v13 = vld [vmem:[#allocation3 + $0x79] sm:$0xff] }
 0x36c   : > { %v4776_v57 = vadd.f32 %v4744_v29, %v4673_v46  ;;  %v4370_v58 = vadd.f32 %v4338_v43, %v4269_v41  ;;  %v4137_v44 = vmul.f32 %v14342_v31, %v14476_v1  ;;  %v4745_v61 = vmul.f32 %v14422_v38, %v14612_v51  ;;  %v14645_v26 = vpop.f32.mrb[27].mxu0  ;;  %v14667_v43 = vld [vmem:[#allocation3 + $0x7a] sm:$0xff] }
 0x36d   : > { %v5083_v60 = vmax.f32 %v5051_v30, 0.0  ;;  %4084 = vst.msk [vmem:[#allocation3 + $0x121] sm:$0xff] %vm333_vm1, %v3997_v7  ;;  %v4846_v14 = vmul.f32 %v14409_v21, %v14614_v52  ;;  %v4238_v16 = vmul.f32 %v14347_v37, %v14478_v0  ;;  %5191 = vst.msk [vmem:[#allocation4 + $0x121] sm:$0xff] %vm333_vm1, %v3997_v7  ;;  %v4947_v18 = vmul.f32 %v14427_v39, %v14621_v56 }
 0x36e   : > { %v4877_v15 = vadd.f32 %v4845_v11, %v4776_v57  ;;  %v4472_v1 = vadd.f32 %v4440_v48, %v4370_v58  ;;  %v4339_v19 = vmul.f32 %v14359_v34, %v14519_v23  ;;  %v4441_v0 = vmul.f32 %v14391_v54, %v14581_v24 }
 0x36f   : > { %5239 = vrot.lane.b32.xlu1 %v5083_v60, %s12940_s23  ;;  %v4270_v27 = vadd.f32 %v4238_v16, %v4137_v44  ;;  %v4542_v3 = vmul.f32 %v14379_v49, %v14587_v32  ;;  %v4643_v4 = vmul.f32 %v14384_v50, %v14596_v63  ;;  %v3931_v23 = vmul.f32 %v11925_v45, %v14329_v20  ;;  %v14662_v9 = vpop.f32.mrb[28].mxu0  ;;  %v14682_v44 = vld [vmem:[#allocation3 + $0x80] sm:$0xff] }
 0x370   : > { %v4978_v40 = vadd.f32 %v4946_v6, %v4877_v15  ;;  %v4573_v2 = vadd.f32 %v4541_v53, %v4472_v1  ;;  %v3930_v5 = vmul.f32 %v14329_v20, %v3830_v28  ;;  %v4746_v35 = vmul.f32 %v14422_v38, %v14643_v62  ;;  %v14671_v47 = vpop.f32.mrb[29].mxu0  ;;  %v14684_v60 = vld [vmem:[#allocation3 + $0x81] sm:$0xff] }
 0x371   : > { %v4371_v33 = vadd.f32 %v4339_v19, %v4270_v27  ;;  %v4138_v29 = vmul.f32 %v14342_v31, %v14532_v25  ;;  %v4239_v8 = vmul.f32 %v14347_v37, %v14550_v36  ;;  %v3968_v45 = vadd.f32 %v14334_v22, %v3931_v23 }
 0x372   : > { %v5015_v12 = vmul.f32 %v14488_v42, %v4978_v40  ;;  %v4674_v11 = vadd.f32 %v4642_v59, %v4573_v2  ;;  %v3967_v46 = vadd.f32 %v14334_v22, %v3930_v5  ;;  %v4340_v36 = vmul.f32 %v14359_v34, %v14567_v55 }
 0x373   : > { %v4473_v41 = vadd.f32 %v4441_v0, %v4371_v33  ;;  %v4271_v25 = vadd.f32 %v4239_v8, %v4138_v29  ;;  %v4442_v48 = vmul.f32 %v14391_v54, %v14612_v51  ;;  %v4000_v6 = vmax.f32 %v3968_v45, 0.0  ;;  %v14686_v55 = vpop.f32.mrb[30].mxu0 }
 0x374   : > { %v5052_v28 = vadd.f32 %v14504_v10, %v5015_v12  ;;  %v4777_v30 = vadd.f32 %v4745_v61, %v4674_v11  ;;  %v3999_v7 = vmax.f32 %v3967_v46, 0.0  ;;  %v4847_v57 = vmul.f32 %v14409_v21, %v14665_v13  ;;  %v14694_v19 = vpop.f32.mrb[31].mxu0 }
 0x375   : > { %v4574_v53 = vadd.f32 %v4542_v3, %v4473_v41  ;;  %v4948_v58 = vmul.f32 %v14427_v39, %v14667_v43  ;;  %v4372_v59 = vadd.f32 %v4340_v36, %v4271_v25  ;;  %4087 = vst.msk [vmem:[#allocation3 + $0x141] sm:$0xff] %vm333_vm1, %v4000_v6  ;;  %v4543_v61 = vmul.f32 %v14379_v49, %v14614_v52  ;;  %v14698_v3 = vld [vmem:[#allocation3 + $0x82] sm:$0xff] }
 0x376   : > { %v5084_v16 = vmax.f32 %v5052_v28, 0.0  ;;  %v4878_v15 = vadd.f32 %v4846_v14, %v4777_v30  ;;  %4086 = vst.msk [vmem:[#allocation3 + $0x139] sm:$0xff] %vm333_vm1, %v3999_v7  ;;  %v4644_v1 = vmul.f32 %v14384_v50, %v14621_v56  ;;  %5193 = vst.msk [vmem:[#allocation4 + $0x139] sm:$0xff] %vm333_vm1, %v3999_v7  ;;  %v4139_v14 = vmul.f32 %v14342_v31, %v14581_v24 }
 0x377   : > { %5194 = vst.msk [vmem:[#allocation4 + $0x141] sm:$0xff] %vm333_vm1, %v4000_v6  ;;  %v4675_v27 = vadd.f32 %v4643_v4, %v4574_v53  ;;  %v4474_v0 = vadd.f32 %v4442_v48, %v4372_v59  ;;  %v4240_v40 = vmul.f32 %v14347_v37, %v14587_v32  ;;  %v4747_v23 = vmul.f32 %v14422_v38, %v14682_v44 }
 0x378   : > { %5241 = vrot.lane.b32.xlu0 %v5084_v16, %s12940_s23  ;;  %v4979_v2 = vadd.f32 %v4947_v18, %v4878_v15  ;;  %v4848_v5 = vmul.f32 %v14409_v21, %v14684_v60  ;;  %v4341_v4 = vmul.f32 %v14359_v34, %v14596_v63  ;;  %v4443_v24 = vmul.f32 %v14391_v54, %v14643_v62 }
 0x379   : > { %v4778_v33 = vadd.f32 %v4746_v35, %v4675_v27  ;;  %v4575_v29 = vadd.f32 %v4543_v61, %v4474_v0  ;;  %v4272_v8 = vadd.f32 %v4240_v40, %v4139_v14  ;;  %v4949_v18 = vmul.f32 %v14427_v39, %v14698_v3  ;;  %v14736_v61 = vld [vmem:[#allocation3 + $0x91] sm:$0xff] }
 0x37a   : > { %v5016_v32 = vmul.f32 %v14488_v42, %v4979_v2  ;;  %v4544_v12 = vmul.f32 %v14379_v49, %v14665_v13  ;;  %v4645_v11 = vmul.f32 %v14384_v50, %v14667_v43  ;;  %v3933_v35 = vmul.f32 %v14636_v17, %v14329_v20  ;;  %v14744_v2 = vld [vmem:[#allocation3 + $0x92] sm:$0xff] }
 0x37b   : > { %v4879_v45 = vadd.f32 %v4847_v57, %v4778_v33  ;;  %v4676_v46 = vadd.f32 %v4644_v1, %v4575_v29  ;;  %v4373_v63 = vadd.f32 %v4341_v4, %v4272_v8  ;;  %v3932_v25 = vmul.f32 %v14329_v20, %v14645_v26  ;;  %v14730_v57 = vld [vmem:[#allocation3 + $0x90] sm:$0xff]  ;;  %v14753_v33 = vld [vmem:[#allocation3 + $0x98] sm:$0xff] }
 0x37c   : > { %v5053_v41 = vadd.f32 %v14504_v10, %v5016_v32  ;;  %v4140_v36 = vmul.f32 %v14342_v31, %v14612_v51  ;;  %v4241_v48 = vmul.f32 %v14347_v37, %v14614_v52  ;;  %v3970_v7 = vadd.f32 %v14334_v22, %v3933_v35  ;;  %v14755_v29 = vld [vmem:[#allocation3 + $0x99] sm:$0xff] }
 0x37d   : > { %v4980_v28 = vadd.f32 %v4948_v58, %v4879_v45  ;;  %v4779_v30 = vadd.f32 %v4747_v23, %v4676_v46  ;;  %v4475_v6 = vadd.f32 %v4443_v24, %v4373_v63  ;;  %v3969_v17 = vadd.f32 %v14334_v22, %v3932_v25  ;;  %v14765_v46 = vld [vmem:[#allocation3 + $0x9a] sm:$0xff] }
 0x37e   : > { %v5085_v53 = vmax.f32 %v5053_v41, 0.0  ;;  %v4273_v59 = vadd.f32 %v4241_v48, %v4140_v36  ;;  %v4342_v26 = vmul.f32 %v14359_v34, %v14621_v56  ;;  %v4002_v52 = vmax.f32 %v3970_v7, 0.0 }
 0x37f   : > { %v5017_v16 = vmul.f32 %v14488_v42, %v4980_v28  ;;  %v4880_v51 = vadd.f32 %v4848_v5, %v4779_v30  ;;  %v4576_v15 = vadd.f32 %v4544_v12, %v4475_v6  ;;  %v4001_v58 = vmax.f32 %v3969_v17, 0.0  ;;  %v5395_v6 = vld [vmem:[#allocation4 + $0x1] sm:$0xff] }
 0x380   : > { %5243 = vrot.lane.b32.xlu1 %v5085_v53, %s12940_s23  ;;  %v4374_v1 = vadd.f32 %v4342_v26, %v4273_v59  ;;  %v4444_v27 = vmul.f32 %v14391_v54, %v14682_v44  ;;  %v4748_v56 = vmul.f32 %v14422_v38, %v14730_v57  ;;  %4089 = vst.msk [vmem:[#allocation3 + $0x159] sm:$0xff] %vm333_vm1, %v4002_v52  ;;  %5196 = vst.msk [vmem:[#allocation4 + $0x159] sm:$0xff] %vm333_vm1, %v4002_v52  ;;  %v5394_v52 = vld [vmem:[%s17321_s5] sm:$0xff] }
 0x381   : > { %v5054_v0 = vadd.f32 %v14504_v10, %v5017_v16  ;;  %v4981_v14 = vadd.f32 %v4949_v18, %v4880_v51  ;;  %v4677_v40 = vadd.f32 %v4645_v11, %v4576_v15  ;;  %v4849_v23 = vmul.f32 %v14409_v21, %v14736_v61  ;;  %4088 = vst.msk [vmem:[#allocation3 + $0x151] sm:$0xff] %vm333_vm1, %v4001_v58 }
 0x382   : > { %v4476_v5 = vadd.f32 %v4444_v27, %v4374_v1  ;;  %v4545_v4 = vmul.f32 %v14379_v49, %v14684_v60  ;;  %5195 = vst.msk [vmem:[#allocation4 + $0x151] sm:$0xff] %vm333_vm1, %v4001_v58  ;;  %v4141_v18 = vmul.f32 %v14342_v31, %v14643_v62  ;;  %v4950_v12 = vmul.f32 %v14427_v39, %v14744_v2 }
 0x383   : > { %v5086_v8 = vmax.f32 %v5054_v0, 0.0  ;;  %v5018_v24 = vmul.f32 %v14488_v42, %v4981_v14  ;;  %v4780_v32 = vadd.f32 %v4748_v56, %v4677_v40  ;;  %v4646_v45 = vmul.f32 %v14384_v50, %v14698_v3  ;;  %11937 = vmatprep.mubr.msk.f32.mxu1 %vm5112_vm3, %v5395_v6  ;;  %v14803_v14 = vld [vmem:[#allocation3 + $0xa9] sm:$0xff]  ;;  %v14838_v6 = vld [vmem:[#allocation3 + $0xb2] sm:$0xff] }
 0x384   : > { %v4577_v11 = vadd.f32 %v4545_v4, %v4476_v5  ;;  %v4242_v63 = vmul.f32 %v14347_v37, %v14665_v13  ;;  %v4749_v62 = vmul.f32 %v14422_v38, %v14753_v33  ;;  %v4850_v25 = vmul.f32 %v14409_v21, %v14755_v29  ;;  %v10572_v13 = vld [vmem:[%s17321_s5 + $0x8] sm:$0xff]  ;;  %v14810_v5 = vld [vmem:[#allocation3 + $0xaa] sm:$0xff] }
 0x385   : > { %5245 = vrot.lane.b32.xlu0 %v5086_v8, %s12940_s23  ;;  %v5055_v35 = vadd.f32 %v14504_v10, %v5018_v24  ;;  %v4881_v41 = vadd.f32 %v4849_v23, %v4780_v32  ;;  %v4343_v28 = vmul.f32 %v14359_v34, %v14667_v43  ;;  %v4445_v30 = vmul.f32 %v14391_v54, %v14730_v57  ;;  %v5396_v43 = vld [vmem:[#allocation4 + $0x9] sm:$0xff] }
 0x386   : > { %v4678_v36 = vadd.f32 %v4646_v45, %v4577_v11  ;;  %v4274_v48 = vadd.f32 %v4242_v63, %v4141_v18  ;;  %v4951_v17 = vmul.f32 %v14427_v39, %v14765_v46  ;;  %v3935_v59 = vmul.f32 %v14662_v9, %v14329_v20  ;;  %11935 = vmatprep.subr.mxu1 %v10572_v13 }
 0x387   : > { %v5087_v7 = vmax.f32 %v5055_v35, 0.0  ;;  %v4982_v53 = vadd.f32 %v4950_v12, %v4881_v41  ;;  %v3934_v51 = vmul.f32 %v14329_v20, %v14671_v47  ;;  %v4142_v15 = vmul.f32 %v14342_v31, %v14682_v44  ;;  %11936 = vmatpush3.msra.mxu1 %v10572_v13  ;;  %v14801_v44 = vld [vmem:[#allocation3 + $0xa8] sm:$0xff]  ;;  %v14821_v35 = vld [vmem:[#allocation3 + $0xb0] sm:$0xff] }
 0x388   : > { %v4781_v26 = vadd.f32 %v4749_v62, %v4678_v36  ;;  %v4375_v16 = vadd.f32 %v4343_v28, %v4274_v48  ;;  %v4546_v58 = vmul.f32 %v14379_v49, %v14736_v61  ;;  %v3972_v1 = vadd.f32 %v14334_v22, %v3935_v59  ;;  %11938 = vmatmul.mubr.msk.f32.vlgmr.msra.gmra.mrb[0].mxu1 %vm5112_vm3, %v5396_v43  ;;  %v14823_v41 = vld [vmem:[#allocation3 + $0xb1] sm:$0xff] }
 0x389   : > { %5247 = vrot.lane.b32.xlu1 %v5087_v7, %s12940_s23  ;;  %v5019_v9 = vmul.f32 %v14488_v42, %v4982_v53  ;;  %v4243_v47 = vmul.f32 %v14347_v37, %v14684_v60  ;;  %v3971_v40 = vadd.f32 %v14334_v22, %v3934_v51  ;;  %v4344_v56 = vmul.f32 %v14359_v34, %v14698_v3 }
 0x38a   : > { %v4882_v27 = vadd.f32 %v4850_v25, %v4781_v26  ;;  %v4477_v0 = vadd.f32 %v4445_v30, %v4375_v16  ;;  %v4004_v4 = vmax.f32 %v3972_v1, 0.0  ;;  %v4446_v60 = vmul.f32 %v14391_v54, %v14753_v33  ;;  %11985 = vmatprep.subr.mxu1 %v5394_v52 }
 0x38b   : > { %v5056_v23 = vadd.f32 %v14504_v10, %v5019_v9  ;;  %v4275_v8 = vadd.f32 %v4243_v47, %v4142_v15  ;;  %v4647_v18 = vmul.f32 %v14384_v50, %v14744_v2  ;;  %v4003_v12 = vmax.f32 %v3971_v40, 0.0  ;;  %11986 = vmatpush3.msra.mxu1 %v5394_v52 }
 0x38c   : > { %v4983_v24 = vadd.f32 %v4951_v17, %v4882_v27  ;;  %v4578_v32 = vadd.f32 %v4546_v58, %v4477_v0  ;;  %v4750_v11 = vmul.f32 %v14422_v38, %v14801_v44  ;;  %v4851_v45 = vmul.f32 %v14409_v21, %v14803_v14  ;;  %4091 = vst.msk [vmem:[#allocation3 + $0x171] sm:$0xff] %vm333_vm1, %v4004_v4 }
 0x38d   : > { %v5088_v3 = vmax.f32 %v5056_v23, 0.0  ;;  %v4376_v63 = vadd.f32 %v4344_v56, %v4275_v8  ;;  %5198 = vst.msk [vmem:[#allocation4 + $0x171] sm:$0xff] %vm333_vm1, %v4004_v4  ;;  %v4952_v36 = vmul.f32 %v14427_v39, %v14810_v5  ;;  %4090 = vst.msk [vmem:[#allocation3 + $0x169] sm:$0xff] %vm333_vm1, %v4003_v12  ;;  %v4143_v48 = vmul.f32 %v14342_v31, %v14730_v57  ;;  %v14865_v4 = vld [vmem:[#allocation3 + $0xc0] sm:$0xff] }
 0x38e   : > { %v5020_v62 = vmul.f32 %v14488_v42, %v4983_v24  ;;  %v4679_v25 = vadd.f32 %v4647_v18, %v4578_v32  ;;  %5197 = vst.msk [vmem:[#allocation4 + $0x169] sm:$0xff] %vm333_vm1, %v4003_v12  ;;  %v4547_v30 = vmul.f32 %v14379_v49, %v14755_v29  ;;  %v4648_v13 = vmul.f32 %v14384_v50, %v14765_v46 }
 0x38f   : > { %5249 = vrot.lane.b32.xlu0 %v5088_v3, %s12940_s23  ;;  %v4478_v28 = vadd.f32 %v4446_v60, %v4376_v63  ;;  %v4244_v7 = vmul.f32 %v14347_v37, %v14736_v61  ;;  %v4751_v57 = vmul.f32 %v14422_v38, %v14821_v35  ;;  %v4852_v59 = vmul.f32 %v14409_v21, %v14823_v41  ;;  %v14890_v63 = vld [vmem:[%s17319_s3] ss:$0 sm:$0xff] }
 0x390   : > { %v5057_v53 = vadd.f32 %v14504_v10, %v5020_v62  ;;  %v4782_v17 = vadd.f32 %v4750_v11, %v4679_v25  ;;  %v4345_v16 = vmul.f32 %v14359_v34, %v14744_v2  ;;  %v4447_v51 = vmul.f32 %v14391_v54, %v14801_v44 }
 0x391   : > { %v4579_v43 = vadd.f32 %v4547_v30, %v4478_v28  ;;  %v4276_v26 = vadd.f32 %v4244_v7, %v4143_v48  ;;  %v4953_v61 = vmul.f32 %v14427_v39, %v14838_v6  ;;  %v3937_v9 = vmul.f32 %v14686_v55, %v14329_v20  ;;  %v14897_v28 = vld [vmem:[#allocation3 + $0xc8] sm:$0xff] }
 0x392   : > { %v5089_v15 = vmax.f32 %v5057_v53, 0.0  ;;  %v4883_v52 = vadd.f32 %v4851_v45, %v4782_v17  ;;  %v3936_v47 = vmul.f32 %v14329_v20, %v14694_v19  ;;  %v4144_v27 = vmul.f32 %v14342_v31, %v14753_v33  ;;  %v14871_v33 = vld [vmem:[#allocation3 + $0xc1] sm:$0xff]  ;;  %v14899_v30 = vld [vmem:[#allocation3 + $0xc9] sm:$0xff] }
 0x393   : > { %v4680_v58 = vadd.f32 %v4648_v13, %v4579_v43  ;;  %v4377_v1 = vadd.f32 %v4345_v16, %v4276_v26  ;;  %v4548_v0 = vmul.f32 %v14379_v49, %v14803_v14  ;;  %v3974_v40 = vadd.f32 %v14334_v22, %v3937_v9  ;;  %v14904_v13 = vld [vmem:[%s17319_s3 + $0x1] ss:$0 sm:$0xff]  ;;  %v14917_v26 = vld [vmem:[%s17319_s3 + $0x2] ss:$0 sm:$0xff] }
 0x394   : > { %5251 = vrot.lane.b32.xlu1 %v5089_v15, %s12940_s23  ;;  %v4984_v2 = vadd.f32 %v4952_v36, %v4883_v52  ;;  %v4245_v56 = vmul.f32 %v14347_v37, %v14755_v29  ;;  %v3973_v20 = vadd.f32 %v14334_v22, %v3936_v47  ;;  %v4346_v31 = vmul.f32 %v14359_v34, %v14765_v46  ;;  %v14880_v46 = vld [vmem:[#allocation3 + $0xc2] sm:$0xff]  ;;  %v4918_v9 = vld [vmem:[#allocation3 + $0xca] sm:$0xff] }
 0x395   : > { %v4783_v55 = vadd.f32 %v4751_v57, %v4680_v58  ;;  %v4479_v23 = vadd.f32 %v4447_v51, %v4377_v1  ;;  %v4006_v8 = vmax.f32 %v3974_v40, 0.0  ;;  %v4448_v24 = vmul.f32 %v14391_v54, %v14821_v35  ;;  %v14928_v1 = vld [vmem:[#allocation3 + $0xd8] sm:$0xff] }
 0x396   : > { %v5021_v19 = vmul.f32 %v14488_v42, %v4984_v2  ;;  %v4277_v60 = vadd.f32 %v4245_v56, %v4144_v27  ;;  %v4649_v29 = vmul.f32 %v14384_v50, %v14810_v5  ;;  %v4005_v18 = vmax.f32 %v3973_v20, 0.0 }
 0x397   : > { %v4884_v32 = vadd.f32 %v4852_v59, %v4783_v55  ;;  %v4580_v37 = vadd.f32 %v4548_v0, %v4479_v23  ;;  %v4752_v34 = vmul.f32 %v14422_v38, %v14865_v4  ;;  %4093 = vst.msk [vmem:[#allocation3 + $0x189] sm:$0xff] %vm333_vm1, %v4006_v8  ;;  %5200 = vst.msk [vmem:[#allocation4 + $0x189] sm:$0xff] %vm333_vm1, %v4006_v8  ;;  %v14936_v0 = vld [vmem:[#allocation3 + $0xd9] sm:$0xff] }
 0x398   : > { %v5058_v22 = vadd.f32 %v14504_v10, %v5021_v19  ;;  %v4378_v12 = vadd.f32 %v4346_v31, %v4277_v60  ;;  %v4853_v45 = vmul.f32 %v14409_v21, %v14871_v33  ;;  %4092 = vst.msk [vmem:[#allocation3 + $0x181] sm:$0xff] %vm333_vm1, %v4005_v18  ;;  %v4145_v62 = vmul.f32 %v14890_v63, %v14801_v44  ;;  %v14940_v23 = vld [vmem:[#allocation3 + $0xda] sm:$0xff] }
 0x399   : > { %v4985_v3 = vadd.f32 %v4953_v61, %v4884_v32  ;;  %v4681_v11 = vadd.f32 %v4649_v29, %v4580_v37  ;;  %5199 = vst.msk [vmem:[#allocation4 + $0x181] sm:$0xff] %vm333_vm1, %v4005_v18  ;;  %v4549_v48 = vmul.f32 %v14379_v49, %v14823_v41  ;;  %v4246_v7 = vmul.f32 %v14904_v13, %v14803_v14 }
 0x39a   : > { %v5090_v25 = vmax.f32 %v5058_v22, 0.0  ;;  %v4480_v36 = vadd.f32 %v4448_v24, %v4378_v12  ;;  %v4954_v17 = vmul.f32 %v14427_v39, %v14880_v46  ;;  %v4650_v57 = vmul.f32 %v14384_v50, %v14838_v6 }
 0x39b   : > { %v5022_v44 = vmul.f32 %v14488_v42, %v4985_v3  ;;  %v4784_v53 = vadd.f32 %v4752_v34, %v4681_v11  ;;  %v4278_v43 = vadd.f32 %v4246_v7, %v4145_v62  ;;  %v4347_v14 = vmul.f32 %v14917_v26, %v14810_v5  ;;  %v14973_v11 = vld [vmem:[%s17319_s3 + $0x5] ss:$0 sm:$0xff] }
 0x39c   : > { %5253 = vrot.lane.b32.xlu0 %v5090_v25, %s12940_s23  ;;  %v4581_v59 = vadd.f32 %v4549_v48, %v4480_v36  ;;  %v4449_v16 = vmul.f32 %v14391_v54, %v14865_v4  ;;  %v4753_v50 = vmul.f32 %v14422_v38, %v14897_v28  ;;  %v4854_v52 = vmul.f32 %v14409_v21, %v14899_v30 }
 0x39d   : > { %v5059_v51 = vadd.f32 %v14504_v10, %v5022_v44  ;;  %v4885_v15 = vadd.f32 %v4853_v45, %v4784_v53  ;;  %v4379_v58 = vadd.f32 %v4347_v14, %v4278_v43  ;;  %v4146_v5 = vmul.f32 %v14890_v63, %v14821_v35  ;;  %v14945_v35 = vld [vmem:[%s17319_s3 + $0x4] ss:$0 sm:$0xff]  ;;  %v14977_v45 = vld [vmem:[#allocation3 + $0xe0] sm:$0xff]  ;;  %v14991_v53 = vld [vmem:[%s17319_s3 + $0x8] ss:$0 sm:$0xff] }
 0x39e   : > { %v4682_v61 = vadd.f32 %v4650_v57, %v4581_v59  ;;  %v4247_v54 = vmul.f32 %v14904_v13, %v14823_v41  ;;  %v4550_v2 = vmul.f32 %v14379_v49, %v14871_v33  ;;  %v4348_v40 = vmul.f32 %v14917_v26, %v14838_v6  ;;  %v14955_v6 = vld [vmem:[%s17319_s3 + $0x6] ss:$0 sm:$0xff] }
 0x39f   : > { %v5091_v47 = vmax.f32 %v5059_v51, 0.0  ;;  %v4986_v27 = vadd.f32 %v4954_v17, %v4885_v15  ;;  %v4481_v55 = vadd.f32 %v4449_v16, %v4379_v58  ;;  %v4450_v41 = vmul.f32 %v14945_v35, %v14897_v28  ;;  %v4920_v15 = vld [vmem:[#allocation3 + $0xe2] sm:$0xff] }
 0x3a0   : > { %v4785_v56 = vadd.f32 %v4753_v50, %v4682_v61  ;;  %v4279_v20 = vadd.f32 %v4247_v54, %v4146_v5  ;;  %v4955_v31 = vmul.f32 %v14427_v39, %v4918_v9  ;;  %v4651_v19 = vmul.f32 %v14955_v6, %v14880_v46  ;;  %v15005_v50 = vld [vmem:[#allocation3 + $0xf0] sm:$0xff] }
 0x3a1   : > { %5255 = vrot.lane.b32.xlu1 %v5091_v47, %s12940_s23  ;;  %v5023_v49 = vmul.f32 %v14488_v42, %v4986_v27  ;;  %v4754_v8 = vmul.f32 %v14422_v38, %v14928_v1  ;;  %v4582_v24 = vadd.f32 %v4550_v2, %v4481_v55  ;;  %v4855_v32 = vmul.f32 %v14409_v21, %v14936_v0  ;;  %v15011_v5 = vld [vmem:[#allocation3 + $0xf1] sm:$0xff] }
 0x3a2   : > { %v4886_v60 = vadd.f32 %v4854_v52, %v4785_v56  ;;  %v4380_v37 = vadd.f32 %v4348_v40, %v4279_v20  ;;  %v4956_v18 = vmul.f32 %v14427_v39, %v14940_v23  ;;  %v4147_v22 = vmul.f32 %v14890_v63, %v14865_v4  ;;  %v14979_v39 = vld [vmem:[#allocation3 + $0xe1] sm:$0xff]  ;;  %v15016_v40 = vld [vmem:[#allocation3 + $0xf2] sm:$0xff] }
 0x3a3   : > { %v5060_v29 = vadd.f32 %v14504_v10, %v5023_v49  ;;  %v4248_v34 = vmul.f32 %v14904_v13, %v14871_v33  ;;  %v4683_v3 = vadd.f32 %v4651_v19, %v4582_v24  ;;  %v4551_v21 = vmul.f32 %v14973_v11, %v14899_v30 }
 0x3a4   : > { %v4987_v12 = vadd.f32 %v4955_v31, %v4886_v60  ;;  %v4482_v38 = vadd.f32 %v4450_v41, %v4380_v37  ;;  %v4349_v33 = vmul.f32 %v14917_v26, %v14880_v46  ;;  %v4451_v25 = vmul.f32 %v14945_v35, %v14928_v1  ;;  %v14998_v46 = vld [vmem:[%s17319_s3 + $0x9] ss:$0 sm:$0xff] }
 0x3a5   : > { %v5092_v62 = vmax.f32 %v5060_v29, 0.0  ;;  %v4280_v4 = vadd.f32 %v4248_v34, %v4147_v22  ;;  %v4786_v48 = vadd.f32 %v4754_v8, %v4683_v3  ;;  %v4652_v44 = vmul.f32 %v14955_v6, %v4918_v9  ;;  %v15043_v3 = vld [vmem:[#allocation3 + $0xf9] sm:$0xff] }
 0x3a6   : > { %v5024_v36 = vmul.f32 %v14488_v42, %v4987_v12  ;;  %v4583_v7 = vadd.f32 %v4551_v21, %v4482_v38  ;;  %v4755_v17 = vmul.f32 %v14991_v53, %v14977_v45  ;;  %v4856_v57 = vmul.f32 %v14998_v46, %v14979_v39  ;;  %v15041_v12 = vld [vmem:[#allocation3 + $0xf8] sm:$0xff] }
 0x3a7   : > { %5257 = vrot.lane.b32.xlu0 %v5092_v62, %s12940_s23  ;;  %v4381_v59 = vadd.f32 %v4349_v33, %v4280_v4  ;;  %v4148_v43 = vmul.f32 %v14890_v63, %v14897_v28  ;;  %v4887_v16 = vadd.f32 %v4855_v32, %v4786_v48  ;;  %v4249_v52 = vmul.f32 %v14904_v13, %v14899_v30  ;;  %v15021_v30 = vld [vmem:[%s17319_s3 + $0xa] ss:$0 sm:$0xff] }
 0x3a8   : > { %v5061_v14 = vadd.f32 %v14504_v10, %v5024_v36  ;;  %v4684_v51 = vadd.f32 %v4652_v44, %v4583_v7  ;;  %v4552_v58 = vmul.f32 %v14973_v11, %v14936_v0  ;;  %v4350_v54 = vmul.f32 %v14917_v26, %v4918_v9 }
 0x3a9   : > { %v4483_v61 = vadd.f32 %v4451_v25, %v4381_v59  ;;  %v4452_v28 = vmul.f32 %v14945_v35, %v14977_v45  ;;  %v4988_v27 = vadd.f32 %v4956_v18, %v4887_v16  ;;  %v4281_v56 = vadd.f32 %v4249_v52, %v4148_v43  ;;  %v15065_v52 = vld [vmem:[#allocation3 + $0x109] sm:$0xff] }
 0x3aa   : > { %v5093_v47 = vmax.f32 %v5061_v14, 0.0  ;;  %v4787_v2 = vadd.f32 %v4755_v17, %v4684_v51  ;;  %v4957_v55 = vmul.f32 %v15021_v30, %v4920_v15  ;;  %v4653_v9 = vmul.f32 %v14955_v6, %v14940_v23  ;;  %v15063_v51 = vld [vmem:[#allocation3 + $0x108] sm:$0xff] }
 0x3ab   : > { %v4584_v20 = vadd.f32 %v4552_v58, %v4483_v61  ;;  %v4756_v41 = vmul.f32 %v14991_v53, %v15005_v50  ;;  %v5025_v49 = vmul.f32 %v14488_v42, %v4988_v27  ;;  %v4857_v19 = vmul.f32 %v14998_v46, %v15011_v5 }
 0x3ac   : > { %5259 = vrot.lane.b32.xlu1 %v5093_v47, %s12940_s23  ;;  %v4888_v31 = vadd.f32 %v4856_v57, %v4787_v2  ;;  %v4382_v8 = vadd.f32 %v4350_v54, %v4281_v56  ;;  %v4958_v24 = vmul.f32 %v15021_v30, %v15016_v40  ;;  %v4149_v32 = vmul.f32 %v14890_v63, %v14928_v1  ;;  %v4922_v57 = vld [vmem:[#allocation3 + $0xfa] sm:$0xff] }
 0x3ad   : > { %v4685_v60 = vadd.f32 %v4653_v9, %v4584_v20  ;;  %v4250_v37 = vmul.f32 %v14904_v13, %v14936_v0  ;;  %v5062_v29 = vadd.f32 %v14504_v10, %v5025_v49  ;;  %v4553_v34 = vmul.f32 %v14973_v11, %v14979_v39  ;;  %v15087_v9 = vld [vmem:[%s17320_s4 + $0x1] ss:$0 sm:$0xff] }
 0x3ae   : > { %v4989_v18 = vadd.f32 %v4957_v55, %v4888_v31  ;;  %v4484_v22 = vadd.f32 %v4452_v28, %v4382_v8  ;;  %v4351_v62 = vmul.f32 %v14917_v26, %v14940_v23  ;;  %v4453_v1 = vmul.f32 %v14945_v35, %v15005_v50  ;;  %v4923_v31 = vld [vmem:[#allocation3 + $0x10a] sm:$0xff] }
 0x3af   : > { %v4788_v38 = vadd.f32 %v4756_v41, %v4685_v60  ;;  %v4282_v21 = vadd.f32 %v4250_v37, %v4149_v32  ;;  %v5094_v0 = vmax.f32 %v5062_v29, 0.0  ;;  %v4654_v25 = vmul.f32 %v14955_v6, %v4920_v15  ;;  %v15096_v37 = vld [vmem:[#allocation3 + $0x110] sm:$0xff] }
 0x3b0   : > { %v5026_v4 = vmul.f32 %v14488_v42, %v4989_v18  ;;  %v4585_v33 = vadd.f32 %v4553_v34, %v4484_v22  ;;  %v4757_v48 = vmul.f32 %v14991_v53, %v15041_v12  ;;  %v4858_v7 = vmul.f32 %v14998_v46, %v15043_v3  ;;  %v15098_v29 = vld [vmem:[#allocation3 + $0x111] sm:$0xff] }
 0x3b1   : > { %v4889_v36 = vadd.f32 %v4857_v19, %v4788_v38  ;;  %v4383_v44 = vadd.f32 %v4351_v62, %v4282_v21  ;;  %5261 = vrot.lane.b32.xlu0 %v5094_v0, %s12940_s23  ;;  %v4150_v42 = vmul.f32 %v14890_v63, %v14977_v45  ;;  %v4251_v59 = vmul.f32 %v14904_v13, %v14979_v39  ;;  %v15073_v39 = vld [vmem:[%s17320_s4] ss:$0 sm:$0xff] }
 0x3b2   : > { %v5063_v23 = vadd.f32 %v14504_v10, %v5026_v4  ;;  %v4686_v17 = vadd.f32 %v4654_v25, %v4585_v33  ;;  %v4554_v16 = vmul.f32 %v14973_v11, %v15011_v5  ;;  %v4352_v61 = vmul.f32 %v14917_v26, %v4920_v15 }
 0x3b3   : > { %v4990_v43 = vadd.f32 %v4958_v24, %v4889_v36  ;;  %v4485_v14 = vadd.f32 %v4453_v1, %v4383_v44  ;;  %v4283_v54 = vadd.f32 %v4251_v59, %v4150_v42  ;;  %v4454_v45 = vmul.f32 %v14945_v35, %v15041_v12  ;;  %v15119_v59 = vld [vmem:[#allocation3 + $0x120] sm:$0xff] }
 0x3b4   : > { %v5095_v10 = vmax.f32 %v5063_v23, 0.0  ;;  %v4789_v58 = vadd.f32 %v4757_v48, %v4686_v17  ;;  %v4959_v47 = vmul.f32 %v15021_v30, %v4922_v57  ;;  %v4655_v2 = vmul.f32 %v14955_v6, %v15016_v40  ;;  %v4924_v48 = vld [vmem:[#allocation3 + $0x112] sm:$0xff] }
 0x3b5   : > { %v5027_v28 = vmul.f32 %v15073_v39, %v4990_v43  ;;  %v4586_v27 = vadd.f32 %v4554_v16, %v4485_v14  ;;  %v4758_v56 = vmul.f32 %v14991_v53, %v15063_v51  ;;  %v4859_v55 = vmul.f32 %v14998_v46, %v15065_v52  ;;  %v15121_v43 = vld [vmem:[#allocation3 + $0x121] sm:$0xff] }
 0x3b6   : > { %5263 = vrot.lane.b32.xlu1 %v5095_v10, %s12940_s23  ;;  %v4890_v15 = vadd.f32 %v4858_v7, %v4789_v58  ;;  %v4384_v20 = vadd.f32 %v4352_v61, %v4283_v54  ;;  %v4151_v19 = vmul.f32 %v14890_v63, %v15005_v50  ;;  %v4252_v8 = vmul.f32 %v14904_v13, %v15011_v5 }
 0x3b7   : > { %v5064_v41 = vadd.f32 %v15087_v9, %v5027_v28  ;;  %v4687_v49 = vadd.f32 %v4655_v2, %v4586_v27  ;;  %v4555_v32 = vmul.f32 %v14973_v11, %v15043_v3  ;;  %v4353_v18 = vmul.f32 %v14917_v26, %v15016_v40 }
 0x3b8   : > { %v4991_v60 = vadd.f32 %v4959_v47, %v4890_v15  ;;  %v4486_v24 = vadd.f32 %v4454_v45, %v4384_v20  ;;  %v4284_v38 = vadd.f32 %v4252_v8, %v4151_v19  ;;  %v4455_v50 = vmul.f32 %v14945_v35, %v15063_v51  ;;  %v15141_v8 = vld [vmem:[#allocation3 + $0x128] sm:$0xff] }
 0x3b9   : > { %v5096_v22 = vmax.f32 %v5064_v41, 0.0  ;;  %v4790_v34 = vadd.f32 %v4758_v56, %v4687_v49  ;;  %v4960_v21 = vmul.f32 %v15021_v30, %v4923_v31  ;;  %v4656_v1 = vmul.f32 %v14955_v6, %v4922_v57  ;;  %v4925_v56 = vld [vmem:[#allocation3 + $0x122] sm:$0xff] }
 0x3ba   : > { %v5028_v5 = vmul.f32 %v15073_v39, %v4991_v60  ;;  %v4587_v62 = vadd.f32 %v4555_v32, %v4486_v24  ;;  %v4759_v4 = vmul.f32 %v14991_v53, %v15096_v37  ;;  %v4860_v40 = vmul.f32 %v14998_v46, %v15098_v29  ;;  %v15143_v60 = vld [vmem:[#allocation3 + $0x129] sm:$0xff] }
 0x3bb   : > { %5265 = vrot.lane.b32.xlu0 %v5096_v22, %s12940_s23  ;;  %v4891_v0 = vadd.f32 %v4859_v55, %v4790_v34  ;;  %v4385_v33 = vadd.f32 %v4353_v18, %v4284_v38  ;;  %v4152_v7 = vmul.f32 %v14890_v63, %v15041_v12  ;;  %v4253_v44 = vmul.f32 %v14904_v13, %v15043_v3 }
 0x3bc   : > { %v5065_v25 = vadd.f32 %v15087_v9, %v5028_v5  ;;  %v4688_v36 = vadd.f32 %v4656_v1, %v4587_v62  ;;  %v4556_v42 = vmul.f32 %v14973_v11, %v15065_v52  ;;  %v4354_v14 = vmul.f32 %v14917_v26, %v4922_v57 }
 0x3bd   : > { %v4992_v23 = vadd.f32 %v4960_v21, %v4891_v0  ;;  %v4487_v17 = vadd.f32 %v4455_v50, %v4385_v33  ;;  %v4285_v10 = vadd.f32 %v4253_v44, %v4152_v7  ;;  %v4456_v12 = vmul.f32 %v14945_v35, %v15096_v37  ;;  %v15163_v44 = vld [vmem:[#allocation3 + $0x138] sm:$0xff] }
 0x3be   : > { %v5097_v16 = vmax.f32 %v5065_v25, 0.0  ;;  %v4791_v61 = vadd.f32 %v4759_v4, %v4688_v36  ;;  %v4961_v3 = vmul.f32 %v15021_v30, %v4924_v48  ;;  %v4657_v45 = vmul.f32 %v14955_v6, %v4923_v31  ;;  %v4926_v4 = vld [vmem:[#allocation3 + $0x12a] sm:$0xff] }
 0x3bf   : > { %v5029_v58 = vmul.f32 %v15073_v39, %v4992_v23  ;;  %v4588_v54 = vadd.f32 %v4556_v42, %v4487_v17  ;;  %v4760_v47 = vmul.f32 %v14991_v53, %v15119_v59  ;;  %v4861_v57 = vmul.f32 %v14998_v46, %v15121_v43  ;;  %v15165_v23 = vld [vmem:[#allocation3 + $0x139] sm:$0xff] }
 0x3c0   : > { %5267 = vrot.lane.b32.xlu1 %v5097_v16, %s12940_s23  ;;  %v4892_v28 = vadd.f32 %v4860_v40, %v4791_v61  ;;  %v4386_v27 = vadd.f32 %v4354_v14, %v4285_v10  ;;  %v4153_v55 = vmul.f32 %v14890_v63, %v15063_v51  ;;  %v4254_v20 = vmul.f32 %v14904_v13, %v15065_v52 }
 0x3c1   : > { %v5066_v2 = vadd.f32 %v15087_v9, %v5029_v58  ;;  %v4689_v15 = vadd.f32 %v4657_v45, %v4588_v54  ;;  %v4557_v19 = vmul.f32 %v14973_v11, %v15098_v29  ;;  %v4355_v24 = vmul.f32 %v14917_v26, %v4923_v31 }
 0x3c2   : > { %v4993_v41 = vadd.f32 %v4961_v3, %v4892_v28  ;;  %v4488_v49 = vadd.f32 %v4456_v12, %v4386_v27  ;;  %v4286_v22 = vadd.f32 %v4254_v20, %v4153_v55  ;;  %v4457_v51 = vmul.f32 %v14945_v35, %v15119_v59  ;;  %v15185_v20 = vld [vmem:[#allocation3 + $0x140] sm:$0xff] }
 0x3c3   : > { %v5098_v32 = vmax.f32 %v5066_v2, 0.0  ;;  %v4792_v18 = vadd.f32 %v4760_v47, %v4689_v15  ;;  %v4962_v52 = vmul.f32 %v15021_v30, %v4925_v56  ;;  %v4658_v50 = vmul.f32 %v14955_v6, %v4924_v48  ;;  %v4927_v47 = vld [vmem:[#allocation3 + $0x13a] sm:$0xff] }
 0x3c4   : > { %v5030_v34 = vmul.f32 %v15073_v39, %v4993_v41  ;;  %v4589_v38 = vadd.f32 %v4557_v19, %v4488_v49  ;;  %v4761_v21 = vmul.f32 %v14991_v53, %v15141_v8  ;;  %v4862_v31 = vmul.f32 %v14998_v46, %v15143_v60  ;;  %v15187_v41 = vld [vmem:[#allocation3 + $0x141] sm:$0xff] }
 0x3c5   : > { %5269 = vrot.lane.b32.xlu0 %v5098_v32, %s12940_s23  ;;  %v4893_v5 = vadd.f32 %v4861_v57, %v4792_v18  ;;  %v4387_v62 = vadd.f32 %v4355_v24, %v4286_v22  ;;  %v4154_v40 = vmul.f32 %v14890_v63, %v15096_v37  ;;  %v4255_v33 = vmul.f32 %v14904_v13, %v15098_v29 }
 0x3c6   : > { %v5067_v1 = vadd.f32 %v15087_v9, %v5030_v34  ;;  %v4690_v0 = vadd.f32 %v4658_v50, %v4589_v38  ;;  %v4558_v7 = vmul.f32 %v14973_v11, %v15121_v43  ;;  %v4356_v17 = vmul.f32 %v14917_v26, %v4924_v48 }
 0x3c7   : > { %v4994_v25 = vadd.f32 %v4962_v52, %v4893_v5  ;;  %v4489_v36 = vadd.f32 %v4457_v51, %v4387_v62  ;;  %v4287_v16 = vadd.f32 %v4255_v33, %v4154_v40  ;;  %v4458_v37 = vmul.f32 %v14945_v35, %v15141_v8  ;;  %v15207_v33 = vld [vmem:[#allocation3 + $0x150] sm:$0xff] }
 0x3c8   : > { %v5099_v42 = vmax.f32 %v5067_v1, 0.0  ;;  %v4793_v14 = vadd.f32 %v4761_v21, %v4690_v0  ;;  %v4963_v29 = vmul.f32 %v15021_v30, %v4926_v4  ;;  %v4659_v12 = vmul.f32 %v14955_v6, %v4925_v56  ;;  %v4928_v21 = vld [vmem:[#allocation3 + $0x142] sm:$0xff] }
 0x3c9   : > { %v5031_v61 = vmul.f32 %v15073_v39, %v4994_v25  ;;  %v4590_v10 = vadd.f32 %v4558_v7, %v4489_v36  ;;  %v4762_v3 = vmul.f32 %v14991_v53, %v15163_v44  ;;  %v4863_v48 = vmul.f32 %v14998_v46, %v15165_v23  ;;  %v15209_v25 = vld [vmem:[#allocation3 + $0x151] sm:$0xff] }
 0x3ca   : > { %5271 = vrot.lane.b32.xlu1 %v5099_v42, %s12940_s23  ;;  %v4894_v58 = vadd.f32 %v4862_v31, %v4793_v14  ;;  %v4388_v54 = vadd.f32 %v4356_v17, %v4287_v16  ;;  %v4155_v57 = vmul.f32 %v14890_v63, %v15119_v59  ;;  %v4256_v27 = vmul.f32 %v14904_v13, %v15121_v43 }
 0x3cb   : > { %v5068_v45 = vadd.f32 %v15087_v9, %v5031_v61  ;;  %v4691_v28 = vadd.f32 %v4659_v12, %v4590_v10  ;;  %v4559_v55 = vmul.f32 %v14973_v11, %v15143_v60  ;;  %v4357_v49 = vmul.f32 %v14917_v26, %v4925_v56 }
 0x3cc   : > { %v4995_v2 = vadd.f32 %v4963_v29, %v4894_v58  ;;  %v4490_v15 = vadd.f32 %v4458_v37, %v4388_v54  ;;  %v4288_v32 = vadd.f32 %v4256_v27, %v4155_v57  ;;  %v4459_v59 = vmul.f32 %v14945_v35, %v15163_v44  ;;  %v15229_v27 = vld [vmem:[#allocation3 + $0x158] sm:$0xff] }
 0x3cd   : > { %v5100_v19 = vmax.f32 %v5068_v45, 0.0  ;;  %v4794_v24 = vadd.f32 %v4762_v3, %v4691_v28  ;;  %v4964_v43 = vmul.f32 %v15021_v30, %v4927_v47  ;;  %v4660_v51 = vmul.f32 %v14955_v6, %v4926_v4  ;;  %v4929_v3 = vld [vmem:[#allocation3 + $0x152] sm:$0xff] }
 0x3ce   : > { %v5032_v18 = vmul.f32 %v15073_v39, %v4995_v2  ;;  %v4591_v22 = vadd.f32 %v4559_v55, %v4490_v15  ;;  %v4763_v52 = vmul.f32 %v14991_v53, %v15185_v20  ;;  %v4864_v56 = vmul.f32 %v14998_v46, %v15187_v41  ;;  %v15231_v2 = vld [vmem:[#allocation3 + $0x159] sm:$0xff] }
 0x3cf   : > { %5273 = vrot.lane.b32.xlu0 %v5100_v19, %s12940_s23  ;;  %v4895_v34 = vadd.f32 %v4863_v48, %v4794_v24  ;;  %v4389_v38 = vadd.f32 %v4357_v49, %v4288_v32  ;;  %v4156_v31 = vmul.f32 %v14890_v63, %v15141_v8  ;;  %v4257_v62 = vmul.f32 %v14904_v13, %v15143_v60 }
 0x3d0   : > { %v5069_v50 = vadd.f32 %v15087_v9, %v5032_v18  ;;  %v4692_v5 = vadd.f32 %v4660_v51, %v4591_v22  ;;  %v4560_v40 = vmul.f32 %v14973_v11, %v15165_v23  ;;  %v4358_v36 = vmul.f32 %v14917_v26, %v4926_v4 }
 0x3d1   : > { %v4996_v1 = vadd.f32 %v4964_v43, %v4895_v34  ;;  %v4491_v0 = vadd.f32 %v4459_v59, %v4389_v38  ;;  %v4289_v42 = vadd.f32 %v4257_v62, %v4156_v31  ;;  %v4460_v8 = vmul.f32 %v14945_v35, %v15185_v20  ;;  %v15251_v62 = vld [vmem:[#allocation3 + $0x168] sm:$0xff] }
 0x3d2   : > { %v5101_v7 = vmax.f32 %v5069_v50, 0.0  ;;  %v4795_v17 = vadd.f32 %v4763_v52, %v4692_v5  ;;  %v4965_v60 = vmul.f32 %v15021_v30, %v4928_v21  ;;  %v4661_v37 = vmul.f32 %v14955_v6, %v4927_v47  ;;  %v4930_v52 = vld [vmem:[#allocation3 + $0x15a] sm:$0xff] }
 0x3d3   : > { %v5033_v14 = vmul.f32 %v15073_v39, %v4996_v1  ;;  %v4592_v16 = vadd.f32 %v4560_v40, %v4491_v0  ;;  %v4764_v29 = vmul.f32 %v14991_v53, %v15207_v33  ;;  %v4865_v4 = vmul.f32 %v14998_v46, %v15209_v25  ;;  %v15253_v1 = vld [vmem:[#allocation3 + $0x169] sm:$0xff] }
 0x3d4   : > { %5275 = vrot.lane.b32.xlu1 %v5101_v7, %s12940_s23  ;;  %v4896_v61 = vadd.f32 %v4864_v56, %v4795_v17  ;;  %v4390_v10 = vadd.f32 %v4358_v36, %v4289_v42  ;;  %v4157_v48 = vmul.f32 %v14890_v63, %v15163_v44  ;;  %v4258_v54 = vmul.f32 %v14904_v13, %v15165_v23 }
 0x3d5   : > { %v5070_v12 = vadd.f32 %v15087_v9, %v5033_v14  ;;  %v4693_v58 = vadd.f32 %v4661_v37, %v4592_v16  ;;  %v4561_v57 = vmul.f32 %v14973_v11, %v15187_v41  ;;  %v4359_v15 = vmul.f32 %v14917_v26, %v4927_v47 }
 0x3d6   : > { %v4997_v45 = vadd.f32 %v4965_v60, %v4896_v61  ;;  %v4492_v28 = vadd.f32 %v4460_v8, %v4390_v10  ;;  %v4290_v19 = vadd.f32 %v4258_v54, %v4157_v48  ;;  %v4461_v44 = vmul.f32 %v14945_v35, %v15207_v33  ;;  %v15273_v54 = vld [vmem:[#allocation3 + $0x170] sm:$0xff] }
 0x3d7   : > { %v5102_v55 = vmax.f32 %v5070_v12, 0.0  ;;  %v4796_v49 = vadd.f32 %v4764_v29, %v4693_v58  ;;  %v4966_v23 = vmul.f32 %v15021_v30, %v4929_v3  ;;  %v4662_v59 = vmul.f32 %v14955_v6, %v4928_v21  ;;  %v4931_v29 = vld [vmem:[#allocation3 + $0x16a] sm:$0xff] }
 0x3d8   : > { %v5034_v24 = vmul.f32 %v15073_v39, %v4997_v45  ;;  %v4593_v32 = vadd.f32 %v4561_v57, %v4492_v28  ;;  %v4765_v43 = vmul.f32 %v14991_v53, %v15229_v27  ;;  %v4866_v47 = vmul.f32 %v14998_v46, %v15231_v2  ;;  %v15275_v45 = vld [vmem:[#allocation3 + $0x171] sm:$0xff] }
 0x3d9   : > { %5277 = vrot.lane.b32.xlu0 %v5102_v55, %s12940_s23  ;;  %v4897_v18 = vadd.f32 %v4865_v4, %v4796_v49  ;;  %v4391_v22 = vadd.f32 %v4359_v15, %v4290_v19  ;;  %v4158_v56 = vmul.f32 %v14890_v63, %v15185_v20  ;;  %v4259_v38 = vmul.f32 %v14904_v13, %v15187_v41 }
 0x3da   : > { %v5071_v51 = vadd.f32 %v15087_v9, %v5034_v24  ;;  %v4694_v34 = vadd.f32 %v4662_v59, %v4593_v32  ;;  %v4562_v31 = vmul.f32 %v14973_v11, %v15209_v25  ;;  %v4360_v0 = vmul.f32 %v14917_v26, %v4928_v21 }
 0x3db   : > { %v4998_v50 = vadd.f32 %v4966_v23, %v4897_v18  ;;  %v4493_v5 = vadd.f32 %v4461_v44, %v4391_v22  ;;  %v4291_v7 = vadd.f32 %v4259_v38, %v4158_v56  ;;  %v4462_v20 = vmul.f32 %v14945_v35, %v15229_v27  ;;  %v4730_v38 = vld [vmem:[#allocation3 + $0x180] sm:$0xff] }
 0x3dc   : > { %v5103_v40 = vmax.f32 %v5071_v51, 0.0  ;;  %v4797_v36 = vadd.f32 %v4765_v43, %v4694_v34  ;;  %v4967_v41 = vmul.f32 %v15021_v30, %v4930_v52  ;;  %v4663_v8 = vmul.f32 %v14955_v6, %v4929_v3  ;;  %v4932_v43 = vld [vmem:[#allocation3 + $0x172] sm:$0xff] }
 0x3dd   : > { %v5035_v17 = vmul.f32 %v15073_v39, %v4998_v50  ;;  %v4594_v42 = vadd.f32 %v4562_v31, %v4493_v5  ;;  %v4766_v60 = vmul.f32 %v14991_v53, %v15251_v62  ;;  %v4867_v21 = vmul.f32 %v14998_v46, %v15253_v1  ;;  %v4832_v50 = vld [vmem:[#allocation3 + $0x181] sm:$0xff]  ;;  %v15296_v31 = vpop.permute.xlu0 %5233 }
 0x3de   : > { %5279 = vrot.lane.b32.xlu1 %v5103_v40, %s12940_s23  ;;  %v4898_v14 = vadd.f32 %v4866_v47, %v4797_v36  ;;  %v4392_v16 = vadd.f32 %v4360_v0, %v4291_v7  ;;  %v4159_v4 = vmul.f32 %v14890_v63, %v15207_v33  ;;  %v4260_v10 = vmul.f32 %v14904_v13, %v15209_v25  ;;  %v15300_v7 = vpop.permute.xlu1 %5237 }
 0x3df   : > { %v5072_v37 = vadd.f32 %v15087_v9, %v5035_v17  ;;  %v4695_v61 = vadd.f32 %v4663_v8, %v4594_v42  ;;  %v4563_v48 = vmul.f32 %v14973_v11, %v15231_v2  ;;  %v4361_v28 = vmul.f32 %v14917_v26, %v4929_v3  ;;  %5330 = vst.msk [vmem:[#allocation4 + $0x19] sm:$0xff] %vm5329_vm5, %v15296_v31 }
 0x3e0   : > { %v4999_v12 = vadd.f32 %v4967_v41, %v4898_v14  ;;  %v4494_v58 = vadd.f32 %v4462_v20, %v4392_v16  ;;  %v4292_v55 = vadd.f32 %v4260_v10, %v4159_v4  ;;  %v4463_v33 = vmul.f32 %v14945_v35, %v15251_v62  ;;  %v4933_v16 = vld [vmem:[#allocation3 + $0x182] sm:$0xff]  ;;  %5332 = vst.msk [vmem:[#allocation4 + $0x31] sm:$0xff] %vm5329_vm5, %v15300_v7 }
 0x3e1   : > { %v5104_v57 = vmax.f32 %v5072_v37, 0.0  ;;  %v4798_v15 = vadd.f32 %v4766_v60, %v4695_v61  ;;  %v4968_v25 = vmul.f32 %v15021_v30, %v4931_v29  ;;  %v4664_v44 = vmul.f32 %v14955_v6, %v4930_v52 }
 0x3e2   : > { %v5036_v49 = vmul.f32 %v15073_v39, %v4999_v12  ;;  %v4595_v19 = vadd.f32 %v4563_v48, %v4494_v58  ;;  %v4767_v23 = vmul.f32 %v14991_v53, %v15273_v54  ;;  %v4868_v3 = vmul.f32 %v14998_v46, %v15275_v45  ;;  %v4731_v58 = vld [vmem:[#allocation3 + $0x188] sm:$0xff] }
 0x3e3   : > { %5281 = vrot.lane.b32.xlu0 %v5104_v57, %s12940_s23  ;;  %v4899_v24 = vadd.f32 %v4867_v21, %v4798_v15  ;;  %v4393_v32 = vadd.f32 %v4361_v28, %v4292_v55  ;;  %v4160_v47 = vmul.f32 %v14890_v63, %v15229_v27  ;;  %v4261_v22 = vmul.f32 %v14904_v13, %v15231_v2  ;;  %v4833_v48 = vld [vmem:[#allocation3 + $0x189] sm:$0xff] }
 0x3e4   : > { %v5073_v59 = vadd.f32 %v15087_v9, %v5036_v49  ;;  %v4696_v18 = vadd.f32 %v4664_v44, %v4595_v19  ;;  %v4564_v56 = vmul.f32 %v14973_v11, %v15253_v1  ;;  %v4362_v5 = vmul.f32 %v14917_v26, %v4930_v52  ;;  %v5236_v49 = vpop.permute.xlu0 %5235  ;;  %v5240_v44 = vpop.permute.xlu1 %5239 }
 0x3e5   : > { %v5000_v51 = vadd.f32 %v4968_v25, %v4899_v24  ;;  %v4495_v34 = vadd.f32 %v4463_v33, %v4393_v32  ;;  %v4293_v36 = vadd.f32 %v4261_v22, %v4160_v47  ;;  %v4464_v27 = vmul.f32 %v14945_v35, %v15273_v54  ;;  %5331 = vst.msk [vmem:[#allocation4 + $0x21] sm:$0xff] %vm5329_vm5, %v5236_v49 }
 0x3e6   : > { %v5105_v0 = vmax.f32 %v5073_v59, 0.0  ;;  %v4799_v40 = vadd.f32 %v4767_v23, %v4696_v18  ;;  %v4969_v20 = vmul.f32 %v15021_v30, %v4932_v43  ;;  %v4665_v41 = vmul.f32 %v14955_v6, %v4931_v29  ;;  %v4732_v18 = vld [vmem:[#allocation3 + $0x198] sm:$0xff]  ;;  %5333 = vst.msk [vmem:[#allocation4 + $0x39] sm:$0xff] %vm5329_vm5, %v5240_v44 }
 0x3e7   : > { %v5037_v2 = vmul.f32 %v15073_v39, %v5000_v51  ;;  %v4596_v17 = vadd.f32 %v4564_v56, %v4495_v34  ;;  %v4768_v42 = vmul.f32 %v14991_v53, %v4730_v38  ;;  %v4869_v8 = vmul.f32 %v14998_v46, %v4832_v50  ;;  %v4934_v34 = vld [vmem:[#allocation3 + $0x18a] sm:$0xff] }
 0x3e8   : > { %5283 = vrot.lane.b32.xlu1 %v5105_v0, %s12940_s23  ;;  %v4900_v52 = vadd.f32 %v4868_v3, %v4799_v40  ;;  %v4394_v14 = vadd.f32 %v4362_v5, %v4293_v36  ;;  %v4161_v37 = vmul.f32 %v14890_v63, %v15251_v62  ;;  %v4262_v61 = vmul.f32 %v14904_v13, %v15253_v1  ;;  %v4834_v36 = vld [vmem:[#allocation3 + $0x199] sm:$0xff] }
 0x3e9   : > { %v5074_v60 = vadd.f32 %v15087_v9, %v5037_v2  ;;  %v4697_v21 = vadd.f32 %v4665_v41, %v4596_v17  ;;  %v4565_v12 = vmul.f32 %v14973_v11, %v15275_v45  ;;  %v4363_v28 = vmul.f32 %v14917_v26, %v4931_v29 }
 0x3ea   : > { %v5001_v4 = vadd.f32 %v4969_v20, %v4900_v52  ;;  %v4496_v10 = vadd.f32 %v4464_v27, %v4394_v14  ;;  %v4294_v55 = vadd.f32 %v4262_v61, %v4161_v37  ;;  %v4465_v33 = vmul.f32 %v14945_v35, %v4730_v38 }
 0x3eb   : > { %v5106_v57 = vmax.f32 %v5074_v60, 0.0  ;;  %v4800_v15 = vadd.f32 %v4768_v42, %v4697_v21  ;;  %v4970_v25 = vmul.f32 %v15021_v30, %v4933_v16  ;;  %v4666_v19 = vmul.f32 %v14955_v6, %v4932_v43 }
 0x3ec   : > { %v5038_v62 = vmul.f32 %v15073_v39, %v5001_v4  ;;  %v4597_v1 = vadd.f32 %v4565_v12, %v4496_v10  ;;  %v4769_v23 = vmul.f32 %v14991_v53, %v4731_v58  ;;  %v4870_v29 = vmul.f32 %v14998_v46, %v4833_v48  ;;  %v4835_v4 = vld [vmem:[#allocation3 + $0x1a1] sm:$0xff] }
 0x3ed   : > { %5285 = vrot.lane.b32.xlu0 %v5106_v57, %s12940_s23  ;;  %v4901_v24 = vadd.f32 %v4869_v8, %v4800_v15  ;;  %v4395_v3 = vadd.f32 %v4363_v28, %v4294_v55  ;;  %v4162_v47 = vmul.f32 %v14890_v63, %v15273_v54  ;;  %v4263_v22 = vmul.f32 %v14904_v13, %v15275_v45  ;;  %v5242_v54 = vpop.permute.xlu0 %5241  ;;  %v4733_v8 = vld [vmem:[#allocation3 + $0x1a0] sm:$0xff] }
 0x3ee   : > { %v5075_v32 = vadd.f32 %v15087_v9, %v5038_v62  ;;  %v4698_v59 = vadd.f32 %v4666_v19, %v4597_v1  ;;  %v4566_v38 = vmul.f32 %v14973_v11, %v4832_v50  ;;  %v4364_v5 = vmul.f32 %v14917_v26, %v4932_v43  ;;  %v4935_v26 = vld [vmem:[#allocation3 + $0x19a] sm:$0xff]  ;;  %5334 = vst.msk [vmem:[#allocation4 + $0x49] sm:$0xff] %vm5329_vm5, %v5242_v54  ;;  %v15365_v1 = vld [vmem:[#allocation4 + $0x21] sm:$0xff] }
 0x3ef   : > { %v5002_v51 = vadd.f32 %v4970_v25, %v4901_v24  ;;  %v4497_v56 = vadd.f32 %v4465_v33, %v4395_v3  ;;  %v4295_v27 = vadd.f32 %v4263_v22, %v4162_v47  ;;  %v4466_v2 = vmul.f32 %v14945_v35, %v4731_v58  ;;  %v4936_v58 = vld [vmem:[#allocation3 + $0x1a2] sm:$0xff] }
 0x3f0   : > { %v5107_v0 = vmax.f32 %v5075_v32, 0.0  ;;  %v4801_v40 = vadd.f32 %v4769_v23, %v4698_v59  ;;  %v4667_v63 = vmul.f32 %v14955_v6, %v4933_v16  ;;  %v4770_v13 = vmul.f32 %v14991_v53, %v4732_v18  ;;  %v15358_v33 = vld [vmem:[%s17321_s5 + $0x10] sm:$0xff]  ;;  %v15363_v25 = vld [vmem:[#allocation4 + $0x19] sm:$0xff] }
 0x3f1   : > { %v5039_v20 = vmul.f32 %v15073_v39, %v5002_v51  ;;  %v4598_v17 = vadd.f32 %v4566_v38, %v4497_v56  ;;  %v4971_v50 = vmul.f32 %v15021_v30, %v4934_v34  ;;  %v4396_v43 = vadd.f32 %v4364_v5, %v4295_v27  ;;  %12035 = vmatprep.subr.mxu1 %v15358_v33  ;;  %v15378_v23 = vld [vmem:[#allocation4 + $0x39] sm:$0xff] }
 0x3f2   : > { %5287 = vrot.lane.b32.xlu1 %v5107_v0, %s12940_s23  ;;  %v4902_v45 = vadd.f32 %v4870_v29, %v4801_v40  ;;  %v5244_v41 = vpop.permute.xlu1 %5243  ;;  %v4871_v35 = vmul.f32 %v14998_v46, %v4834_v36  ;;  %v4567_v21 = vmul.f32 %v14973_v11, %v4833_v48  ;;  %v4972_v61 = vmul.f32 %v15021_v30, %v4935_v26 }
 0x3f3   : > { %v5076_v52 = vadd.f32 %v15087_v9, %v5039_v20  ;;  %v4699_v42 = vadd.f32 %v4667_v63, %v4598_v17  ;;  %v4498_v60 = vadd.f32 %v4466_v2, %v4396_v43  ;;  %5335 = vst.msk [vmem:[#allocation4 + $0x51] sm:$0xff] %vm5329_vm5, %v5244_v41  ;;  %v4668_v31 = vmul.f32 %v14955_v6, %v4934_v34 }
 0x3f4   : > { %v5003_v14 = vadd.f32 %v4971_v50, %v4902_v45  ;;  %v4771_v12 = vmul.f32 %v14991_v53, %v4733_v8  ;;  %v4872_v15 = vmul.f32 %v14998_v46, %v4835_v4  ;;  %v4973_v49 = vmul.f32 %v15021_v30, %v4936_v58  ;;  %v15367_v46 = vld [vmem:[#allocation4 + $0x31] sm:$0xff]  ;;  %11940 = vmatprep.mubr.msk.f32.mxu1 %vm5112_vm3, %v15363_v25 }
 0x3f5   : > { %v5108_v16 = vmax.f32 %v5076_v52, 0.0  ;;  %v4802_v37 = vadd.f32 %v4770_v13, %v4699_v42  ;;  %v4599_v10 = vadd.f32 %v4567_v21, %v4498_v60  ;;  %11941 = vmatmul.mubr.msk.f32.gmra.mrb[2].mxu1 %vm5112_vm3, %v15365_v1  ;;  %v15380_v3 = vld [vmem:[#allocation4 + $0x49] sm:$0xff] }
 0x3f6   : > { %v5040_v11 = vmul.f32 %v15073_v39, %v5003_v14  ;;  %11943 = vmatprep.mubr.msk.f32.mxu1 %vm5112_vm3, %v15367_v46 }
 0x3f7   : > { %5289 = vrot.lane.b32.xlu0 %v5108_v16, %s12940_s23  ;;  %v4903_v7 = vadd.f32 %v4871_v35, %v4802_v37  ;;  %v5246_v48 = vpop.permute.xlu0 %5245  ;;  %v4700_v57 = vadd.f32 %v4668_v31, %v4599_v10 }
 0x3f8   : > { %v5077_v28 = vadd.f32 %v15087_v9, %v5040_v11  ;;  %5336 = vst.msk [vmem:[#allocation4 + $0x61] sm:$0xff] %vm5329_vm5, %v5246_v48 }
 0x3f9   : > { %v5004_v55 = vadd.f32 %v4972_v61, %v4903_v7  ;;  %v4803_v53 = vadd.f32 %v4771_v12, %v4700_v57  ;;  %11944 = vmatmul.mubr.msk.f32.gmra.mrb[4].mxu1 %vm5112_vm3, %v15378_v23 }
 0x3fa   : > { %v5109_v6 = vmax.f32 %v5077_v28, 0.0  ;;  %11946 = vmatprep.mubr.msk.f32.mxu1 %vm5112_vm3, %v15380_v3  ;;  %v15390_v47 = vld [vmem:[#allocation4 + $0x51] sm:$0xff] }
 0x3fb   : > { %v5041_v62 = vmul.f32 %v15073_v39, %v5004_v55  ;;  %v5248_v19 = vpop.permute.xlu1 %5247  ;;  %v4904_v44 = vadd.f32 %v4872_v15, %v4803_v53  ;;  %v5362_v53 = vld [vmem:[#allocation4] sm:$0xff] }
 0x3fc   : > { %5291 = vrot.lane.b32.xlu1 %v5109_v6, %s12940_s23  ;;  %5337 = vst.msk [vmem:[#allocation4 + $0x69] sm:$0xff] %vm5329_vm5, %v5248_v19  ;;  %v5363_v19 = vld [vmem:[#allocation4 + $0x8] sm:$0xff] }
 0x3fd   : > { %v5078_v30 = vadd.f32 %v15087_v9, %v5041_v62  ;;  %v5005_v24 = vadd.f32 %v4973_v49, %v4904_v44  ;;  %11947 = vmatmul.mubr.msk.f32.gmra.mrb[6].mxu1 %vm5112_vm3, %v15390_v47  ;;  %v15518_v44 = vld [vmem:[%s17321_s5 + $0x18] sm:$0xff] }
 0x3ff   : > { %v5110_v29 = vmax.f32 %v5078_v30, 0.0  ;;  %v5042_v32 = vmul.f32 %v15073_v39, %v5005_v24  ;;  %v15392_v22 = vld [vmem:[#allocation4 + $0x61] sm:$0xff]  ;;  %v15521_v30 = vld [vmem:[#allocation4 + $0x18] sm:$0xff] }
 0x400   : > { %11949 = vmatprep.mubr.msk.f32.mxu1 %vm5112_vm3, %v15392_v22  ;;  %v15527_v24 = vld [vmem:[#allocation4 + $0x20] sm:$0xff] }
 0x401   : > { %5293 = vrot.lane.b32.xlu0 %v5110_v29, %s12940_s23  ;;  %v5250_v59 = vpop.permute.xlu0 %5249  ;;  %v5079_v18 = vadd.f32 %v15087_v9, %v5042_v32  ;;  %v15531_v29 = vld [vmem:[#allocation4 + $0x30] sm:$0xff]  ;;  %v15535_v32 = vld [vmem:[#allocation4 + $0x38] sm:$0xff] }
 0x402   : > { %5338 = vst.msk [vmem:[#allocation4 + $0x79] sm:$0xff] %vm5329_vm5, %v5250_v59  ;;  %v15543_v59 = vld [vmem:[#allocation4 + $0x50] sm:$0xff] }
 0x403   : > { %v5111_v51 = vmax.f32 %v5079_v18, 0.0  ;;  %v15399_v9 = vld [vmem:[#allocation4 + $0x69] sm:$0xff]  ;;  %v15547_v18 = vld [vmem:[#allocation4 + $0x60] sm:$0xff] }
 0x404   : > { %11950 = vmatmul.mubr.msk.f32.gmra.mrb[8].mxu1 %vm5112_vm3, %v15399_v9 }
 0x405   : > { %5295 = vrot.lane.b32.xlu1 %v5111_v51, %s12940_s23  ;;  %v15551_v51 = vld [vmem:[#allocation4 + $0x68] sm:$0xff] }
 0x406   : > { %v5252_v39 = vpop.permute.xlu1 %5251 }
 0x407   : > { %5339 = vst.msk [vmem:[#allocation4 + $0x81] sm:$0xff] %vm5329_vm5, %v5252_v39 }
 0x409   : > { %v15404_v34 = vld [vmem:[#allocation4 + $0x79] sm:$0xff] }
 0x40a   : > { %11952 = vmatprep.mubr.msk.f32.mxu1 %vm5112_vm3, %v15404_v34  ;;  %v15555_v39 = vld [vmem:[#allocation4 + $0x78] sm:$0xff] }
 0x40e   : > { %v5254_v56 = vpop.permute.xlu0 %5253  ;;  %v15408_v38 = vld [vmem:[#allocation4 + $0x81] sm:$0xff] }
 0x40f   : > { %5340 = vst.msk [vmem:[#allocation4 + $0x91] sm:$0xff] %vm5329_vm5, %v5254_v56  ;;  %11953 = vmatmul.mubr.msk.f32.gmra.mrb[10].mxu1 %vm5112_vm3, %v15408_v38  ;;  %v15559_v56 = vld [vmem:[#allocation4 + $0x80] sm:$0xff] }
 0x413   : > { %v5256_v5 = vpop.permute.xlu1 %5255 }
 0x414   : > { %5341 = vst.msk [vmem:[#allocation4 + $0x99] sm:$0xff] %vm5329_vm5, %v5256_v5 }
 0x416   : > { %v15414_v0 = vld [vmem:[#allocation4 + $0x91] sm:$0xff] }
 0x417   : > { %11955 = vmatprep.mubr.msk.f32.mxu1 %vm5112_vm3, %v15414_v0  ;;  %v15563_v5 = vld [vmem:[#allocation4 + $0x90] sm:$0xff] }
 0x419   : > { %v5258_v40 = vpop.permute.xlu0 %5257 }
 0x41a   : > { %5342 = vst.msk [vmem:[#allocation4 + $0xa9] sm:$0xff] %vm5329_vm5, %v5258_v40 }
 0x41b   : > { %v15419_v36 = vld [vmem:[#allocation4 + $0x99] sm:$0xff] }
 0x41c   : > { %11956 = vmatmul.mubr.msk.f32.gmra.mrb[12].mxu1 %vm5112_vm3, %v15419_v36  ;;  %v15567_v40 = vld [vmem:[#allocation4 + $0x98] sm:$0xff] }
 0x41e   : > { %v5260_v27 = vpop.permute.xlu1 %5259 }
 0x41f   : > { %5343 = vst.msk [vmem:[#allocation4 + $0xb1] sm:$0xff] %vm5329_vm5, %v5260_v27 }
 0x421   : > { %v15424_v2 = vld [vmem:[#allocation4 + $0xa9] sm:$0xff] }
 0x422   : > { %11958 = vmatprep.mubr.msk.f32.mxu1 %vm5112_vm3, %v15424_v2  ;;  %v15571_v27 = vld [vmem:[#allocation4 + $0xa8] sm:$0xff] }
 0x423   : > { %v5262_v20 = vpop.permute.xlu0 %5261 }
 0x424   : > { %5344 = vst.msk [vmem:[#allocation4 + $0xc1] sm:$0xff] %vm5329_vm5, %v5262_v20 }
 0x426   : > { %v15429_v17 = vld [vmem:[#allocation4 + $0xb1] sm:$0xff] }
 0x427   : > { %11959 = vmatmul.mubr.msk.f32.gmra.mrb[14].mxu1 %vm5112_vm3, %v15429_v17  ;;  %v15575_v20 = vld [vmem:[#allocation4 + $0xb0] sm:$0xff] }
 0x428   : > { %v5264_v63 = vpop.permute.xlu1 %5263 }
 0x429   : > { %5345 = vst.msk [vmem:[#allocation4 + $0xc9] sm:$0xff] %vm5329_vm5, %v5264_v63 }
 0x42b   : > { %v15434_v13 = vld [vmem:[#allocation4 + $0xc1] sm:$0xff] }
 0x42c   : > { %11961 = vmatprep.mubr.msk.f32.mxu1 %vm5112_vm3, %v15434_v13  ;;  %v15579_v63 = vld [vmem:[#allocation4 + $0xc0] sm:$0xff] }
 0x42d   : > { %v5266_v54 = vpop.permute.xlu0 %5265 }
 0x42e   : > { %5346 = vst.msk [vmem:[#allocation4 + $0xd9] sm:$0xff] %vm5329_vm5, %v5266_v54 }
 0x430   : > { %v15439_v45 = vld [vmem:[#allocation4 + $0xc9] sm:$0xff] }
 0x431   : > { %11962 = vmatmul.mubr.msk.f32.gmra.mrb[16].mxu1 %vm5112_vm3, %v15439_v45  ;;  %v15583_v54 = vld [vmem:[#allocation4 + $0xc8] sm:$0xff] }
 0x432   : > { %v5268_v50 = vpop.permute.xlu1 %5267 }
 0x433   : > { %5347 = vst.msk [vmem:[#allocation4 + $0xe1] sm:$0xff] %vm5329_vm5, %v5268_v50 }
 0x435   : > { %v15444_v26 = vld [vmem:[#allocation4 + $0xd9] sm:$0xff] }
 0x436   : > { %11964 = vmatprep.mubr.msk.f32.mxu1 %vm5112_vm3, %v15444_v26  ;;  %v15587_v50 = vld [vmem:[#allocation4 + $0xd8] sm:$0xff] }
 0x437   : > { %v5270_v43 = vpop.permute.xlu0 %5269 }
 0x438   : > { %5348 = vst.msk [vmem:[#allocation4 + $0xf1] sm:$0xff] %vm5329_vm5, %v5270_v43 }
 0x43a   : > { %v15449_v41 = vld [vmem:[#allocation4 + $0xe1] sm:$0xff] }
 0x43b   : > { %11965 = vmatmul.mubr.msk.f32.gmra.mrb[18].mxu1 %vm5112_vm3, %v15449_v41  ;;  %v15591_v43 = vld [vmem:[#allocation4 + $0xe0] sm:$0xff] }
 0x43c   : > { %v5272_v52 = vpop.permute.xlu1 %5271 }
 0x43d   : > { %5349 = vst.msk [vmem:[#allocation4 + $0xf9] sm:$0xff] %vm5329_vm5, %v5272_v52 }
 0x43f   : > { %v15454_v42 = vld [vmem:[#allocation4 + $0xf1] sm:$0xff] }
 0x440   : > { %11967 = vmatprep.mubr.msk.f32.mxu1 %vm5112_vm3, %v15454_v42  ;;  %v15595_v52 = vld [vmem:[#allocation4 + $0xf0] sm:$0xff] }
 0x441   : > { %v5274_v35 = vpop.permute.xlu0 %5273 }
 0x442   : > { %5350 = vst.msk [vmem:[#allocation4 + $0x109] sm:$0xff] %vm5329_vm5, %v5274_v35 }
 0x444   : > { %v15459_v8 = vld [vmem:[#allocation4 + $0xf9] sm:$0xff] }
 0x445   : > { %11968 = vmatmul.mubr.msk.f32.gmra.mrb[20].mxu1 %vm5112_vm3, %v15459_v8  ;;  %v15599_v35 = vld [vmem:[#allocation4 + $0xf8] sm:$0xff] }
 0x446   : > { %v5276_v14 = vpop.permute.xlu1 %5275 }
 0x447   : > { %5351 = vst.msk [vmem:[#allocation4 + $0x111] sm:$0xff] %vm5329_vm5, %v5276_v14 }
 0x449   : > { %v15464_v60 = vld [vmem:[#allocation4 + $0x109] sm:$0xff] }
 0x44a   : > { %11970 = vmatprep.mubr.msk.f32.mxu1 %vm5112_vm3, %v15464_v60  ;;  %v15603_v14 = vld [vmem:[#allocation4 + $0x108] sm:$0xff] }
 0x44b   : > { %v5278_v21 = vpop.permute.xlu0 %5277 }
 0x44c   : > { %5352 = vst.msk [vmem:[#allocation4 + $0x121] sm:$0xff] %vm5329_vm5, %v5278_v21 }
 0x44e   : > { %v15469_v16 = vld [vmem:[#allocation4 + $0x111] sm:$0xff] }
 0x44f   : > { %11971 = vmatmul.mubr.msk.f32.gmra.mrb[22].mxu1 %vm5112_vm3, %v15469_v16  ;;  %v15607_v21 = vld [vmem:[#allocation4 + $0x110] sm:$0xff] }
 0x450   : > { %v5280_v37 = vpop.permute.xlu1 %5279 }
 0x451   : > { %5353 = vst.msk [vmem:[#allocation4 + $0x129] sm:$0xff] %vm5329_vm5, %v5280_v37 }
 0x453   : > { %v15474_v61 = vld [vmem:[#allocation4 + $0x121] sm:$0xff] }
 0x454   : > { %11973 = vmatprep.mubr.msk.f32.mxu1 %vm5112_vm3, %v15474_v61  ;;  %v15611_v37 = vld [vmem:[#allocation4 + $0x120] sm:$0xff] }
 0x455   : > { %v5282_v4 = vpop.permute.xlu0 %5281 }
 0x456   : > { %5354 = vst.msk [vmem:[#allocation4 + $0x139] sm:$0xff] %vm5329_vm5, %v5282_v4 }
 0x458   : > { %v15479_v11 = vld [vmem:[#allocation4 + $0x129] sm:$0xff] }
 0x459   : > { %17533 = vst [vmem:[#allocation10_spill] sm:$0xff] %v15479_v11  ;;  %11974 = vmatmul.mubr.msk.f32.gmra.mrb[24].mxu1 %vm5112_vm3, %v15479_v11  ;;  %v15615_v4 = vld [vmem:[#allocation4 + $0x128] sm:$0xff] }
 0x45a   : > { %v5284_v10 = vpop.permute.xlu1 %5283 }
 0x45b   : > { %5355 = vst.msk [vmem:[#allocation4 + $0x141] sm:$0xff] %vm5329_vm5, %v5284_v10 }
 0x45d   : > { %v15484_v31 = vld [vmem:[#allocation4 + $0x139] sm:$0xff] }
 0x45e   : > { %17534 = vst [vmem:[#allocation11_spill] sm:$0xff] %v15484_v31  ;;  %11976 = vmatprep.mubr.msk.f32.mxu1 %vm5112_vm3, %v15484_v31  ;;  %v15619_v10 = vld [vmem:[#allocation4 + $0x138] sm:$0xff] }
 0x45f   : > { %v5286_v12 = vpop.permute.xlu0 %5285 }
 0x460   : > { %5356 = vst.msk [vmem:[#allocation4 + $0x151] sm:$0xff] %vm5329_vm5, %v5286_v12 }
 0x462   : > { %v15489_v7 = vld [vmem:[#allocation4 + $0x141] sm:$0xff] }
 0x463   : > { %17535 = vst [vmem:[#allocation25_spill] sm:$0xff] %v15489_v7  ;;  %11977 = vmatmul.mubr.msk.f32.gmra.mrb[26].mxu1 %vm5112_vm3, %v15489_v7  ;;  %v15623_v12 = vld [vmem:[#allocation4 + $0x140] sm:$0xff] }
 0x464   : > { %v5288_v58 = vpop.permute.xlu1 %5287 }
 0x465   : > { %5357 = vst.msk [vmem:[#allocation4 + $0x159] sm:$0xff] %vm5329_vm5, %v5288_v58 }
 0x467   : > { %v15494_v48 = vld [vmem:[#allocation4 + $0x151] sm:$0xff] }
 0x468   : > { %17536 = vst [vmem:[#allocation27_spill] sm:$0xff] %v15494_v48  ;;  %11979 = vmatprep.mubr.msk.f32.mxu1 %vm5112_vm3, %v15494_v48  ;;  %v15627_v58 = vld [vmem:[#allocation4 + $0x150] sm:$0xff] }
 0x469   : > { %v5290_v28 = vpop.permute.xlu0 %5289 }
 0x46a   : > { %5358 = vst.msk [vmem:[#allocation4 + $0x169] sm:$0xff] %vm5329_vm5, %v5290_v28 }
 0x46c   : > { %v15499_v57 = vld [vmem:[#allocation4 + $0x159] sm:$0xff] }
 0x46d   : > { %17537 = vst [vmem:[#allocation29_spill] sm:$0xff] %v15499_v57  ;;  %11980 = vmatmul.mubr.msk.f32.gmra.mrb[28].mxu1 %vm5112_vm3, %v15499_v57  ;;  %v15631_v28 = vld [vmem:[#allocation4 + $0x158] sm:$0xff] }
 0x46e   : > { %v5292_v15 = vpop.permute.xlu1 %5291 }
 0x46f   : > { %5359 = vst.msk [vmem:[#allocation4 + $0x171] sm:$0xff] %vm5329_vm5, %v5292_v15 }
 0x471   : > { %v15504_v55 = vld [vmem:[#allocation4 + $0x169] sm:$0xff] }
 0x472   : > { %17538 = vst [vmem:[#allocation30_spill] sm:$0xff] %v15504_v55  ;;  %11982 = vmatprep.mubr.msk.f32.mxu1 %vm5112_vm3, %v15504_v55  ;;  %v15635_v15 = vld [vmem:[#allocation4 + $0x168] sm:$0xff] }
 0x473   : > { %v5294_v6 = vpop.permute.xlu0 %5293  ;;  %v15656_v55 = vld [vmem:[#allocation4 + $0x22] sm:$0xff] }
 0x474   : > { %5360 = vst.msk [vmem:[#allocation4 + $0x181] sm:$0xff] %vm5329_vm5, %v5294_v6  ;;  %v6071_v6 = vld [vmem:[#allocation4 + $0x2] sm:$0xff]  ;;  %17541 = vst [vmem:[#allocation6_spill] sm:$0xff] %v15656_v55 }
 0x476   : > { %v15509_v49 = vld [vmem:[#allocation4 + $0x171] sm:$0xff] }
 0x477   : > { %17539 = vst [vmem:[#allocation32_spill] sm:$0xff] %v15509_v49  ;;  %11983 = vmatmul.mubr.msk.f32.gmra.mrb[30].mxu1 %vm5112_vm3, %v15509_v49  ;;  %v5296_v62 = vpop.permute.xlu1 %5295  ;;  %v15650_v49 = vld [vmem:[#allocation4 + $0x1a] sm:$0xff] }
 0x478   : > { %11987 = vmatprep.mubr.msk.f32.mxu1 %vm5112_vm3, %v5362_v53  ;;  %5361 = vst.msk [vmem:[#allocation4 + $0x189] sm:$0xff] %vm5329_vm5, %v5296_v62  ;;  %v15639_v53 = vld [vmem:[#allocation4 + $0x170] sm:$0xff]  ;;  %17540 = vst [vmem:[#allocation34_spill] sm:$0xff] %v15650_v49 }
 0x479   : > { %v6072_v62 = vld [vmem:[#allocation4 + $0xa] sm:$0xff] }
 0x47b   : > { %11988 = vmatmul.mubr.msk.f32.vlgmr.msra.gmra.mrb[0].mxu1 %vm5112_vm3, %v5363_v19  ;;  %v15647_v19 = vld [vmem:[%s17321_s5 + $0x20] sm:$0xff] }
 0x47c   : > { %12036 = vmatpush3.msra.mxu1 %v15358_v33  ;;  %11990 = vmatprep.mubr.msk.f32.mxu1 %vm5112_vm3, %v15521_v30  ;;  %v15539_v33 = vld [vmem:[#allocation4 + $0x48] sm:$0xff] }
 0x47d   : > { %12085 = vmatprep.subr.mxu1 %v15518_v44 }
 0x47f   : > { %11991 = vmatmul.mubr.msk.f32.gmra.mrb[2].mxu1 %vm5112_vm3, %v15527_v24 }
 0x480   : > { %11993 = vmatprep.mubr.msk.f32.mxu1 %vm5112_vm3, %v15531_v29 }
 0x483   : > { %11994 = vmatmul.mubr.msk.f32.gmra.mrb[4].mxu1 %vm5112_vm3, %v15535_v32 }
 0x484   : > { %11996 = vmatprep.mubr.msk.f32.mxu1 %vm5112_vm3, %v15539_v33 }
 0x487   : > { %11997 = vmatmul.mubr.msk.f32.gmra.mrb[6].mxu1 %vm5112_vm3, %v15543_v59 }
 0x488   : > { %11999 = vmatprep.mubr.msk.f32.mxu1 %vm5112_vm3, %v15547_v18 }
 0x48b   : > { %12000 = vmatmul.mubr.msk.f32.gmra.mrb[8].mxu1 %vm5112_vm3, %v15551_v51 }
 0x48c   : > { %12002 = vmatprep.mubr.msk.f32.mxu1 %vm5112_vm3, %v15555_v39 }
 0x48f   : > { %12003 = vmatmul.mubr.msk.f32.gmra.mrb[10].mxu1 %vm5112_vm3, %v15559_v56 }
 0x490   : > { %12005 = vmatprep.mubr.msk.f32.mxu1 %vm5112_vm3, %v15563_v5 }
 0x493   : > { %12006 = vmatmul.mubr.msk.f32.gmra.mrb[12].mxu1 %vm5112_vm3, %v15567_v40 }
 0x494   : > { %12008 = vmatprep.mubr.msk.f32.mxu1 %vm5112_vm3, %v15571_v27 }
 0x497   : > { %12009 = vmatmul.mubr.msk.f32.gmra.mrb[14].mxu1 %vm5112_vm3, %v15575_v20 }
 0x498   : > { %12011 = vmatprep.mubr.msk.f32.mxu1 %vm5112_vm3, %v15579_v63 }
 0x49b   : > { %12012 = vmatmul.mubr.msk.f32.gmra.mrb[16].mxu1 %vm5112_vm3, %v15583_v54 }
 0x49c   : > { %12014 = vmatprep.mubr.msk.f32.mxu1 %vm5112_vm3, %v15587_v50 }
 0x49f   : > { %12015 = vmatmul.mubr.msk.f32.gmra.mrb[18].mxu1 %vm5112_vm3, %v15591_v43 }
 0x4a0   : > { %12017 = vmatprep.mubr.msk.f32.mxu1 %vm5112_vm3, %v15595_v52 }
 0x4a3   : > { %12018 = vmatmul.mubr.msk.f32.gmra.mrb[20].mxu1 %vm5112_vm3, %v15599_v35 }
 0x4a4   : > { %12020 = vmatprep.mubr.msk.f32.mxu1 %vm5112_vm3, %v15603_v14 }
 0x4a7   : > { %12021 = vmatmul.mubr.msk.f32.gmra.mrb[22].mxu1 %vm5112_vm3, %v15607_v21 }
 0x4a8   : > { %12023 = vmatprep.mubr.msk.f32.mxu1 %vm5112_vm3, %v15611_v37 }
 0x4ab   : > { %12024 = vmatmul.mubr.msk.f32.gmra.mrb[24].mxu1 %vm5112_vm3, %v15615_v4 }
 0x4ac   : > { %12026 = vmatprep.mubr.msk.f32.mxu1 %vm5112_vm3, %v15619_v10 }
 0x4af   : > { %12027 = vmatmul.mubr.msk.f32.gmra.mrb[26].mxu1 %vm5112_vm3, %v15623_v12 }
 0x4b0   : > { %12029 = vmatprep.mubr.msk.f32.mxu1 %vm5112_vm3, %v15627_v58 }
 0x4b3   : > { %12030 = vmatmul.mubr.msk.f32.gmra.mrb[28].mxu1 %vm5112_vm3, %v15631_v28 }
 0x4b4   : > { %12032 = vmatprep.mubr.msk.f32.mxu1 %vm5112_vm3, %v15635_v15 }
 0x4b7   : > { %12033 = vmatmul.mubr.msk.f32.gmra.mrb[30].mxu1 %vm5112_vm3, %v15639_v53 }
 0x4b8   : > { %12037 = vmatprep.mubr.msk.f32.mxu1 %vm5112_vm3, %v6071_v6  ;;  %v15660_v6 = vld [vmem:[#allocation4 + $0x32] sm:$0xff] }
 0x4b9   : > { %17542 = vst [vmem:[#allocation7_spill] sm:$0xff] %v15660_v6 }
 0x4bb   : > { %12038 = vmatmul.mubr.msk.f32.vlgmr.msra.gmra.mrb[0].mxu1 %vm5112_vm3, %v6072_v62  ;;  %v15664_v62 = vld [vmem:[#allocation4 + $0x3a] sm:$0xff] }
 0x4bc   : > { %12086 = vmatpush3.msra.mxu1 %v15518_v44  ;;  %12040 = vmatprep.mubr.msk.f32.mxu1 %vm5112_vm3, %v15650_v49  ;;  %17543 = vst [vmem:[#allocation8_spill] sm:$0xff] %v15664_v62  ;;  %v15668_v44 = vld [vmem:[#allocation4 + $0x4a] sm:$0xff]  ;;  %v15672_v49 = vld [vmem:[#allocation4 + $0x52] sm:$0xff] }
 0x4bd   : > { %12135 = vmatprep.subr.mxu1 %v15647_v19  ;;  %17544 = vst [vmem:[#allocation9_spill] sm:$0xff] %v15668_v44  ;;  %17545 = vst [vmem:[#allocation36_spill] sm:$0xff] %v15672_v49 }
 0x4bf   : > { %12041 = vmatmul.mubr.msk.f32.gmra.mrb[2].mxu1 %vm5112_vm3, %v15656_v55  ;;  %v15676_v55 = vld [vmem:[#allocation4 + $0x62] sm:$0xff] }
 0x4c0   : > { %12043 = vmatprep.mubr.msk.f32.mxu1 %vm5112_vm3, %v15660_v6  ;;  %17546 = vst [vmem:[#allocation37_spill] sm:$0xff] %v15676_v55  ;;  %v15680_v6 = vld [vmem:[#allocation4 + $0x6a] sm:$0xff] }
 0x4c1   : > { %17547 = vst [vmem:[#allocation12_spill] sm:$0xff] %v15680_v6 }
 0x4c3   : > { %12044 = vmatmul.mubr.msk.f32.gmra.mrb[4].mxu1 %vm5112_vm3, %v15664_v62  ;;  %v15684_v62 = vld [vmem:[#allocation4 + $0x7a] sm:$0xff] }
 0x4c4   : > { %12046 = vmatprep.mubr.msk.f32.mxu1 %vm5112_vm3, %v15668_v44  ;;  %17548 = vst [vmem:[#allocation13_spill] sm:$0xff] %v15684_v62  ;;  %v15688_v44 = vld [vmem:[#allocation4 + $0x82] sm:$0xff] }
 0x4c5   : > { %17549 = vst [vmem:[#allocation14_spill] sm:$0xff] %v15688_v44 }
 0x4c7   : > { %12047 = vmatmul.mubr.msk.f32.gmra.mrb[6].mxu1 %vm5112_vm3, %v15672_v49  ;;  %v15692_v49 = vld [vmem:[#allocation4 + $0x92] sm:$0xff] }
 0x4c8   : > { %12049 = vmatprep.mubr.msk.f32.mxu1 %vm5112_vm3, %v15676_v55  ;;  %17550 = vst [vmem:[#allocation15_spill] sm:$0xff] %v15692_v49  ;;  %v15696_v55 = vld [vmem:[#allocation4 + $0x9a] sm:$0xff] }
 0x4c9   : > { %17551 = vst [vmem:[#allocation16_spill] sm:$0xff] %v15696_v55 }
 0x4cb   : > { %12050 = vmatmul.mubr.msk.f32.gmra.mrb[8].mxu1 %vm5112_vm3, %v15680_v6  ;;  %v15700_v6 = vld [vmem:[#allocation4 + $0xaa] sm:$0xff] }
 0x4cc   : > { %12052 = vmatprep.mubr.msk.f32.mxu1 %vm5112_vm3, %v15684_v62  ;;  %17552 = vst [vmem:[#allocation17_spill] sm:$0xff] %v15700_v6  ;;  %v15704_v62 = vld [vmem:[#allocation4 + $0xb2] sm:$0xff] }
 0x4cd   : > { %17553 = vst [vmem:[#allocation18_spill] sm:$0xff] %v15704_v62 }
 0x4cf   : > { %12053 = vmatmul.mubr.msk.f32.gmra.mrb[10].mxu1 %vm5112_vm3, %v15688_v44  ;;  %v15708_v44 = vld [vmem:[#allocation4 + $0xc2] sm:$0xff] }
 0x4d0   : > { %12055 = vmatprep.mubr.msk.f32.mxu1 %vm5112_vm3, %v15692_v49  ;;  %17554 = vst [vmem:[#allocation19_spill] sm:$0xff] %v15708_v44  ;;  %v15712_v49 = vld [vmem:[#allocation4 + $0xca] sm:$0xff] }
 0x4d1   : > { %17555 = vst [vmem:[#allocation20_spill] sm:$0xff] %v15712_v49 }
 0x4d3   : > { %12056 = vmatmul.mubr.msk.f32.gmra.mrb[12].mxu1 %vm5112_vm3, %v15696_v55  ;;  %v15716_v55 = vld [vmem:[#allocation4 + $0xda] sm:$0xff] }
 0x4d4   : > { %12058 = vmatprep.mubr.msk.f32.mxu1 %vm5112_vm3, %v15700_v6  ;;  %17556 = vst [vmem:[#allocation21_spill] sm:$0xff] %v15716_v55  ;;  %v15720_v6 = vld [vmem:[#allocation4 + $0xe2] sm:$0xff] }
 0x4d5   : > { %17557 = vst [vmem:[#allocation22_spill] sm:$0xff] %v15720_v6 }
 0x4d7   : > { %12059 = vmatmul.mubr.msk.f32.gmra.mrb[14].mxu1 %vm5112_vm3, %v15704_v62  ;;  %v15724_v62 = vld [vmem:[#allocation4 + $0xf2] sm:$0xff] }
 0x4d8   : > { %12061 = vmatprep.mubr.msk.f32.mxu1 %vm5112_vm3, %v15708_v44  ;;  %17558 = vst [vmem:[#allocation23_spill] sm:$0xff] %v15724_v62  ;;  %v15728_v44 = vld [vmem:[#allocation4 + $0xfa] sm:$0xff] }
 0x4d9   : > { %17559 = vst [vmem:[#allocation24_spill] sm:$0xff] %v15728_v44 }
 0x4db   : > { %12062 = vmatmul.mubr.msk.f32.gmra.mrb[16].mxu1 %vm5112_vm3, %v15712_v49  ;;  %v15732_v49 = vld [vmem:[#allocation4 + $0x10a] sm:$0xff] }
 0x4dc   : > { %12064 = vmatprep.mubr.msk.f32.mxu1 %vm5112_vm3, %v15716_v55  ;;  %17560 = vst [vmem:[#allocation26_spill] sm:$0xff] %v15732_v49  ;;  %v15736_v55 = vld [vmem:[#allocation4 + $0x112] sm:$0xff] }
 0x4dd   : > { %17561 = vst [vmem:[#allocation28_spill] sm:$0xff] %v15736_v55 }
 0x4df   : > { %12065 = vmatmul.mubr.msk.f32.gmra.mrb[18].mxu1 %vm5112_vm3, %v15720_v6  ;;  %v15740_v6 = vld [vmem:[#allocation4 + $0x122] sm:$0xff] }
 0x4e0   : > { %12067 = vmatprep.mubr.msk.f32.mxu1 %vm5112_vm3, %v15724_v62  ;;  %17562 = vst [vmem:[#allocation31_spill] sm:$0xff] %v15740_v6  ;;  %v15744_v62 = vld [vmem:[#allocation4 + $0x12a] sm:$0xff] }
 0x4e1   : > { %17563 = vst [vmem:[#allocation33_spill] sm:$0xff] %v15744_v62 }
 0x4e3   : > { %12068 = vmatmul.mubr.msk.f32.gmra.mrb[20].mxu1 %vm5112_vm3, %v15728_v44  ;;  %v15748_v44 = vld [vmem:[#allocation4 + $0x13a] sm:$0xff] }
 0x4e4   : > { %12070 = vmatprep.mubr.msk.f32.mxu1 %vm5112_vm3, %v15732_v49  ;;  %17564 = vst [vmem:[#allocation35_spill] sm:$0xff] %v15748_v44  ;;  %v15752_v49 = vld [vmem:[#allocation4 + $0x142] sm:$0xff] }
 0x4e7   : > { %12071 = vmatmul.mubr.msk.f32.gmra.mrb[22].mxu1 %vm5112_vm3, %v15736_v55  ;;  %v15756_v55 = vld [vmem:[#allocation4 + $0x152] sm:$0xff] }
 0x4e8   : > { %12073 = vmatprep.mubr.msk.f32.mxu1 %vm5112_vm3, %v15740_v6  ;;  %17565 = vst [vmem:[#allocation38_spill] sm:$0xff] %v15756_v55  ;;  %v15760_v6 = vld [vmem:[#allocation4 + $0x15a] sm:$0xff] }
 0x4eb   : > { %12074 = vmatmul.mubr.msk.f32.gmra.mrb[24].mxu1 %vm5112_vm3, %v15744_v62  ;;  %v15764_v62 = vld [vmem:[#allocation4 + $0x16a] sm:$0xff] }
 0x4ec   : > { %12076 = vmatprep.mubr.msk.f32.mxu1 %vm5112_vm3, %v15748_v44  ;;  %17566 = vst [vmem:[#allocation39_spill] sm:$0xff] %v15764_v62  ;;  %v15768_v44 = vld [vmem:[#allocation4 + $0x172] sm:$0xff] }
 0x4ef   : > { %12077 = vmatmul.mubr.msk.f32.gmra.mrb[26].mxu1 %vm5112_vm3, %v15752_v49 }
 0x4f0   : > { %12079 = vmatprep.mubr.msk.f32.mxu1 %vm5112_vm3, %v15756_v55  ;;  %v10736_v55 = vld [vmem:[%s17321_s5 + $0x28] sm:$0xff] }
 0x4f3   : > { %12080 = vmatmul.mubr.msk.f32.gmra.mrb[28].mxu1 %vm5112_vm3, %v15760_v6 }
 0x4f4   : > { %12082 = vmatprep.mubr.msk.f32.mxu1 %vm5112_vm3, %v15764_v62 }
 0x4f7   : > { %12083 = vmatmul.mubr.msk.f32.gmra.mrb[30].mxu1 %vm5112_vm3, %v15768_v44 }
 0x4f8   : > { %12087 = vmatprep.mubr.msk.f32.mxu1 %vm5112_vm3, %v15521_v30  ;;  %v15836_v30 = vld [vmem:[#allocation4 + $0x180] sm:$0xff] }
 0x4fb   : > { %12088 = vmatmul.mubr.msk.f32.vlgmr.msra.gmra.mrb[0].mxu1 %vm5112_vm3, %v15527_v24  ;;  %v15840_v24 = vld [vmem:[#allocation4 + $0x188] sm:$0xff] }
 0x4fc   : > { %12136 = vmatpush3.msra.mxu1 %v15647_v19  ;;  %12090 = vmatprep.mubr.msk.f32.mxu1 %vm5112_vm3, %v15531_v29  ;;  %v10769_v19 = vld [vmem:[%s17321_s5 + $0x30] sm:$0xff] }
 0x4fd   : > { %12185 = vmatprep.subr.mxu1 %v10736_v55 }
 0x4ff   : > { %12091 = vmatmul.mubr.msk.f32.gmra.mrb[2].mxu1 %vm5112_vm3, %v15535_v32 }
 0x500   : > { %12093 = vmatprep.mubr.msk.f32.mxu1 %vm5112_vm3, %v15539_v33 }
 0x503   : > { %12094 = vmatmul.mubr.msk.f32.gmra.mrb[4].mxu1 %vm5112_vm3, %v15543_v59 }
 0x504   : > { %12096 = vmatprep.mubr.msk.f32.mxu1 %vm5112_vm3, %v15547_v18 }
 0x507   : > { %12097 = vmatmul.mubr.msk.f32.gmra.mrb[6].mxu1 %vm5112_vm3, %v15551_v51 }
 0x508   : > { %12099 = vmatprep.mubr.msk.f32.mxu1 %vm5112_vm3, %v15555_v39 }
 0x50b   : > { %12100 = vmatmul.mubr.msk.f32.gmra.mrb[8].mxu1 %vm5112_vm3, %v15559_v56 }
 0x50c   : > { %12102 = vmatprep.mubr.msk.f32.mxu1 %vm5112_vm3, %v15563_v5 }
 0x50f   : > { %12103 = vmatmul.mubr.msk.f32.gmra.mrb[10].mxu1 %vm5112_vm3, %v15567_v40 }
 0x510   : > { %12105 = vmatprep.mubr.msk.f32.mxu1 %vm5112_vm3, %v15571_v27 }
 0x513   : > { %12106 = vmatmul.mubr.msk.f32.gmra.mrb[12].mxu1 %vm5112_vm3, %v15575_v20 }
 0x514   : > { %12108 = vmatprep.mubr.msk.f32.mxu1 %vm5112_vm3, %v15579_v63 }
 0x517   : > { %12109 = vmatmul.mubr.msk.f32.gmra.mrb[14].mxu1 %vm5112_vm3, %v15583_v54 }
 0x518   : > { %12111 = vmatprep.mubr.msk.f32.mxu1 %vm5112_vm3, %v15587_v50 }
 0x51b   : > { %12112 = vmatmul.mubr.msk.f32.gmra.mrb[16].mxu1 %vm5112_vm3, %v15591_v43 }
 0x51c   : > { %12114 = vmatprep.mubr.msk.f32.mxu1 %vm5112_vm3, %v15595_v52 }
 0x51f   : > { %12115 = vmatmul.mubr.msk.f32.gmra.mrb[18].mxu1 %vm5112_vm3, %v15599_v35 }
 0x520   : > { %12117 = vmatprep.mubr.msk.f32.mxu1 %vm5112_vm3, %v15603_v14 }
 0x523   : > { %12118 = vmatmul.mubr.msk.f32.gmra.mrb[20].mxu1 %vm5112_vm3, %v15607_v21 }
 0x524   : > { %12120 = vmatprep.mubr.msk.f32.mxu1 %vm5112_vm3, %v15611_v37 }
 0x527   : > { %12121 = vmatmul.mubr.msk.f32.gmra.mrb[22].mxu1 %vm5112_vm3, %v15615_v4 }
 0x528   : > { %12123 = vmatprep.mubr.msk.f32.mxu1 %vm5112_vm3, %v15619_v10 }
 0x52b   : > { %12124 = vmatmul.mubr.msk.f32.gmra.mrb[24].mxu1 %vm5112_vm3, %v15623_v12 }
 0x52c   : > { %12126 = vmatprep.mubr.msk.f32.mxu1 %vm5112_vm3, %v15627_v58 }
 0x52f   : > { %12127 = vmatmul.mubr.msk.f32.gmra.mrb[26].mxu1 %vm5112_vm3, %v15631_v28 }
 0x530   : > { %12129 = vmatprep.mubr.msk.f32.mxu1 %vm5112_vm3, %v15635_v15 }
 0x533   : > { %12130 = vmatmul.mubr.msk.f32.gmra.mrb[28].mxu1 %vm5112_vm3, %v15639_v53 }
 0x534   : > { %12132 = vmatprep.mubr.msk.f32.mxu1 %vm5112_vm3, %v15836_v30 }
 0x537   : > { %12133 = vmatmul.mubr.msk.f32.gmra.mrb[30].mxu1 %vm5112_vm3, %v15840_v24 }
 0x538   : > { %12137 = vmatprep.mubr.msk.f32.mxu1 %vm5112_vm3, %v15363_v25  ;;  %v17567_v25 = vld [vmem:[#allocation30_spill] sm:$0xff] }
 0x53b   : > { %12138 = vmatmul.mubr.msk.f32.vlgmr.msra.gmra.mrb[0].mxu1 %vm5112_vm3, %v15365_v1  ;;  %v17568_v1 = vld [vmem:[#allocation32_spill] sm:$0xff] }
 0x53c   : > { %12186 = vmatpush3.msra.mxu1 %v10736_v55  ;;  %12140 = vmatprep.mubr.msk.f32.mxu1 %vm5112_vm3, %v15367_v46  ;;  %v15907_v55 = vld [vmem:[#allocation4 + $0x181] sm:$0xff] }
 0x53d   : > { %12235 = vmatprep.subr.mxu1 %v10769_v19  ;;  %17569 = vst [vmem:[#allocation40_spill] sm:$0xff] %v15907_v55 }
 0x53f   : > { %12141 = vmatmul.mubr.msk.f32.gmra.mrb[2].mxu1 %vm5112_vm3, %v15378_v23 }
 0x540   : > { %12143 = vmatprep.mubr.msk.f32.mxu1 %vm5112_vm3, %v15380_v3 }
 0x543   : > { %12144 = vmatmul.mubr.msk.f32.gmra.mrb[4].mxu1 %vm5112_vm3, %v15390_v47 }
 0x544   : > { %12146 = vmatprep.mubr.msk.f32.mxu1 %vm5112_vm3, %v15392_v22 }
 0x547   : > { %12147 = vmatmul.mubr.msk.f32.gmra.mrb[6].mxu1 %vm5112_vm3, %v15399_v9 }
 0x548   : > { %12149 = vmatprep.mubr.msk.f32.mxu1 %vm5112_vm3, %v15404_v34 }
 0x54b   : > { %12150 = vmatmul.mubr.msk.f32.gmra.mrb[8].mxu1 %vm5112_vm3, %v15408_v38 }
 0x54c   : > { %12152 = vmatprep.mubr.msk.f32.mxu1 %vm5112_vm3, %v15414_v0 }
 0x54f   : > { %12153 = vmatmul.mubr.msk.f32.gmra.mrb[10].mxu1 %vm5112_vm3, %v15419_v36 }
 0x550   : > { %12155 = vmatprep.mubr.msk.f32.mxu1 %vm5112_vm3, %v15424_v2 }
 0x553   : > { %12156 = vmatmul.mubr.msk.f32.gmra.mrb[12].mxu1 %vm5112_vm3, %v15429_v17 }
 0x554   : > { %12158 = vmatprep.mubr.msk.f32.mxu1 %vm5112_vm3, %v15434_v13 }
 0x557   : > { %12159 = vmatmul.mubr.msk.f32.gmra.mrb[14].mxu1 %vm5112_vm3, %v15439_v45 }
 0x558   : > { %12161 = vmatprep.mubr.msk.f32.mxu1 %vm5112_vm3, %v15444_v26 }
 0x55b   : > { %12162 = vmatmul.mubr.msk.f32.gmra.mrb[16].mxu1 %vm5112_vm3, %v15449_v41 }
 0x55c   : > { %12164 = vmatprep.mubr.msk.f32.mxu1 %vm5112_vm3, %v15454_v42 }
 0x55f   : > { %12165 = vmatmul.mubr.msk.f32.gmra.mrb[18].mxu1 %vm5112_vm3, %v15459_v8 }
 0x560   : > { %12167 = vmatprep.mubr.msk.f32.mxu1 %vm5112_vm3, %v15464_v60 }
 0x563   : > { %12168 = vmatmul.mubr.msk.f32.gmra.mrb[20].mxu1 %vm5112_vm3, %v15469_v16 }
 0x564   : > { %12170 = vmatprep.mubr.msk.f32.mxu1 %vm5112_vm3, %v15474_v61 }
 0x567   : > { %12171 = vmatmul.mubr.msk.f32.gmra.mrb[22].mxu1 %vm5112_vm3, %v15479_v11  ;;  %v17578_v11 = vld [vmem:[#allocation12_spill] sm:$0xff] }
 0x568   : > { %12173 = vmatprep.mubr.msk.f32.mxu1 %vm5112_vm3, %v15484_v31  ;;  %v15911_v31 = vld [vmem:[#allocation4 + $0x189] sm:$0xff] }
 0x569   : > { %17570 = vst [vmem:[#allocation41_spill] sm:$0xff] %v15911_v31 }
 0x56b   : > { %12174 = vmatmul.mubr.msk.f32.gmra.mrb[24].mxu1 %vm5112_vm3, %v15489_v7  ;;  %v17575_v7 = vld [vmem:[#allocation9_spill] sm:$0xff] }
 0x56c   : > { %12176 = vmatprep.mubr.msk.f32.mxu1 %vm5112_vm3, %v15494_v48  ;;  %v17571_v48 = vld [vmem:[#allocation34_spill] sm:$0xff] }
 0x56f   : > { %12177 = vmatmul.mubr.msk.f32.gmra.mrb[26].mxu1 %vm5112_vm3, %v15499_v57  ;;  %v17572_v57 = vld [vmem:[#allocation6_spill] sm:$0xff] }
 0x570   : > { %12179 = vmatprep.mubr.msk.f32.mxu1 %vm5112_vm3, %v17567_v25  ;;  %v10802_v25 = vld [vmem:[%s17321_s5 + $0x38] sm:$0xff] }
 0x573   : > { %12180 = vmatmul.mubr.msk.f32.gmra.mrb[28].mxu1 %vm5112_vm3, %v17568_v1  ;;  %v17573_v1 = vld [vmem:[#allocation7_spill] sm:$0xff] }
 0x574   : > { %12182 = vmatprep.mubr.msk.f32.mxu1 %vm5112_vm3, %v15907_v55  ;;  %v17574_v55 = vld [vmem:[#allocation8_spill] sm:$0xff] }
 0x577   : > { %12183 = vmatmul.mubr.msk.f32.gmra.mrb[30].mxu1 %vm5112_vm3, %v15911_v31  ;;  %v17576_v31 = vld [vmem:[#allocation36_spill] sm:$0xff] }
 0x578   : > { %12187 = vmatprep.mubr.msk.f32.mxu1 %vm5112_vm3, %v17571_v48  ;;  %v17577_v48 = vld [vmem:[#allocation37_spill] sm:$0xff] }
 0x57b   : > { %12188 = vmatmul.mubr.msk.f32.vlgmr.msra.gmra.mrb[0].mxu1 %vm5112_vm3, %v17572_v57  ;;  %v17579_v57 = vld [vmem:[#allocation13_spill] sm:$0xff] }
 0x57c   : > { %12236 = vmatpush3.msra.mxu1 %v10769_v19  ;;  %12190 = vmatprep.mubr.msk.f32.mxu1 %vm5112_vm3, %v17573_v1  ;;  %v17580_v19 = vld [vmem:[#allocation14_spill] sm:$0xff]  ;;  %v17581_v1 = vld [vmem:[#allocation15_spill] sm:$0xff] }
 0x57d   : > { %12285 = vmatprep.subr.mxu1 %v10802_v25 }
 0x57f   : > { %12191 = vmatmul.mubr.msk.f32.gmra.mrb[2].mxu1 %vm5112_vm3, %v17574_v55  ;;  %v17582_v55 = vld [vmem:[#allocation16_spill] sm:$0xff] }
 0x580   : > { %12193 = vmatprep.mubr.msk.f32.mxu1 %vm5112_vm3, %v17575_v7  ;;  %v17583_v7 = vld [vmem:[#allocation17_spill] sm:$0xff] }
 0x583   : > { %12194 = vmatmul.mubr.msk.f32.gmra.mrb[4].mxu1 %vm5112_vm3, %v17576_v31  ;;  %v17584_v31 = vld [vmem:[#allocation18_spill] sm:$0xff] }
 0x584   : > { %12196 = vmatprep.mubr.msk.f32.mxu1 %vm5112_vm3, %v17577_v48  ;;  %v17585_v48 = vld [vmem:[#allocation19_spill] sm:$0xff] }
 0x587   : > { %12197 = vmatmul.mubr.msk.f32.gmra.mrb[6].mxu1 %vm5112_vm3, %v17578_v11  ;;  %v17586_v11 = vld [vmem:[#allocation20_spill] sm:$0xff] }
 0x588   : > { %12199 = vmatprep.mubr.msk.f32.mxu1 %vm5112_vm3, %v17579_v57  ;;  %v17587_v57 = vld [vmem:[#allocation21_spill] sm:$0xff] }
 0x58b   : > { %12200 = vmatmul.mubr.msk.f32.gmra.mrb[8].mxu1 %vm5112_vm3, %v17580_v19  ;;  %v17588_v19 = vld [vmem:[#allocation22_spill] sm:$0xff] }
 0x58c   : > { %12202 = vmatprep.mubr.msk.f32.mxu1 %vm5112_vm3, %v17581_v1  ;;  %v17589_v1 = vld [vmem:[#allocation23_spill] sm:$0xff] }
 0x58f   : > { %12203 = vmatmul.mubr.msk.f32.gmra.mrb[10].mxu1 %vm5112_vm3, %v17582_v55  ;;  %v17590_v55 = vld [vmem:[#allocation24_spill] sm:$0xff] }
 0x590   : > { %12205 = vmatprep.mubr.msk.f32.mxu1 %vm5112_vm3, %v17583_v7  ;;  %v17591_v7 = vld [vmem:[#allocation26_spill] sm:$0xff] }
 0x593   : > { %12206 = vmatmul.mubr.msk.f32.gmra.mrb[12].mxu1 %vm5112_vm3, %v17584_v31  ;;  %v17592_v31 = vld [vmem:[#allocation28_spill] sm:$0xff] }
 0x594   : > { %12208 = vmatprep.mubr.msk.f32.mxu1 %vm5112_vm3, %v17585_v48  ;;  %v17593_v48 = vld [vmem:[#allocation31_spill] sm:$0xff] }
 0x597   : > { %12209 = vmatmul.mubr.msk.f32.gmra.mrb[14].mxu1 %vm5112_vm3, %v17586_v11  ;;  %v17594_v11 = vld [vmem:[#allocation33_spill] sm:$0xff] }
 0x598   : > { %12211 = vmatprep.mubr.msk.f32.mxu1 %vm5112_vm3, %v17587_v57  ;;  %v17595_v57 = vld [vmem:[#allocation35_spill] sm:$0xff] }
 0x59b   : > { %12212 = vmatmul.mubr.msk.f32.gmra.mrb[16].mxu1 %vm5112_vm3, %v17588_v19 }
 0x59c   : > { %12214 = vmatprep.mubr.msk.f32.mxu1 %vm5112_vm3, %v17589_v1  ;;  %v17596_v1 = vld [vmem:[#allocation38_spill] sm:$0xff] }
 0x59f   : > { %12215 = vmatmul.mubr.msk.f32.gmra.mrb[18].mxu1 %vm5112_vm3, %v17590_v55 }
 0x5a0   : > { %12217 = vmatprep.mubr.msk.f32.mxu1 %vm5112_vm3, %v17591_v7 }
 0x5a3   : > { %12218 = vmatmul.mubr.msk.f32.gmra.mrb[20].mxu1 %vm5112_vm3, %v17592_v31 }
 0x5a4   : > { %12220 = vmatprep.mubr.msk.f32.mxu1 %vm5112_vm3, %v17593_v48  ;;  %v15978_v48 = vld [vmem:[#allocation4 + $0x182] sm:$0xff] }
 0x5a7   : > { %12221 = vmatmul.mubr.msk.f32.gmra.mrb[22].mxu1 %vm5112_vm3, %v17594_v11 }
 0x5a8   : > { %12223 = vmatprep.mubr.msk.f32.mxu1 %vm5112_vm3, %v17595_v57  ;;  %v15982_v57 = vld [vmem:[#allocation4 + $0x18a] sm:$0xff] }
 0x5ab   : > { %12224 = vmatmul.mubr.msk.f32.gmra.mrb[24].mxu1 %vm5112_vm3, %v15752_v49 }
 0x5ac   : > { %12226 = vmatprep.mubr.msk.f32.mxu1 %vm5112_vm3, %v17596_v1 }
 0x5af   : > { %12227 = vmatmul.mubr.msk.f32.gmra.mrb[26].mxu1 %vm5112_vm3, %v15760_v6 }
 0x5b0   : > { %12229 = vmatprep.mubr.msk.f32.mxu1 %vm5112_vm3, %v15764_v62  ;;  %v10835_v62 = vld [vmem:[%s17321_s5 + $0x40] sm:$0xff] }
 0x5b3   : > { %12230 = vmatmul.mubr.msk.f32.gmra.mrb[28].mxu1 %vm5112_vm3, %v15768_v44 }
 0x5b4   : > { %12232 = vmatprep.mubr.msk.f32.mxu1 %vm5112_vm3, %v15978_v48 }
 0x5b7   : > { %12233 = vmatmul.mubr.msk.f32.gmra.mrb[30].mxu1 %vm5112_vm3, %v15982_v57 }
 0x5b8   : > { %12237 = vmatprep.mubr.msk.f32.mxu1 %vm5112_vm3, %v15531_v29  ;;  %v7650_v29 = vld [vmem:[#allocation4 + $0x198] sm:$0xff] }
 0x5bb   : > { %12238 = vmatmul.mubr.msk.f32.vlgmr.msra.gmra.mrb[0].mxu1 %vm5112_vm3, %v15535_v32  ;;  %v7651_v32 = vld [vmem:[#allocation4 + $0x1a0] sm:$0xff] }
 0x5bc   : > { %12286 = vmatpush3.msra.mxu1 %v10802_v25  ;;  %12240 = vmatprep.mubr.msk.f32.mxu1 %vm5112_vm3, %v15539_v33  ;;  %v17616_v33 = vld [vmem:[#allocation17_spill] sm:$0xff] }
 0x5bd   : > { %12335 = vmatprep.subr.mxu1 %v10835_v62 }
 0x5bf   : > { %12241 = vmatmul.mubr.msk.f32.gmra.mrb[2].mxu1 %vm5112_vm3, %v15543_v59  ;;  %v17617_v59 = vld [vmem:[#allocation18_spill] sm:$0xff] }
 0x5c0   : > { %12243 = vmatprep.mubr.msk.f32.mxu1 %vm5112_vm3, %v15547_v18  ;;  %v17618_v18 = vld [vmem:[#allocation19_spill] sm:$0xff] }
 0x5c3   : > { %12244 = vmatmul.mubr.msk.f32.gmra.mrb[4].mxu1 %vm5112_vm3, %v15551_v51  ;;  %v17619_v51 = vld [vmem:[#allocation20_spill] sm:$0xff] }
 0x5c4   : > { %12246 = vmatprep.mubr.msk.f32.mxu1 %vm5112_vm3, %v15555_v39  ;;  %v17620_v39 = vld [vmem:[#allocation21_spill] sm:$0xff] }
 0x5c7   : > { %12247 = vmatmul.mubr.msk.f32.gmra.mrb[6].mxu1 %vm5112_vm3, %v15559_v56  ;;  %v17621_v56 = vld [vmem:[#allocation23_spill] sm:$0xff] }
 0x5c8   : > { %12249 = vmatprep.mubr.msk.f32.mxu1 %vm5112_vm3, %v15563_v5  ;;  %v17622_v5 = vld [vmem:[#allocation31_spill] sm:$0xff] }
 0x5cb   : > { %12250 = vmatmul.mubr.msk.f32.gmra.mrb[8].mxu1 %vm5112_vm3, %v15567_v40  ;;  %v17623_v40 = vld [vmem:[#allocation35_spill] sm:$0xff] }
 0x5cc   : > { %12252 = vmatprep.mubr.msk.f32.mxu1 %vm5112_vm3, %v15571_v27 }
 0x5cf   : > { %12253 = vmatmul.mubr.msk.f32.gmra.mrb[10].mxu1 %vm5112_vm3, %v15575_v20  ;;  %v16183_v20 = vld [vmem:[%s17322_s6 + $0x1] ss:$0 sm:$0xff] }
 0x5d0   : > { %12255 = vmatprep.mubr.msk.f32.mxu1 %vm5112_vm3, %v15579_v63 }
 0x5d3   : > { %12256 = vmatmul.mubr.msk.f32.gmra.mrb[12].mxu1 %vm5112_vm3, %v15583_v54 }
 0x5d4   : > { %12258 = vmatprep.mubr.msk.f32.mxu1 %vm5112_vm3, %v15587_v50  ;;  %v8975_v50 = vld [vmem:[#allocation5 + $0x8] sm:$0xff] }
 0x5d7   : > { %12259 = vmatmul.mubr.msk.f32.gmra.mrb[14].mxu1 %vm5112_vm3, %v15591_v43 }
 0x5d8   : > { %12261 = vmatprep.mubr.msk.f32.mxu1 %vm5112_vm3, %v15595_v52  ;;  %v16190_v52 = vld [vmem:[%s17323_s7] ss:$0 sm:$0xff] }
 0x5db   : > { %12262 = vmatmul.mubr.msk.f32.gmra.mrb[16].mxu1 %vm5112_vm3, %v15599_v35  ;;  %v9076_v35 = vld [vmem:[#allocation5 + $0x9] sm:$0xff] }
 0x5dc   : > { %12264 = vmatprep.mubr.msk.f32.mxu1 %vm5112_vm3, %v15603_v14  ;;  %v16195_v14 = vld [vmem:[%s17323_s7 + $0x1] ss:$0 sm:$0xff] }
 0x5df   : > { %12265 = vmatmul.mubr.msk.f32.gmra.mrb[18].mxu1 %vm5112_vm3, %v15607_v21 }
 0x5e0   : > { %12267 = vmatprep.mubr.msk.f32.mxu1 %vm5112_vm3, %v15611_v37  ;;  %v8974_v37 = vld [vmem:[#allocation5] sm:$0xff] }
 0x5e1   : > { %v9011_v25 = vmul.f32 %v16190_v52, %v8974_v37 }
 0x5e3   : > { %12268 = vmatmul.mubr.msk.f32.gmra.mrb[20].mxu1 %vm5112_vm3, %v15615_v4  ;;  %v9075_v4 = vld [vmem:[#allocation5 + $0x1] sm:$0xff] }
 0x5e4   : > { %12270 = vmatprep.mubr.msk.f32.mxu1 %vm5112_vm3, %v15619_v10 }
 0x5e7   : > { %12271 = vmatmul.mubr.msk.f32.gmra.mrb[22].mxu1 %vm5112_vm3, %v15623_v12 }
 0x5e8   : > { %12273 = vmatprep.mubr.msk.f32.mxu1 %vm5112_vm3, %v15627_v58 }
 0x5eb   : > { %12274 = vmatmul.mubr.msk.f32.gmra.mrb[24].mxu1 %vm5112_vm3, %v15631_v28 }
 0x5ec   : > { %12276 = vmatprep.mubr.msk.f32.mxu1 %vm5112_vm3, %v15635_v15 }
 0x5ef   : > { %12277 = vmatmul.mubr.msk.f32.gmra.mrb[26].mxu1 %vm5112_vm3, %v15639_v53  ;;  %v9012_v53 = vmul.f32 %v16190_v52, %v8975_v50 }
 0x5f0   : > { %12279 = vmatprep.mubr.msk.f32.mxu1 %vm5112_vm3, %v15836_v30  ;;  %v9177_v30 = vld [vmem:[#allocation5 + $0xa] sm:$0xff] }
 0x5f3   : > { %12280 = vmatmul.mubr.msk.f32.gmra.mrb[28].mxu1 %vm5112_vm3, %v15840_v24  ;;  %v16213_v24 = vld [vmem:[%s17323_s7 + $0x2] ss:$0 sm:$0xff] }
 0x5f4   : > { %12282 = vmatprep.mubr.msk.f32.mxu1 %vm5112_vm3, %v7650_v29 }
 0x5f7   : > { %12283 = vmatmul.mubr.msk.f32.gmra.mrb[30].mxu1 %vm5112_vm3, %v7651_v32 }
 0x5f8   : > { %12287 = vmatprep.mubr.msk.f32.mxu1 %vm5112_vm3, %v15367_v46  ;;  %v17597_v46 = vld [vmem:[#allocation10_spill] sm:$0xff] }
 0x5fb   : > { %12288 = vmatmul.mubr.msk.f32.vlgmr.msra.gmra.mrb[0].mxu1 %vm5112_vm3, %v15378_v23  ;;  %v17598_v23 = vld [vmem:[#allocation11_spill] sm:$0xff] }
 0x5fc   : > { %12336 = vmatpush3.msra.mxu1 %v10835_v62  ;;  %12290 = vmatprep.mubr.msk.f32.mxu1 %vm5112_vm3, %v15380_v3  ;;  %v17599_v3 = vld [vmem:[#allocation25_spill] sm:$0xff] }
 0x5ff   : > { %12291 = vmatmul.mubr.msk.f32.gmra.mrb[2].mxu1 %vm5112_vm3, %v15390_v47  ;;  %v17600_v47 = vld [vmem:[#allocation27_spill] sm:$0xff] }
 0x600   : > { %12293 = vmatprep.mubr.msk.f32.mxu1 %vm5112_vm3, %v15392_v22  ;;  %v17601_v22 = vld [vmem:[#allocation29_spill] sm:$0xff] }
 0x603   : > { %12294 = vmatmul.mubr.msk.f32.gmra.mrb[4].mxu1 %vm5112_vm3, %v15399_v9  ;;  %v17602_v9 = vld [vmem:[#allocation30_spill] sm:$0xff] }
 0x604   : > { %12296 = vmatprep.mubr.msk.f32.mxu1 %vm5112_vm3, %v15404_v34  ;;  %v17603_v34 = vld [vmem:[#allocation32_spill] sm:$0xff] }
 0x607   : > { %12297 = vmatmul.mubr.msk.f32.gmra.mrb[6].mxu1 %vm5112_vm3, %v15408_v38  ;;  %v17604_v38 = vld [vmem:[#allocation40_spill] sm:$0xff] }
 0x608   : > { %12299 = vmatprep.mubr.msk.f32.mxu1 %vm5112_vm3, %v15414_v0  ;;  %v8037_v0 = vld [vmem:[#allocation4 + $0x199] sm:$0xff] }
 0x60b   : > { %12300 = vmatmul.mubr.msk.f32.gmra.mrb[8].mxu1 %vm5112_vm3, %v15419_v36  ;;  %v17605_v36 = vld [vmem:[#allocation41_spill] sm:$0xff] }
 0x60c   : > { %12302 = vmatprep.mubr.msk.f32.mxu1 %vm5112_vm3, %v15424_v2  ;;  %v8038_v2 = vld [vmem:[#allocation4 + $0x1a1] sm:$0xff] }
 0x60f   : > { %12303 = vmatmul.mubr.msk.f32.gmra.mrb[10].mxu1 %vm5112_vm3, %v15429_v17  ;;  %v17606_v17 = vld [vmem:[#allocation7_spill] sm:$0xff] }
 0x610   : > { %12305 = vmatprep.mubr.msk.f32.mxu1 %vm5112_vm3, %v15434_v13  ;;  %v17607_v13 = vld [vmem:[#allocation8_spill] sm:$0xff] }
 0x613   : > { %12306 = vmatmul.mubr.msk.f32.gmra.mrb[12].mxu1 %vm5112_vm3, %v15439_v45  ;;  %v17608_v45 = vld [vmem:[#allocation9_spill] sm:$0xff] }
 0x614   : > { %12308 = vmatprep.mubr.msk.f32.mxu1 %vm5112_vm3, %v15444_v26  ;;  %v17609_v26 = vld [vmem:[#allocation36_spill] sm:$0xff] }
 0x617   : > { %12309 = vmatmul.mubr.msk.f32.gmra.mrb[14].mxu1 %vm5112_vm3, %v15449_v41  ;;  %v17610_v41 = vld [vmem:[#allocation37_spill] sm:$0xff] }
 0x618   : > { %12311 = vmatprep.mubr.msk.f32.mxu1 %vm5112_vm3, %v15454_v42  ;;  %v17611_v42 = vld [vmem:[#allocation12_spill] sm:$0xff] }
 0x61b   : > { %12312 = vmatmul.mubr.msk.f32.gmra.mrb[16].mxu1 %vm5112_vm3, %v15459_v8  ;;  %v17612_v8 = vld [vmem:[#allocation13_spill] sm:$0xff] }
 0x61c   : > { %12314 = vmatprep.mubr.msk.f32.mxu1 %vm5112_vm3, %v15464_v60  ;;  %v17613_v60 = vld [vmem:[#allocation14_spill] sm:$0xff] }
 0x61f   : > { %12315 = vmatmul.mubr.msk.f32.gmra.mrb[18].mxu1 %vm5112_vm3, %v15469_v16  ;;  %v17614_v16 = vld [vmem:[#allocation15_spill] sm:$0xff] }
 0x620   : > { %12317 = vmatprep.mubr.msk.f32.mxu1 %vm5112_vm3, %v15474_v61  ;;  %v17615_v61 = vld [vmem:[#allocation16_spill] sm:$0xff] }
 0x623   : > { %12318 = vmatmul.mubr.msk.f32.gmra.mrb[20].mxu1 %vm5112_vm3, %v17597_v46 }
 0x624   : > { %12320 = vmatprep.mubr.msk.f32.mxu1 %vm5112_vm3, %v17598_v23  ;;  %v9214_v23 = vmul.f32 %v16213_v24, %v9177_v30 }
 0x627   : > { %12321 = vmatmul.mubr.msk.f32.gmra.mrb[22].mxu1 %vm5112_vm3, %v17599_v3 }
 0x628   : > { %12323 = vmatprep.mubr.msk.f32.mxu1 %vm5112_vm3, %v17600_v47 }
 0x62b   : > { %12324 = vmatmul.mubr.msk.f32.gmra.mrb[24].mxu1 %vm5112_vm3, %v17601_v22 }
 0x62c   : > { %12326 = vmatprep.mubr.msk.f32.mxu1 %vm5112_vm3, %v17602_v9 }
 0x62f   : > { %12327 = vmatmul.mubr.msk.f32.gmra.mrb[26].mxu1 %vm5112_vm3, %v17603_v34 }
 0x630   : > { %12329 = vmatprep.mubr.msk.f32.mxu1 %vm5112_vm3, %v17604_v38 }
 0x633   : > { %12330 = vmatmul.mubr.msk.f32.gmra.mrb[28].mxu1 %vm5112_vm3, %v17605_v36 }
 0x634   : > { %12332 = vmatprep.mubr.msk.f32.mxu1 %vm5112_vm3, %v8037_v0 }
 0x637   : > { %12333 = vmatmul.mubr.msk.f32.gmra.mrb[30].mxu1 %vm5112_vm3, %v8038_v2  ;;  %v16240_v2 = vld [vmem:[%s17323_s7 + $0x5] ss:$0 sm:$0xff] }
 0x638   : > { %12337 = vmatprep.mubr.msk.f32.mxu1 %vm5112_vm3, %v17606_v17  ;;  %v16245_v17 = vld [vmem:[%s17323_s7 + $0x6] ss:$0 sm:$0xff] }
 0x63b   : > { %12338 = vmatmul.mubr.msk.f32.vlgmr.msra.gmra.mrb[0].mxu1 %vm5112_vm3, %v17607_v13 }
 0x63c   : > { %12340 = vmatprep.mubr.msk.f32.mxu1 %vm5112_vm3, %v17608_v45 }
 0x63f   : > { %12341 = vmatmul.mubr.msk.f32.gmra.mrb[2].mxu1 %vm5112_vm3, %v17609_v26 }
 0x640   : > { %12343 = vmatprep.mubr.msk.f32.mxu1 %vm5112_vm3, %v17610_v41  ;;  %v16251_v41 = vld [vmem:[%s17323_s7 + $0x4] ss:$0 sm:$0xff] }
 0x643   : > { %12344 = vmatmul.mubr.msk.f32.gmra.mrb[4].mxu1 %vm5112_vm3, %v17611_v42 }
 0x644   : > { %12346 = vmatprep.mubr.msk.f32.mxu1 %vm5112_vm3, %v17612_v8 }
 0x647   : > { %12347 = vmatmul.mubr.msk.f32.gmra.mrb[6].mxu1 %vm5112_vm3, %v17613_v60 }
 0x648   : > { %12349 = vmatprep.mubr.msk.f32.mxu1 %vm5112_vm3, %v17614_v16 }
 0x64b   : > { %12350 = vmatmul.mubr.msk.f32.gmra.mrb[8].mxu1 %vm5112_vm3, %v17615_v61 }
 0x64c   : > { %12352 = vmatprep.mubr.msk.f32.mxu1 %vm5112_vm3, %v17616_v33 }
 0x64f   : > { %12353 = vmatmul.mubr.msk.f32.gmra.mrb[10].mxu1 %vm5112_vm3, %v17617_v59 }
 0x650   : > { %12355 = vmatprep.mubr.msk.f32.mxu1 %vm5112_vm3, %v17618_v18 }
 0x653   : > { %12356 = vmatmul.mubr.msk.f32.gmra.mrb[12].mxu1 %vm5112_vm3, %v17619_v51 }
 0x654   : > { %12358 = vmatprep.mubr.msk.f32.mxu1 %vm5112_vm3, %v17620_v39 }
 0x657   : > { %12359 = vmatmul.mubr.msk.f32.gmra.mrb[14].mxu1 %vm5112_vm3, %v17588_v19 }
 0x658   : > { %12361 = vmatprep.mubr.msk.f32.mxu1 %vm5112_vm3, %v17621_v56 }
 0x65b   : > { %12362 = vmatmul.mubr.msk.f32.gmra.mrb[16].mxu1 %vm5112_vm3, %v17590_v55  ;;  %v9176_v55 = vld [vmem:[#allocation5 + $0x2] sm:$0xff] }
 0x65c   : > { %12364 = vmatprep.mubr.msk.f32.mxu1 %vm5112_vm3, %v17591_v7  ;;  %v17624_v7 = vld [vmem:[#allocation39_spill] sm:$0xff]  ;;  %v9213_v3 = vmul.f32 %v16213_v24, %v9176_v55 }
 0x65f   : > { %12365 = vmatmul.mubr.msk.f32.gmra.mrb[18].mxu1 %vm5112_vm3, %v17592_v31  ;;  %v8425_v31 = vld [vmem:[#allocation4 + $0x1a2] sm:$0xff] }
 0x660   : > { %12367 = vmatprep.mubr.msk.f32.mxu1 %vm5112_vm3, %v17622_v5 }
 0x663   : > { %12368 = vmatmul.mubr.msk.f32.gmra.mrb[20].mxu1 %vm5112_vm3, %v17594_v11  ;;  %v8424_v11 = vld [vmem:[#allocation4 + $0x19a] sm:$0xff] }
 0x664   : > { %12370 = vmatprep.mubr.msk.f32.mxu1 %vm5112_vm3, %v17623_v40 }
 0x667   : > { %12371 = vmatmul.mubr.msk.f32.gmra.mrb[22].mxu1 %vm5112_vm3, %v15752_v49  ;;  %v16178_v49 = vld [vmem:[%s17322_s6] ss:$0 sm:$0xff] }
 0x668   : > { %12373 = vmatprep.mubr.msk.f32.mxu1 %vm5112_vm3, %v17596_v1  ;;  %v9112_v1 = vmul.f32 %v16195_v14, %v9075_v4 }
 0x66a   : > { %v9144_v34 = vadd.f32 %v9112_v1, %v9011_v25 }
 0x66b   : > { %12374 = vmatmul.mubr.msk.f32.gmra.mrb[24].mxu1 %vm5112_vm3, %v15760_v6  ;;  %v9113_v6 = vmul.f32 %v16195_v14, %v9076_v35 }
 0x66c   : > { %12376 = vmatprep.mubr.msk.f32.mxu1 %vm5112_vm3, %v17624_v7  ;;  %v9245_v33 = vadd.f32 %v9213_v3, %v9144_v34 }
 0x66d   : > { %v9145_v9 = vadd.f32 %v9113_v6, %v9012_v53 }
 0x66f   : > { %12377 = vmatmul.mubr.msk.f32.gmra.mrb[26].mxu1 %vm5112_vm3, %v15768_v44  ;;  %v9246_v60 = vadd.f32 %v9214_v23, %v9145_v9 }
 0x670   : > { %12379 = vmatprep.mubr.msk.f32.mxu1 %vm5112_vm3, %v15978_v48 }
 0x673   : > { %12380 = vmatmul.mubr.msk.f32.gmra.mrb[28].mxu1 %vm5112_vm3, %v15982_v57 }
 0x674   : > { %12382 = vmatprep.mubr.msk.f32.mxu1 %vm5112_vm3, %v8424_v11 }
 0x677   : > { %12383 = vmatmul.mubr.msk.f32.gmra.mrb[30].mxu1 %vm5112_vm3, %v8425_v31  ;;  %v16272_v31 = vld [vmem:[%s17323_s7 + $0x9] ss:$0 sm:$0xff] }
 0x70e   : > { %v12339_v27 = vpop.f32.mrb[0].mxu1 }
 0x70f   : > { %v8787_v63 = vmul.f32 %v12339_v27, %v16178_v49  ;;  %v8590_v54 = vpop.f32.mrb[1].mxu1  ;;  %v16277_v27 = vld [vmem:[%s17323_s7 + $0xa] ss:$0 sm:$0xff] }
 0x710   : > { %v8786_v43 = vmul.f32 %v16178_v49, %v8590_v54 }
 0x711   : > { %v8824_v21 = vadd.f32 %v16183_v20, %v8787_v63 }
 0x712   : > { %v8823_v10 = vadd.f32 %v16183_v20, %v8786_v43  ;;  %v12342_v12 = vpop.f32.mrb[2].mxu1 }
 0x713   : > { %v8856_v58 = vmax.f32 %v8824_v21, 0.0  ;;  %v8789_v28 = vmul.f32 %v12342_v12, %v16178_v49  ;;  %v8600_v15 = vpop.f32.mrb[3].mxu1 }
 0x714   : > { %v8855_v62 = vmax.f32 %v8823_v10, 0.0  ;;  %v8788_v44 = vmul.f32 %v16178_v49, %v8600_v15 }
 0x715   : > { %8943 = vst.msk [vmem:[#allocation5 + $0x21] sm:$0xff] %vm333_vm1, %v8856_v58  ;;  %9993 = vst.msk [vmem:[%s16203_s22 + $0x8] sm:$0xff] %vm333_vm1, %v8856_v58  ;;  %v8826_v48 = vadd.f32 %v16183_v20, %v8789_v28  ;;  %v16292_v28 = vld [vmem:[%s17323_s7 + $0x8] ss:$0 sm:$0xff] }
 0x716   : > { %8942 = vst.msk [vmem:[#allocation5 + $0x19] sm:$0xff] %vm333_vm1, %v8855_v62  ;;  %9992 = vst.msk [vmem:[%s16203_s22] sm:$0xff] %vm333_vm1, %v8855_v62  ;;  %v8825_v57 = vadd.f32 %v16183_v20, %v8788_v44  ;;  %v12345_v19 = vpop.f32.mrb[4].mxu1 }
 0x717   : > { %v8858_v29 = vmax.f32 %v8826_v48, 0.0  ;;  %v8791_v32 = vmul.f32 %v12345_v19, %v16178_v49  ;;  %v8610_v46 = vpop.f32.mrb[5].mxu1 }
 0x718   : > { %v8857_v47 = vmax.f32 %v8825_v57, 0.0  ;;  %v8790_v22 = vmul.f32 %v16178_v49, %v8610_v46 }
 0x719   : > { %8945 = vst.msk [vmem:[#allocation5 + $0x39] sm:$0xff] %vm333_vm1, %v8858_v29  ;;  %9995 = vst.msk [vmem:[%s16203_s22 + $0x18] sm:$0xff] %vm333_vm1, %v8858_v29  ;;  %v8828_v38 = vadd.f32 %v16183_v20, %v8791_v32 }
 0x71a   : > { %8944 = vst.msk [vmem:[#allocation5 + $0x31] sm:$0xff] %vm333_vm1, %v8857_v47  ;;  %9994 = vst.msk [vmem:[%s16203_s22 + $0x10] sm:$0xff] %vm333_vm1, %v8857_v47  ;;  %v8827_v0 = vadd.f32 %v16183_v20, %v8790_v22  ;;  %v12348_v36 = vpop.f32.mrb[6].mxu1 }
 0x71b   : > { %v8860_v13 = vmax.f32 %v8828_v38, 0.0  ;;  %v8793_v45 = vmul.f32 %v12348_v36, %v16178_v49  ;;  %v8620_v26 = vpop.f32.mrb[7].mxu1 }
 0x71c   : > { %v8859_v42 = vmax.f32 %v8827_v0, 0.0  ;;  %v8792_v8 = vmul.f32 %v16178_v49, %v8620_v26  ;;  %v9380_v16 = vld [vmem:[#allocation5 + $0x21] sm:$0xff] }
 0x71d   : > { %v9481_v61 = vld [vmem:[#allocation5 + $0x22] sm:$0xff]  ;;  %8947 = vst.msk [vmem:[#allocation5 + $0x51] sm:$0xff] %vm333_vm1, %v8860_v13  ;;  %9997 = vst.msk [vmem:[%s16203_s22 + $0x28] sm:$0xff] %vm333_vm1, %v8860_v13  ;;  %v8830_v59 = vadd.f32 %v16183_v20, %v8793_v45  ;;  %v9417_v51 = vmul.f32 %v16240_v2, %v9380_v16  ;;  %v16260_v56 = vld [vmem:[#allocation5 + $0x18] sm:$0xff]  ;;  %v9115_v50 = vmul.f32 %v16195_v14, %v9380_v16 }
 0x71e   : > { %v9278_v18 = vld [vmem:[#allocation5 + $0x20] sm:$0xff]  ;;  %v9518_v39 = vmul.f32 %v16245_v17, %v9481_v61  ;;  %8946 = vst.msk [vmem:[#allocation5 + $0x49] sm:$0xff] %vm333_vm1, %v8859_v42  ;;  %9996 = vst.msk [vmem:[%s16203_s22 + $0x20] sm:$0xff] %vm333_vm1, %v8859_v42  ;;  %v8829_v40 = vadd.f32 %v16183_v20, %v8792_v8  ;;  %v12351_v7 = vpop.f32.mrb[8].mxu1  ;;  %v9315_v63 = vmul.f32 %v16251_v41, %v16260_v56 }
 0x71f   : > { %v16262_v5 = vld [vmem:[#allocation5 + $0x19] sm:$0xff]  ;;  %v9316_v11 = vmul.f32 %v16251_v41, %v9278_v18  ;;  %v8862_v43 = vmax.f32 %v8830_v59, 0.0  ;;  %v8795_v35 = vmul.f32 %v12351_v7, %v16178_v49  ;;  %v8630_v21 = vpop.f32.mrb[9].mxu1  ;;  %v9014_v4 = vmul.f32 %v16190_v52, %v9278_v18 }
 0x720   : > { %v16281_v54 = vld [vmem:[#allocation5 + $0x1a] sm:$0xff]  ;;  %v9416_v37 = vmul.f32 %v16240_v2, %v16262_v5  ;;  %v8861_v10 = vmax.f32 %v8829_v40, 0.0  ;;  %v8794_v12 = vmul.f32 %v16178_v49, %v8630_v21  ;;  %v9347_v6 = vadd.f32 %v9315_v63, %v9245_v33 }
 0x721   : > { %v9348_v58 = vadd.f32 %v9316_v11, %v9246_v60  ;;  %v16294_v15 = vld [vmem:[#allocation5 + $0x39] sm:$0xff]  ;;  %8949 = vst.msk [vmem:[#allocation5 + $0x69] sm:$0xff] %vm333_vm1, %v8862_v43  ;;  %9999 = vst.msk [vmem:[%s16203_s22 + $0x38] sm:$0xff] %vm333_vm1, %v8862_v43  ;;  %v8832_v62 = vadd.f32 %v16183_v20, %v8795_v35  ;;  %v9517_v1 = vmul.f32 %v16245_v17, %v16281_v54  ;;  %v16310_v55 = vld [vmem:[#allocation5 + $0x30] sm:$0xff] }
 0x722   : > { %v16296_v53 = vld [vmem:[#allocation5 + $0x3a] sm:$0xff]  ;;  %v9722_v30 = vmul.f32 %v16272_v31, %v16294_v15  ;;  %8948 = vst.msk [vmem:[#allocation5 + $0x61] sm:$0xff] %vm333_vm1, %v8861_v10  ;;  %9998 = vst.msk [vmem:[%s16203_s22 + $0x30] sm:$0xff] %vm333_vm1, %v8861_v10  ;;  %v8831_v48 = vadd.f32 %v16183_v20, %v8794_v12  ;;  %v12354_v57 = vpop.f32.mrb[10].mxu1  ;;  %v9448_v29 = vadd.f32 %v9416_v37, %v9347_v6  ;;  %v16316_v32 = vld [vmem:[#allocation5 + $0x31] sm:$0xff] }
 0x723   : > { %v16302_v44 = vld [vmem:[#allocation5 + $0x38] sm:$0xff]  ;;  %v9823_v25 = vmul.f32 %v16277_v27, %v16296_v53  ;;  %v9449_v19 = vadd.f32 %v9417_v51, %v9348_v58  ;;  %v9147_v46 = vadd.f32 %v9115_v50, %v9014_v4  ;;  %v8864_v23 = vmax.f32 %v8832_v62, 0.0  ;;  %v8640_v47 = vpop.f32.mrb[11].mxu1  ;;  %v16356_v4 = vld [vmem:[%s17324_s8] ss:$0 sm:$0xff] }
 0x724   : > { %v8797_v3 = vmul.f32 %v12354_v57, %v16178_v49  ;;  %v9621_v22 = vmul.f32 %v16292_v28, %v16302_v44  ;;  %v9620_v9 = vmul.f32 %v16292_v28, %v16310_v55  ;;  %v16323_v34 = vld [vmem:[#allocation5 + $0x32] sm:$0xff]  ;;  %v8863_v38 = vmax.f32 %v8831_v48, 0.0 }
 0x725   : > { %v8796_v0 = vmul.f32 %v16178_v49, %v8640_v47  ;;  %v9550_v36 = vadd.f32 %v9518_v39, %v9449_v19  ;;  %v9549_v13 = vadd.f32 %v9517_v1, %v9448_v29  ;;  %8951 = vst.msk [vmem:[#allocation5 + $0x81] sm:$0xff] %vm333_vm1, %v8864_v23  ;;  %10001 = vst.msk [vmem:[%s16203_s22 + $0x48] sm:$0xff] %vm333_vm1, %v8864_v23  ;;  %v16341_v51 = vld [vmem:[#allocation5 + $0x50] sm:$0xff] }
 0x726   : > { %v8834_v45 = vadd.f32 %v16183_v20, %v8797_v3  ;;  %v9721_v26 = vmul.f32 %v16272_v31, %v16316_v32  ;;  %v9216_v42 = vmul.f32 %v16213_v24, %v9481_v61  ;;  %v9318_v8 = vmul.f32 %v16251_v41, %v16302_v44  ;;  %8950 = vst.msk [vmem:[#allocation5 + $0x79] sm:$0xff] %vm333_vm1, %v8863_v38  ;;  %v12357_v16 = vpop.f32.mrb[12].mxu1  ;;  %v16346_v63 = vld [vmem:[#allocation5 + $0x51] sm:$0xff] }
 0x727   : > { %10000 = vst.msk [vmem:[%s16203_s22 + $0x40] sm:$0xff] %vm333_vm1, %v8863_v38  ;;  %v8833_v60 = vadd.f32 %v16183_v20, %v8796_v0  ;;  %v9653_v33 = vadd.f32 %v9621_v22, %v9550_v36  ;;  %v9652_v59 = vadd.f32 %v9620_v9, %v9549_v13  ;;  %v9822_v18 = vmul.f32 %v16277_v27, %v16323_v34  ;;  %v8650_v40 = vpop.f32.mrb[13].mxu1 }
 0x728   : > { %v8866_v39 = vmax.f32 %v8834_v45, 0.0  ;;  %v8799_v61 = vmul.f32 %v12357_v16, %v16178_v49  ;;  %v9248_v7 = vadd.f32 %v9216_v42, %v9147_v46  ;;  %v9419_v11 = vmul.f32 %v16240_v2, %v16294_v15  ;;  %v16372_v46 = vld [vmem:[%s17324_s8 + $0x1] ss:$0 sm:$0xff] }
 0x729   : > { %v8865_v50 = vmax.f32 %v8833_v60, 0.0  ;;  %v8798_v43 = vmul.f32 %v16178_v49, %v8650_v40  ;;  %v9754_v35 = vadd.f32 %v9722_v30, %v9653_v33  ;;  %v9753_v21 = vadd.f32 %v9721_v26, %v9652_v59 }
 0x72a   : > { %8953 = vst.msk [vmem:[#allocation5 + $0x99] sm:$0xff] %vm333_vm1, %v8866_v39  ;;  %10003 = vst.msk [vmem:[%s16203_s22 + $0x58] sm:$0xff] %vm333_vm1, %v8866_v39  ;;  %v8836_v37 = vadd.f32 %v16183_v20, %v8799_v61  ;;  %v9350_v10 = vadd.f32 %v9318_v8, %v9248_v7  ;;  %v9520_v12 = vmul.f32 %v16245_v17, %v16296_v53  ;;  %v12360_v62 = vpop.f32.mrb[14].mxu1  ;;  %v16393_v8 = vld [vmem:[#allocation5 + $0x52] sm:$0xff] }
 0x72b   : > { %v9623_v58 = vmul.f32 %v16292_v28, %v16341_v51  ;;  %8952 = vst.msk [vmem:[#allocation5 + $0x91] sm:$0xff] %vm333_vm1, %v8865_v50  ;;  %10002 = vst.msk [vmem:[%s16203_s22 + $0x50] sm:$0xff] %vm333_vm1, %v8865_v50  ;;  %v8835_v6 = vadd.f32 %v16183_v20, %v8798_v43  ;;  %v9855_v30 = vadd.f32 %v9823_v25, %v9754_v35  ;;  %v8660_v29 = vpop.f32.mrb[15].mxu1 }
 0x72c   : > { %v9854_v1 = vadd.f32 %v9822_v18, %v9753_v21  ;;  %v9724_v48 = vmul.f32 %v16272_v31, %v16346_v63  ;;  %v8868_v57 = vmax.f32 %v8836_v37, 0.0  ;;  %v8801_v19 = vmul.f32 %v12360_v62, %v16178_v49 }
 0x72d   : > { %v9451_v23 = vadd.f32 %v9419_v11, %v9350_v10  ;;  %v9013_v3 = vmul.f32 %v16190_v52, %v16260_v56  ;;  %v8867_v47 = vmax.f32 %v8835_v6, 0.0  ;;  %v8800_v25 = vmul.f32 %v16178_v49, %v8660_v29 }
 0x72e   : > { %v9892_v22 = vmul.f32 %v16356_v4, %v9855_v30  ;;  %v9891_v9 = vmul.f32 %v16356_v4, %v9854_v1  ;;  %8955 = vst.msk [vmem:[#allocation5 + $0xb1] sm:$0xff] %vm333_vm1, %v8868_v57  ;;  %10005 = vst.msk [vmem:[%s16203_s22 + $0x68] sm:$0xff] %vm333_vm1, %v8868_v57  ;;  %v8838_v38 = vadd.f32 %v16183_v20, %v8801_v19  ;;  %v12363_v45 = vpop.f32.mrb[16].mxu1  ;;  %v16414_v30 = vld [vmem:[#allocation5 + $0x48] sm:$0xff] }
 0x72f   : > { %v9552_v0 = vadd.f32 %v9520_v12, %v9451_v23  ;;  %v9114_v36 = vmul.f32 %v16195_v14, %v16262_v5  ;;  %v9215_v56 = vmul.f32 %v16213_v24, %v16281_v54  ;;  %8954 = vst.msk [vmem:[#allocation5 + $0xa9] sm:$0xff] %vm333_vm1, %v8867_v47  ;;  %10004 = vst.msk [vmem:[%s16203_s22 + $0x60] sm:$0xff] %vm333_vm1, %v8867_v47  ;;  %v8670_v16 = vpop.f32.mrb[17].mxu1 }
 0x730   : > { %v8837_v13 = vadd.f32 %v16183_v20, %v8800_v25  ;;  %v9929_v26 = vadd.f32 %v16372_v46, %v9892_v22  ;;  %v9928_v42 = vadd.f32 %v16372_v46, %v9891_v9  ;;  %v9317_v5 = vmul.f32 %v16251_v41, %v16310_v55  ;;  %v16432_v22 = vld [vmem:[#allocation5 + $0x49] sm:$0xff] }
 0x731   : > { %v8870_v60 = vmax.f32 %v8838_v38, 0.0  ;;  %v8803_v54 = vmul.f32 %v12363_v45, %v16178_v49  ;;  %v9655_v33 = vadd.f32 %v9623_v58, %v9552_v0  ;;  %v9146_v59 = vadd.f32 %v9114_v36, %v9013_v3 }
 0x732   : > { %v8869_v18 = vmax.f32 %v8837_v13, 0.0  ;;  %v8802_v39 = vmul.f32 %v16178_v49, %v8670_v16  ;;  %v9961_v61 = vmax.f32 %v9929_v26, 0.0  ;;  %v9960_v40 = vmax.f32 %v9928_v42, 0.0  ;;  %v12366_v21 = vpop.f32.mrb[18].mxu1  ;;  %v16439_v13 = vld [vmem:[#allocation5 + $0x4a] sm:$0xff] }
 0x733   : > { %8957 = vst.msk [vmem:[#allocation5 + $0xc9] sm:$0xff] %vm333_vm1, %v8870_v60  ;;  %10007 = vst.msk [vmem:[%s16203_s22 + $0x78] sm:$0xff] %vm333_vm1, %v8870_v60  ;;  %v8840_v7 = vadd.f32 %v16183_v20, %v8803_v54  ;;  %v9756_v11 = vadd.f32 %v9724_v48, %v9655_v33  ;;  %v9825_v50 = vmul.f32 %v16277_v27, %v16393_v8  ;;  %v8680_v58 = vpop.f32.mrb[19].mxu1 }
 0x734   : > { %v9247_v43 = vadd.f32 %v9215_v56, %v9146_v59  ;;  %8956 = vst.msk [vmem:[#allocation5 + $0xc1] sm:$0xff] %vm333_vm1, %v8869_v18  ;;  %10006 = vst.msk [vmem:[%s16203_s22 + $0x70] sm:$0xff] %vm333_vm1, %v8869_v18  ;;  %v8839_v35 = vadd.f32 %v16183_v20, %v8802_v39  ;;  %10058 = vrot.lane.b32.xlu1 %v9961_v61, %s12940_s23  ;;  %10056 = vrot.lane.b32.xlu0 %v9960_v40, %s12940_s23  ;;  %v16451_v59 = vld [vmem:[#allocation5 + $0x68] sm:$0xff] }
 0x735   : > { %v9418_v37 = vmul.f32 %v16240_v2, %v16316_v32  ;;  %v8872_v10 = vmax.f32 %v8840_v7, 0.0  ;;  %v8805_v12 = vmul.f32 %v12366_v21, %v16178_v49  ;;  %v9857_v6 = vadd.f32 %v9825_v50, %v9756_v11  ;;  %v16461_v7 = vld [vmem:[#allocation5 + $0x69] sm:$0xff] }
 0x736   : > { %v9349_v62 = vadd.f32 %v9317_v5, %v9247_v43  ;;  %v8871_v1 = vmax.f32 %v8839_v35, 0.0  ;;  %v8804_v48 = vmul.f32 %v16178_v49, %v8680_v58  ;;  %v9519_v57 = vmul.f32 %v16245_v17, %v16323_v34  ;;  %v12369_v9 = vpop.f32.mrb[20].mxu1  ;;  %v16463_v11 = vld [vmem:[#allocation5 + $0x6a] sm:$0xff] }
 0x737   : > { %8959 = vst.msk [vmem:[#allocation5 + $0xe1] sm:$0xff] %vm333_vm1, %v8872_v10  ;;  %10009 = vst.msk [vmem:[%s16203_s22 + $0x88] sm:$0xff] %vm333_vm1, %v8872_v10  ;;  %v8842_v19 = vadd.f32 %v16183_v20, %v8805_v12  ;;  %v9894_v29 = vmul.f32 %v16356_v4, %v9857_v6  ;;  %v9016_v3 = vmul.f32 %v16190_v52, %v16302_v44  ;;  %v8690_v26 = vpop.f32.mrb[21].mxu1 }
 0x738   : > { %v9450_v23 = vadd.f32 %v9418_v37, %v9349_v62  ;;  %8958 = vst.msk [vmem:[#allocation5 + $0xd9] sm:$0xff] %vm333_vm1, %v8871_v1  ;;  %10008 = vst.msk [vmem:[%s16203_s22 + $0x80] sm:$0xff] %vm333_vm1, %v8871_v1  ;;  %v8841_v47 = vadd.f32 %v16183_v20, %v8804_v48  ;;  %v9622_v25 = vmul.f32 %v16292_v28, %v16414_v30 }
 0x739   : > { %v9117_v38 = vmul.f32 %v16195_v14, %v16294_v15  ;;  %v9218_v0 = vmul.f32 %v16213_v24, %v16296_v53  ;;  %v8874_v44 = vmax.f32 %v8842_v19, 0.0  ;;  %v9931_v36 = vadd.f32 %v16372_v46, %v9894_v29 }
 0x73a   : > { %v9551_v56 = vadd.f32 %v9519_v57, %v9450_v23  ;;  %v8807_v45 = vmul.f32 %v12369_v9, %v16178_v49  ;;  %v8873_v42 = vmax.f32 %v8841_v47, 0.0  ;;  %v8806_v5 = vmul.f32 %v16178_v49, %v8690_v26  ;;  %v12372_v50 = vpop.f32.mrb[22].mxu1 }
 0x73b   : > { %v9149_v60 = vadd.f32 %v9117_v38, %v9016_v3  ;;  %v9320_v15 = vmul.f32 %v16251_v41, %v16341_v51  ;;  %8961 = vst.msk [vmem:[#allocation5 + $0xf9] sm:$0xff] %vm333_vm1, %v8874_v44  ;;  %10011 = vst.msk [vmem:[%s16203_s22 + $0x98] sm:$0xff] %vm333_vm1, %v8874_v44  ;;  %v9963_v53 = vmax.f32 %v9931_v36, 0.0  ;;  %v9723_v16 = vmul.f32 %v16272_v31, %v16432_v22  ;;  %v8700_v10 = vpop.f32.mrb[23].mxu1  ;;  %v16495_v36 = vld [vmem:[#allocation5 + $0x60] sm:$0xff] }
 0x73c   : > { %v9654_v54 = vadd.f32 %v9622_v25, %v9551_v56  ;;  %v8844_v33 = vadd.f32 %v16183_v20, %v8807_v45  ;;  %8960 = vst.msk [vmem:[#allocation5 + $0xf1] sm:$0xff] %vm333_vm1, %v8873_v42  ;;  %10010 = vst.msk [vmem:[%s16203_s22 + $0x90] sm:$0xff] %vm333_vm1, %v8873_v42  ;;  %v9824_v18 = vmul.f32 %v16277_v27, %v16439_v13  ;;  %v16502_v42 = vld [vmem:[#allocation5 + $0x61] sm:$0xff] }
 0x73d   : > { %v8843_v39 = vadd.f32 %v16183_v20, %v8806_v5  ;;  %v9250_v61 = vadd.f32 %v9218_v0, %v9149_v60  ;;  %v9421_v40 = vmul.f32 %v16240_v2, %v16346_v63  ;;  %10062 = vrot.lane.b32.xlu1 %v9963_v53, %s12940_s23  ;;  %v9522_v21 = vmul.f32 %v16245_v17, %v16393_v8 }
 0x73e   : > { %v9755_v43 = vadd.f32 %v9723_v16, %v9654_v54  ;;  %v8876_v35 = vmax.f32 %v8844_v33, 0.0  ;;  %v9015_v37 = vmul.f32 %v16190_v52, %v16310_v55  ;;  %v9625_v6 = vmul.f32 %v16292_v28, %v16451_v59  ;;  %v12375_v3 = vpop.f32.mrb[24].mxu1  ;;  %v16508_v16 = vld [vmem:[#allocation5 + $0x62] sm:$0xff] }
 0x73f   : > { %v8875_v12 = vmax.f32 %v8843_v39, 0.0  ;;  %v9352_v58 = vadd.f32 %v9320_v15, %v9250_v61  ;;  %v9116_v62 = vmul.f32 %v16195_v14, %v16316_v32  ;;  %v9726_v48 = vmul.f32 %v16272_v31, %v16461_v7  ;;  %v8710_v38 = vpop.f32.mrb[25].mxu1 }
 0x740   : > { %v9856_v1 = vadd.f32 %v9824_v18, %v9755_v43  ;;  %8963 = vst.msk [vmem:[#allocation5 + $0x111] sm:$0xff] %vm333_vm1, %v8876_v35  ;;  %10013 = vst.msk [vmem:[%s16203_s22 + $0xa8] sm:$0xff] %vm333_vm1, %v8876_v35  ;;  %v9827_v55 = vmul.f32 %v16277_v27, %v16463_v11  ;;  %v9217_v57 = vmul.f32 %v16213_v24, %v16323_v34 }
 0x741   : > { %8962 = vst.msk [vmem:[#allocation5 + $0x109] sm:$0xff] %vm333_vm1, %v8875_v12  ;;  %10012 = vst.msk [vmem:[%s16203_s22 + $0xa0] sm:$0xff] %vm333_vm1, %v8875_v12  ;;  %v9453_v19 = vadd.f32 %v9421_v40, %v9352_v58  ;;  %v9148_v32 = vadd.f32 %v9116_v62, %v9015_v37  ;;  %v9319_v29 = vmul.f32 %v16251_v41, %v16414_v30  ;;  %v16520_v37 = vld [vmem:[#allocation5 + $0x80] sm:$0xff] }
 0x742   : > { %v9420_v23 = vmul.f32 %v16240_v2, %v16432_v22  ;;  %v9893_v47 = vmul.f32 %v16356_v4, %v9856_v1  ;;  %v9521_v25 = vmul.f32 %v16245_v17, %v16439_v13  ;;  %v8809_v34 = vmul.f32 %v12372_v50, %v16178_v49 }
 0x743   : > { %v8808_v9 = vmul.f32 %v16178_v49, %v8700_v10  ;;  %v9554_v0 = vadd.f32 %v9522_v21, %v9453_v19  ;;  %v9249_v44 = vadd.f32 %v9217_v57, %v9148_v32  ;;  %v9018_v56 = vmul.f32 %v16190_v52, %v16341_v51  ;;  %v16522_v10 = vld [vmem:[#allocation5 + $0x81] sm:$0xff] }
 0x744   : > { %v9119_v45 = vmul.f32 %v16195_v14, %v16346_v63  ;;  %v9930_v26 = vadd.f32 %v16372_v46, %v9893_v47  ;;  %v8846_v5 = vadd.f32 %v16183_v20, %v8809_v34  ;;  %v9220_v15 = vmul.f32 %v16213_v24, %v16393_v8  ;;  %v16512_v63 = vpop.f32.mrb[26].mxu1  ;;  %v16539_v19 = vld [vmem:[#allocation5 + $0x82] sm:$0xff] }
 0x745   : > { %v8845_v60 = vadd.f32 %v16183_v20, %v8808_v9  ;;  %v9657_v53 = vadd.f32 %v9625_v6, %v9554_v0  ;;  %v9351_v54 = vadd.f32 %v9319_v29, %v9249_v44  ;;  %v9322_v51 = vmul.f32 %v16251_v41, %v16451_v59  ;;  %v16516_v50 = vpop.f32.mrb[27].mxu1 }
 0x746   : > { %v9151_v33 = vadd.f32 %v9119_v45, %v9018_v56  ;;  %v9962_v18 = vmax.f32 %v9930_v26, 0.0  ;;  %v9624_v39 = vmul.f32 %v16292_v28, %v16495_v36  ;;  %v8878_v61 = vmax.f32 %v8846_v5, 0.0  ;;  %v16543_v29 = vpop.f32.mrb[28].mxu1 }
 0x747   : > { %v8877_v40 = vmax.f32 %v8845_v60, 0.0  ;;  %v9758_v8 = vadd.f32 %v9726_v48, %v9657_v53  ;;  %v9452_v43 = vadd.f32 %v9420_v23, %v9351_v54  ;;  %v9725_v35 = vmul.f32 %v16272_v31, %v16502_v42 }
 0x748   : > { %v9252_v21 = vadd.f32 %v9220_v15, %v9151_v33  ;;  %10060 = vrot.lane.b32.xlu0 %v9962_v18, %s12940_s23  ;;  %v9826_v12 = vmul.f32 %v16277_v27, %v16508_v16  ;;  %8965 = vst.msk [vmem:[#allocation5 + $0x129] sm:$0xff] %vm333_vm1, %v8878_v61  ;;  %10015 = vst.msk [vmem:[%s16203_s22 + $0xb8] sm:$0xff] %vm333_vm1, %v8878_v61  ;;  %v9423_v58 = vmul.f32 %v16240_v2, %v16461_v7 }
 0x749   : > { %8964 = vst.msk [vmem:[#allocation5 + $0x121] sm:$0xff] %vm333_vm1, %v8877_v40  ;;  %10014 = vst.msk [vmem:[%s16203_s22 + $0xb0] sm:$0xff] %vm333_vm1, %v8877_v40  ;;  %v9524_v6 = vmul.f32 %v16245_v17, %v16463_v11  ;;  %v9017_v62 = vmul.f32 %v16190_v52, %v16414_v30  ;;  %v9859_v1 = vadd.f32 %v9827_v55, %v9758_v8  ;;  %v16553_v55 = vpop.f32.mrb[29].mxu1 }
 0x74a   : > { %v9553_v48 = vadd.f32 %v9521_v25, %v9452_v43  ;;  %v9354_v57 = vadd.f32 %v9322_v51, %v9252_v21  ;;  %v9118_v32 = vmul.f32 %v16195_v14, %v16432_v22  ;;  %v9627_v23 = vmul.f32 %v16292_v28, %v16520_v37  ;;  %v16564_v53 = vpop.f32.mrb[30].mxu1  ;;  %v16574_v43 = vld [vmem:[#allocation5 + $0x78] sm:$0xff] }
 0x74b   : > { %v9728_v47 = vmul.f32 %v16272_v31, %v16522_v10  ;;  %v9219_v34 = vmul.f32 %v16213_v24, %v16439_v13  ;;  %v9321_v30 = vmul.f32 %v16251_v41, %v16495_v36  ;;  %v9896_v25 = vmul.f32 %v16356_v4, %v9859_v1 }
 0x74c   : > { %v9656_v9 = vadd.f32 %v9624_v39, %v9553_v48  ;;  %v9455_v22 = vadd.f32 %v9423_v58, %v9354_v57  ;;  %v9150_v0 = vadd.f32 %v9118_v32, %v9017_v62  ;;  %v9829_v44 = vmul.f32 %v16277_v27, %v16539_v19  ;;  %v16572_v39 = vpop.f32.mrb[31].mxu1  ;;  %v16583_v62 = vld [vmem:[#allocation5 + $0x7a] sm:$0xff] }
 0x74d   : > { %v9422_v56 = vmul.f32 %v16240_v2, %v16502_v42  ;;  %v9523_v45 = vmul.f32 %v16245_v17, %v16508_v16  ;;  %v8811_v13 = vmul.f32 %v12375_v3, %v16178_v49  ;;  %v9933_v26 = vadd.f32 %v16372_v46, %v9896_v25 }
 0x74e   : > { %v9757_v5 = vadd.f32 %v9725_v35, %v9656_v9  ;;  %v9556_v60 = vadd.f32 %v9524_v6, %v9455_v22  ;;  %v9251_v15 = vadd.f32 %v9219_v34, %v9150_v0  ;;  %v8810_v33 = vmul.f32 %v16178_v49, %v8710_v38  ;;  %v16576_v35 = vld [vmem:[#allocation5 + $0x79] sm:$0xff] }
 0x74f   : > { %v8848_v54 = vadd.f32 %v16183_v20, %v8811_v13  ;;  %v9020_v51 = vmul.f32 %v16190_v52, %v16451_v59  ;;  %v9121_v18 = vmul.f32 %v16195_v14, %v16461_v7  ;;  %v9965_v3 = vmax.f32 %v9933_v26, 0.0  ;;  %v16607_v13 = vld [vmem:[#allocation5 + $0x99] sm:$0xff] }
 0x750   : > { %v9858_v61 = vadd.f32 %v9826_v12, %v9757_v5  ;;  %v9659_v40 = vadd.f32 %v9627_v23, %v9556_v60  ;;  %v9353_v8 = vadd.f32 %v9321_v30, %v9251_v15  ;;  %v8847_v38 = vadd.f32 %v16183_v20, %v8810_v33  ;;  %v16595_v30 = vld [vmem:[#allocation5 + $0x98] sm:$0xff] }
 0x751   : > { %v8880_v21 = vmax.f32 %v8848_v54, 0.0  ;;  %v9153_v58 = vadd.f32 %v9121_v18, %v9020_v51  ;;  %v9222_v59 = vmul.f32 %v16213_v24, %v16463_v11  ;;  %10066 = vrot.lane.b32.xlu1 %v9965_v3, %s12940_s23  ;;  %v9324_v1 = vmul.f32 %v16251_v41, %v16520_v37  ;;  %v16609_v26 = vld [vmem:[#allocation5 + $0x9a] sm:$0xff] }
 0x752   : > { %v9895_v7 = vmul.f32 %v16356_v4, %v9858_v61  ;;  %v9760_v6 = vadd.f32 %v9728_v47, %v9659_v40  ;;  %v9454_v12 = vadd.f32 %v9422_v56, %v9353_v8  ;;  %v9626_v48 = vmul.f32 %v16292_v28, %v16574_v43 }
 0x753   : > { %8967 = vst.msk [vmem:[#allocation5 + $0x141] sm:$0xff] %vm333_vm1, %v8880_v21  ;;  %10017 = vst.msk [vmem:[%s16203_s22 + $0xc8] sm:$0xff] %vm333_vm1, %v8880_v21  ;;  %v8879_v11 = vmax.f32 %v8847_v38, 0.0  ;;  %v9254_v57 = vadd.f32 %v9222_v59, %v9153_v58  ;;  %v9727_v34 = vmul.f32 %v16272_v31, %v16576_v35  ;;  %v9828_v25 = vmul.f32 %v16277_v27, %v16583_v62 }
 0x754   : > { %v9932_v32 = vadd.f32 %v16372_v46, %v9895_v7  ;;  %v9861_v23 = vadd.f32 %v9829_v44, %v9760_v6  ;;  %v9555_v47 = vadd.f32 %v9523_v45, %v9454_v12  ;;  %v9425_v22 = vmul.f32 %v16240_v2, %v16522_v10 }
 0x755   : > { %8966 = vst.msk [vmem:[#allocation5 + $0x139] sm:$0xff] %vm333_vm1, %v8879_v11  ;;  %10016 = vst.msk [vmem:[%s16203_s22 + $0xc0] sm:$0xff] %vm333_vm1, %v8879_v11  ;;  %v9356_v9 = vadd.f32 %v9324_v1, %v9254_v57  ;;  %v9019_v0 = vmul.f32 %v16190_v52, %v16495_v36  ;;  %v9120_v5 = vmul.f32 %v16195_v14, %v16502_v42  ;;  %v16639_v11 = vld [vmem:[#allocation5 + $0x90] sm:$0xff] }
 0x756   : > { %v9964_v44 = vmax.f32 %v9932_v32, 0.0  ;;  %v9898_v56 = vmul.f32 %v16356_v4, %v9861_v23  ;;  %v9658_v45 = vadd.f32 %v9626_v48, %v9555_v47  ;;  %v9526_v15 = vmul.f32 %v16245_v17, %v16539_v19  ;;  %v16646_v23 = vld [vmem:[#allocation5 + $0x92] sm:$0xff] }
 0x757   : > { %v9457_v60 = vadd.f32 %v9425_v22, %v9356_v9  ;;  %v9629_v54 = vmul.f32 %v16292_v28, %v16595_v30  ;;  %v9221_v36 = vmul.f32 %v16213_v24, %v16508_v16  ;;  %v9152_v18 = vadd.f32 %v9120_v5, %v9019_v0 }
 0x758   : > { %10064 = vrot.lane.b32.xlu0 %v9964_v44, %s12940_s23  ;;  %v9935_v33 = vadd.f32 %v16372_v46, %v9898_v56  ;;  %v9759_v51 = vadd.f32 %v9727_v34, %v9658_v45  ;;  %v9323_v3 = vmul.f32 %v16251_v41, %v16574_v43  ;;  %v9730_v61 = vmul.f32 %v16272_v31, %v16607_v13  ;;  %v16656_v45 = vld [vmem:[#allocation5 + $0xb0] sm:$0xff] }
 0x759   : > { %v9558_v42 = vadd.f32 %v9526_v15, %v9457_v60  ;;  %v9831_v40 = vmul.f32 %v16277_v27, %v16609_v26  ;;  %v9424_v8 = vmul.f32 %v16240_v2, %v16576_v35  ;;  %v9253_v38 = vadd.f32 %v9221_v36, %v9152_v18  ;;  %v16665_v36 = vld [vmem:[#allocation5 + $0xb1] sm:$0xff] }
 0x75a   : > { %v9967_v16 = vmax.f32 %v9935_v33, 0.0  ;;  %v9860_v21 = vadd.f32 %v9828_v25, %v9759_v51  ;;  %v8813_v58 = vmul.f32 %v16512_v63, %v16178_v49  ;;  %v8812_v7 = vmul.f32 %v16178_v49, %v16516_v50  ;;  %v16644_v50 = vld [vmem:[#allocation5 + $0x91] sm:$0xff] }
 0x75b   : > { %v9661_v59 = vadd.f32 %v9629_v54, %v9558_v42  ;;  %v9022_v6 = vmul.f32 %v16190_v52, %v16520_v37  ;;  %v9123_v12 = vmul.f32 %v16195_v14, %v16522_v10  ;;  %v9355_v48 = vadd.f32 %v9323_v3, %v9253_v38  ;;  %v16667_v33 = vld [vmem:[#allocation5 + $0xb2] sm:$0xff] }
 0x75c   : > { %10070 = vrot.lane.b32.xlu1 %v9967_v16, %s12940_s23  ;;  %v9897_v1 = vmul.f32 %v16356_v4, %v9860_v21  ;;  %v8850_v57 = vadd.f32 %v16183_v20, %v8813_v58  ;;  %v9224_v63 = vmul.f32 %v16213_v24, %v16539_v19  ;;  %v8849_v37 = vadd.f32 %v16183_v20, %v8812_v7 }
 0x75d   : > { %v9762_v32 = vadd.f32 %v9730_v61, %v9661_v59  ;;  %v9155_v10 = vadd.f32 %v9123_v12, %v9022_v6  ;;  %v9326_v47 = vmul.f32 %v16251_v41, %v16595_v30  ;;  %v9456_v25 = vadd.f32 %v9424_v8, %v9355_v48 }
 0x75e   : > { %v9934_v34 = vadd.f32 %v16372_v46, %v9897_v1  ;;  %v9525_v9 = vmul.f32 %v16245_v17, %v16583_v62  ;;  %v8882_v22 = vmax.f32 %v8850_v57, 0.0  ;;  %v9628_v0 = vmul.f32 %v16292_v28, %v16639_v11 }
 0x75f   : > { %v9863_v19 = vadd.f32 %v9831_v40, %v9762_v32  ;;  %v8881_v44 = vmax.f32 %v8849_v37, 0.0  ;;  %v9256_v56 = vadd.f32 %v9224_v63, %v9155_v10  ;;  %v9729_v15 = vmul.f32 %v16272_v31, %v16644_v50 }
 0x760   : > { %v9966_v5 = vmax.f32 %v9934_v34, 0.0  ;;  %v9557_v60 = vadd.f32 %v9525_v9, %v9456_v25  ;;  %v9830_v54 = vmul.f32 %v16277_v27, %v16646_v23  ;;  %8969 = vst.msk [vmem:[#allocation5 + $0x159] sm:$0xff] %vm333_vm1, %v8882_v22  ;;  %10019 = vst.msk [vmem:[%s16203_s22 + $0xd8] sm:$0xff] %vm333_vm1, %v8882_v22  ;;  %v9427_v3 = vmul.f32 %v16240_v2, %v16607_v13  ;;  %v16704_v34 = vld [vmem:[#allocation5 + $0xa8] sm:$0xff] }
 0x761   : > { %v9900_v51 = vmul.f32 %v16356_v4, %v9863_v19  ;;  %8968 = vst.msk [vmem:[#allocation5 + $0x151] sm:$0xff] %vm333_vm1, %v8881_v44  ;;  %10018 = vst.msk [vmem:[%s16203_s22 + $0xd0] sm:$0xff] %vm333_vm1, %v8881_v44  ;;  %v9358_v18 = vadd.f32 %v9326_v47, %v9256_v56  ;;  %v9021_v42 = vmul.f32 %v16190_v52, %v16574_v43 }
 0x762   : > { %10068 = vrot.lane.b32.xlu0 %v9966_v5, %s12940_s23  ;;  %v9660_v61 = vadd.f32 %v9628_v0, %v9557_v60  ;;  %v9528_v40 = vmul.f32 %v16245_v17, %v16609_v26  ;;  %v9631_v8 = vmul.f32 %v16292_v28, %v16656_v45  ;;  %v9122_v16 = vmul.f32 %v16195_v14, %v16576_v35 }
 0x763   : > { %v9937_v21 = vadd.f32 %v16372_v46, %v9900_v51  ;;  %v9459_v38 = vadd.f32 %v9427_v3, %v9358_v18  ;;  %v9732_v58 = vmul.f32 %v16272_v31, %v16665_v36  ;;  %v9833_v43 = vmul.f32 %v16277_v27, %v16667_v33 }
 0x764   : > { %v9761_v59 = vadd.f32 %v9729_v15, %v9660_v61  ;;  %v9154_v7 = vadd.f32 %v9122_v16, %v9021_v42  ;;  %v9223_v6 = vmul.f32 %v16213_v24, %v16583_v62  ;;  %v9325_v12 = vmul.f32 %v16251_v41, %v16639_v11  ;;  %v16729_v42 = vld [vmem:[#allocation5 + $0xc8] sm:$0xff] }
 0x765   : > { %v9969_v1 = vmax.f32 %v9937_v21, 0.0  ;;  %v9560_v48 = vadd.f32 %v9528_v40, %v9459_v38  ;;  %v9426_v35 = vmul.f32 %v16240_v2, %v16644_v50  ;;  %v8815_v57 = vmul.f32 %v16543_v29, %v16178_v49  ;;  %v16731_v61 = vld [vmem:[#allocation5 + $0xc9] sm:$0xff] }
 0x766   : > { %v9862_v63 = vadd.f32 %v9830_v54, %v9761_v59  ;;  %v9255_v32 = vadd.f32 %v9223_v6, %v9154_v7  ;;  %v8814_v37 = vmul.f32 %v16178_v49, %v16553_v55  ;;  %v9024_v10 = vmul.f32 %v16190_v52, %v16595_v30  ;;  %v16710_v55 = vld [vmem:[#allocation5 + $0xa9] sm:$0xff] }
 0x767   : > { %10074 = vrot.lane.b32.xlu1 %v9969_v1, %s12940_s23  ;;  %v9663_v62 = vadd.f32 %v9631_v8, %v9560_v48  ;;  %v9527_v47 = vmul.f32 %v16245_v17, %v16646_v23  ;;  %v8852_v25 = vadd.f32 %v16183_v20, %v8815_v57  ;;  %v9125_v29 = vmul.f32 %v16195_v14, %v16607_v13  ;;  %v16712_v30 = vld [vmem:[#allocation5 + $0xaa] sm:$0xff] }
 0x768   : > { %v9899_v9 = vmul.f32 %v16356_v4, %v9862_v63  ;;  %v9357_v22 = vadd.f32 %v9325_v12, %v9255_v32  ;;  %v8851_v19 = vadd.f32 %v16183_v20, %v8814_v37  ;;  %v9226_v0 = vmul.f32 %v16213_v24, %v16609_v26  ;;  %v16743_v59 = vld [vmem:[#allocation5 + $0xca] sm:$0xff] }
 0x769   : > { %v9764_v44 = vadd.f32 %v9732_v58, %v9663_v62  ;;  %v8884_v56 = vmax.f32 %v8852_v25, 0.0  ;;  %v9157_v5 = vadd.f32 %v9125_v29, %v9024_v10  ;;  %v9328_v60 = vmul.f32 %v16251_v41, %v16656_v45  ;;  %v12918_v25 = vld [vmem:[%s17322_s6] ss:$0 sm:$0xff] }
 0x76a   : > { %v9936_v13 = vadd.f32 %v16372_v46, %v9899_v9  ;;  %v9458_v15 = vadd.f32 %v9426_v35, %v9357_v22  ;;  %v9630_v54 = vmul.f32 %v16292_v28, %v16704_v34  ;;  %v8883_v51 = vmax.f32 %v8851_v19, 0.0  ;;  %v12919_v22 = vld [vmem:[%s17322_s6 + $0x1] ss:$0 sm:$0xff] }
 0x76b   : > { %v9865_v18 = vadd.f32 %v9833_v43, %v9764_v44  ;;  %v9731_v20 = vmul.f32 %v16272_v31, %v16710_v55  ;;  %v9832_v26 = vmul.f32 %v16277_v27, %v16712_v30  ;;  %8971 = vst.msk [vmem:[#allocation5 + $0x171] sm:$0xff] %vm333_vm1, %v8884_v56  ;;  %10021 = vst.msk [vmem:[%s16203_s22 + $0xe8] sm:$0xff] %vm333_vm1, %v8884_v56 }
 0x76c   : > { %v9258_v3 = vadd.f32 %v9226_v0, %v9157_v5  ;;  %v9968_v40 = vmax.f32 %v9936_v13, 0.0  ;;  %v9559_v8 = vadd.f32 %v9527_v47, %v9458_v15  ;;  %8970 = vst.msk [vmem:[#allocation5 + $0x169] sm:$0xff] %vm333_vm1, %v8883_v51  ;;  %10020 = vst.msk [vmem:[%s16203_s22 + $0xe0] sm:$0xff] %vm333_vm1, %v8883_v51  ;;  %v9429_v16 = vmul.f32 %v16240_v2, %v16665_v36 }
 0x76d   : > { %v9023_v21 = vmul.f32 %v16190_v52, %v16639_v11  ;;  %v9902_v38 = vmul.f32 %v16356_v4, %v9865_v18  ;;  %v9530_v43 = vmul.f32 %v16245_v17, %v16667_v33  ;;  %v9124_v7 = vmul.f32 %v16195_v14, %v16644_v50  ;;  %v16785_v18 = vld [vmem:[#allocation5 + $0xc1] sm:$0xff] }
 0x76e   : > { %v9360_v58 = vadd.f32 %v9328_v60, %v9258_v3  ;;  %10072 = vrot.lane.b32.xlu0 %v9968_v40, %s12940_s23  ;;  %v9662_v6 = vadd.f32 %v9630_v54, %v9559_v8  ;;  %v9633_v12 = vmul.f32 %v16292_v28, %v16729_v42  ;;  %v9734_v11 = vmul.f32 %v16272_v31, %v16731_v61  ;;  %v16778_v60 = vld [vmem:[#allocation5 + $0xc0] sm:$0xff] }
 0x76f   : > { %v9225_v1 = vmul.f32 %v16213_v24, %v16646_v23  ;;  %v9939_v48 = vadd.f32 %v16372_v46, %v9902_v38  ;;  %v9156_v57 = vadd.f32 %v9124_v7, %v9023_v21  ;;  %v9327_v63 = vmul.f32 %v16251_v41, %v16704_v34  ;;  %v9797_v8 = vld [vmem:[#allocation5 + $0xc2] sm:$0xff]  ;;  %v16802_v38 = vld [vmem:[%s17323_s7] ss:$0 sm:$0xff] }
 0x770   : > { %v9461_v35 = vadd.f32 %v9429_v16, %v9360_v58  ;;  %v9763_v50 = vadd.f32 %v9731_v20, %v9662_v6  ;;  %v9835_v32 = vmul.f32 %v16277_v27, %v16743_v59  ;;  %v9428_v37 = vmul.f32 %v16240_v2, %v16710_v55  ;;  %v16797_v21 = vld [vmem:[#allocation5 + $0xe0] sm:$0xff] }
 0x771   : > { %v8817_v10 = vmul.f32 %v16564_v53, %v16178_v49  ;;  %v9971_v62 = vmax.f32 %v9939_v48, 0.0  ;;  %v9257_v23 = vadd.f32 %v9225_v1, %v9156_v57  ;;  %v8816_v29 = vmul.f32 %v12918_v25, %v16572_v39  ;;  %v16818_v1 = vld [vmem:[#allocation5 + $0xe1] sm:$0xff] }
 0x772   : > { %v9562_v47 = vadd.f32 %v9530_v43, %v9461_v35  ;;  %v9864_v9 = vadd.f32 %v9832_v26, %v9763_v50  ;;  %v9026_v0 = vmul.f32 %v16190_v52, %v16656_v45  ;;  %v9127_v49 = vmul.f32 %v16195_v14, %v16665_v36  ;;  %v16809_v43 = vld [vmem:[%s17323_s7 + $0x1] ss:$0 sm:$0xff]  ;;  %v16821_v48 = vld [vmem:[#allocation5 + $0xe2] sm:$0xff] }
 0x773   : > { %v8854_v19 = vadd.f32 %v12919_v22, %v8817_v10  ;;  %10078 = vrot.lane.b32.xlu1 %v9971_v62, %s12940_s23  ;;  %v9359_v44 = vadd.f32 %v9327_v63, %v9257_v23  ;;  %v8853_v56 = vadd.f32 %v12919_v22, %v8816_v29  ;;  %v9228_v39 = vmul.f32 %v16213_v24, %v16667_v33  ;;  %v16842_v29 = vld [vmem:[#allocation5 + $0xd8] sm:$0xff] }
 0x774   : > { %v9665_v53 = vadd.f32 %v9633_v12, %v9562_v47  ;;  %v9901_v5 = vmul.f32 %v16356_v4, %v9864_v9  ;;  %v9159_v15 = vadd.f32 %v9127_v49, %v9026_v0  ;;  %v9330_v52 = vmul.f32 %v16251_v41, %v16729_v42  ;;  %v16844_v9 = vld [vmem:[#allocation5 + $0xd9] sm:$0xff] }
 0x775   : > { %v8886_v13 = vmax.f32 %v8854_v19, 0.0  ;;  %v9460_v45 = vadd.f32 %v9428_v37, %v9359_v44  ;;  %v9529_v36 = vmul.f32 %v16245_v17, %v16712_v30  ;;  %v8885_v54 = vmax.f32 %v8853_v56, 0.0  ;;  %v16868_v56 = vld [vmem:[%s17323_s7 + $0x4] ss:$0 sm:$0xff] }
 0x776   : > { %v9766_v14 = vadd.f32 %v9734_v11, %v9665_v53  ;;  %v9938_v51 = vadd.f32 %v16372_v46, %v9901_v5  ;;  %v9260_v24 = vadd.f32 %v9228_v39, %v9159_v15  ;;  %v9632_v26 = vmul.f32 %v16292_v28, %v16778_v60 }
 0x777   : > { %8973 = vst.msk [vmem:[#allocation5 + $0x189] sm:$0xff] %vm333_vm1, %v8886_v13  ;;  %10023 = vst.msk [vmem:[%s16203_s22 + $0xf8] sm:$0xff] %vm333_vm1, %v8886_v13  ;;  %v9561_v20 = vadd.f32 %v9529_v36, %v9460_v45  ;;  %v9431_v3 = vmul.f32 %v16240_v2, %v16731_v61  ;;  %v9025_v58 = vmul.f32 %v16802_v38, %v16704_v34  ;;  %v9799_v45 = vld [vmem:[#allocation5 + $0xda] sm:$0xff] }
 0x778   : > { %v9867_v33 = vadd.f32 %v9835_v32, %v9766_v14  ;;  %8972 = vst.msk [vmem:[#allocation5 + $0x181] sm:$0xff] %vm333_vm1, %v8885_v54  ;;  %10022 = vst.msk [vmem:[%s16203_s22 + $0xf0] sm:$0xff] %vm333_vm1, %v8885_v54  ;;  %v9970_v40 = vmax.f32 %v9938_v51, 0.0  ;;  %v9362_v16 = vadd.f32 %v9330_v52, %v9260_v24  ;;  %v9126_v2 = vmul.f32 %v16809_v43, %v16710_v55  ;;  %v16826_v55 = vld [vmem:[%s17323_s7 + $0x2] ss:$0 sm:$0xff] }
 0x779   : > { %v9664_v6 = vadd.f32 %v9632_v26, %v9561_v20  ;;  %v9733_v12 = vmul.f32 %v16272_v31, %v16785_v18  ;;  %v9532_v11 = vmul.f32 %v16245_v17, %v16743_v59  ;;  %v9227_v57 = vmul.f32 %v16826_v55, %v16712_v30  ;;  %v16877_v52 = vld [vmem:[%s17323_s7 + $0x9] ss:$0 sm:$0xff] }
 0x77a   : > { %v9904_v7 = vmul.f32 %v16356_v4, %v9867_v33  ;;  %10076 = vrot.lane.b32.xlu0 %v9970_v40, %s12940_s23  ;;  %v9463_v34 = vadd.f32 %v9431_v3, %v9362_v16  ;;  %v9158_v35 = vadd.f32 %v9126_v2, %v9025_v58  ;;  %v9329_v63 = vmul.f32 %v16251_v41, %v16778_v60  ;;  %v16888_v20 = vld [vmem:[#allocation5 + $0xf8] sm:$0xff] }
 0x77b   : > { %v9765_v50 = vadd.f32 %v9733_v12, %v9664_v6  ;;  %v9834_v32 = vmul.f32 %v16277_v27, %v9797_v8  ;;  %v9635_v37 = vmul.f32 %v16292_v28, %v16797_v21  ;;  %v9736_v62 = vmul.f32 %v16272_v31, %v16818_v1  ;;  %v16851_v31 = vld [vmem:[%s17323_s7 + $0x5] ss:$0 sm:$0xff]  ;;  %v16890_v26 = vld [vmem:[#allocation5 + $0xf9] sm:$0xff] }
 0x77c   : > { %v9941_v17 = vadd.f32 %v16372_v46, %v9904_v7  ;;  %v9564_v10 = vadd.f32 %v9532_v11, %v9463_v34  ;;  %v9259_v47 = vadd.f32 %v9227_v57, %v9158_v35  ;;  %v9028_v23 = vmul.f32 %v16802_v38, %v16729_v42  ;;  %v16899_v7 = vld [vmem:[%s17323_s7 + $0xa] ss:$0 sm:$0xff]  ;;  %v16908_v11 = vld [vmem:[%s17323_s7 + $0x8] ss:$0 sm:$0xff] }
 0x77d   : > { %v9866_v25 = vadd.f32 %v9834_v32, %v9765_v50  ;;  %v9837_v41 = vmul.f32 %v16277_v27, %v16821_v48  ;;  %v9129_v22 = vmul.f32 %v16809_v43, %v16731_v61  ;;  %v9430_v42 = vmul.f32 %v16851_v31, %v16785_v18  ;;  %v16858_v27 = vld [vmem:[%s17323_s7 + $0x6] ss:$0 sm:$0xff]  ;;  %v9802_v50 = vld [vmem:[#allocation5 + $0xfa] sm:$0xff] }
 0x77e   : > { %v9973_v30 = vmax.f32 %v9941_v17, 0.0  ;;  %v9667_v19 = vadd.f32 %v9635_v37, %v9564_v10  ;;  %v9361_v0 = vadd.f32 %v9329_v63, %v9259_v47  ;;  %v9531_v49 = vmul.f32 %v16858_v27, %v9797_v8 }
 0x77f   : > { %v9903_v61 = vmul.f32 %v16356_v4, %v9866_v25  ;;  %v9161_v53 = vadd.f32 %v9129_v22, %v9028_v23  ;;  %v9230_v44 = vmul.f32 %v16826_v55, %v16743_v59  ;;  %v9332_v39 = vmul.f32 %v16868_v56, %v16797_v21  ;;  %v16921_v23 = vld [vmem:[#allocation5 + $0xf0] sm:$0xff] }
 0x780   : > { %10082 = vrot.lane.b32.xlu1 %v9973_v30, %s12940_s23  ;;  %v9768_v5 = vadd.f32 %v9736_v62, %v9667_v19  ;;  %v9462_v13 = vadd.f32 %v9430_v42, %v9361_v0  ;;  %v9634_v15 = vmul.f32 %v16292_v28, %v16842_v29  ;;  %v9735_v59 = vmul.f32 %v16877_v52, %v16844_v9  ;;  %v16923_v30 = vld [vmem:[#allocation5 + $0xf1] sm:$0xff] }
 0x781   : > { %v9940_v14 = vadd.f32 %v16372_v46, %v9903_v61  ;;  %v9262_v36 = vadd.f32 %v9230_v44, %v9161_v53  ;;  %v9027_v54 = vmul.f32 %v16802_v38, %v16778_v60  ;;  %v9128_v51 = vmul.f32 %v16809_v43, %v16785_v18 }
 0x782   : > { %v9869_v24 = vadd.f32 %v9837_v41, %v9768_v5  ;;  %v9563_v28 = vadd.f32 %v9531_v49, %v9462_v13  ;;  %v9433_v33 = vmul.f32 %v16851_v31, %v16818_v1  ;;  %v9229_v3 = vmul.f32 %v16826_v55, %v9797_v8  ;;  %v9801_v13 = vld [vmem:[#allocation5 + $0xf2] sm:$0xff] }
 0x783   : > { %v9972_v40 = vmax.f32 %v9940_v14, 0.0  ;;  %v9364_v16 = vadd.f32 %v9332_v39, %v9262_v36  ;;  %v9160_v58 = vadd.f32 %v9128_v51, %v9027_v54  ;;  %v9331_v60 = vmul.f32 %v16868_v56, %v16842_v29  ;;  %v16944_v51 = vld [vmem:[#allocation5 + $0x110] sm:$0xff] }
 0x784   : > { %v9906_v2 = vmul.f32 %v16356_v4, %v9869_v24  ;;  %v9666_v18 = vadd.f32 %v9634_v15, %v9563_v28  ;;  %v9836_v6 = vmul.f32 %v16899_v7, %v9799_v45  ;;  %v9534_v12 = vmul.f32 %v16858_v27, %v16821_v48 }
 0x785   : > { %10080 = vrot.lane.b32.xlu0 %v9972_v40, %s12940_s23  ;;  %v9465_v8 = vadd.f32 %v9433_v33, %v9364_v16  ;;  %v9637_v34 = vmul.f32 %v16908_v11, %v16888_v20  ;;  %v9738_v35 = vmul.f32 %v16877_v52, %v16890_v26  ;;  %v9261_v57 = vadd.f32 %v9229_v3, %v9160_v58  ;;  %v16947_v3 = vld [vmem:[#allocation5 + $0x111] sm:$0xff] }
 0x786   : > { %v9943_v63 = vadd.f32 %v16372_v46, %v9906_v2  ;;  %v9767_v17 = vadd.f32 %v9735_v59, %v9666_v18  ;;  %v9030_v32 = vmul.f32 %v16802_v38, %v16797_v21  ;;  %v9131_v37 = vmul.f32 %v16809_v43, %v16818_v1 }
 0x787   : > { %v9566_v10 = vadd.f32 %v9534_v12, %v9465_v8  ;;  %v9363_v62 = vadd.f32 %v9331_v60, %v9261_v57  ;;  %v9432_v47 = vmul.f32 %v16851_v31, %v16844_v9  ;;  %v9232_v25 = vmul.f32 %v16826_v55, %v16821_v48 }
 0x788   : > { %v9975_v41 = vmax.f32 %v9943_v63, 0.0  ;;  %v9868_v22 = vadd.f32 %v9836_v6, %v9767_v17  ;;  %v9163_v19 = vadd.f32 %v9131_v37, %v9030_v32  ;;  %v9334_v21 = vmul.f32 %v16868_v56, %v16888_v20  ;;  %v9804_v63 = vld [vmem:[#allocation5 + $0x112] sm:$0xff]  ;;  %v16966_v37 = vld [vmem:[#allocation5 + $0x108] sm:$0xff] }
 0x789   : > { %v9669_v0 = vadd.f32 %v9637_v34, %v9566_v10  ;;  %v9839_v1 = vmul.f32 %v16899_v7, %v9802_v50  ;;  %v9464_v42 = vadd.f32 %v9432_v47, %v9363_v62  ;;  %v9533_v49 = vmul.f32 %v16858_v27, %v9799_v45  ;;  %v16968_v62 = vld [vmem:[#allocation5 + $0x109] sm:$0xff] }
 0x78a   : > { %10086 = vrot.lane.b32.xlu1 %v9975_v41, %s12940_s23  ;;  %v9905_v61 = vmul.f32 %v16356_v4, %v9868_v22  ;;  %v9636_v53 = vmul.f32 %v16908_v11, %v16921_v23  ;;  %v9737_v48 = vmul.f32 %v16877_v52, %v16923_v30  ;;  %v9264_v44 = vadd.f32 %v9232_v25, %v9163_v19 }
 0x78b   : > { %v9770_v39 = vadd.f32 %v9738_v35, %v9669_v0  ;;  %v9565_v5 = vadd.f32 %v9533_v49, %v9464_v42  ;;  %v9029_v15 = vmul.f32 %v16802_v38, %v16842_v29  ;;  %v9130_v59 = vmul.f32 %v16809_v43, %v16844_v9  ;;  %v16987_v42 = vld [vmem:[%s17324_s8 + $0x1] ss:$0 sm:$0xff] }
 0x78c   : > { %v9942_v14 = vadd.f32 %v16372_v46, %v9905_v61  ;;  %v9366_v36 = vadd.f32 %v9334_v21, %v9264_v44  ;;  %v9435_v54 = vmul.f32 %v16851_v31, %v16890_v26  ;;  %v9231_v24 = vmul.f32 %v16826_v55, %v9799_v45 }
 0x78d   : > { %v9871_v28 = vadd.f32 %v9839_v1, %v9770_v39  ;;  %v9668_v33 = vadd.f32 %v9636_v53, %v9565_v5  ;;  %v9162_v40 = vadd.f32 %v9130_v59, %v9029_v15  ;;  %v9333_v29 = vmul.f32 %v16868_v56, %v16921_v23  ;;  %v9803_v39 = vld [vmem:[#allocation5 + $0x10a] sm:$0xff] }
 0x78e   : > { %v9974_v16 = vmax.f32 %v9942_v14, 0.0  ;;  %v9838_v9 = vmul.f32 %v16899_v7, %v9801_v13  ;;  %v9467_v58 = vadd.f32 %v9435_v54, %v9366_v36  ;;  %v9536_v60 = vmul.f32 %v16858_v27, %v9802_v50  ;;  %v16996_v59 = vld [vmem:[#allocation5 + $0x128] sm:$0xff] }
 0x78f   : > { %v9908_v2 = vmul.f32 %v16356_v4, %v9871_v28  ;;  %v9769_v18 = vadd.f32 %v9737_v48, %v9668_v33  ;;  %v9639_v45 = vmul.f32 %v16908_v11, %v16944_v51  ;;  %v9263_v6 = vadd.f32 %v9231_v24, %v9162_v40  ;;  %v16998_v14 = vld [vmem:[#allocation5 + $0x129] sm:$0xff] }
 0x790   : > { %10084 = vrot.lane.b32.xlu0 %v9974_v16, %s12940_s23  ;;  %v9568_v12 = vadd.f32 %v9536_v60, %v9467_v58  ;;  %v9740_v8 = vmul.f32 %v16877_v52, %v16947_v3  ;;  %v9032_v34 = vmul.f32 %v16802_v38, %v16888_v20  ;;  %v9133_v35 = vmul.f32 %v16809_v43, %v16890_v26 }
 0x791   : > { %v9945_v57 = vadd.f32 %v16372_v46, %v9908_v2  ;;  %v9870_v4 = vadd.f32 %v9838_v9, %v9769_v18  ;;  %v9365_v17 = vadd.f32 %v9333_v29, %v9263_v6  ;;  %v9434_v32 = vmul.f32 %v16851_v31, %v16923_v30  ;;  %v16976_v46 = vld [vmem:[%s17324_s8] ss:$0 sm:$0xff] }
 0x792   : > { %v9671_v10 = vadd.f32 %v9639_v45, %v9568_v12  ;;  %v9165_v47 = vadd.f32 %v9133_v35, %v9032_v34  ;;  %v9234_v25 = vmul.f32 %v16826_v55, %v9802_v50  ;;  %v9336_v20 = vmul.f32 %v16868_v56, %v16944_v51  ;;  %v17005_v29 = vld [vmem:[#allocation5 + $0x12a] sm:$0xff]  ;;  %v17022_v35 = vld [vmem:[#allocation5 + $0x120] sm:$0xff] }
 0x793   : > { %v9977_v26 = vmax.f32 %v9945_v57, 0.0  ;;  %v9907_v41 = vmul.f32 %v16976_v46, %v9870_v4  ;;  %v9466_v22 = vadd.f32 %v9434_v32, %v9365_v17  ;;  %v9535_v19 = vmul.f32 %v16858_v27, %v9801_v13  ;;  %v17024_v57 = vld [vmem:[#allocation5 + $0x121] sm:$0xff] }
 0x794   : > { %v9772_v21 = vadd.f32 %v9740_v8, %v9671_v10  ;;  %v9841_v0 = vmul.f32 %v16899_v7, %v9804_v63  ;;  %v9638_v50 = vmul.f32 %v16908_v11, %v16966_v37  ;;  %v9266_v1 = vadd.f32 %v9234_v25, %v9165_v47 }
 0x795   : > { %10090 = vrot.lane.b32.xlu1 %v9977_v26, %s12940_s23  ;;  %v9944_v49 = vadd.f32 %v16987_v42, %v9907_v41  ;;  %v9567_v61 = vadd.f32 %v9535_v19, %v9466_v22  ;;  %v9739_v53 = vmul.f32 %v16877_v52, %v16968_v62  ;;  %v9031_v48 = vmul.f32 %v16802_v38, %v16921_v23 }
 0x796   : > { %v9873_v44 = vadd.f32 %v9841_v0, %v9772_v21  ;;  %v9368_v5 = vadd.f32 %v9336_v20, %v9266_v1  ;;  %v9437_v15 = vmul.f32 %v16851_v31, %v16947_v3  ;;  %v9132_v36 = vmul.f32 %v16809_v43, %v16923_v30  ;;  %v9805_v0 = vld [vmem:[#allocation5 + $0x122] sm:$0xff] }
 0x797   : > { %v9976_v54 = vmax.f32 %v9944_v49, 0.0  ;;  %v9670_v24 = vadd.f32 %v9638_v50, %v9567_v61  ;;  %v9538_v28 = vmul.f32 %v16858_v27, %v9804_v63  ;;  %v9233_v33 = vmul.f32 %v16826_v55, %v9801_v13 }
 0x798   : > { %v9910_v23 = vmul.f32 %v16976_v46, %v9873_v44  ;;  %v9469_v40 = vadd.f32 %v9437_v15, %v9368_v5  ;;  %v9164_v16 = vadd.f32 %v9132_v36, %v9031_v48  ;;  %v9335_v9 = vmul.f32 %v16868_v56, %v16966_v37  ;;  %v17045_v48 = vld [vmem:[#allocation5 + $0x140] sm:$0xff] }
 0x799   : > { %10088 = vrot.lane.b32.xlu0 %v9976_v54, %s12940_s23  ;;  %v9771_v58 = vadd.f32 %v9739_v53, %v9670_v24  ;;  %v9840_v30 = vmul.f32 %v16899_v7, %v9803_v39  ;;  %v9641_v60 = vmul.f32 %v16908_v11, %v16996_v59  ;;  %v9742_v13 = vmul.f32 %v16877_v52, %v16998_v14  ;;  %v17047_v44 = vld [vmem:[#allocation5 + $0x141] sm:$0xff] }
 0x79a   : > { %v9947_v2 = vadd.f32 %v16987_v42, %v9910_v23  ;;  %v9570_v18 = vadd.f32 %v9538_v28, %v9469_v40  ;;  %v9265_v45 = vadd.f32 %v9233_v33, %v9164_v16  ;;  %v9034_v6 = vmul.f32 %v16802_v38, %v16944_v51 }
 0x79b   : > { %v9872_v12 = vadd.f32 %v9840_v30, %v9771_v58  ;;  %v9843_v8 = vmul.f32 %v16899_v7, %v17005_v29  ;;  %v9436_v34 = vmul.f32 %v16851_v31, %v16968_v62  ;;  %v9135_v4 = vmul.f32 %v16809_v43, %v16947_v3  ;;  %v17062_v30 = vld [vmem:[#allocation5 + $0x142] sm:$0xff] }
 0x79c   : > { %v9979_v17 = vmax.f32 %v9947_v2, 0.0  ;;  %v9673_v32 = vadd.f32 %v9641_v60, %v9570_v18  ;;  %v9367_v10 = vadd.f32 %v9335_v9, %v9265_v45  ;;  %v9537_v47 = vmul.f32 %v16858_v27, %v9803_v39 }
 0x79d   : > { %v9909_v51 = vmul.f32 %v16976_v46, %v9872_v12  ;;  %v9167_v25 = vadd.f32 %v9135_v4, %v9034_v6  ;;  %v9236_v20 = vmul.f32 %v16826_v55, %v9804_v63  ;;  %v9338_v26 = vmul.f32 %v16868_v56, %v16996_v59  ;;  %v17070_v6 = vld [vmem:[#allocation5 + $0x138] sm:$0xff] }
 0x79e   : > { %10094 = vrot.lane.b32.xlu1 %v9979_v17, %s12940_s23  ;;  %v9774_v41 = vadd.f32 %v9742_v13, %v9673_v32  ;;  %v9468_v22 = vadd.f32 %v9436_v34, %v9367_v10  ;;  %v9640_v3 = vmul.f32 %v16908_v11, %v17022_v35  ;;  %v9741_v19 = vmul.f32 %v16877_v52, %v17024_v57  ;;  %v17072_v12 = vld [vmem:[#allocation5 + $0x139] sm:$0xff] }
 0x79f   : > { %v9946_v21 = vadd.f32 %v16987_v42, %v9909_v51  ;;  %v9268_v50 = vadd.f32 %v9236_v20, %v9167_v25  ;;  %v9033_v63 = vmul.f32 %v16802_v38, %v16966_v37  ;;  %v9134_v1 = vmul.f32 %v16809_v43, %v16968_v62 }
 0x7a0   : > { %v9875_v49 = vadd.f32 %v9843_v8, %v9774_v41  ;;  %v9569_v61 = vadd.f32 %v9537_v47, %v9468_v22  ;;  %v9439_v53 = vmul.f32 %v16851_v31, %v16998_v14  ;;  %v9235_v5 = vmul.f32 %v16826_v55, %v9803_v39 }
 0x7a1   : > { %v9978_v15 = vmax.f32 %v9946_v21, 0.0  ;;  %v9370_v36 = vadd.f32 %v9338_v26, %v9268_v50  ;;  %v9166_v54 = vadd.f32 %v9134_v1, %v9033_v63  ;;  %v9337_v37 = vmul.f32 %v16868_v56, %v17022_v35 }
 0x7a2   : > { %v9912_v24 = vmul.f32 %v16976_v46, %v9875_v49  ;;  %v9672_v62 = vadd.f32 %v9640_v3, %v9569_v61  ;;  %v9842_v28 = vmul.f32 %v16899_v7, %v9805_v0  ;;  %v9540_v33 = vmul.f32 %v16858_v27, %v17005_v29  ;;  %v17100_v61 = vld [vmem:[#allocation5 + $0x158] sm:$0xff] }
 0x7a3   : > { %10092 = vrot.lane.b32.xlu0 %v9978_v15, %s12940_s23  ;;  %v9471_v23 = vadd.f32 %v9439_v53, %v9370_v36  ;;  %v9643_v39 = vmul.f32 %v16908_v11, %v17045_v48  ;;  %v9744_v40 = vmul.f32 %v16877_v52, %v17047_v44  ;;  %v9267_v16 = vadd.f32 %v9235_v5, %v9166_v54 }
 0x7a4   : > { %v9949_v9 = vadd.f32 %v16987_v42, %v9912_v24  ;;  %v9773_v58 = vadd.f32 %v9741_v19, %v9672_v62  ;;  %v9036_v60 = vmul.f32 %v16802_v38, %v16996_v59  ;;  %v9137_v13 = vmul.f32 %v16809_v43, %v16998_v14  ;;  %v17087_v19 = vld [vmem:[#allocation5 + $0x13a] sm:$0xff] }
 0x7a5   : > { %v9572_v2 = vadd.f32 %v9540_v33, %v9471_v23  ;;  %v9369_v18 = vadd.f32 %v9337_v37, %v9267_v16  ;;  %v9438_v45 = vmul.f32 %v16851_v31, %v17024_v57  ;;  %v9238_v8 = vmul.f32 %v16826_v55, %v17005_v29 }
 0x7a6   : > { %v9981_v34 = vmax.f32 %v9949_v9, 0.0  ;;  %v9874_v4 = vadd.f32 %v9842_v28, %v9773_v58  ;;  %v9169_v17 = vadd.f32 %v9137_v13, %v9036_v60  ;;  %v9340_v59 = vmul.f32 %v16868_v56, %v17045_v48  ;;  %v10059_v26 = vpop.permute.xlu1 %10058  ;;  %v10057_v41 = vpop.permute.xlu0 %10056  ;;  %v9810_v13 = vld [vmem:[#allocation5 + $0x15a] sm:$0xff] }
 0x7a7   : > { %v9675_v32 = vadd.f32 %v9643_v39, %v9572_v2  ;;  %v9845_v14 = vmul.f32 %v16899_v7, %v17062_v30  ;;  %v9470_v10 = vadd.f32 %v9438_v45, %v9369_v18  ;;  %v9539_v47 = vmul.f32 %v16858_v27, %v9805_v0  ;;  %10153 = vst.msk [vmem:[%s16203_s22 + $0x8] sm:$0xff] %vm5329_vm5, %v10059_v26  ;;  %v17124_v45 = vld [vmem:[#allocation5 + $0x150] sm:$0xff] }
 0x7a8   : > { %10098 = vrot.lane.b32.xlu1 %v9981_v34, %s12940_s23  ;;  %v9911_v51 = vmul.f32 %v16976_v46, %v9874_v4  ;;  %v9642_v29 = vmul.f32 %v16908_v11, %v17070_v6  ;;  %v9743_v25 = vmul.f32 %v16877_v52, %v17072_v12  ;;  %v9270_v20 = vadd.f32 %v9238_v8, %v9169_v17  ;;  %v17126_v34 = vld [vmem:[#allocation5 + $0x151] sm:$0xff] }
 0x7a9   : > { %v9776_v22 = vadd.f32 %v9744_v40, %v9675_v32  ;;  %v9571_v3 = vadd.f32 %v9539_v47, %v9470_v10  ;;  %v9035_v21 = vmul.f32 %v16802_v38, %v17022_v35  ;;  %v9136_v50 = vmul.f32 %v16809_v43, %v17024_v57  ;;  %10152 = vst.msk [vmem:[%s16203_s22] sm:$0xff] %vm5329_vm5, %v10057_v41  ;;  %v17103_v35 = vld [vmem:[#allocation5 + $0x159] sm:$0xff] }
 0x7aa   : > { %v9948_v63 = vadd.f32 %v16987_v42, %v9911_v51  ;;  %v9372_v1 = vadd.f32 %v9340_v59, %v9270_v20  ;;  %v9441_v49 = vmul.f32 %v16851_v31, %v17047_v44  ;;  %v9237_v53 = vmul.f32 %v16826_v55, %v9805_v0 }
 0x7ab   : > { %v9877_v5 = vadd.f32 %v9845_v14, %v9776_v22  ;;  %v9674_v15 = vadd.f32 %v9642_v29, %v9571_v3  ;;  %v9168_v36 = vadd.f32 %v9136_v50, %v9035_v21  ;;  %v9339_v57 = vmul.f32 %v16868_v56, %v17070_v6  ;;  %v9809_v3 = vld [vmem:[#allocation5 + $0x152] sm:$0xff] }
 0x7ac   : > { %v9980_v54 = vmax.f32 %v9948_v63, 0.0  ;;  %v9844_v37 = vmul.f32 %v16899_v7, %v17087_v19  ;;  %v9473_v24 = vadd.f32 %v9441_v49, %v9372_v1  ;;  %v9542_v62 = vmul.f32 %v16858_v27, %v17062_v30  ;;  %v17148_v63 = vld [vmem:[#allocation5 + $0x170] sm:$0xff] }
 0x7ad   : > { %v9914_v28 = vmul.f32 %v16976_v46, %v9877_v5  ;;  %v9775_v33 = vadd.f32 %v9743_v25, %v9674_v15  ;;  %v9645_v0 = vmul.f32 %v16908_v11, %v17100_v61  ;;  %v9269_v23 = vadd.f32 %v9237_v53, %v9168_v36  ;;  %v17150_v1 = vld [vmem:[#allocation5 + $0x171] sm:$0xff] }
 0x7ae   : > { %10096 = vrot.lane.b32.xlu0 %v9980_v54, %s12940_s23  ;;  %v9574_v39 = vadd.f32 %v9542_v62, %v9473_v24  ;;  %v9746_v40 = vmul.f32 %v16877_v52, %v17103_v35  ;;  %v9038_v16 = vmul.f32 %v16802_v38, %v17045_v48  ;;  %v9139_v9 = vmul.f32 %v16809_v43, %v17047_v44  ;;  %v17158_v54 = vld [vmem:[#allocation5 + $0x172] sm:$0xff] }
 0x7af   : > { %v9951_v58 = vadd.f32 %v16987_v42, %v9914_v28  ;;  %v9876_v60 = vadd.f32 %v9844_v37, %v9775_v33  ;;  %v9371_v2 = vadd.f32 %v9339_v57, %v9269_v23  ;;  %v9440_v18 = vmul.f32 %v16851_v31, %v17072_v12  ;;  %v10063_v10 = vpop.permute.xlu1 %10062 }
 0x7b0   : > { %v9677_v8 = vadd.f32 %v9645_v0, %v9574_v39  ;;  %v9171_v4 = vadd.f32 %v9139_v9, %v9038_v16  ;;  %v9240_v48 = vmul.f32 %v16826_v55, %v17062_v30  ;;  %v9342_v44 = vmul.f32 %v16868_v56, %v17100_v61  ;;  %10155 = vst.msk [vmem:[%s16203_s22 + $0x18] sm:$0xff] %vm5329_vm5, %v10063_v10 }
 0x7b1   : > { %v9983_v17 = vmax.f32 %v9951_v58, 0.0  ;;  %v9913_v59 = vmul.f32 %v16976_v46, %v9876_v60  ;;  %v9472_v32 = vadd.f32 %v9440_v18, %v9371_v2  ;;  %v9541_v14 = vmul.f32 %v16858_v27, %v17087_v19  ;;  %v17175_v58 = vld [vmem:[#allocation5 + $0x168] sm:$0xff] }
 0x7b2   : > { %v9778_v47 = vadd.f32 %v9746_v40, %v9677_v8  ;;  %v9847_v51 = vmul.f32 %v16899_v7, %v9810_v13  ;;  %v9644_v29 = vmul.f32 %v16908_v11, %v17124_v45  ;;  %v9272_v25 = vadd.f32 %v9240_v48, %v9171_v4  ;;  %v17177_v60 = vld [vmem:[#allocation5 + $0x169] sm:$0xff] }
 0x7b3   : > { %10102 = vrot.lane.b32.xlu1 %v9983_v17, %s12940_s23  ;;  %v9950_v30 = vadd.f32 %v16987_v42, %v9913_v59  ;;  %v9573_v20 = vadd.f32 %v9541_v14, %v9472_v32  ;;  %v9745_v26 = vmul.f32 %v16877_v52, %v17126_v34  ;;  %v9037_v41 = vmul.f32 %v16802_v38, %v17070_v6 }
 0x7b4   : > { %v9879_v22 = vadd.f32 %v9847_v51, %v9778_v47  ;;  %v9374_v21 = vadd.f32 %v9342_v44, %v9272_v25  ;;  %v9443_v50 = vmul.f32 %v16851_v31, %v17103_v35  ;;  %v9138_v49 = vmul.f32 %v16809_v43, %v17072_v12 }
 0x7b5   : > { %v9982_v53 = vmax.f32 %v9950_v30, 0.0  ;;  %v9676_v5 = vadd.f32 %v9644_v29, %v9573_v20  ;;  %v9544_v15 = vmul.f32 %v16858_v27, %v9810_v13  ;;  %v9239_v6 = vmul.f32 %v16826_v55, %v17087_v19  ;;  %v9811_v29 = vld [vmem:[#allocation5 + $0x16a] sm:$0xff] }
 0x7b6   : > { %v9916_v36 = vmul.f32 %v16976_v46, %v9879_v22  ;;  %v9475_v57 = vadd.f32 %v9443_v50, %v9374_v21  ;;  %v9170_v37 = vadd.f32 %v9138_v49, %v9037_v41  ;;  %v9341_v24 = vmul.f32 %v16868_v56, %v17124_v45  ;;  %v9611_v22 = vld [vmem:[#allocation5 + $0x188] sm:$0xff] }
 0x7b7   : > { %10100 = vrot.lane.b32.xlu0 %v9982_v53, %s12940_s23  ;;  %v9777_v62 = vadd.f32 %v9745_v26, %v9676_v5  ;;  %v9846_v12 = vmul.f32 %v16899_v7, %v9809_v3  ;;  %v9647_v28 = vmul.f32 %v16908_v11, %v17148_v63  ;;  %v9748_v19 = vmul.f32 %v16877_v52, %v17150_v1  ;;  %v9713_v21 = vld [vmem:[#allocation5 + $0x189] sm:$0xff] }
 0x7b8   : > { %v9953_v33 = vadd.f32 %v16987_v42, %v9916_v36  ;;  %v9576_v0 = vadd.f32 %v9544_v15, %v9475_v57  ;;  %v9271_v23 = vadd.f32 %v9239_v6, %v9170_v37  ;;  %v9040_v39 = vmul.f32 %v16802_v38, %v17100_v61 }
 0x7b9   : > { %v9878_v40 = vadd.f32 %v9846_v12, %v9777_v62  ;;  %v9849_v16 = vmul.f32 %v16899_v7, %v17158_v54  ;;  %v9442_v9 = vmul.f32 %v16851_v31, %v17126_v34  ;;  %v9141_v2 = vmul.f32 %v16809_v43, %v17103_v35 }
 0x7ba   : > { %v9985_v18 = vmax.f32 %v9953_v33, 0.0  ;;  %v9679_v8 = vadd.f32 %v9647_v28, %v9576_v0  ;;  %v9373_v4 = vadd.f32 %v9341_v24, %v9271_v23  ;;  %v9543_v61 = vmul.f32 %v16858_v27, %v9809_v3  ;;  %v10061_v32 = vpop.permute.xlu0 %10060  ;;  %v9814_v28 = vld [vmem:[#allocation5 + $0x18a] sm:$0xff] }
 0x7bb   : > { %v9915_v48 = vmul.f32 %v16976_v46, %v9878_v40  ;;  %v9173_v44 = vadd.f32 %v9141_v2, %v9040_v39  ;;  %v9242_v17 = vmul.f32 %v16826_v55, %v9810_v13  ;;  %v9344_v59 = vmul.f32 %v16868_v56, %v17148_v63  ;;  %10154 = vst.msk [vmem:[%s16203_s22 + $0x10] sm:$0xff] %vm5329_vm5, %v10061_v32  ;;  %v9610_v40 = vld [vmem:[#allocation5 + $0x180] sm:$0xff] }
 0x7bc   : > { %10106 = vrot.lane.b32.xlu1 %v9985_v18, %s12940_s23  ;;  %v9780_v14 = vadd.f32 %v9748_v19, %v9679_v8  ;;  %v9474_v10 = vadd.f32 %v9442_v9, %v9373_v4  ;;  %v9646_v35 = vmul.f32 %v16908_v11, %v17175_v58  ;;  %v9747_v47 = vmul.f32 %v16877_v52, %v17177_v60 }
 0x7bd   : > { %v9952_v51 = vadd.f32 %v16987_v42, %v9915_v48  ;;  %v9274_v13 = vadd.f32 %v9242_v17, %v9173_v44  ;;  %v9039_v25 = vmul.f32 %v16802_v38, %v17124_v45  ;;  %v9140_v30 = vmul.f32 %v16809_v43, %v17126_v34 }
 0x7be   : > { %v9881_v20 = vadd.f32 %v9849_v16, %v9780_v14  ;;  %v9575_v26 = vadd.f32 %v9543_v61, %v9474_v10  ;;  %v9445_v41 = vmul.f32 %v16851_v31, %v17150_v1  ;;  %v9241_v50 = vmul.f32 %v16826_v55, %v9809_v3  ;;  %v9712_v16 = vld [vmem:[#allocation5 + $0x181] sm:$0xff] }
 0x7bf   : > { %v9984_v49 = vmax.f32 %v9952_v51, 0.0  ;;  %v9376_v53 = vadd.f32 %v9344_v59, %v9274_v13  ;;  %v9172_v5 = vadd.f32 %v9140_v30, %v9039_v25  ;;  %v9343_v15 = vmul.f32 %v16868_v56, %v17175_v58  ;;  %v9813_v25 = vld [vmem:[#allocation5 + $0x182] sm:$0xff] }
 0x7c0   : > { %v9918_v45 = vmul.f32 %v16976_v46, %v9881_v20  ;;  %v9678_v6 = vadd.f32 %v9646_v35, %v9575_v26  ;;  %v9848_v34 = vmul.f32 %v16899_v7, %v9811_v29  ;;  %v9546_v36 = vmul.f32 %v16858_v27, %v17158_v54  ;;  %v9613_v35 = vld [vmem:[#allocation5 + $0x1a0] sm:$0xff] }
 0x7c1   : > { %10104 = vrot.lane.b32.xlu0 %v9984_v49, %s12940_s23  ;;  %v9477_v57 = vadd.f32 %v9445_v41, %v9376_v53  ;;  %v9649_v37 = vmul.f32 %v16908_v11, %v9611_v22  ;;  %v9750_v3 = vmul.f32 %v16877_v52, %v9713_v21  ;;  %v9273_v24 = vadd.f32 %v9241_v50, %v9172_v5  ;;  %v9715_v50 = vld [vmem:[#allocation5 + $0x1a1] sm:$0xff] }
 0x7c2   : > { %v9955_v62 = vadd.f32 %v16987_v42, %v9918_v45  ;;  %v9779_v12 = vadd.f32 %v9747_v47, %v9678_v6  ;;  %v9042_v19 = vmul.f32 %v16802_v38, %v17148_v63  ;;  %v9143_v33 = vmul.f32 %v16809_v43, %v17150_v1 }
 0x7c3   : > { %v9578_v0 = vadd.f32 %v9546_v36, %v9477_v57  ;;  %v9375_v23 = vadd.f32 %v9343_v15, %v9273_v24  ;;  %v9444_v39 = vmul.f32 %v16851_v31, %v17177_v60  ;;  %v9244_v9 = vmul.f32 %v16826_v55, %v17158_v54  ;;  %v10067_v63 = vpop.permute.xlu1 %10066 }
 0x7c4   : > { %v9987_v2 = vmax.f32 %v9955_v62, 0.0  ;;  %v9880_v18 = vadd.f32 %v9848_v34, %v9779_v12  ;;  %v9175_v8 = vadd.f32 %v9143_v33, %v9042_v19  ;;  %v9346_v4 = vmul.f32 %v16868_v56, %v9611_v22  ;;  %10157 = vst.msk [vmem:[%s16203_s22 + $0x28] sm:$0xff] %vm5329_vm5, %v10067_v63  ;;  %v9612_v34 = vld [vmem:[#allocation5 + $0x198] sm:$0xff] }
 0x7c5   : > { %v9681_v61 = vadd.f32 %v9649_v37, %v9578_v0  ;;  %v9851_v1 = vmul.f32 %v16899_v7, %v9814_v28  ;;  %v9476_v48 = vadd.f32 %v9444_v39, %v9375_v23  ;;  %v9545_v44 = vmul.f32 %v16858_v27, %v9811_v29 }
 0x7c6   : > { %10110 = vrot.lane.b32.xlu1 %v9987_v2, %s12940_s23  ;;  %v9917_v17 = vmul.f32 %v16976_v46, %v9880_v18  ;;  %v9648_v54 = vmul.f32 %v16908_v11, %v9610_v40  ;;  %v9749_v59 = vmul.f32 %v16877_v52, %v9712_v16  ;;  %v9276_v32 = vadd.f32 %v9244_v9, %v9175_v8  ;;  %v9815_v9 = vld [vmem:[#allocation5 + $0x19a] sm:$0xff] }
 0x7c7   : > { %v9782_v14 = vadd.f32 %v9750_v3, %v9681_v61  ;;  %v9577_v10 = vadd.f32 %v9545_v44, %v9476_v48  ;;  %v9041_v47 = vmul.f32 %v16802_v38, %v17175_v58  ;;  %v9142_v51 = vmul.f32 %v16809_v43, %v17177_v60 }
 0x7c8   : > { %v9954_v13 = vadd.f32 %v16987_v42, %v9917_v17  ;;  %v9378_v30 = vadd.f32 %v9346_v4, %v9276_v32  ;;  %v9447_v20 = vmul.f32 %v16851_v31, %v9713_v21  ;;  %v9243_v26 = vmul.f32 %v16826_v55, %v9811_v29  ;;  %v9816_v55 = vld [vmem:[#allocation5 + $0x1a2] sm:$0xff] }
 0x7c9   : > { %v9883_v41 = vadd.f32 %v9851_v1, %v9782_v14  ;;  %v9680_v22 = vadd.f32 %v9648_v54, %v9577_v10  ;;  %v9174_v49 = vadd.f32 %v9142_v51, %v9041_v47  ;;  %v9345_v53 = vmul.f32 %v16868_v56, %v9610_v40 }
 0x7ca   : > { %v9986_v5 = vmax.f32 %v9954_v13, 0.0  ;;  %v9479_v38 = vadd.f32 %v9447_v20, %v9378_v30  ;;  %v9548_v58 = vmul.f32 %v16858_v27, %v9814_v28  ;;  %v9651_v43 = vmul.f32 %v16908_v11, %v9613_v35  ;;  %v10065_v60 = vpop.permute.xlu0 %10064  ;;  %v9714_v28 = vld [vmem:[#allocation5 + $0x199] sm:$0xff] }
 0x7cb   : > { %v9920_v15 = vmul.f32 %v16976_v46, %v9883_v41  ;;  %v9781_v45 = vadd.f32 %v9749_v59, %v9680_v22  ;;  %v9850_v21 = vmul.f32 %v16899_v7, %v9813_v25  ;;  %v9275_v29 = vadd.f32 %v9243_v26, %v9174_v49  ;;  %10156 = vst.msk [vmem:[%s16203_s22 + $0x20] sm:$0xff] %vm5329_vm5, %v10065_v60 }
 0x7cc   : > { %10108 = vrot.lane.b32.xlu0 %v9986_v5, %s12940_s23  ;;  %v9580_v6 = vadd.f32 %v9548_v58, %v9479_v38  ;;  %v9752_v56 = vmul.f32 %v16877_v52, %v9715_v50  ;;  %v9446_v3 = vmul.f32 %v16851_v31, %v9712_v16  ;;  %v9853_v62 = vmul.f32 %v16899_v7, %v9816_v55 }
 0x7cd   : > { %v9957_v36 = vadd.f32 %v16987_v42, %v9920_v15  ;;  %v9882_v57 = vadd.f32 %v9850_v21, %v9781_v45  ;;  %v9377_v37 = vadd.f32 %v9345_v53, %v9275_v29  ;;  %v9547_v12 = vmul.f32 %v16858_v27, %v9813_v25 }
 0x7ce   : > { %v9683_v24 = vadd.f32 %v9651_v43, %v9580_v6  ;;  %v10071_v19 = vpop.permute.xlu1 %10070  ;;  %v9650_v39 = vmul.f32 %v16908_v11, %v9612_v34  ;;  %v9751_v27 = vmul.f32 %v16877_v52, %v9714_v28  ;;  %v9852_v4 = vmul.f32 %v16899_v7, %v9815_v9 }
 0x7cf   : > { %v9989_v33 = vmax.f32 %v9957_v36, 0.0  ;;  %v9919_v0 = vmul.f32 %v16976_v46, %v9882_v57  ;;  %v9478_v23 = vadd.f32 %v9446_v3, %v9377_v37  ;;  %10159 = vst.msk [vmem:[%s16203_s22 + $0x38] sm:$0xff] %vm5329_vm5, %v10071_v19 }
 0x7d0   : > { %v9784_v40 = vadd.f32 %v9752_v56, %v9683_v24 }
 0x7d1   : > { %10114 = vrot.lane.b32.xlu1 %v9989_v33, %s12940_s23  ;;  %v9956_v31 = vadd.f32 %v16987_v42, %v9919_v0  ;;  %v9579_v16 = vadd.f32 %v9547_v12, %v9478_v23 }
 0x7d2   : > { %v9885_v2 = vadd.f32 %v9853_v62, %v9784_v40 }
 0x7d3   : > { %v9988_v18 = vmax.f32 %v9956_v31, 0.0  ;;  %v9682_v8 = vadd.f32 %v9650_v39, %v9579_v16 }
 0x7d4   : > { %v9922_v11 = vmul.f32 %v16976_v46, %v9885_v2  ;;  %v10069_v63 = vpop.permute.xlu0 %10068 }
 0x7d5   : > { %10112 = vrot.lane.b32.xlu0 %v9988_v18, %s12940_s23  ;;  %v9783_v61 = vadd.f32 %v9751_v27, %v9682_v8  ;;  %10158 = vst.msk [vmem:[%s16203_s22 + $0x30] sm:$0xff] %vm5329_vm5, %v10069_v63 }
 0x7d6   : > { %v9959_v1 = vadd.f32 %v16987_v42, %v9922_v11 }
 0x7d7   : > { %v9884_v52 = vadd.f32 %v9852_v4, %v9783_v61 }
 0x7d8   : > { %v9991_v48 = vmax.f32 %v9959_v1, 0.0 }
 0x7d9   : > { %v9921_v44 = vmul.f32 %v16976_v46, %v9884_v52  ;;  %v10075_v7 = vpop.permute.xlu1 %10074 }
 0x7da   : > { %10118 = vrot.lane.b32.xlu1 %v9991_v48, %s12940_s23  ;;  %10161 = vst.msk [vmem:[%s16203_s22 + $0x48] sm:$0xff] %vm5329_vm5, %v10075_v7 }
 0x7db   : > { %v9958_v17 = vadd.f32 %v16987_v42, %v9921_v44 }
 0x7dd   : > { %v9990_v54 = vmax.f32 %v9958_v17, 0.0 }
 0x7df   : > { %10116 = vrot.lane.b32.xlu0 %v9990_v54, %s12940_s23 }
 0x7e0   : > { %v10073_v59 = vpop.permute.xlu0 %10072 }
 0x7e1   : > { %10160 = vst.msk [vmem:[%s16203_s22 + $0x40] sm:$0xff] %vm5329_vm5, %v10073_v59 }
 0x7e5   : > { %v10079_v32 = vpop.permute.xlu1 %10078 }
 0x7e6   : > { %10163 = vst.msk [vmem:[%s16203_s22 + $0x58] sm:$0xff] %vm5329_vm5, %v10079_v32 }
 0x7ec   : > { %v10077_v46 = vpop.permute.xlu0 %10076 }
 0x7ed   : > { %10162 = vst.msk [vmem:[%s16203_s22 + $0x50] sm:$0xff] %vm5329_vm5, %v10077_v46 }
 0x7f2   : > { %v10083_v14 = vpop.permute.xlu1 %10082 }
 0x7f3   : > { %10165 = vst.msk [vmem:[%s16203_s22 + $0x68] sm:$0xff] %vm5329_vm5, %v10083_v14 }
 0x7f7   : > { %v10081_v42 = vpop.permute.xlu0 %10080 }
 0x7f8   : > { %10164 = vst.msk [vmem:[%s16203_s22 + $0x60] sm:$0xff] %vm5329_vm5, %v10081_v42 }
 0x7fc   : > { %v10087_v10 = vpop.permute.xlu1 %10086 }
 0x7fd   : > { %10167 = vst.msk [vmem:[%s16203_s22 + $0x78] sm:$0xff] %vm5329_vm5, %v10087_v10 }
 0x802   : > { %v10085_v35 = vpop.permute.xlu0 %10084 }
 0x803   : > { %10166 = vst.msk [vmem:[%s16203_s22 + $0x70] sm:$0xff] %vm5329_vm5, %v10085_v35 }
 0x807   : > { %v10091_v47 = vpop.permute.xlu1 %10090 }
 0x808   : > { %10169 = vst.msk [vmem:[%s16203_s22 + $0x88] sm:$0xff] %vm5329_vm5, %v10091_v47 }
 0x80b   : > { %v10089_v51 = vpop.permute.xlu0 %10088 }
 0x80c   : > { %10168 = vst.msk [vmem:[%s16203_s22 + $0x80] sm:$0xff] %vm5329_vm5, %v10089_v51 }
 0x810   : > { %v10095_v13 = vpop.permute.xlu1 %10094 }
 0x811   : > { %10171 = vst.msk [vmem:[%s16203_s22 + $0x98] sm:$0xff] %vm5329_vm5, %v10095_v13 }
 0x815   : > { %v10093_v25 = vpop.permute.xlu0 %10092 }
 0x816   : > { %10170 = vst.msk [vmem:[%s16203_s22 + $0x90] sm:$0xff] %vm5329_vm5, %v10093_v25 }
 0x81a   : > { %v10099_v30 = vpop.permute.xlu1 %10098 }
 0x81b   : > { %10173 = vst.msk [vmem:[%s16203_s22 + $0xa8] sm:$0xff] %vm5329_vm5, %v10099_v30 }
 0x820   : > { %v10097_v20 = vpop.permute.xlu0 %10096 }
 0x821   : > { %10172 = vst.msk [vmem:[%s16203_s22 + $0xa0] sm:$0xff] %vm5329_vm5, %v10097_v20 }
 0x825   : > { %v10103_v26 = vpop.permute.xlu1 %10102 }
 0x826   : > { %10175 = vst.msk [vmem:[%s16203_s22 + $0xb8] sm:$0xff] %vm5329_vm5, %v10103_v26 }
 0x829   : > { %v10101_v41 = vpop.permute.xlu0 %10100 }
 0x82a   : > { %10174 = vst.msk [vmem:[%s16203_s22 + $0xb0] sm:$0xff] %vm5329_vm5, %v10101_v41 }
 0x82e   : > { %v10107_v22 = vpop.permute.xlu1 %10106 }
 0x82f   : > { %10177 = vst.msk [vmem:[%s16203_s22 + $0xc8] sm:$0xff] %vm5329_vm5, %v10107_v22 }
 0x833   : > { %v10105_v50 = vpop.permute.xlu0 %10104 }
 0x834   : > { %10176 = vst.msk [vmem:[%s16203_s22 + $0xc0] sm:$0xff] %vm5329_vm5, %v10105_v50 }
 0x838   : > { %v10111_v49 = vpop.permute.xlu1 %10110 }
 0x839   : > { %10179 = vst.msk [vmem:[%s16203_s22 + $0xd8] sm:$0xff] %vm5329_vm5, %v10111_v49 }
 0x83e   : > { %v10109_v53 = vpop.permute.xlu0 %10108 }
 0x83f   : > { %10178 = vst.msk [vmem:[%s16203_s22 + $0xd0] sm:$0xff] %vm5329_vm5, %v10109_v53 }
 0x843   : > { %v10115_v5 = vpop.permute.xlu1 %10114 }
 0x844   : > { %10181 = vst.msk [vmem:[%s16203_s22 + $0xe8] sm:$0xff] %vm5329_vm5, %v10115_v5 }
 0x847   : > { %v10113_v38 = vpop.permute.xlu0 %10112 }
 0x848   : > { %10180 = vst.msk [vmem:[%s16203_s22 + $0xe0] sm:$0xff] %vm5329_vm5, %v10113_v38 }
 0x84c   : > { %v10119_v58 = vpop.permute.xlu1 %10118 }
 0x84d   : > { %10183 = vst.msk [vmem:[%s16203_s22 + $0xf8] sm:$0xff] %vm5329_vm5, %v10119_v58 }
 0x851   : > { %v10117_v43 = vpop.permute.xlu0 %10116 }
 0x852   : > { %10182 = vst.msk [vmem:[%s16203_s22 + $0xf0] sm:$0xff] %vm5329_vm5, %v10117_v43 }
 0x853 PF: > { %s19_s30 = sadd.s32 1, %s12937_s30  }
 0x854   : > { %p16_p4 = scmp.ge.s32.totalorder %s19_s30, 4  }
 0x856   :  { %18 = sbr.rel (!%p16_p4) target bundleno = 1 (0x1), region = 114 }

</bundles_post_ra>
